<compile_context>
chip_gen: v7x
topology: tpu7x:2x2x1
jax: 0.10.0
libtpu: 0.0.40
codegen_flags: <defaults>
</compile_context>

<pallas_src>
import jax
import jax.numpy as jnp
from jax.experimental import pallas as pl
from jax.experimental.pallas import tpu as pltpu


# ----------------------------------------------------------------------------
# Fused kernel: both MLPs (Linear -> ReLU -> Linear, twice) in one pallas_call
# grid = (batch_block, mlp, hidden_block); activations stay resident in VMEM,
# quantized weights stream from HBM exactly once per batch block.
# ----------------------------------------------------------------------------

def _fused_proxycore_kernel(feat_ref, w1_ref, s1_ref, b1_ref,
                            w2_ref, s2_ref, b2_ref,
                            out_ref, z_ref, acc_ref):
    m = pl.program_id(1)              # which MLP (0 = embedding, 1 = projection)
    h = pl.program_id(2)              # hidden block index (reduction axis)
    last_m = pl.num_programs(1) - 1
    last_h = pl.num_programs(2) - 1

    # New batch block: load the network input, casting f32 -> bf16 in-kernel.
    @pl.when((m == 0) & (h == 0))
    def _():
        z_ref[...] = feat_ref[...].astype(z_ref.dtype)

    # New MLP: reset the f32 output accumulator.
    @pl.when(h == 0)
    def _():
        acc_ref[...] = jnp.zeros_like(acc_ref)

    # Dequantize weight blocks to bf16 (VPU work, hidden under the weight DMA).
    # Per-output-channel scales are applied to the dot *outputs* instead of the
    # weights: (z @ (Wq * s)) == (z @ Wq) * s since s is per output column.
    w1 = w1_ref[...].astype(jnp.bfloat16)
    w2 = w2_ref[...].astype(jnp.bfloat16)

    # First linear (full K = n_in in one MXU pass) + scale + bias + ReLU.
    hidden = jnp.dot(z_ref[...], w1, preferred_element_type=jnp.float32)
    hidden = jnp.maximum(hidden * s1_ref[...] + b1_ref[...], 0.0)

    # Second linear: accumulate this hidden block's contribution (f32 acc).
    acc_ref[...] += jnp.dot(hidden.astype(jnp.bfloat16), w2,
                            preferred_element_type=jnp.float32)

    # Finalize this MLP (scale + bias applied once): feed next MLP OR emit output.
    # The two branches are mutually exclusive at runtime -> no redundant work.
    @pl.when((h == last_h) & (m != last_m))
    def _():
        z_ref[...] = (acc_ref[...] * s2_ref[...] + b2_ref[...]).astype(z_ref.dtype)

    @pl.when((h == last_h) & (m == last_m))
    def _():
        out_ref[...] = (acc_ref[...] * s2_ref[...] + b2_ref[...]).astype(out_ref.dtype)


def proxycore_forward_impl(params, feat, *, batch_block=256,
                           vmem_limit_bytes=32 * 1024 * 1024):
    W1, S1, B1 = params["W1"], params["S1"], params["B1"]
    W2, S2, B2 = params["W2"], params["S2"], params["B2"]

    n_mlp, n_hb, n_in, th = W1.shape          # W1 pre-blocked: contiguous column slabs
    n_hidden = n_hb * th
    n_out = W2.shape[-1]
    assert W2.shape == (n_mlp, n_hidden, n_out), W2.shape
    assert n_in == n_out, "fused kernel feeds MLP0 output into MLP1"
    assert S1.shape == (n_mlp, 1, n_hidden) and B1.shape == (n_mlp, 1, n_hidden)
    assert S2.shape == (n_mlp, 1, n_out) and B2.shape == (n_mlp, 1, n_out)

    # Pad batch to bf16 sublane packing (16 rows), then to a multiple of the
    # batch tile so the leading "parallel" grid axis is exact.
    b0 = feat.shape[0]
    bp = b0 + ((-b0) % 16)
    bb = min(batch_block, bp)
    bp = bp + ((-bp) % bb)   # TODO(synk): may over-pad up to bb-16 rows for awkward B
    if bp != b0:
        feat = jnp.pad(feat, ((0, bp - b0), (0, 0)))
    n_bb = bp // bb

    flops = 2 * bp * n_mlp * (n_in * n_hidden + n_hidden * n_out)
    bytes_accessed = int(
        W1.size * W1.dtype.itemsize + W2.size * W2.dtype.itemsize
        + (S1.size + B1.size + S2.size + B2.size) * 4
        + bp * n_in * 4 + bp * n_out * 4)

    out = pl.pallas_call(
        _fused_proxycore_kernel,
        out_shape=jax.ShapeDtypeStruct((bp, n_out), jnp.float32),
        grid_spec=pltpu.PrefetchScalarGridSpec(
            num_scalar_prefetch=0,
            grid=(n_bb, n_mlp, n_hb),
            in_specs=[
                # network input (f32), resident per batch block
                pl.BlockSpec((bb, n_in), lambda b, m, h: (b, 0)),
                # W1 column block, contiguous slab: (n_in, th)
                pl.BlockSpec((None, None, n_in, th), lambda b, m, h: (m, h, 0, 0)),
                # per-hidden-channel scale / bias: (1, th)
                pl.BlockSpec((None, 1, th), lambda b, m, h: (m, 0, h)),
                pl.BlockSpec((None, 1, th), lambda b, m, h: (m, 0, h)),
                # W2 row block (contiguous): (th, n_out)
                pl.BlockSpec((None, th, n_out), lambda b, m, h: (m, h, 0)),
                # per-output-channel scale / bias: (1, n_out)
                pl.BlockSpec((None, 1, n_out), lambda b, m, h: (m, 0, 0)),
                pl.BlockSpec((None, 1, n_out), lambda b, m, h: (m, 0, 0)),
            ],
            out_specs=pl.BlockSpec((bb, n_out), lambda b, m, h: (b, 0)),
            scratch_shapes=[
                pltpu.VMEM((bb, n_in), jnp.bfloat16),   # z: current MLP input
                pltpu.VMEM((bb, n_out), jnp.float32),   # acc: second-linear accumulator
            ],
        ),
        compiler_params=pltpu.CompilerParams(
            # batch is independent (megacore on v7x); mlp axis is a serial
            # dependency; hidden axis is a reduction.
            dimension_semantics=("parallel", "arbitrary", "arbitrary"),
            vmem_limit_bytes=vmem_limit_bytes,
        ),
        cost_estimate=pl.CostEstimate(flops=flops, transcendentals=0,
                                      bytes_accessed=bytes_accessed),
    )(feat, W1, S1, B1, W2, S2, B2)

    return out[:b0]


@jax.jit
def proxycore_forward(params, feat):
    return proxycore_forward_impl(params, feat)


# ----------------------------------------------------------------------------
# Parameters (torch.nn.Linear-style init) + deployment prep
# (weight-only int8 quantization + contiguous W1 blocking)
# ----------------------------------------------------------------------------

def _init_linear(key, fan_in, fan_out):
    kw, kb = jax.random.split(key)
    bound = 1.0 / (fan_in ** 0.5)
    w = jax.random.uniform(kw, (fan_in, fan_out), jnp.float32, -bound, bound)
    b = jax.random.uniform(kb, (fan_out,), jnp.float32, -bound, bound)
    return w, b


def init_proxycore_params(key, n_input_feat=1024, n_hidden_feat=4096,
                          n_projection_feat=1024):
    # Fused kernel requires the two MLPs to share in/out width (true for the
    # module defaults: n_input_feat == n_projection_feat == 1024).
    assert n_input_feat == n_projection_feat
    k1, k2, k3, k4 = jax.random.split(key, 4)
    ew1, eb1 = _init_linear(k1, n_input_feat, n_hidden_feat)
    ew2, eb2 = _init_linear(k2, n_hidden_feat, n_projection_feat)
    pw1, pb1 = _init_linear(k3, n_projection_feat, n_hidden_feat)
    pw2, pb2 = _init_linear(k4, n_hidden_feat, n_projection_feat)
    return {
        "W1": jnp.stack([ew1, pw1]),                                # (2, in, hid) f32
        "B1": jnp.stack([eb1, pb1]).reshape(2, 1, n_hidden_feat),   # f32
        "W2": jnp.stack([ew2, pw2]),                                # (2, hid, out) f32
        "B2": jnp.stack([eb2, pb2]).reshape(2, 1, n_projection_feat),
    }


def _quantize_per_out_channel(w):
    """int8 symmetric weight-only quantization, per output channel (last dim)."""
    absmax = jnp.max(jnp.abs(w), axis=-2, keepdims=True)
    scale = jnp.maximum(absmax, 1e-12) / 127.0
    q = jnp.clip(jnp.round(w / scale), -127, 127).astype(jnp.int8)
    return q, scale.astype(jnp.float32)


def prepare_params(fp_params, *, hidden_block=2048, quantize=True):
    """One-time deployment prep: quantize weights and pre-block W1 so each
    (n_in, th) column block is a contiguous HBM slab."""
    W1, B1, W2, B2 = (fp_params["W1"], fp_params["B1"],
                      fp_params["W2"], fp_params["B2"])
    n_mlp, n_in, n_hidden = W1.shape
    n_out = W2.shape[-1]

    # Largest power-of-two hidden block (multiple of 128) dividing n_hidden.
    th = min(hidden_block, n_hidden)
    while n_hidden % th:
        th //= 2
    assert th >= 128 and th % 128 == 0, (th, n_hidden)
    n_hb = n_hidden // th

    if quantize:
        # TODO(synk): numerics deviate from the f32 torch module by the int8
        # weight-quantization error (~1% relative); store fp8 on v7x / int4 on
        # v5e-v6e if further compression is acceptable.
        w1q, s1 = _quantize_per_out_channel(W1)
        w2q, s2 = _quantize_per_out_channel(W2)
    else:
        w1q = W1.astype(jnp.bfloat16)
        w2q = W2.astype(jnp.bfloat16)
        s1 = jnp.ones((n_mlp, 1, n_hidden), jnp.float32)
        s2 = jnp.ones((n_mlp, 1, n_out), jnp.float32)

    # Pre-block W1: (n_mlp, n_in, n_hidden) -> (n_mlp, n_hb, n_in, th), contiguous.
    w1q = w1q.reshape(n_mlp, n_in, n_hb, th).transpose(0, 2, 1, 3)

    return {
        "W1": w1q, "S1": s1, "B1": B1.astype(jnp.float32),
        "W2": w2q, "S2": s2, "B2": B2.astype(jnp.float32),
    }


# ----------------------------------------------------------------------------
# Plain-JAX reference implementing the identical dequant + bf16-matmul math
# ----------------------------------------------------------------------------

def _ref_forward(params, feat):
    W1, S1, B1 = params["W1"], params["S1"], params["B1"]
    W2, S2, B2 = params["W2"], params["S2"], params["B2"]
    n_mlp, n_hb, n_in, th = W1.shape
    n_hidden = n_hb * th
    x = feat.astype(jnp.bfloat16)
    y = None
    for m in range(n_mlp):
        w1 = jnp.transpose(W1[m], (1, 0, 2)).reshape(n_in, n_hidden).astype(jnp.bfloat16)
        h = jnp.dot(x, w1, preferred_element_type=jnp.float32) * S1[m] + B1[m]
        h = jnp.maximum(h, 0.0).astype(jnp.bfloat16)
        w2 = W2[m].astype(jnp.bfloat16)
        y = jnp.dot(h, w2, preferred_element_type=jnp.float32) * S2[m] + B2[m]
        x = y.astype(jnp.bfloat16)
    return y


if __name__ == "__main__":
    key = jax.random.PRNGKey(0)
    kp, kx = jax.random.split(key)

    N_INPUT, N_HIDDEN, N_PROJ = 1024, 4096, 1024   # module __init__ defaults
    BATCH = 8                                       # small example batch

    fp_params = init_proxycore_params(kp, N_INPUT, N_HIDDEN, N_PROJ)
    params = prepare_params(fp_params, hidden_block=2048, quantize=True)
    feat = jax.random.normal(kx, (BATCH, N_INPUT), dtype=jnp.float32)

    out = proxycore_forward(params, feat)
    out = jax.block_until_ready(out)
    assert out.shape == (BATCH, N_PROJ), out.shape

    ref = _ref_forward(params, feat)
    max_err = float(jnp.max(jnp.abs(out - ref)))
    assert max_err < 2e-2, max_err

    print("KERNEL_OK")
</pallas_src>

<mosaic_0001>
module attributes {stable_mosaic.version = 11 : i64} {
  func.func @_fused_proxycore_kernel(%arg0: i32, %arg1: i32, %arg2: i32, %arg3: memref<16x1024xf32, #tpu.memory_space<vmem>>, %arg4: memref<1x1x1024x2048xi8, #tpu.memory_space<vmem>>, %arg5: memref<1x1x2048xf32, #tpu.memory_space<vmem>>, %arg6: memref<1x1x2048xf32, #tpu.memory_space<vmem>>, %arg7: memref<1x2048x1024xi8, #tpu.memory_space<vmem>>, %arg8: memref<1x1x1024xf32, #tpu.memory_space<vmem>>, %arg9: memref<1x1x1024xf32, #tpu.memory_space<vmem>>, %arg10: memref<16x1024xf32, #tpu.memory_space<vmem>>, %arg11: memref<16x1024xbf16, #tpu.memory_space<vmem>>, %arg12: memref<16x1024xf32, #tpu.memory_space<vmem>>) attributes {dimension_semantics = [#tpu.dimension_semantics<parallel>, #tpu.dimension_semantics<arbitrary>, #tpu.dimension_semantics<arbitrary>], iteration_bounds = array<i64: 1, 2, 2>, scalar_prefetch = 0 : i64, scratch_operands = 2 : i64, tpu.core_type = #tpu.core_type<tc>, window_params = [{transform_indices = @transform_0, window_bounds = array<i64: 16, 1024>}, {transform_indices = @transform_1, window_bounds = array<i64: 1, 1, 1024, 2048>}, {transform_indices = @transform_2, window_bounds = array<i64: 1, 1, 2048>}, {transform_indices = @transform_3, window_bounds = array<i64: 1, 1, 2048>}, {transform_indices = @transform_4, window_bounds = array<i64: 1, 2048, 1024>}, {transform_indices = @transform_5, window_bounds = array<i64: 1, 1, 1024>}, {transform_indices = @transform_6, window_bounds = array<i64: 1, 1, 1024>}, {transform_indices = @transform_7, window_bounds = array<i64: 16, 1024>}]} {
    %c0_i32 = arith.constant 0 : i32
    %0 = arith.cmpi eq, %arg1, %c0_i32 : i32
    %c0_i32_0 = arith.constant 0 : i32
    %1 = arith.cmpi eq, %arg2, %c0_i32_0 : i32
    %2 = arith.andi %0, %1 : i1
    %3 = arith.extui %2 : i1 to i32
    %c0_i32_1 = arith.constant 0 : i32
    %4 = arith.cmpi ne, %3, %c0_i32_1 : i32
    scf.if %4 {
      %c0_29 = arith.constant 0 : index
      %c0_30 = arith.constant 0 : index
      %41 = vector.load %arg3[%c0_29, %c0_30] : memref<16x1024xf32, #tpu.memory_space<vmem>>, vector<16x1024xf32>
      %42 = arith.truncf %41 : vector<16x1024xf32> to vector<16x1024xbf16>
      %c0_31 = arith.constant 0 : index
      %c0_32 = arith.constant 0 : index
      %43 = vector.load %arg11[%c0_31, %c0_32] : memref<16x1024xbf16, #tpu.memory_space<vmem>>, vector<16x1024xbf16>
      tpu.vector_store %arg11[%c0_31, %c0_32], %42 {strides = array<i32>} : memref<16x1024xbf16, #tpu.memory_space<vmem>>, vector<16x1024xbf16>,
    } else {
    }
    %c0_i32_2 = arith.constant 0 : i32
    %5 = arith.cmpi eq, %arg2, %c0_i32_2 : i32
    %6 = arith.extui %5 : i1 to i32
    %c0_i32_3 = arith.constant 0 : i32
    %7 = arith.cmpi ne, %6, %c0_i32_3 : i32
    scf.if %7 {
      %cst_29 = arith.constant 0.000000e+00 : f32
      %41 = vector.broadcast %cst_29 : f32 to vector<16x1024xf32>
      %c0_30 = arith.constant 0 : index
      %c0_31 = arith.constant 0 : index
      %42 = vector.load %arg12[%c0_30, %c0_31] : memref<16x1024xf32, #tpu.memory_space<vmem>>, vector<16x1024xf32>
      tpu.vector_store %arg12[%c0_30, %c0_31], %41 {strides = array<i32>} : memref<16x1024xf32, #tpu.memory_space<vmem>>, vector<16x1024xf32>,
    } else {
    }
    %c0 = arith.constant 0 : index
    %c0_4 = arith.constant 0 : index
    %c0_5 = arith.constant 0 : index
    %c0_6 = arith.constant 0 : index
    %8 = vector.load %arg4[%c0, %c0_4, %c0_5, %c0_6] : memref<1x1x1024x2048xi8, #tpu.memory_space<vmem>>, vector<1x1x1024x2048xi8>
    %9 = vector.shape_cast %8 : vector<1x1x1024x2048xi8> to vector<1024x2048xi8>
    %10 = arith.sitofp %9 : vector<1024x2048xi8> to vector<1024x2048xbf16>
    %c0_7 = arith.constant 0 : index
    %c0_8 = arith.constant 0 : index
    %c0_9 = arith.constant 0 : index
    %11 = vector.load %arg7[%c0_7, %c0_8, %c0_9] : memref<1x2048x1024xi8, #tpu.memory_space<vmem>>, vector<1x2048x1024xi8>
    %12 = vector.shape_cast %11 : vector<1x2048x1024xi8> to vector<2048x1024xi8>
    %13 = arith.sitofp %12 : vector<2048x1024xi8> to vector<2048x1024xbf16>
    %c0_10 = arith.constant 0 : index
    %c0_11 = arith.constant 0 : index
    %14 = vector.load %arg11[%c0_10, %c0_11] : memref<16x1024xbf16, #tpu.memory_space<vmem>>, vector<16x1024xbf16>
    %cst = arith.constant dense<0.000000e+00> : vector<16x2048xf32>
    %15 = tpu.matmul %14, %10, %cst {dimension_numbers = #tpu.dot_dimension_numbers<[1], [0], [0], [1], [0, 0, 1, 1], [], []>} : vector<16x1024xbf16>, vector<1024x2048xbf16>, vector<16x2048xf32> -> vector<16x2048xf32>
    %c0_12 = arith.constant 0 : index
    %c0_13 = arith.constant 0 : index
    %c0_14 = arith.constant 0 : index
    %16 = vector.load %arg5[%c0_12, %c0_13, %c0_14] : memref<1x1x2048xf32, #tpu.memory_space<vmem>>, vector<1x1x2048xf32>
    %17 = vector.shape_cast %16 : vector<1x1x2048xf32> to vector<1x2048xf32>
    %18 = vector.broadcast %17 : vector<1x2048xf32> to vector<16x2048xf32>
    %19 = arith.mulf %15, %18 : vector<16x2048xf32>
    %c0_15 = arith.constant 0 : index
    %c0_16 = arith.constant 0 : index
    %c0_17 = arith.constant 0 : index
    %20 = vector.load %arg6[%c0_15, %c0_16, %c0_17] : memref<1x1x2048xf32, #tpu.memory_space<vmem>>, vector<1x1x2048xf32>
    %21 = vector.shape_cast %20 : vector<1x1x2048xf32> to vector<1x2048xf32>
    %22 = vector.broadcast %21 : vector<1x2048xf32> to vector<16x2048xf32>
    %23 = arith.addf %19, %22 : vector<16x2048xf32>
    %cst_18 = arith.constant 0.000000e+00 : f32
    %24 = vector.broadcast %cst_18 : f32 to vector<16x2048xf32>
    %25 = arith.maximumf %23, %24 : vector<16x2048xf32>
    %c0_19 = arith.constant 0 : index
    %c0_20 = arith.constant 0 : index
    %26 = vector.load %arg12[%c0_19, %c0_20] : memref<16x1024xf32, #tpu.memory_space<vmem>>, vector<16x1024xf32>
    %27 = arith.truncf %25 : vector<16x2048xf32> to vector<16x2048xbf16>
    %cst_21 = arith.constant dense<0.000000e+00> : vector<16x1024xf32>
    %28 = tpu.matmul %27, %13, %cst_21 {dimension_numbers = #tpu.dot_dimension_numbers<[1], [0], [0], [1], [0, 0, 1, 1], [], []>} : vector<16x2048xbf16>, vector<2048x1024xbf16>, vector<16x1024xf32> -> vector<16x1024xf32>
    %29 = arith.addf %26, %28 : vector<16x1024xf32>
    %c0_22 = arith.constant 0 : index
    %c0_23 = arith.constant 0 : index
    %30 = vector.load %arg12[%c0_22, %c0_23] : memref<16x1024xf32, #tpu.memory_space<vmem>>, vector<16x1024xf32>
    tpu.vector_store %arg12[%c0_22, %c0_23], %29 {strides = array<i32>} : memref<16x1024xf32, #tpu.memory_space<vmem>>, vector<16x1024xf32>,
    %c1_i32 = arith.constant 1 : i32
    %31 = arith.cmpi eq, %arg2, %c1_i32 : i32
    %c1_i32_24 = arith.constant 1 : i32
    %32 = arith.cmpi ne, %arg1, %c1_i32_24 : i32
    %33 = arith.andi %31, %32 : i1
    %34 = arith.extui %33 : i1 to i32
    %c0_i32_25 = arith.constant 0 : i32
    %35 = arith.cmpi ne, %34, %c0_i32_25 : i32
    scf.if %35 {
      %c0_29 = arith.constant 0 : index
      %c0_30 = arith.constant 0 : index
      %41 = vector.load %arg12[%c0_29, %c0_30] : memref<16x1024xf32, #tpu.memory_space<vmem>>, vector<16x1024xf32>
      %c0_31 = arith.constant 0 : index
      %c0_32 = arith.constant 0 : index
      %c0_33 = arith.constant 0 : index
      %42 = vector.load %arg8[%c0_31, %c0_32, %c0_33] : memref<1x1x1024xf32, #tpu.memory_space<vmem>>, vector<1x1x1024xf32>
      %43 = vector.shape_cast %42 : vector<1x1x1024xf32> to vector<1x1024xf32>
      %44 = vector.broadcast %43 : vector<1x1024xf32> to vector<16x1024xf32>
      %45 = arith.mulf %41, %44 : vector<16x1024xf32>
      %c0_34 = arith.constant 0 : index
      %c0_35 = arith.constant 0 : index
      %c0_36 = arith.constant 0 : index
      %46 = vector.load %arg9[%c0_34, %c0_35, %c0_36] : memref<1x1x1024xf32, #tpu.memory_space<vmem>>, vector<1x1x1024xf32>
      %47 = vector.shape_cast %46 : vector<1x1x1024xf32> to vector<1x1024xf32>
      %48 = vector.broadcast %47 : vector<1x1024xf32> to vector<16x1024xf32>
      %49 = arith.addf %45, %48 : vector<16x1024xf32>
      %50 = arith.truncf %49 : vector<16x1024xf32> to vector<16x1024xbf16>
      %c0_37 = arith.constant 0 : index
      %c0_38 = arith.constant 0 : index
      %51 = vector.load %arg11[%c0_37, %c0_38] : memref<16x1024xbf16, #tpu.memory_space<vmem>>, vector<16x1024xbf16>
      tpu.vector_store %arg11[%c0_37, %c0_38], %50 {strides = array<i32>} : memref<16x1024xbf16, #tpu.memory_space<vmem>>, vector<16x1024xbf16>,
    } else {
    }
    %c1_i32_26 = arith.constant 1 : i32
    %36 = arith.cmpi eq, %arg2, %c1_i32_26 : i32
    %c1_i32_27 = arith.constant 1 : i32
    %37 = arith.cmpi eq, %arg1, %c1_i32_27 : i32
    %38 = arith.andi %36, %37 : i1
    %39 = arith.extui %38 : i1 to i32
    %c0_i32_28 = arith.constant 0 : i32
    %40 = arith.cmpi ne, %39, %c0_i32_28 : i32
    scf.if %40 {
      %c0_29 = arith.constant 0 : index
      %c0_30 = arith.constant 0 : index
      %41 = vector.load %arg12[%c0_29, %c0_30] : memref<16x1024xf32, #tpu.memory_space<vmem>>, vector<16x1024xf32>
      %c0_31 = arith.constant 0 : index
      %c0_32 = arith.constant 0 : index
      %c0_33 = arith.constant 0 : index
      %42 = vector.load %arg8[%c0_31, %c0_32, %c0_33] : memref<1x1x1024xf32, #tpu.memory_space<vmem>>, vector<1x1x1024xf32>
      %43 = vector.shape_cast %42 : vector<1x1x1024xf32> to vector<1x1024xf32>
      %44 = vector.broadcast %43 : vector<1x1024xf32> to vector<16x1024xf32>
      %45 = arith.mulf %41, %44 : vector<16x1024xf32>
      %c0_34 = arith.constant 0 : index
      %c0_35 = arith.constant 0 : index
      %c0_36 = arith.constant 0 : index
      %46 = vector.load %arg9[%c0_34, %c0_35, %c0_36] : memref<1x1x1024xf32, #tpu.memory_space<vmem>>, vector<1x1x1024xf32>
      %47 = vector.shape_cast %46 : vector<1x1x1024xf32> to vector<1x1024xf32>
      %48 = vector.broadcast %47 : vector<1x1024xf32> to vector<16x1024xf32>
      %49 = arith.addf %45, %48 : vector<16x1024xf32>
      %c0_37 = arith.constant 0 : index
      %c0_38 = arith.constant 0 : index
      %50 = vector.load %arg10[%c0_37, %c0_38] : memref<16x1024xf32, #tpu.memory_space<vmem>>, vector<16x1024xf32>
      tpu.vector_store %arg10[%c0_37, %c0_38], %49 {strides = array<i32>} : memref<16x1024xf32, #tpu.memory_space<vmem>>, vector<16x1024xf32>,
    } else {
    }
    return
  }
  func.func @transform_0(%arg0: i32, %arg1: i32, %arg2: i32) -> (i32, i32) {
    %c0_i32 = arith.constant 0 : i32
    %c0_i32_0 = arith.constant 0 : i32
    return %arg0, %c0_i32 : i32, i32
  }
  func.func @transform_1(%arg0: i32, %arg1: i32, %arg2: i32) -> (i32, i32, i32, i32) {
    %c0_i32 = arith.constant 0 : i32
    %c0_i32_0 = arith.constant 0 : i32
    %c0_i32_1 = arith.constant 0 : i32
    return %arg1, %arg2, %c0_i32, %c0_i32_0 : i32, i32, i32, i32
  }
  func.func @transform_2(%arg0: i32, %arg1: i32, %arg2: i32) -> (i32, i32, i32) {
    %c0_i32 = arith.constant 0 : i32
    %c0_i32_0 = arith.constant 0 : i32
    return %arg1, %c0_i32, %arg2 : i32, i32, i32
  }
  func.func @transform_3(%arg0: i32, %arg1: i32, %arg2: i32) -> (i32, i32, i32) {
    %c0_i32 = arith.constant 0 : i32
    %c0_i32_0 = arith.constant 0 : i32
    return %arg1, %c0_i32, %arg2 : i32, i32, i32
  }
  func.func @transform_4(%arg0: i32, %arg1: i32, %arg2: i32) -> (i32, i32, i32) {
    %c0_i32 = arith.constant 0 : i32
    %c0_i32_0 = arith.constant 0 : i32
    return %arg1, %arg2, %c0_i32 : i32, i32, i32
  }
  func.func @transform_5(%arg0: i32, %arg1: i32, %arg2: i32) -> (i32, i32, i32) {
    %c0_i32 = arith.constant 0 : i32
    %c0_i32_0 = arith.constant 0 : i32
    %c0_i32_1 = arith.constant 0 : i32
    return %arg1, %c0_i32, %c0_i32_0 : i32, i32, i32
  }
  func.func @transform_6(%arg0: i32, %arg1: i32, %arg2: i32) -> (i32, i32, i32) {
    %c0_i32 = arith.constant 0 : i32
    %c0_i32_0 = arith.constant 0 : i32
    %c0_i32_1 = arith.constant 0 : i32
    return %arg1, %c0_i32, %c0_i32_0 : i32, i32, i32
  }
  func.func @transform_7(%arg0: i32, %arg1: i32, %arg2: i32) -> (i32, i32) {
    %c0_i32 = arith.constant 0 : i32
    %c0_i32_0 = arith.constant 0 : i32
    return %arg0, %c0_i32 : i32, i32
  }
}

</mosaic_0001>

<bundles_post_ra>
// kernel: proxycore_forward.1
= control target key start
LH: loop header
LB: loop body
LE: loop exit
PB: predicated region body
PF: predicated region fallthrough
CT: control target
= control target key end

     0   :  { %s9849_s0 = inlined_call_operand.vmem [shape: f32[16,1024], index: 0, kind: input, shape index: {}]   ;;  %s9850_s1 = inlined_call_operand.hbm [shape: s8[2,2,1024,2048], index: 1, kind: input, shape index: {}]   ;;  %s9851_s2 = inlined_call_operand.hbm [shape: f32[2,1,4096], index: 2, kind: input, shape index: {}]   ;;  %s9852_s3 = inlined_call_operand.hbm [shape: f32[2,1,4096], index: 3, kind: input, shape index: {}]   ;;  %s9853_s4 = inlined_call_operand.hbm [shape: s8[2,4096,1024], index: 4, kind: input, shape index: {}]   ;;  %s9854_s5 = inlined_call_operand.hbm [shape: f32[2,1,1024], index: 5, kind: input, shape index: {}]   ;;  %s9855_s6 = inlined_call_operand.hbm [shape: f32[2,1,1024], index: 6, kind: input, shape index: {}]   ;;  %s9856_s7 = inlined_call_operand.vmem [shape: f32[16,1024], index: 7, kind: output, shape index: {}]  }
   0x1   :  { %9878 = sst [smem:[#allocation28_spill]] %s9849_s0 }
   0x2   :  { %9879 = sst [smem:[#allocation29_spill]] %s9851_s2 }
   0x3   :  { %9880 = sst [smem:[#allocation30_spill]] %s9853_s4 }
   0x4   :  { %9881 = sst [smem:[#allocation31_spill]] %s9855_s6 }
   0x5   :  { %9882 = sst [smem:[#allocation32_spill]] %s9856_s7 }
   0x6   :  { %12 = vsyncpa [#allocation5], 0 }
   0x7   :  { %14 = vsyncpa [#allocation5 + $0x1], 0 }
   0x8   :  { %15 = vsyncpa [#allocation7], 0 }
   0x9   :  { %17 = vsyncpa [#allocation7 + $0x1], 0 }
   0xa   :  { %18 = vsyncpa [#allocation10], 0 }
   0xb   :  { %20 = vsyncpa [#allocation10 + $0x1], 0 }
   0xc   :  { %21 = vsyncpa [#allocation13], 0 }
   0xd   :  { %23 = vsyncpa [#allocation13 + $0x1], 0  ;;  %s8035_s24 = smov 0   ;;  %s8037_s25 = smov 0  }
   0xe   :  { %s8039_s26 = smov 0   ;;  %s8041_s27 = smov 0  }
   0xf   :  { %s8043_s28 = smov 0   ;;  %s8045_s29 = smov 0  }
  0x10   :  { %s8047_s30 = smov 0   ;;  %s8049_s8 = smov 0  }
  0x11   :  { %s8051_s9 = smov 0   ;;  %s8053_s10 = smov 0  }
  0x12   :  { %s8055_s11 = smov 0  }
  0x13 LB: > { %9883 = sst [smem:[#allocation19_spill]] %s7958_s28  ;;  %s9857_s12 = sadd.s32 4294967295, %s7982_s11   ;;  %s7982_s11 = sphi %s8055_s11, %s29_s11   ;;  %s7978_s10 = sphi %s8053_s10, %s9938_s10   ;;  %s7974_s9 = sphi %s8051_s9, %s9932_s9   ;;  %s7970_s8 = sphi %s8049_s8, %s9937_s8   ;;  %s7966_s30 = sphi %s8047_s30, %s9931_s30   ;;  %s7962_s29 = sphi %s8045_s29, %s9930_s29   ;;  %s7958_s28 = sphi %s8043_s28, %s9929_s28   ;;  %s7954_s27 = sphi %s8041_s27, %s9928_s27   ;;  %s7950_s26 = sphi %s8039_s26, %s9936_s26   ;;  %s7946_s25 = sphi %s8037_s25, %s9935_s25   ;;  %s7942_s24 = sphi %s8035_s24, %s9934_s24  }
  0x14   : > { %9884 = sst [smem:[#allocation20_spill]] %s7962_s29  ;;  %s41_s13 = sadd.s32 1, %s7974_s9 }
  0x15   : > { %9885 = sst [smem:[#allocation21_spill]] %s7966_s30  ;;  %p42_p0 = scmp.ge.s32.totalorder %s41_s13, 2 }
  0x16   : > { %9886 = sst [smem:[#allocation22_spill]] %s7970_s8  ;;  %s44_s14 = sadd.s32 1, %s7978_s10 }
  0x17   : > { %9887 = sst [smem:[#allocation23_spill]] %s7974_s9  ;;  %s83_s15 = sadd.s32 1, %s7962_s29 }
  0x18   : > { %p90_p1 = scmp.ne.s32.totalorder %s7962_s29, %s7958_s28  ;;  %s9940_s13 = smov (%p42_p0, %s41_s13), 0 }
  0x19   : > { %9888 = sst [smem:[#allocation24_spill]] %s9940_s13  ;;  %s9942_s14 = smov (!%p42_p0, %s44_s14), %s7978_s10 }
  0x1a   : > { %s79_s16 = ssub.s32 %s7974_s9, %s9940_s13  ;;  %p9868_p2 = scmp.eq.s32.totalorder %s7982_s11, 0 }
  0x1b   : > { %p46_p3 = scmp.ge.s32.totalorder %s9942_s14, 2  ;;  %p96_p4 = scmp.ne.s32.totalorder %s7958_s28, %s7954_s27 }
  0x1c   : > { %p92_p5 = por %p9868_p2, %p90_p1  ;;  %p8105_p6 = scmp.eq.s32.totalorder %s9857_s12, 0 }
  0x1d   : > { %s9944_s14 = smov (%p46_p3, %s9942_s14), 0  ;;  %p9867_p8 = scmp.lt.s32.totalorder %s7982_s11, 4 }
  0x1e   : > { %s9889_s17 = scalar_select %p8105_p6, 1, 0 }
  0x1f   : > { %9890 = sst [smem:[#allocation25_spill]] %s9944_s14  ;;  %p8113_p7 = por %p8105_p6, %p96_p4 }
  0x20   : > { %s8119_s19 = ssub.s32 %s7978_s10, %s9944_s14  ;;  %s8125_s21 = sand.u32 1, %s7962_s29  }
  0x21   : > { %s9891_s18 = scalar_select %p8113_p7, 1, 0 }
  0x22   : > { %s80_s20 = sor.u32 %s79_s16, %s8119_s19  ;;  %p8130_p11 = pnand %p9867_p8, %p92_p5 }
  0x23   : > { %9892 = sst [smem:[#allocation26_spill]] %s9891_s18  ;;  %p81_p10 = scmp.eq.s32.totalorder %s80_s20, 0 }
  0x24   : > { %s9893_s23 = scalar_select %p8130_p11, 1, 0 }
  0x25   : > { %s8135_s27 = scalar_select %p81_p10, %s7962_s29, %s83_s15  }
  0x26   : > { %s9872_s12 = sand.u32 1, %s7982_s11   ;;  %s9871_s14 = sshll.u32 %s8125_s21, 4 }
  0x27   : > { %9894 = sst [smem:[#allocation27_spill]] %s8135_s27  ;;  %s7302_s16 = sshll.u32 %s7974_s9, 4 }
  0x28   : > { %s7303_s13 = sshll.u32 %s7978_s10, 5  ;;  %s319_s20 = scalar_lea.vmem [#allocation6], %s9871_s14 }
  0x29   : > { %s329_s7 = sshll.u32 %s319_s20, 4  ;;  %s325_s0 = sadd.s32 %s7303_s13, %s7302_s16  ;;  %s8143_s7 = int_to_ptr.vmem [resolvable:$true] %s329_s7 }
  0x2a   : > { %s7304_s30 = sshll.u32 %s325_s0, 4  ;;  %s9895_s2 = sld [smem:[#allocation29_spill]] }
  0x2b   : > { %s8153_s15 = scalar_lea.hbm %s9852_s3, %s7304_s30  ;;  %s8157_s20 = scalar_lea.sflag [#allocation7], %s9872_s12 }
  0x2c   : > { %p8163_p13 = pneg %p8130_p11 }
  0x30   : > { %s8148_s18 = scalar_lea.hbm %s9895_s2, %s7304_s30  ;;  %s7701_s8 = scalar_lea.hbm %s9895_s2, 1024 }
  0x31   : > { %s7696_s13 = scalar_lea.hbm %s8148_s18, 256  ;;  %p7702_p3 = scmp.lt.u32.totalorder %s8148_s18, %s9895_s2 }
  0x32   : > { %p7697_p12 = scmp.ne.s32.totalorder %s8148_s18, %s7696_s13  ;;  %p7703_p4 = scmp.lt.u32.totalorder %s7701_s8, %s7696_s13 }
  0x33   : > { %p7705_p10 = scmp.lt.u32.totalorder %s7696_s13, %s8148_s18 }
  0x34   : > { %p7699_p0 = pnand %p8163_p13, %p7697_p12  ;;  %p7704_p5 = por %p7703_p4, %p7702_p3 }
  0x36   : > { %p7700_p1 = pneg %p7699_p0  ;;  %p7706_p8 = por %p7705_p10, %p7704_p5 }
  0x38   : > { %p7707_p2 = pnand %p7706_p8, %p7700_p1 }
  0x3a   : > { %7710 = shalt.err (!%p7707_p2)
}
  0x3b   : > { %s7711_s16 = scalar_lea.vmem %s8143_s7, 256  ;;  %s7984_s6 = smov [#allocation6]  }
  0x3c   : > { %p7712_p12 = scmp.ne.s32.totalorder %s8143_s7, %s7711_s16  ;;  %s7716_s28 = sshll.u32 %s7984_s6, 4  ;;  %s7717_s28 = int_to_ptr.vmem [resolvable:$false] %s7716_s28 }
  0x3d   : > { %s7718_s30 = scalar_lea.vmem %s7717_s28, 512  ;;  %p7719_p7 = scmp.lt.s32.totalorder %s8143_s7, %s7717_s28 }
  0x3e   : > { %p7714_p0 = pnand %p7712_p12, %p8163_p13  ;;  %p7720_p6 = scmp.lt.s32.totalorder %s7718_s30, %s7711_s16 }
  0x40   : > { %p7715_p9 = pneg %p7714_p0  ;;  %p7721_p3 = por %p7720_p6, %p7719_p7 }
  0x42   : > { %p7722_p4 = pnand %p7721_p3, %p7715_p9 }
  0x44   : > { %7725 = shalt.err (!%p7722_p4)
}
  0x45   : > { %7561 = dma.hbm_to_vmem [thread:$0]  (!%p8130_p11), %s8148_s18, 256, %s8143_s7, %s8157_s20  }
  0x46   : > { %p7320_p2 = scmp.ge.s32.totalorder %s7982_s11, 1  ;;  %p417_p8 = scmp.lt.s32.totalorder %s7982_s11, 5 }
  0x47   : > { %s7298_s13 = sshll.u32 %s7974_s9, 9  ;;  %s7299_s8 = sshll.u32 %s7978_s10, 10 }
  0x48   : > { %p8191_p6 = pnand %p7320_p2, %p417_p8  ;;  %s8195_s16 = sadd.s32 %s7299_s8, %s7298_s13 }
  0x49   : > { %s9873_s6 = sshll.u32 %s8195_s16, 7  ;;  %s9898_s28 = sshll.u32 %s8125_s21, 12 }
  0x4a   : > { %s9897_s22 = scalar_select %p8191_p6, 1, 0 }
  0x4b   : > { %s361_s30 = scalar_lea.vmem [#allocation9], %s9898_s28  ;;  %s9899_s4 = sld [smem:[#allocation30_spill]] }
  0x4c   : > { %s371_s14 = sshll.u32 %s361_s30, 4  ;;  %s9900_s18 = sand.u32 1, %s7982_s11   ;;  %s8207_s14 = int_to_ptr.vmem [resolvable:$true] %s371_s14 }
  0x4d   : > { %s8211_s13 = scalar_lea.sflag [#allocation10], %s9900_s18 }
  0x51   : > { %s8205_s7 = scalar_lea.hbm %s9899_s4, %s9873_s6  ;;  %s7731_s2 = scalar_lea.hbm %s9899_s4, 262144 }
  0x52   : > { %s7726_s8 = scalar_lea.hbm %s8205_s7, 65536  ;;  %p7732_p5 = scmp.lt.u32.totalorder %s8205_s7, %s9899_s4 }
  0x53   : > { %p7727_p7 = scmp.ne.s32.totalorder %s8205_s7, %s7726_s8  ;;  %p7733_p10 = scmp.lt.u32.totalorder %s7731_s2, %s7726_s8 }
  0x54   : > { %p7735_p0 = scmp.lt.u32.totalorder %s7726_s8, %s8205_s7 }
  0x55   : > { %p7729_p9 = pnand %p7727_p7, %p8163_p13  ;;  %p7734_p12 = por %p7733_p10, %p7732_p5 }
  0x57   : > { %p7730_p1 = pneg %p7729_p9  ;;  %p7736_p3 = por %p7735_p0, %p7734_p12 }
  0x59   : > { %p7737_p4 = pnand %p7736_p3, %p7730_p1 }
  0x5b   : > { %7740 = shalt.err (!%p7737_p4)
}
  0x5c   : > { %s7741_s18 = scalar_lea.vmem %s8207_s14, 65536  ;;  %s7985_s28 = smov [#allocation9]  }
  0x5d   : > { %p7742_p2 = scmp.ne.s32.totalorder %s8207_s14, %s7741_s18  ;;  %s7746_s30 = sshll.u32 %s7985_s28, 4  ;;  %s7747_s30 = int_to_ptr.vmem [resolvable:$false] %s7746_s30 }
  0x5e   : > { %s7748_s6 = scalar_lea.vmem %s7747_s30, 131072  ;;  %p7749_p9 = scmp.lt.s32.totalorder %s8207_s14, %s7747_s30 }
  0x5f   : > { %p7744_p8 = pnand %p7742_p2, %p8163_p13  ;;  %p7750_p6 = scmp.lt.s32.totalorder %s7748_s6, %s7741_s18 }
  0x61   : > { %p7745_p7 = pneg %p7744_p8  ;;  %p7751_p5 = por %p7750_p6, %p7749_p9 }
  0x63   : > { %p7752_p10 = pnand %p7751_p5, %p7745_p7 }
  0x65   : > { %7755 = shalt.err (!%p7752_p10)
}
  0x66   : > { %s7986_s8 = smov 1024   ;;  %s7987_s2 = smov 64  }
  0x67   : > { %7567 = dma.hbm_to_vmem [thread:$0]  (!%p8130_p11), %s8205_s7, 65536, %s8207_s14, %s8211_s13, %s7986_s8, %s7986_s8, %s7987_s2  }
  0x68   : > { %s9901_s12 = sshll.u32 %s8195_s16, 7  ;;  %s9902_s6 = sshll.u32 %s8125_s21, 12 }
  0x69   : > { %s8240_s18 = scalar_lea.hbm %s9850_s1, %s9901_s12  ;;  %s296_s4 = scalar_lea.vmem [#allocation4], %s9902_s6 }
  0x6a   : > { %s305_s9 = sshll.u32 %s296_s4, 4  ;;  %s9903_s27 = sshll.u32 %s8125_s21, 4  ;;  %s8244_s9 = int_to_ptr.vmem [resolvable:$true] %s305_s9 }
  0x6b   : > { %s8248_s29 = scalar_lea.vmem [#allocation8], %s9903_s27  ;;  %s293_s16 = scalar_lea.sflag [#allocation5], %s8125_s21 }
  0x6c   : > { %s350_s14 = sshll.u32 %s8248_s29, 4  ;;  %s7756_s7 = scalar_lea.hbm %s8240_s18, 65536  ;;  %s351_s14 = int_to_ptr.vmem [resolvable:$true] %s350_s14 }
  0x6d   : > { %p7757_p6 = scmp.ne.s32.totalorder %s8240_s18, %s7756_s7  ;;  %s7761_s12 = scalar_lea.hbm %s9850_s1, 262144 }
  0x6e   : > { %p7762_p0 = scmp.lt.u32.totalorder %s8240_s18, %s9850_s1  ;;  %p7763_p3 = scmp.lt.u32.totalorder %s7761_s12, %s7756_s7 }
  0x6f   : > { %p7759_p1 = pnand %p7757_p6, %p8163_p13  ;;  %p7765_p2 = scmp.lt.u32.totalorder %s7756_s7, %s8240_s18 }
  0x70   : > { %p7764_p4 = por %p7763_p3, %p7762_p0 }
  0x71   : > { %p7760_p12 = pneg %p7759_p1 }
  0x72   : > { %p7766_p8 = por %p7765_p2, %p7764_p4 }
  0x74   : > { %p7767_p7 = pnand %p7766_p8, %p7760_p12 }
  0x76   : > { %7770 = shalt.err (!%p7767_p7)
}
  0x77   : > { %s7771_s4 = scalar_lea.vmem %s8244_s9, 65536  ;;  %s7988_s27 = smov [#allocation4]  }
  0x78   : > { %p7772_p9 = scmp.ne.s32.totalorder %s8244_s9, %s7771_s4  ;;  %s7776_s6 = sshll.u32 %s7988_s27, 4  ;;  %s7777_s6 = int_to_ptr.vmem [resolvable:$false] %s7776_s6 }
  0x79   : > { %s7778_s8 = scalar_lea.vmem %s7777_s6, 131072  ;;  %p7779_p6 = scmp.lt.s32.totalorder %s8244_s9, %s7777_s6 }
  0x7a   : > { %p7774_p5 = pnand %p7772_p9, %p8163_p13  ;;  %p7780_p1 = scmp.lt.s32.totalorder %s7778_s8, %s7771_s4 }
  0x7c   : > { %p7775_p10 = pneg %p7774_p5  ;;  %p7781_p0 = por %p7780_p1, %p7779_p6 }
  0x7e   : > { %p7782_p3 = pnand %p7781_p0, %p7775_p10 }
  0x80   : > { %7785 = shalt.err (!%p7782_p3)
}
  0x81   : > { %s7989_s7 = smov 2048   ;;  %s7990_s2 = smov 128  }
  0x82   : > { %7558 = dma.hbm_to_vmem [thread:$0]  (!%p8130_p11), %s8240_s18, 65536, %s8244_s9, %s293_s16, %s7989_s7, %s7989_s7, %s7990_s2  }
  0x83   : > { %s7786_s12 = scalar_lea.hbm %s8153_s15, 256  ;;  %s7791_s4 = scalar_lea.hbm %s9852_s3, 1024 }
  0x84   : > { %p7787_p12 = scmp.ne.s32.totalorder %s8153_s15, %s7786_s12  ;;  %p7792_p8 = scmp.lt.u32.totalorder %s8153_s15, %s9852_s3 }
  0x85   : > { %p7793_p7 = scmp.lt.u32.totalorder %s7791_s4, %s7786_s12  ;;  %p7795_p5 = scmp.lt.u32.totalorder %s7786_s12, %s8153_s15 }
  0x86   : > { %p7789_p4 = pnand %p7787_p12, %p8163_p13 }
  0x87   : > { %p7794_p9 = por %p7793_p7, %p7792_p8 }
  0x88   : > { %p7790_p2 = pneg %p7789_p4 }
  0x89   : > { %p7796_p10 = por %p7795_p5, %p7794_p9 }
  0x8b   : > { %p7797_p6 = pnand %p7796_p10, %p7790_p2 }
  0x8d   : > { %7800 = shalt.err (!%p7797_p6)
}
  0x8e   : > { %s7801_s29 = scalar_lea.vmem %s351_s14, 256  ;;  %s7991_s9 = smov [#allocation8]  }
  0x8f   : > { %p7802_p1 = scmp.ne.s32.totalorder %s351_s14, %s7801_s29  ;;  %s7806_s21 = sshll.u32 %s7991_s9, 4  ;;  %s7807_s21 = int_to_ptr.vmem [resolvable:$false] %s7806_s21 }
  0x90   : > { %s7808_s18 = scalar_lea.vmem %s7807_s21, 512  ;;  %p7809_p12 = scmp.lt.s32.totalorder %s351_s14, %s7807_s21 }
  0x91   : > { %p7804_p0 = pnand %p7802_p1, %p8163_p13  ;;  %p7810_p4 = scmp.lt.s32.totalorder %s7808_s18, %s7801_s29 }
  0x93   : > { %p7805_p3 = pneg %p7804_p0  ;;  %p7811_p11 = por %p7810_p4, %p7809_p12 }
  0x95   : > { %p7812_p7 = pnand %p7811_p11, %p7805_p3 }
  0x97   : > { %7815 = shalt.err (!%p7812_p7)
}
  0x98   : > { %p9904_p8 = scmp.ne.s32.totalorder %s9893_s23, 0  ;;  %s193_s0 = sadd.s32 1, %s7950_s26 }
  0x99   : > { %p9905_p11 = scmp.eq.s32.totalorder %s8119_s19, 0  ;;  %p200_p13 = scmp.ne.s32.totalorder %s7950_s26, %s7946_s25 }
  0x9a   : > { %7564 = dma.hbm_to_vmem [thread:$0]  (!%p9904_p8), %s8153_s15, 256, %s351_s14, %s8157_s20  }
  0x9b   : > { %s8299_s23 = scalar_select %p9905_p11, %s7950_s26, %s193_s0  }
  0x9c   : > { %p206_p2 = scmp.ne.s32.totalorder %s7946_s25, %s7942_s24  ;;  %s383_s16 = sand.u32 1, %s7950_s26  }
  0x9d   : > { %s7333_s8 = sshll.u32 %s7978_s10, 7  ;;  %p9906_p9 = scmp.eq.s32.totalorder %s7982_s11, 0 }
  0x9e   : > { %p9907_p10 = scmp.ne.s32.totalorder %s9889_s17, 0  ;;  %s8317_s2 = sshll.u32 %s383_s16, 3 }
  0x9f   : > { %p202_p5 = por %p200_p13, %p9906_p9  ;;  %s8324_s19 = scalar_lea.hbm %s9854_s5, %s7333_s8 }
  0xa0   : > { %p8311_p6 = por %p206_p2, %p9907_p10  ;;  %p9909_p1 = scmp.lt.s32.totalorder %s7982_s11, 4 }
  0xa1   : > { %s385_s17 = scalar_lea.vmem [#allocation11], %s8317_s2  ;;  %s7816_s12 = scalar_lea.hbm %s8324_s19, 128 }
  0xa2   : > { %s9908_s7 = scalar_select %p8311_p6, 1, 0 }
  0xa3   : > { %p8328_p0 = pnand %p9909_p1, %p202_p5  ;;  %s393_s14 = sshll.u32 %s385_s17, 4  ;;  %s394_s14 = int_to_ptr.vmem [resolvable:$true] %s393_s14 }
  0xa4   : > { %p7817_p3 = scmp.ne.s32.totalorder %s8324_s19, %s7816_s12  ;;  %s7821_s4 = scalar_lea.hbm %s9854_s5, 256 }
  0xa5   : > { %p7818_p12 = pneg %p8328_p0  ;;  %p7822_p8 = scmp.lt.u32.totalorder %s8324_s19, %s9854_s5 }
  0xa6   : > { %p7823_p11 = scmp.lt.u32.totalorder %s7821_s4, %s7816_s12  ;;  %p7825_p2 = scmp.lt.u32.totalorder %s7816_s12, %s8324_s19 }
  0xa7   : > { %p7819_p4 = pnand %p7818_p12, %p7817_p3 }
  0xa8   : > { %p7824_p13 = por %p7823_p11, %p7822_p8 }
  0xa9   : > { %p7820_p7 = pneg %p7819_p4 }
  0xaa   : > { %p7826_p9 = por %p7825_p2, %p7824_p13 }
  0xac   : > { %p7827_p5 = pnand %p7826_p9, %p7820_p7 }
  0xae   : > { %7830 = shalt.err (!%p7827_p5)
}
  0xaf   : > { %s7831_s29 = scalar_lea.vmem %s394_s14, 128  ;;  %s7992_s9 = smov [#allocation11]  }
  0xb0   : > { %p7832_p10 = scmp.ne.s32.totalorder %s394_s14, %s7831_s29  ;;  %s7836_s21 = sshll.u32 %s7992_s9, 4  ;;  %s7837_s21 = int_to_ptr.vmem [resolvable:$false] %s7836_s21 }
  0xb1   : > { %s7838_s18 = scalar_lea.vmem %s7837_s21, 256  ;;  %p7839_p4 = scmp.lt.s32.totalorder %s394_s14, %s7837_s21 }
  0xb2   : > { %p7834_p1 = pnand %p7832_p10, %p7818_p12  ;;  %p7840_p6 = scmp.lt.s32.totalorder %s7838_s18, %s7831_s29 }
  0xb4   : > { %p7835_p3 = pneg %p7834_p1  ;;  %p7841_p8 = por %p7840_p6, %p7839_p4 }
  0xb6   : > { %p7842_p11 = pnand %p7841_p8, %p7835_p3 }
  0xb8   : > { %7845 = shalt.err (!%p7842_p11)
}
  0xb9   : > { %7570 = dma.hbm_to_vmem [thread:$0]  (!%p8328_p0), %s8324_s19, 128, %s394_s14, %s8211_s13  }
  0xba   : > { %s9911_s20 = sld [smem:[#allocation31_spill]]  ;;  %s404_s12 = scalar_lea.vmem [#allocation12], %s8317_s2 }
  0xbb   : > { %s412_s28 = sshll.u32 %s404_s12, 4  ;;  %s401_s30 = scalar_lea.sflag [#allocation13], %s383_s16  ;;  %s413_s28 = int_to_ptr.vmem [resolvable:$true] %s412_s28 }
  0xc0   : > { %s8360_s17 = scalar_lea.hbm %s9911_s20, %s7333_s8  ;;  %s7851_s8 = scalar_lea.hbm %s9911_s20, 256 }
  0xc1   : > { %s7846_s4 = scalar_lea.hbm %s8360_s17, 128  ;;  %p7852_p2 = scmp.lt.u32.totalorder %s8360_s17, %s9911_s20 }
  0xc2   : > { %p7847_p6 = scmp.ne.s32.totalorder %s8360_s17, %s7846_s4  ;;  %p7853_p9 = scmp.lt.u32.totalorder %s7851_s8, %s7846_s4 }
  0xc3   : > { %p7855_p10 = scmp.lt.u32.totalorder %s7846_s4, %s8360_s17 }
  0xc4   : > { %p7849_p7 = pnand %p7847_p6, %p7818_p12  ;;  %p7854_p5 = por %p7853_p9, %p7852_p2 }
  0xc6   : > { %p7850_p13 = pneg %p7849_p7  ;;  %p7856_p1 = por %p7855_p10, %p7854_p5 }
  0xc8   : > { %p7857_p3 = pnand %p7856_p1, %p7850_p13 }
  0xca   : > { %7860 = shalt.err (!%p7857_p3)
}
  0xcb   : > { %s7861_s16 = scalar_lea.vmem %s413_s28, 128  ;;  %s7993_s2 = smov [#allocation12]  }
  0xcc   : > { %p7862_p4 = scmp.ne.s32.totalorder %s413_s28, %s7861_s16  ;;  %s7866_s6 = sshll.u32 %s7993_s2, 4  ;;  %s7867_s6 = int_to_ptr.vmem [resolvable:$false] %s7866_s6 }
  0xcd   : > { %s7868_s29 = scalar_lea.vmem %s7867_s6, 256  ;;  %p7869_p6 = scmp.lt.s32.totalorder %s413_s28, %s7867_s6 }
  0xce   : > { %p7864_p8 = pnand %p7862_p4, %p7818_p12  ;;  %p7870_p7 = scmp.lt.s32.totalorder %s7868_s29, %s7861_s16 }
  0xd0   : > { %p7865_p11 = pneg %p7864_p8  ;;  %p7871_p2 = por %p7870_p7, %p7869_p6 }
  0xd2   : > { %p7872_p9 = pnand %p7871_p2, %p7865_p11 }
  0xd4   : > { %7875 = shalt.err (!%p7872_p9)
}
  0xd5   : > { %7573 = dma.hbm_to_vmem [thread:$0]  (!%p8328_p0), %s8360_s17, 128, %s413_s28, %s401_s30  }
  0xd6   : > { %p9912_p13 = scmp.ne.s32.totalorder %s9897_s22, 0 }
  0xd7   : > { %s9913_s9 = sld [smem:[#allocation19_spill]] (!%p9912_p13) }
  0xd8   : > { %421 = sbr.rel (%p9912_p13) target bundleno = 2589 (0xa1d), region = 48  ;;  %s9914_s21 = sld [smem:[#allocation26_spill]] (!%p9912_p13) }
  0xdd   : > { %s423_s18 = sand.u32 (!%p9912_p13), 1, %s9913_s9  }
  0xde   : > { %s7321_s0 = sshll.u32 (!%p9912_p13), %s423_s18, 12  ;;  %s424_s15 = scalar_lea.sflag (!%p9912_p13), [#allocation5], %s423_s18 }
  0xdf   : > { %s8387_s12 = scalar_lea.vmem [#allocation4], %s7321_s0  ;;  %p9915_p12 = scmp.ne.s32.totalorder %s9914_s21, 0 }
  0xe1   : > { %7921 = dma.done.wait (%p9915_p12), %s424_s15, 65536  }
  0xe2   : > { %7923 = vsyncadd (%p9915_p12), %s424_s15, 4294901760  ;;  %s9916_s4 = sadd.s32 4294967295, %s7982_s11   ;;  %s7322_s17 = sshll.u32 %s423_s18, 4 }
  0xe3   : > { %s432_s24 = sand.u32 1, %s9916_s4   ;;  %s8395_s22 = scalar_lea.vmem [#allocation6], %s7322_s17 }
  0xe4   : > { %s433_s28 = scalar_lea.sflag [#allocation7], %s432_s24 }
  0xe5   : > { %7925 = dma.done.wait (%p9915_p12), %s433_s28, 512  }
  0xe6   : > { %7927 = vsyncadd (%p9915_p12), %s433_s28, 4294966784  ;;  %s8401_s30 = scalar_lea.vmem [#allocation8], %s7322_s17  ;;  %s451_s13 = scalar_lea.sflag [#allocation10], %s432_s24 }
  0xe7   : > { %s8403_s19 = scalar_lea.vmem [#allocation9], %s7321_s0 }
  0xe8   : > { %7929 = dma.done.wait (%p9915_p12), %s451_s13, 65536  }
  0xe9   : > { %7931 = vsyncadd (%p9915_p12), %s451_s13, 4294901760  ;;  %s461_s8 = sand.u32 1, %s7946_s25   ;;  %p9917_p0 = scmp.ne.s32.totalorder %s9908_s7, 0 }
  0xea   : > { %s8410_s14 = sshll.u32 %s461_s8, 3 }
  0xeb   : > { %s463_s27 = scalar_lea.vmem [#allocation11], %s8410_s14 }
  0xec   : > { %7933 = dma.done.wait (%p9917_p0), %s451_s13, 128  }
  0xed   : > { %7935 = vsyncadd (%p9917_p0), %s451_s13, 4294967168  ;;  %s469_s16 = scalar_lea.sflag [#allocation13], %s461_s8  ;;  %s472_s2 = scalar_lea.vmem [#allocation12], %s8410_s14 }
  0xee   : > { %7937 = dma.done.wait (%p9917_p0), %s469_s16, 128  }
  0xef   : > { %7939 = vsyncadd (%p9917_p0), %s469_s16, 4294967168  ;;  %s9918_s6 = sld [smem:[#allocation22_spill]]  ;;  %s9919_s29 = sld [smem:[#allocation21_spill]] }
  0xf5   : > { %p552_p5 = scmp.eq.s32.totalorder %s9918_s6, 0  ;;  %p553_p10 = scmp.eq.s32.totalorder %s9919_s29, 0 }
  0xf7   : > { %p554_p1 = pnand %p553_p10, %p552_p5 }
  0xf8   : > { %s9920_s18 = sld [smem:[#allocation28_spill]] (!%p554_p1) }
  0xf9   : > { %557 = sbr.rel (%p554_p1) target bundleno = 263 (0x107), region = 76 }
  0xfe   : > { %v558_v0 = vld [vmem:[%s9920_s18] sm:$0xff] (!%p554_p1)  ;;  %v559_v2 = vld [vmem:[%s9920_s18 + $0x8] sm:$0xff] (!%p554_p1)  ;;  %v560_v5 = vld [vmem:[%s9920_s18 + $0x10] sm:$0xff] (!%p554_p1) }
  0xff   : > { %v566_v1 = vld [vmem:[%s9920_s18 + $0x40] sm:$0xff] (!%p554_p1)  ;;  %v567_v4 = vld [vmem:[%s9920_s18 + $0x48] sm:$0xff] (!%p554_p1)  ;;  %v568_v6 = vld [vmem:[%s9920_s18 + $0x50] sm:$0xff] (!%p554_p1) }
 0x100   : > { %v574_v3 = vpack.c.bf16 %v566_v1, %v558_v0  ;;  %v575_v7 = vpack.c.bf16 %v567_v4, %v559_v2  ;;  %v576_v8 = vpack.c.bf16 %v568_v6, %v560_v5  ;;  %v561_v9 = vld [vmem:[%s9920_s18 + $0x18] sm:$0xff]  ;;  %v562_v11 = vld [vmem:[%s9920_s18 + $0x20] sm:$0xff]  ;;  %v563_v14 = vld [vmem:[%s9920_s18 + $0x28] sm:$0xff] }
 0x101   : > { %v569_v10 = vld [vmem:[%s9920_s18 + $0x58] sm:$0xff]  ;;  %v570_v13 = vld [vmem:[%s9920_s18 + $0x60] sm:$0xff]  ;;  %v571_v15 = vld [vmem:[%s9920_s18 + $0x68] sm:$0xff] }
 0x102   : > { %582 = vst [vmem:[#allocation2] sm:$0xff] %v574_v3  ;;  %v577_v12 = vpack.c.bf16 %v569_v10, %v561_v9  ;;  %583 = vst [vmem:[#allocation2 + $0x8] sm:$0xff] %v575_v7  ;;  %v578_v16 = vpack.c.bf16 %v570_v13, %v562_v11  ;;  %v579_v17 = vpack.c.bf16 %v571_v15, %v563_v14  ;;  %v564_v18 = vld [vmem:[%s9920_s18 + $0x30] sm:$0xff]  ;;  %v565_v20 = vld [vmem:[%s9920_s18 + $0x38] sm:$0xff] }
 0x103   : > { %584 = vst [vmem:[#allocation2 + $0x10] sm:$0xff] %v576_v8  ;;  %v572_v19 = vld [vmem:[%s9920_s18 + $0x70] sm:$0xff]  ;;  %v573_v22 = vld [vmem:[%s9920_s18 + $0x78] sm:$0xff] }
 0x104   : > { %585 = vst [vmem:[#allocation2 + $0x18] sm:$0xff] %v577_v12  ;;  %v580_v21 = vpack.c.bf16 %v572_v19, %v564_v18  ;;  %586 = vst [vmem:[#allocation2 + $0x20] sm:$0xff] %v578_v16  ;;  %v581_v23 = vpack.c.bf16 %v573_v22, %v565_v20 }
 0x105   : > { %587 = vst [vmem:[#allocation2 + $0x28] sm:$0xff] %v579_v17 }
 0x106   : > { %588 = vst [vmem:[#allocation2 + $0x30] sm:$0xff] %v580_v21  ;;  %589 = vst [vmem:[#allocation2 + $0x38] sm:$0xff] %v581_v23 }
 0x107 PF: > { %s9921_s4 = sld [smem:[#allocation21_spill]] }
 0x10d   : > { %p7327_p3 = scmp.ne.s32.totalorder %s9921_s4, 0 }
 0x10e   : > { %v7994_v24 = vmov (!%p7327_p3), 0.0  }
 0x10f   : > { %592 = sbr.rel (%p7327_p3) target bundleno = 279 (0x117), region = 80  ;;  %593 = vst [vmem:[#allocation3] sm:$0xff] (!%p7327_p3), %v7994_v24  ;;  %594 = vst [vmem:[#allocation3 + $0x8] sm:$0xff] (!%p7327_p3), %v7994_v24 }
 0x110   : > { %595 = vst [vmem:[#allocation3 + $0x10] sm:$0xff] (!%p7327_p3), %v7994_v24  ;;  %596 = vst [vmem:[#allocation3 + $0x18] sm:$0xff] (!%p7327_p3), %v7994_v24 }
 0x111   : > { %597 = vst [vmem:[#allocation3 + $0x20] sm:$0xff] (!%p7327_p3), %v7994_v24  ;;  %598 = vst [vmem:[#allocation3 + $0x28] sm:$0xff] (!%p7327_p3), %v7994_v24 }
 0x112   : > { %599 = vst [vmem:[#allocation3 + $0x30] sm:$0xff] (!%p7327_p3), %v7994_v24  ;;  %600 = vst [vmem:[#allocation3 + $0x38] sm:$0xff] (!%p7327_p3), %v7994_v24 }
 0x113   : > { %601 = vst [vmem:[#allocation3 + $0x40] sm:$0xff] (!%p7327_p3), %v7994_v24  ;;  %602 = vst [vmem:[#allocation3 + $0x48] sm:$0xff] (!%p7327_p3), %v7994_v24 }
 0x114   : > { %603 = vst [vmem:[#allocation3 + $0x50] sm:$0xff] (!%p7327_p3), %v7994_v24  ;;  %604 = vst [vmem:[#allocation3 + $0x58] sm:$0xff] (!%p7327_p3), %v7994_v24 }
 0x115   : > { %605 = vst [vmem:[#allocation3 + $0x60] sm:$0xff] (!%p7327_p3), %v7994_v24  ;;  %606 = vst [vmem:[#allocation3 + $0x68] sm:$0xff] (!%p7327_p3), %v7994_v24 }
 0x116   : > { %607 = vst [vmem:[#allocation3 + $0x70] sm:$0xff] %v7994_v24  ;;  %608 = vst [vmem:[#allocation3 + $0x78] sm:$0xff] %v7994_v24 }
 0x117 PF: > { %v610_v25 = vld [vmem:[%s8387_s12 + $0x8] sm:$0xff]  ;;  %v612_v26 = vld [vmem:[%s8387_s12 + $0x18] sm:$0xff]  ;;  %v609_v27 = vld [vmem:[%s8387_s12] sm:$0xff] }
 0x118   : > { %v1122_v28 = vunpack.c.l.s8.bf16 %v610_v25  ;;  %v1138_v29 = vunpack.c.h.s8.bf16 %v610_v25  ;;  %v1124_v30 = vunpack.c.l.s8.bf16 %v612_v26  ;;  %v1140_v31 = vunpack.c.h.s8.bf16 %v612_v26  ;;  %v611_v32 = vld [vmem:[%s8387_s12 + $0x10] sm:$0xff]  ;;  %v626_v35 = vld [vmem:[%s8387_s12 + $0x88] sm:$0xff]  ;;  %v628_v36 = vld [vmem:[%s8387_s12 + $0x98] sm:$0xff] }
 0x119   : > { %v1121_v33 = vunpack.c.l.s8.bf16 %v609_v27  ;;  %v1123_v34 = vunpack.c.l.s8.bf16 %v611_v32  ;;  %v1137_v37 = vunpack.c.h.s8.bf16 %v609_v27  ;;  %v1139_v38 = vunpack.c.h.s8.bf16 %v611_v32  ;;  %v625_v41 = vld [vmem:[%s8387_s12 + $0x80] sm:$0xff]  ;;  %v627_v42 = vld [vmem:[%s8387_s12 + $0x90] sm:$0xff]  ;;  %v642_v47 = vld [vmem:[%s8387_s12 + $0x108] sm:$0xff] }
 0x11a   : > { %3689 = vmatprep.subr.bf16.mxu0 %v1122_v28  ;;  %3861 = vmatprep.subr.bf16.mxu1 %v1124_v30  ;;  %v1154_v39 = vunpack.c.l.s8.bf16 %v626_v35  ;;  %v1156_v40 = vunpack.c.l.s8.bf16 %v628_v36  ;;  %v1153_v43 = vunpack.c.l.s8.bf16 %v625_v41  ;;  %v1155_v44 = vunpack.c.l.s8.bf16 %v627_v42  ;;  %v644_v48 = vld [vmem:[%s8387_s12 + $0x118] sm:$0xff]  ;;  %v3682_v49 = vld [vmem:[#allocation2 + $0x8] sm:$0xff]  ;;  %v641_v54 = vld [vmem:[%s8387_s12 + $0x100] sm:$0xff] }
 0x11b   : > { %3690 = vmatpush1.bf16.msra.mxu0 %v1121_v33  ;;  %3862 = vmatpush1.bf16.msra.mxu1 %v1123_v34  ;;  %v1170_v45 = vunpack.c.h.s8.bf16 %v626_v35  ;;  %v1172_v46 = vunpack.c.h.s8.bf16 %v628_v36  ;;  %v1169_v50 = vunpack.c.h.s8.bf16 %v625_v41  ;;  %v1171_v51 = vunpack.c.h.s8.bf16 %v627_v42  ;;  %v643_v55 = vld [vmem:[%s8387_s12 + $0x110] sm:$0xff]  ;;  %v658_v60 = vld [vmem:[%s8387_s12 + $0x188] sm:$0xff]  ;;  %v660_v61 = vld [vmem:[%s8387_s12 + $0x198] sm:$0xff] }
 0x11c   : > { %3691 = vmatprep.subr.bf16.mxu0 %v1138_v29  ;;  %3863 = vmatprep.subr.bf16.mxu1 %v1140_v31  ;;  %v1186_v52 = vunpack.c.l.s8.bf16 %v642_v47  ;;  %v1188_v53 = vunpack.c.l.s8.bf16 %v644_v48  ;;  %v1185_v56 = vunpack.c.l.s8.bf16 %v641_v54  ;;  %v1187_v57 = vunpack.c.l.s8.bf16 %v643_v55  ;;  %v657_v2 = vld [vmem:[%s8387_s12 + $0x180] sm:$0xff]  ;;  %v659_v3 = vld [vmem:[%s8387_s12 + $0x190] sm:$0xff]  ;;  %v674_v8 = vld [vmem:[%s8387_s12 + $0x208] sm:$0xff] }
 0x11d   : > { %3721 = vmatprep.mubr.bf16.mxu0 %v3682_v49  ;;  %3893 = vmatprep.mubr.bf16.mxu1 %v3682_v49  ;;  %v1202_v58 = vunpack.c.h.s8.bf16 %v642_v47  ;;  %v1204_v59 = vunpack.c.h.s8.bf16 %v644_v48  ;;  %v1201_v62 = vunpack.c.h.s8.bf16 %v641_v54  ;;  %v1203_v63 = vunpack.c.h.s8.bf16 %v643_v55  ;;  %v676_v9 = vld [vmem:[%s8387_s12 + $0x218] sm:$0xff]  ;;  %v673_v14 = vld [vmem:[%s8387_s12 + $0x200] sm:$0xff]  ;;  %v675_v15 = vld [vmem:[%s8387_s12 + $0x210] sm:$0xff] }
 0x11e   : > { %v1218_v0 = vunpack.c.l.s8.bf16 %v658_v60  ;;  %v1220_v1 = vunpack.c.l.s8.bf16 %v660_v61  ;;  %v1217_v4 = vunpack.c.l.s8.bf16 %v657_v2  ;;  %v1219_v5 = vunpack.c.l.s8.bf16 %v659_v3  ;;  %v690_v20 = vld [vmem:[%s8387_s12 + $0x288] sm:$0xff]  ;;  %v692_v21 = vld [vmem:[%s8387_s12 + $0x298] sm:$0xff]  ;;  %v689_v26 = vld [vmem:[%s8387_s12 + $0x280] sm:$0xff] }
 0x11f   : > { %3692 = vmatpush1.bf16.msra.mxu0 %v1137_v37  ;;  %3864 = vmatpush1.bf16.msra.mxu1 %v1139_v38  ;;  %v1234_v6 = vunpack.c.h.s8.bf16 %v658_v60  ;;  %v1236_v7 = vunpack.c.h.s8.bf16 %v660_v61  ;;  %v1233_v10 = vunpack.c.h.s8.bf16 %v657_v2  ;;  %v1235_v11 = vunpack.c.h.s8.bf16 %v659_v3  ;;  %v691_v27 = vld [vmem:[%s8387_s12 + $0x290] sm:$0xff]  ;;  %v706_v32 = vld [vmem:[%s8387_s12 + $0x308] sm:$0xff]  ;;  %v708_v33 = vld [vmem:[%s8387_s12 + $0x318] sm:$0xff] }
 0x120   : > { %3693 = vmatprep.subr.bf16.mxu0 %v1154_v39  ;;  %3865 = vmatprep.subr.bf16.mxu1 %v1156_v40  ;;  %v1250_v12 = vunpack.c.l.s8.bf16 %v674_v8  ;;  %v1252_v13 = vunpack.c.l.s8.bf16 %v676_v9  ;;  %v1249_v16 = vunpack.c.l.s8.bf16 %v673_v14  ;;  %v1251_v17 = vunpack.c.l.s8.bf16 %v675_v15  ;;  %v705_v38 = vld [vmem:[%s8387_s12 + $0x300] sm:$0xff]  ;;  %v707_v39 = vld [vmem:[%s8387_s12 + $0x310] sm:$0xff] }
 0x121   : > { %v1266_v18 = vunpack.c.h.s8.bf16 %v674_v8  ;;  %v1268_v19 = vunpack.c.h.s8.bf16 %v676_v9  ;;  %v1265_v22 = vunpack.c.h.s8.bf16 %v673_v14  ;;  %v1267_v23 = vunpack.c.h.s8.bf16 %v675_v15 }
 0x122   : > { %v1282_v24 = vunpack.c.l.s8.bf16 %v690_v20  ;;  %v1284_v25 = vunpack.c.l.s8.bf16 %v692_v21  ;;  %v1281_v28 = vunpack.c.l.s8.bf16 %v689_v26  ;;  %v1283_v29 = vunpack.c.l.s8.bf16 %v691_v27 }
 0x123   : > { %3694 = vmatpush1.bf16.msra.mxu0 %v1153_v43  ;;  %3866 = vmatpush1.bf16.msra.mxu1 %v1155_v44  ;;  %v1298_v30 = vunpack.c.h.s8.bf16 %v690_v20  ;;  %v1300_v31 = vunpack.c.h.s8.bf16 %v692_v21  ;;  %v1297_v34 = vunpack.c.h.s8.bf16 %v689_v26  ;;  %v1299_v35 = vunpack.c.h.s8.bf16 %v691_v27  ;;  %v722_v44 = vld [vmem:[%s8387_s12 + $0x388] sm:$0xff] }
 0x124   : > { %3695 = vmatprep.subr.bf16.mxu0 %v1170_v45  ;;  %3867 = vmatprep.subr.bf16.mxu1 %v1172_v46  ;;  %v1314_v36 = vunpack.c.l.s8.bf16 %v706_v32  ;;  %v1316_v37 = vunpack.c.l.s8.bf16 %v708_v33  ;;  %v1313_v40 = vunpack.c.l.s8.bf16 %v705_v38  ;;  %v1315_v41 = vunpack.c.l.s8.bf16 %v707_v39  ;;  %v724_v45 = vld [vmem:[%s8387_s12 + $0x398] sm:$0xff] }
 0x125   : > { %v1330_v42 = vunpack.c.h.s8.bf16 %v706_v32  ;;  %v1332_v43 = vunpack.c.h.s8.bf16 %v708_v33  ;;  %v1329_v46 = vunpack.c.h.s8.bf16 %v705_v38  ;;  %v1331_v47 = vunpack.c.h.s8.bf16 %v707_v39 }
 0x126   : > { %v1346_v48 = vunpack.c.l.s8.bf16 %v722_v44  ;;  %v1348_v49 = vunpack.c.l.s8.bf16 %v724_v45  ;;  %v1362_v54 = vunpack.c.h.s8.bf16 %v722_v44  ;;  %v1364_v55 = vunpack.c.h.s8.bf16 %v724_v45 }
 0x127   : > { %3696 = vmatpush1.bf16.msra.mxu0 %v1169_v50  ;;  %3868 = vmatpush1.bf16.msra.mxu1 %v1171_v51  ;;  %v721_v50 = vld [vmem:[%s8387_s12 + $0x380] sm:$0xff]  ;;  %v723_v51 = vld [vmem:[%s8387_s12 + $0x390] sm:$0xff] }
 0x128   : > { %3697 = vmatprep.subr.bf16.mxu0 %v1186_v52  ;;  %3869 = vmatprep.subr.bf16.mxu1 %v1188_v53  ;;  %v1345_v52 = vunpack.c.l.s8.bf16 %v721_v50  ;;  %v1347_v53 = vunpack.c.l.s8.bf16 %v723_v51 }
 0x12b   : > { %3698 = vmatpush1.bf16.msra.mxu0 %v1185_v56  ;;  %3870 = vmatpush1.bf16.msra.mxu1 %v1187_v57  ;;  %v738_v56 = vld [vmem:[%s8387_s12 + $0x408] sm:$0xff]  ;;  %v740_v57 = vld [vmem:[%s8387_s12 + $0x418] sm:$0xff] }
 0x12c   : > { %3699 = vmatprep.subr.bf16.mxu0 %v1202_v58  ;;  %3871 = vmatprep.subr.bf16.mxu1 %v1204_v59  ;;  %v1361_v58 = vunpack.c.h.s8.bf16 %v721_v50  ;;  %v1363_v59 = vunpack.c.h.s8.bf16 %v723_v51  ;;  %v1378_v60 = vunpack.c.l.s8.bf16 %v738_v56  ;;  %v1380_v61 = vunpack.c.l.s8.bf16 %v740_v57 }
 0x12d   : > { %v1394_v3 = vunpack.c.h.s8.bf16 %v738_v56 }
 0x12f   : > { %3700 = vmatpush1.bf16.msra.mxu0 %v1201_v62  ;;  %3872 = vmatpush1.bf16.msra.mxu1 %v1203_v63  ;;  %v737_v62 = vld [vmem:[%s8387_s12 + $0x400] sm:$0xff]  ;;  %v739_v63 = vld [vmem:[%s8387_s12 + $0x410] sm:$0xff] }
 0x130   : > { %3701 = vmatprep.subr.bf16.mxu0 %v1218_v0  ;;  %3873 = vmatprep.subr.bf16.mxu1 %v1220_v1  ;;  %v3681_v0 = vld [vmem:[#allocation2] sm:$0xff]  ;;  %v1377_v1 = vunpack.c.l.s8.bf16 %v737_v62  ;;  %v1379_v2 = vunpack.c.l.s8.bf16 %v739_v63  ;;  %v1393_v8 = vunpack.c.h.s8.bf16 %v737_v62  ;;  %v1395_v9 = vunpack.c.h.s8.bf16 %v739_v63 }
 0x133   : > { %3702 = vmatpush1.bf16.msra.mxu0 %v1217_v4  ;;  %3874 = vmatpush1.bf16.msra.mxu1 %v1219_v5  ;;  %v1396_v4 = vunpack.c.h.s8.bf16 %v740_v57  ;;  %v754_v5 = vld [vmem:[%s8387_s12 + $0x488] sm:$0xff] }
 0x134   : > { %3703 = vmatprep.subr.bf16.mxu0 %v1234_v6  ;;  %3875 = vmatprep.subr.bf16.mxu1 %v1236_v7  ;;  %v756_v6 = vld [vmem:[%s8387_s12 + $0x498] sm:$0xff] }
 0x135   : > { %v3684_v7 = vld [vmem:[#allocation2 + $0x18] sm:$0xff] }
 0x137   : > { %3704 = vmatpush1.bf16.msra.mxu0 %v1233_v10  ;;  %3876 = vmatpush1.bf16.msra.mxu1 %v1235_v11  ;;  %v1410_v10 = vunpack.c.l.s8.bf16 %v754_v5  ;;  %v1412_v11 = vunpack.c.l.s8.bf16 %v756_v6 }
 0x138   : > { %3705 = vmatprep.subr.bf16.mxu0 %v1250_v12  ;;  %3877 = vmatprep.subr.bf16.mxu1 %v1252_v13  ;;  %v753_v12 = vld [vmem:[%s8387_s12 + $0x480] sm:$0xff]  ;;  %v755_v13 = vld [vmem:[%s8387_s12 + $0x490] sm:$0xff] }
 0x139   : > { %v1409_v14 = vunpack.c.l.s8.bf16 %v753_v12  ;;  %v1411_v15 = vunpack.c.l.s8.bf16 %v755_v13  ;;  %v1425_v20 = vunpack.c.h.s8.bf16 %v753_v12  ;;  %v1427_v21 = vunpack.c.h.s8.bf16 %v755_v13 }
 0x13b   : > { %3706 = vmatpush1.bf16.msra.mxu0 %v1249_v16  ;;  %3878 = vmatpush1.bf16.msra.mxu1 %v1251_v17  ;;  %v1426_v16 = vunpack.c.h.s8.bf16 %v754_v5  ;;  %v1428_v17 = vunpack.c.h.s8.bf16 %v756_v6 }
 0x13c   : > { %3707 = vmatprep.subr.bf16.mxu0 %v1266_v18  ;;  %3879 = vmatprep.subr.bf16.mxu1 %v1268_v19  ;;  %v770_v18 = vld [vmem:[%s8387_s12 + $0x508] sm:$0xff]  ;;  %v772_v19 = vld [vmem:[%s8387_s12 + $0x518] sm:$0xff] }
 0x13f   : > { %3708 = vmatpush1.bf16.msra.mxu0 %v1265_v22  ;;  %3880 = vmatpush1.bf16.msra.mxu1 %v1267_v23  ;;  %v1442_v22 = vunpack.c.l.s8.bf16 %v770_v18  ;;  %v1444_v23 = vunpack.c.l.s8.bf16 %v772_v19 }
 0x140   : > { %3709 = vmatprep.subr.bf16.mxu0 %v1282_v24  ;;  %3881 = vmatprep.subr.bf16.mxu1 %v1284_v25  ;;  %v769_v24 = vld [vmem:[%s8387_s12 + $0x500] sm:$0xff]  ;;  %v771_v25 = vld [vmem:[%s8387_s12 + $0x510] sm:$0xff] }
 0x141   : > { %v1441_v26 = vunpack.c.l.s8.bf16 %v769_v24  ;;  %v1443_v27 = vunpack.c.l.s8.bf16 %v771_v25  ;;  %v1457_v32 = vunpack.c.h.s8.bf16 %v769_v24  ;;  %v1459_v33 = vunpack.c.h.s8.bf16 %v771_v25 }
 0x143   : > { %3710 = vmatpush1.bf16.msra.mxu0 %v1281_v28  ;;  %3882 = vmatpush1.bf16.msra.mxu1 %v1283_v29  ;;  %v1458_v28 = vunpack.c.h.s8.bf16 %v770_v18  ;;  %v1460_v29 = vunpack.c.h.s8.bf16 %v772_v19 }
 0x144   : > { %3711 = vmatprep.subr.bf16.mxu0 %v1298_v30  ;;  %3883 = vmatprep.subr.bf16.mxu1 %v1300_v31  ;;  %v786_v30 = vld [vmem:[%s8387_s12 + $0x588] sm:$0xff]  ;;  %v788_v31 = vld [vmem:[%s8387_s12 + $0x598] sm:$0xff] }
 0x147   : > { %3712 = vmatpush1.bf16.msra.mxu0 %v1297_v34  ;;  %3884 = vmatpush1.bf16.msra.mxu1 %v1299_v35  ;;  %v1474_v34 = vunpack.c.l.s8.bf16 %v786_v30  ;;  %v1476_v35 = vunpack.c.l.s8.bf16 %v788_v31 }
 0x148   : > { %3713 = vmatprep.subr.bf16.mxu0 %v1314_v36  ;;  %3885 = vmatprep.subr.bf16.mxu1 %v1316_v37  ;;  %v785_v36 = vld [vmem:[%s8387_s12 + $0x580] sm:$0xff]  ;;  %v787_v37 = vld [vmem:[%s8387_s12 + $0x590] sm:$0xff] }
 0x149   : > { %v1473_v38 = vunpack.c.l.s8.bf16 %v785_v36  ;;  %v1475_v39 = vunpack.c.l.s8.bf16 %v787_v37  ;;  %v1489_v44 = vunpack.c.h.s8.bf16 %v785_v36  ;;  %v1491_v45 = vunpack.c.h.s8.bf16 %v787_v37 }
 0x14b   : > { %3714 = vmatpush1.bf16.msra.mxu0 %v1313_v40  ;;  %3886 = vmatpush1.bf16.msra.mxu1 %v1315_v41  ;;  %v1490_v40 = vunpack.c.h.s8.bf16 %v786_v30  ;;  %v1492_v41 = vunpack.c.h.s8.bf16 %v788_v31 }
 0x14c   : > { %3715 = vmatprep.subr.bf16.mxu0 %v1330_v42  ;;  %3887 = vmatprep.subr.bf16.mxu1 %v1332_v43  ;;  %v802_v42 = vld [vmem:[%s8387_s12 + $0x608] sm:$0xff]  ;;  %v804_v43 = vld [vmem:[%s8387_s12 + $0x618] sm:$0xff] }
 0x14f   : > { %3716 = vmatpush1.bf16.msra.mxu0 %v1329_v46  ;;  %3888 = vmatpush1.bf16.msra.mxu1 %v1331_v47  ;;  %v1506_v46 = vunpack.c.l.s8.bf16 %v802_v42  ;;  %v1508_v47 = vunpack.c.l.s8.bf16 %v804_v43 }
 0x150   : > { %3717 = vmatprep.subr.bf16.mxu0 %v1346_v48  ;;  %3889 = vmatprep.subr.bf16.mxu1 %v1348_v49  ;;  %v801_v48 = vld [vmem:[%s8387_s12 + $0x600] sm:$0xff]  ;;  %v803_v49 = vld [vmem:[%s8387_s12 + $0x610] sm:$0xff] }
 0x151   : > { %v1505_v50 = vunpack.c.l.s8.bf16 %v801_v48  ;;  %v1507_v51 = vunpack.c.l.s8.bf16 %v803_v49  ;;  %v1521_v56 = vunpack.c.h.s8.bf16 %v801_v48  ;;  %v1523_v57 = vunpack.c.h.s8.bf16 %v803_v49 }
 0x153   : > { %3718 = vmatpush1.bf16.msra.mxu0 %v1345_v52  ;;  %3890 = vmatpush1.bf16.msra.mxu1 %v1347_v53  ;;  %v1522_v52 = vunpack.c.h.s8.bf16 %v802_v42  ;;  %v1524_v53 = vunpack.c.h.s8.bf16 %v804_v43 }
 0x154   : > { %3719 = vmatprep.subr.bf16.mxu0 %v1362_v54  ;;  %3891 = vmatprep.subr.bf16.mxu1 %v1364_v55  ;;  %v818_v54 = vld [vmem:[%s8387_s12 + $0x688] sm:$0xff]  ;;  %v820_v55 = vld [vmem:[%s8387_s12 + $0x698] sm:$0xff] }
 0x157   : > { %3720 = vmatpush1.bf16.msra.mxu0 %v1361_v58  ;;  %3892 = vmatpush1.bf16.msra.mxu1 %v1363_v59  ;;  %v1538_v58 = vunpack.c.l.s8.bf16 %v818_v54  ;;  %v1540_v59 = vunpack.c.l.s8.bf16 %v820_v55 }
 0x158   : > { %3732 = vmatprep.subr.bf16.mxu0 %v1378_v60  ;;  %3904 = vmatprep.subr.bf16.mxu1 %v1380_v61  ;;  %v817_v60 = vld [vmem:[%s8387_s12 + $0x680] sm:$0xff]  ;;  %v819_v61 = vld [vmem:[%s8387_s12 + $0x690] sm:$0xff] }
 0x159   : > { %v1537_v62 = vunpack.c.l.s8.bf16 %v817_v60  ;;  %v1539_v63 = vunpack.c.l.s8.bf16 %v819_v61  ;;  %v1555_v5 = vunpack.c.h.s8.bf16 %v819_v61 }
 0x15a   : > { %3722 = vmatmul.mubr.bf16.vlgmr.msra.gmra.mrb[0].mxu0 %v3681_v0  ;;  %3894 = vmatmul.mubr.bf16.vlgmr.msra.gmra.mrb[0].mxu1 %v3681_v0  ;;  %v1554_v0 = vunpack.c.h.s8.bf16 %v818_v54 }
 0x15b   : > { %3733 = vmatpush1.bf16.msra.mxu0 %v1377_v1  ;;  %3905 = vmatpush1.bf16.msra.mxu1 %v1379_v2  ;;  %v1556_v1 = vunpack.c.h.s8.bf16 %v820_v55  ;;  %v834_v2 = vld [vmem:[%s8387_s12 + $0x708] sm:$0xff] }
 0x15c   : > { %3734 = vmatprep.subr.bf16.mxu0 %v1394_v3  ;;  %3906 = vmatprep.subr.bf16.mxu1 %v1396_v4  ;;  %v836_v3 = vld [vmem:[%s8387_s12 + $0x718] sm:$0xff]  ;;  %v1553_v4 = vunpack.c.h.s8.bf16 %v817_v60  ;;  %v1570_v6 = vunpack.c.l.s8.bf16 %v834_v2  ;;  %v1586_v12 = vunpack.c.h.s8.bf16 %v834_v2 }
 0x15d   : > { %3764 = vmatprep.mubr.bf16.mxu0 %v3684_v7  ;;  %3936 = vmatprep.mubr.bf16.mxu1 %v3684_v7  ;;  %v1572_v7 = vunpack.c.l.s8.bf16 %v836_v3  ;;  %v1588_v13 = vunpack.c.h.s8.bf16 %v836_v3 }
 0x15f   : > { %3735 = vmatpush1.bf16.msra.mxu0 %v1393_v8  ;;  %3907 = vmatpush1.bf16.msra.mxu1 %v1395_v9  ;;  %v833_v8 = vld [vmem:[%s8387_s12 + $0x700] sm:$0xff]  ;;  %v835_v9 = vld [vmem:[%s8387_s12 + $0x710] sm:$0xff] }
 0x160   : > { %3736 = vmatprep.subr.bf16.mxu0 %v1410_v10  ;;  %3908 = vmatprep.subr.bf16.mxu1 %v1412_v11  ;;  %v1569_v10 = vunpack.c.l.s8.bf16 %v833_v8  ;;  %v1571_v11 = vunpack.c.l.s8.bf16 %v835_v9 }
 0x163   : > { %3737 = vmatpush1.bf16.msra.mxu0 %v1409_v14  ;;  %3909 = vmatpush1.bf16.msra.mxu1 %v1411_v15  ;;  %v850_v14 = vld [vmem:[%s8387_s12 + $0x788] sm:$0xff]  ;;  %v852_v15 = vld [vmem:[%s8387_s12 + $0x798] sm:$0xff] }
 0x164   : > { %3738 = vmatprep.subr.bf16.mxu0 %v1426_v16  ;;  %3910 = vmatprep.subr.bf16.mxu1 %v1428_v17  ;;  %v1585_v16 = vunpack.c.h.s8.bf16 %v833_v8  ;;  %v1587_v17 = vunpack.c.h.s8.bf16 %v835_v9  ;;  %v1602_v18 = vunpack.c.l.s8.bf16 %v850_v14  ;;  %v1604_v19 = vunpack.c.l.s8.bf16 %v852_v15 }
 0x165   : > { %v1618_v24 = vunpack.c.h.s8.bf16 %v850_v14  ;;  %v1620_v25 = vunpack.c.h.s8.bf16 %v852_v15 }
 0x167   : > { %3739 = vmatpush1.bf16.msra.mxu0 %v1425_v20  ;;  %3911 = vmatpush1.bf16.msra.mxu1 %v1427_v21  ;;  %v849_v20 = vld [vmem:[%s8387_s12 + $0x780] sm:$0xff]  ;;  %v851_v21 = vld [vmem:[%s8387_s12 + $0x790] sm:$0xff] }
 0x168   : > { %3740 = vmatprep.subr.bf16.mxu0 %v1442_v22  ;;  %3912 = vmatprep.subr.bf16.mxu1 %v1444_v23  ;;  %v1601_v22 = vunpack.c.l.s8.bf16 %v849_v20  ;;  %v1603_v23 = vunpack.c.l.s8.bf16 %v851_v21 }
 0x16b   : > { %3741 = vmatpush1.bf16.msra.mxu0 %v1441_v26  ;;  %3913 = vmatpush1.bf16.msra.mxu1 %v1443_v27  ;;  %v866_v26 = vld [vmem:[%s8387_s12 + $0x808] sm:$0xff]  ;;  %v868_v27 = vld [vmem:[%s8387_s12 + $0x818] sm:$0xff] }
 0x16c   : > { %3742 = vmatprep.subr.bf16.mxu0 %v1458_v28  ;;  %3914 = vmatprep.subr.bf16.mxu1 %v1460_v29  ;;  %v1617_v28 = vunpack.c.h.s8.bf16 %v849_v20  ;;  %v1619_v29 = vunpack.c.h.s8.bf16 %v851_v21  ;;  %v1634_v30 = vunpack.c.l.s8.bf16 %v866_v26  ;;  %v1636_v31 = vunpack.c.l.s8.bf16 %v868_v27 }
 0x16d   : > { %v1650_v37 = vunpack.c.h.s8.bf16 %v866_v26 }
 0x16f   : > { %3743 = vmatpush1.bf16.msra.mxu0 %v1457_v32  ;;  %3915 = vmatpush1.bf16.msra.mxu1 %v1459_v33  ;;  %v865_v32 = vld [vmem:[%s8387_s12 + $0x800] sm:$0xff]  ;;  %v867_v33 = vld [vmem:[%s8387_s12 + $0x810] sm:$0xff] }
 0x170   : > { %3744 = vmatprep.subr.bf16.mxu0 %v1474_v34  ;;  %3916 = vmatprep.subr.bf16.mxu1 %v1476_v35  ;;  %v3683_v34 = vld [vmem:[#allocation2 + $0x10] sm:$0xff]  ;;  %v1633_v35 = vunpack.c.l.s8.bf16 %v865_v32  ;;  %v1635_v36 = vunpack.c.l.s8.bf16 %v867_v33  ;;  %v1649_v42 = vunpack.c.h.s8.bf16 %v865_v32  ;;  %v1651_v43 = vunpack.c.h.s8.bf16 %v867_v33 }
 0x173   : > { %3745 = vmatpush1.bf16.msra.mxu0 %v1473_v38  ;;  %3917 = vmatpush1.bf16.msra.mxu1 %v1475_v39  ;;  %v1652_v38 = vunpack.c.h.s8.bf16 %v868_v27  ;;  %v882_v39 = vld [vmem:[%s8387_s12 + $0x888] sm:$0xff] }
 0x174   : > { %3746 = vmatprep.subr.bf16.mxu0 %v1490_v40  ;;  %3918 = vmatprep.subr.bf16.mxu1 %v1492_v41  ;;  %v884_v40 = vld [vmem:[%s8387_s12 + $0x898] sm:$0xff]  ;;  %v3686_v41 = vld [vmem:[#allocation2 + $0x28] sm:$0xff] }
 0x177   : > { %3747 = vmatpush1.bf16.msra.mxu0 %v1489_v44  ;;  %3919 = vmatpush1.bf16.msra.mxu1 %v1491_v45  ;;  %v1666_v44 = vunpack.c.l.s8.bf16 %v882_v39  ;;  %v1668_v45 = vunpack.c.l.s8.bf16 %v884_v40 }
 0x178   : > { %3748 = vmatprep.subr.bf16.mxu0 %v1506_v46  ;;  %3920 = vmatprep.subr.bf16.mxu1 %v1508_v47  ;;  %v881_v46 = vld [vmem:[%s8387_s12 + $0x880] sm:$0xff]  ;;  %v883_v47 = vld [vmem:[%s8387_s12 + $0x890] sm:$0xff] }
 0x179   : > { %v1665_v48 = vunpack.c.l.s8.bf16 %v881_v46  ;;  %v1667_v49 = vunpack.c.l.s8.bf16 %v883_v47  ;;  %v1681_v54 = vunpack.c.h.s8.bf16 %v881_v46  ;;  %v1683_v55 = vunpack.c.h.s8.bf16 %v883_v47 }
 0x17b   : > { %3749 = vmatpush1.bf16.msra.mxu0 %v1505_v50  ;;  %3921 = vmatpush1.bf16.msra.mxu1 %v1507_v51  ;;  %v1682_v50 = vunpack.c.h.s8.bf16 %v882_v39  ;;  %v1684_v51 = vunpack.c.h.s8.bf16 %v884_v40 }
 0x17c   : > { %3750 = vmatprep.subr.bf16.mxu0 %v1522_v52  ;;  %3922 = vmatprep.subr.bf16.mxu1 %v1524_v53  ;;  %v898_v52 = vld [vmem:[%s8387_s12 + $0x908] sm:$0xff]  ;;  %v900_v53 = vld [vmem:[%s8387_s12 + $0x918] sm:$0xff] }
 0x17f   : > { %3751 = vmatpush1.bf16.msra.mxu0 %v1521_v56  ;;  %3923 = vmatpush1.bf16.msra.mxu1 %v1523_v57  ;;  %v1698_v56 = vunpack.c.l.s8.bf16 %v898_v52  ;;  %v1700_v57 = vunpack.c.l.s8.bf16 %v900_v53 }
 0x180   : > { %3752 = vmatprep.subr.bf16.mxu0 %v1538_v58  ;;  %3924 = vmatprep.subr.bf16.mxu1 %v1540_v59  ;;  %v897_v58 = vld [vmem:[%s8387_s12 + $0x900] sm:$0xff]  ;;  %v899_v59 = vld [vmem:[%s8387_s12 + $0x910] sm:$0xff] }
 0x181   : > { %v1697_v60 = vunpack.c.l.s8.bf16 %v897_v58  ;;  %v1699_v61 = vunpack.c.l.s8.bf16 %v899_v59  ;;  %v1713_v2 = vunpack.c.h.s8.bf16 %v897_v58  ;;  %v1715_v3 = vunpack.c.h.s8.bf16 %v899_v59 }
 0x183   : > { %3753 = vmatpush1.bf16.msra.mxu0 %v1537_v62  ;;  %3925 = vmatpush1.bf16.msra.mxu1 %v1539_v63  ;;  %v1714_v62 = vunpack.c.h.s8.bf16 %v898_v52  ;;  %v1716_v63 = vunpack.c.h.s8.bf16 %v900_v53 }
 0x184   : > { %3754 = vmatprep.subr.bf16.mxu0 %v1554_v0  ;;  %3926 = vmatprep.subr.bf16.mxu1 %v1556_v1  ;;  %v914_v0 = vld [vmem:[%s8387_s12 + $0x988] sm:$0xff]  ;;  %v916_v1 = vld [vmem:[%s8387_s12 + $0x998] sm:$0xff] }
 0x187   : > { %3755 = vmatpush1.bf16.msra.mxu0 %v1553_v4  ;;  %3927 = vmatpush1.bf16.msra.mxu1 %v1555_v5  ;;  %v1730_v4 = vunpack.c.l.s8.bf16 %v914_v0  ;;  %v1732_v5 = vunpack.c.l.s8.bf16 %v916_v1 }
 0x188   : > { %3756 = vmatprep.subr.bf16.mxu0 %v1570_v6  ;;  %3928 = vmatprep.subr.bf16.mxu1 %v1572_v7  ;;  %v913_v6 = vld [vmem:[%s8387_s12 + $0x980] sm:$0xff]  ;;  %v915_v7 = vld [vmem:[%s8387_s12 + $0x990] sm:$0xff] }
 0x189   : > { %v1729_v8 = vunpack.c.l.s8.bf16 %v913_v6  ;;  %v1731_v9 = vunpack.c.l.s8.bf16 %v915_v7  ;;  %v1745_v14 = vunpack.c.h.s8.bf16 %v913_v6  ;;  %v1747_v15 = vunpack.c.h.s8.bf16 %v915_v7 }
 0x18b   : > { %3757 = vmatpush1.bf16.msra.mxu0 %v1569_v10  ;;  %3929 = vmatpush1.bf16.msra.mxu1 %v1571_v11  ;;  %v1746_v10 = vunpack.c.h.s8.bf16 %v914_v0  ;;  %v1748_v11 = vunpack.c.h.s8.bf16 %v916_v1 }
 0x18c   : > { %3758 = vmatprep.subr.bf16.mxu0 %v1586_v12  ;;  %3930 = vmatprep.subr.bf16.mxu1 %v1588_v13  ;;  %v930_v12 = vld [vmem:[%s8387_s12 + $0xa08] sm:$0xff]  ;;  %v932_v13 = vld [vmem:[%s8387_s12 + $0xa18] sm:$0xff] }
 0x18f   : > { %3759 = vmatpush1.bf16.msra.mxu0 %v1585_v16  ;;  %3931 = vmatpush1.bf16.msra.mxu1 %v1587_v17  ;;  %v1762_v16 = vunpack.c.l.s8.bf16 %v930_v12  ;;  %v1764_v17 = vunpack.c.l.s8.bf16 %v932_v13 }
 0x190   : > { %3760 = vmatprep.subr.bf16.mxu0 %v1602_v18  ;;  %3932 = vmatprep.subr.bf16.mxu1 %v1604_v19  ;;  %v929_v18 = vld [vmem:[%s8387_s12 + $0xa00] sm:$0xff]  ;;  %v931_v19 = vld [vmem:[%s8387_s12 + $0xa10] sm:$0xff] }
 0x191   : > { %v1761_v20 = vunpack.c.l.s8.bf16 %v929_v18  ;;  %v1763_v21 = vunpack.c.l.s8.bf16 %v931_v19  ;;  %v1777_v26 = vunpack.c.h.s8.bf16 %v929_v18  ;;  %v1779_v27 = vunpack.c.h.s8.bf16 %v931_v19 }
 0x193   : > { %3761 = vmatpush1.bf16.msra.mxu0 %v1601_v22  ;;  %3933 = vmatpush1.bf16.msra.mxu1 %v1603_v23  ;;  %v1778_v22 = vunpack.c.h.s8.bf16 %v930_v12  ;;  %v1780_v23 = vunpack.c.h.s8.bf16 %v932_v13 }
 0x194   : > { %3762 = vmatprep.subr.bf16.mxu0 %v1618_v24  ;;  %3934 = vmatprep.subr.bf16.mxu1 %v1620_v25  ;;  %v946_v24 = vld [vmem:[%s8387_s12 + $0xa88] sm:$0xff]  ;;  %v948_v25 = vld [vmem:[%s8387_s12 + $0xa98] sm:$0xff] }
 0x197   : > { %3763 = vmatpush1.bf16.msra.mxu0 %v1617_v28  ;;  %3935 = vmatpush1.bf16.msra.mxu1 %v1619_v29  ;;  %v1794_v28 = vunpack.c.l.s8.bf16 %v946_v24  ;;  %v1796_v29 = vunpack.c.l.s8.bf16 %v948_v25 }
 0x198   : > { %3775 = vmatprep.subr.bf16.mxu0 %v1634_v30  ;;  %3947 = vmatprep.subr.bf16.mxu1 %v1636_v31  ;;  %v945_v30 = vld [vmem:[%s8387_s12 + $0xa80] sm:$0xff]  ;;  %v947_v31 = vld [vmem:[%s8387_s12 + $0xa90] sm:$0xff] }
 0x199   : > { %v1793_v32 = vunpack.c.l.s8.bf16 %v945_v30  ;;  %v1795_v33 = vunpack.c.l.s8.bf16 %v947_v31  ;;  %v1811_v39 = vunpack.c.h.s8.bf16 %v947_v31 }
 0x19a   : > { %3765 = vmatmul.mubr.bf16.vlgmr.msra.gmra.mrb[0].mxu0 %v3683_v34  ;;  %3937 = vmatmul.mubr.bf16.vlgmr.msra.gmra.mrb[0].mxu1 %v3683_v34  ;;  %v1810_v34 = vunpack.c.h.s8.bf16 %v946_v24 }
 0x19b   : > { %3776 = vmatpush1.bf16.msra.mxu0 %v1633_v35  ;;  %3948 = vmatpush1.bf16.msra.mxu1 %v1635_v36  ;;  %v1812_v35 = vunpack.c.h.s8.bf16 %v948_v25  ;;  %v962_v36 = vld [vmem:[%s8387_s12 + $0xb08] sm:$0xff] }
 0x19c   : > { %3777 = vmatprep.subr.bf16.mxu0 %v1650_v37  ;;  %3949 = vmatprep.subr.bf16.mxu1 %v1652_v38  ;;  %v964_v37 = vld [vmem:[%s8387_s12 + $0xb18] sm:$0xff]  ;;  %v1809_v38 = vunpack.c.h.s8.bf16 %v945_v30  ;;  %v1826_v40 = vunpack.c.l.s8.bf16 %v962_v36  ;;  %v1842_v46 = vunpack.c.h.s8.bf16 %v962_v36 }
 0x19d   : > { %3807 = vmatprep.mubr.bf16.mxu0 %v3686_v41  ;;  %3979 = vmatprep.mubr.bf16.mxu1 %v3686_v41  ;;  %v1828_v41 = vunpack.c.l.s8.bf16 %v964_v37  ;;  %v1844_v47 = vunpack.c.h.s8.bf16 %v964_v37 }
 0x19f   : > { %3778 = vmatpush1.bf16.msra.mxu0 %v1649_v42  ;;  %3950 = vmatpush1.bf16.msra.mxu1 %v1651_v43  ;;  %v961_v42 = vld [vmem:[%s8387_s12 + $0xb00] sm:$0xff]  ;;  %v963_v43 = vld [vmem:[%s8387_s12 + $0xb10] sm:$0xff] }
 0x1a0   : > { %3779 = vmatprep.subr.bf16.mxu0 %v1666_v44  ;;  %3951 = vmatprep.subr.bf16.mxu1 %v1668_v45  ;;  %v1825_v44 = vunpack.c.l.s8.bf16 %v961_v42  ;;  %v1827_v45 = vunpack.c.l.s8.bf16 %v963_v43 }
 0x1a3   : > { %3780 = vmatpush1.bf16.msra.mxu0 %v1665_v48  ;;  %3952 = vmatpush1.bf16.msra.mxu1 %v1667_v49  ;;  %v978_v48 = vld [vmem:[%s8387_s12 + $0xb88] sm:$0xff]  ;;  %v980_v49 = vld [vmem:[%s8387_s12 + $0xb98] sm:$0xff] }
 0x1a4   : > { %3781 = vmatprep.subr.bf16.mxu0 %v1682_v50  ;;  %3953 = vmatprep.subr.bf16.mxu1 %v1684_v51  ;;  %v1841_v50 = vunpack.c.h.s8.bf16 %v961_v42  ;;  %v1843_v51 = vunpack.c.h.s8.bf16 %v963_v43  ;;  %v1858_v52 = vunpack.c.l.s8.bf16 %v978_v48  ;;  %v1860_v53 = vunpack.c.l.s8.bf16 %v980_v49 }
 0x1a5   : > { %v1874_v58 = vunpack.c.h.s8.bf16 %v978_v48  ;;  %v1876_v59 = vunpack.c.h.s8.bf16 %v980_v49 }
 0x1a7   : > { %3782 = vmatpush1.bf16.msra.mxu0 %v1681_v54  ;;  %3954 = vmatpush1.bf16.msra.mxu1 %v1683_v55  ;;  %v977_v54 = vld [vmem:[%s8387_s12 + $0xb80] sm:$0xff]  ;;  %v979_v55 = vld [vmem:[%s8387_s12 + $0xb90] sm:$0xff] }
 0x1a8   : > { %3783 = vmatprep.subr.bf16.mxu0 %v1698_v56  ;;  %3955 = vmatprep.subr.bf16.mxu1 %v1700_v57  ;;  %v1857_v56 = vunpack.c.l.s8.bf16 %v977_v54  ;;  %v1859_v57 = vunpack.c.l.s8.bf16 %v979_v55 }
 0x1ab   : > { %3784 = vmatpush1.bf16.msra.mxu0 %v1697_v60  ;;  %3956 = vmatpush1.bf16.msra.mxu1 %v1699_v61  ;;  %v994_v60 = vld [vmem:[%s8387_s12 + $0xc08] sm:$0xff]  ;;  %v996_v61 = vld [vmem:[%s8387_s12 + $0xc18] sm:$0xff] }
 0x1ac   : > { %3785 = vmatprep.subr.bf16.mxu0 %v1714_v62  ;;  %3957 = vmatprep.subr.bf16.mxu1 %v1716_v63  ;;  %v1873_v62 = vunpack.c.h.s8.bf16 %v977_v54  ;;  %v1875_v63 = vunpack.c.h.s8.bf16 %v979_v55  ;;  %v1890_v0 = vunpack.c.l.s8.bf16 %v994_v60  ;;  %v1892_v1 = vunpack.c.l.s8.bf16 %v996_v61 }
 0x1ad   : > { %v1906_v7 = vunpack.c.h.s8.bf16 %v994_v60 }
 0x1af   : > { %3786 = vmatpush1.bf16.msra.mxu0 %v1713_v2  ;;  %3958 = vmatpush1.bf16.msra.mxu1 %v1715_v3  ;;  %v993_v2 = vld [vmem:[%s8387_s12 + $0xc00] sm:$0xff]  ;;  %v995_v3 = vld [vmem:[%s8387_s12 + $0xc10] sm:$0xff] }
 0x1b0   : > { %3787 = vmatprep.subr.bf16.mxu0 %v1730_v4  ;;  %3959 = vmatprep.subr.bf16.mxu1 %v1732_v5  ;;  %v3685_v4 = vld [vmem:[#allocation2 + $0x20] sm:$0xff]  ;;  %v1889_v5 = vunpack.c.l.s8.bf16 %v993_v2  ;;  %v1891_v6 = vunpack.c.l.s8.bf16 %v995_v3  ;;  %v1905_v12 = vunpack.c.h.s8.bf16 %v993_v2  ;;  %v1907_v13 = vunpack.c.h.s8.bf16 %v995_v3 }
 0x1b3   : > { %3788 = vmatpush1.bf16.msra.mxu0 %v1729_v8  ;;  %3960 = vmatpush1.bf16.msra.mxu1 %v1731_v9  ;;  %v1908_v8 = vunpack.c.h.s8.bf16 %v996_v61  ;;  %v1010_v9 = vld [vmem:[%s8387_s12 + $0xc88] sm:$0xff] }
 0x1b4   : > { %3789 = vmatprep.subr.bf16.mxu0 %v1746_v10  ;;  %3961 = vmatprep.subr.bf16.mxu1 %v1748_v11  ;;  %v1012_v10 = vld [vmem:[%s8387_s12 + $0xc98] sm:$0xff] }
 0x1b5   : > { %v3688_v11 = vld [vmem:[#allocation2 + $0x38] sm:$0xff] }
 0x1b7   : > { %3790 = vmatpush1.bf16.msra.mxu0 %v1745_v14  ;;  %3962 = vmatpush1.bf16.msra.mxu1 %v1747_v15  ;;  %v1922_v14 = vunpack.c.l.s8.bf16 %v1010_v9  ;;  %v1924_v15 = vunpack.c.l.s8.bf16 %v1012_v10 }
 0x1b8   : > { %3791 = vmatprep.subr.bf16.mxu0 %v1762_v16  ;;  %3963 = vmatprep.subr.bf16.mxu1 %v1764_v17  ;;  %v1009_v16 = vld [vmem:[%s8387_s12 + $0xc80] sm:$0xff]  ;;  %v1011_v17 = vld [vmem:[%s8387_s12 + $0xc90] sm:$0xff] }
 0x1b9   : > { %v1921_v18 = vunpack.c.l.s8.bf16 %v1009_v16  ;;  %v1923_v19 = vunpack.c.l.s8.bf16 %v1011_v17  ;;  %v1937_v24 = vunpack.c.h.s8.bf16 %v1009_v16  ;;  %v1939_v25 = vunpack.c.h.s8.bf16 %v1011_v17 }
 0x1bb   : > { %3792 = vmatpush1.bf16.msra.mxu0 %v1761_v20  ;;  %3964 = vmatpush1.bf16.msra.mxu1 %v1763_v21  ;;  %v1938_v20 = vunpack.c.h.s8.bf16 %v1010_v9  ;;  %v1940_v21 = vunpack.c.h.s8.bf16 %v1012_v10 }
 0x1bc   : > { %3793 = vmatprep.subr.bf16.mxu0 %v1778_v22  ;;  %3965 = vmatprep.subr.bf16.mxu1 %v1780_v23  ;;  %v1026_v22 = vld [vmem:[%s8387_s12 + $0xd08] sm:$0xff]  ;;  %v1028_v23 = vld [vmem:[%s8387_s12 + $0xd18] sm:$0xff] }
 0x1bf   : > { %3794 = vmatpush1.bf16.msra.mxu0 %v1777_v26  ;;  %3966 = vmatpush1.bf16.msra.mxu1 %v1779_v27  ;;  %v1954_v26 = vunpack.c.l.s8.bf16 %v1026_v22  ;;  %v1956_v27 = vunpack.c.l.s8.bf16 %v1028_v23 }
 0x1c0   : > { %3795 = vmatprep.subr.bf16.mxu0 %v1794_v28  ;;  %3967 = vmatprep.subr.bf16.mxu1 %v1796_v29  ;;  %v1025_v28 = vld [vmem:[%s8387_s12 + $0xd00] sm:$0xff]  ;;  %v1027_v29 = vld [vmem:[%s8387_s12 + $0xd10] sm:$0xff] }
 0x1c1   : > { %v1953_v30 = vunpack.c.l.s8.bf16 %v1025_v28  ;;  %v1955_v31 = vunpack.c.l.s8.bf16 %v1027_v29  ;;  %v1969_v36 = vunpack.c.h.s8.bf16 %v1025_v28  ;;  %v1971_v37 = vunpack.c.h.s8.bf16 %v1027_v29 }
 0x1c3   : > { %3796 = vmatpush1.bf16.msra.mxu0 %v1793_v32  ;;  %3968 = vmatpush1.bf16.msra.mxu1 %v1795_v33  ;;  %v1970_v32 = vunpack.c.h.s8.bf16 %v1026_v22  ;;  %v1972_v33 = vunpack.c.h.s8.bf16 %v1028_v23 }
 0x1c4   : > { %3797 = vmatprep.subr.bf16.mxu0 %v1810_v34  ;;  %3969 = vmatprep.subr.bf16.mxu1 %v1812_v35  ;;  %v1042_v34 = vld [vmem:[%s8387_s12 + $0xd88] sm:$0xff]  ;;  %v1044_v35 = vld [vmem:[%s8387_s12 + $0xd98] sm:$0xff] }
 0x1c7   : > { %3798 = vmatpush1.bf16.msra.mxu0 %v1809_v38  ;;  %3970 = vmatpush1.bf16.msra.mxu1 %v1811_v39  ;;  %v1986_v38 = vunpack.c.l.s8.bf16 %v1042_v34  ;;  %v1988_v39 = vunpack.c.l.s8.bf16 %v1044_v35 }
 0x1c8   : > { %3799 = vmatprep.subr.bf16.mxu0 %v1826_v40  ;;  %3971 = vmatprep.subr.bf16.mxu1 %v1828_v41  ;;  %v1041_v40 = vld [vmem:[%s8387_s12 + $0xd80] sm:$0xff]  ;;  %v1043_v41 = vld [vmem:[%s8387_s12 + $0xd90] sm:$0xff] }
 0x1c9   : > { %v1985_v42 = vunpack.c.l.s8.bf16 %v1041_v40  ;;  %v1987_v43 = vunpack.c.l.s8.bf16 %v1043_v41  ;;  %v2001_v48 = vunpack.c.h.s8.bf16 %v1041_v40  ;;  %v2003_v49 = vunpack.c.h.s8.bf16 %v1043_v41 }
 0x1cb   : > { %3800 = vmatpush1.bf16.msra.mxu0 %v1825_v44  ;;  %3972 = vmatpush1.bf16.msra.mxu1 %v1827_v45  ;;  %v2002_v44 = vunpack.c.h.s8.bf16 %v1042_v34  ;;  %v2004_v45 = vunpack.c.h.s8.bf16 %v1044_v35 }
 0x1cc   : > { %3801 = vmatprep.subr.bf16.mxu0 %v1842_v46  ;;  %3973 = vmatprep.subr.bf16.mxu1 %v1844_v47  ;;  %v1058_v46 = vld [vmem:[%s8387_s12 + $0xe08] sm:$0xff]  ;;  %v1060_v47 = vld [vmem:[%s8387_s12 + $0xe18] sm:$0xff] }
 0x1cf   : > { %3802 = vmatpush1.bf16.msra.mxu0 %v1841_v50  ;;  %3974 = vmatpush1.bf16.msra.mxu1 %v1843_v51  ;;  %v2018_v50 = vunpack.c.l.s8.bf16 %v1058_v46  ;;  %v2020_v51 = vunpack.c.l.s8.bf16 %v1060_v47 }
 0x1d0   : > { %3803 = vmatprep.subr.bf16.mxu0 %v1858_v52  ;;  %3975 = vmatprep.subr.bf16.mxu1 %v1860_v53  ;;  %v1057_v52 = vld [vmem:[%s8387_s12 + $0xe00] sm:$0xff]  ;;  %v1059_v53 = vld [vmem:[%s8387_s12 + $0xe10] sm:$0xff] }
 0x1d1   : > { %v2017_v54 = vunpack.c.l.s8.bf16 %v1057_v52  ;;  %v2019_v55 = vunpack.c.l.s8.bf16 %v1059_v53  ;;  %v2033_v60 = vunpack.c.h.s8.bf16 %v1057_v52  ;;  %v2035_v61 = vunpack.c.h.s8.bf16 %v1059_v53 }
 0x1d3   : > { %3804 = vmatpush1.bf16.msra.mxu0 %v1857_v56  ;;  %3976 = vmatpush1.bf16.msra.mxu1 %v1859_v57  ;;  %v2034_v56 = vunpack.c.h.s8.bf16 %v1058_v46  ;;  %v2036_v57 = vunpack.c.h.s8.bf16 %v1060_v47 }
 0x1d4   : > { %3805 = vmatprep.subr.bf16.mxu0 %v1874_v58  ;;  %3977 = vmatprep.subr.bf16.mxu1 %v1876_v59  ;;  %v1074_v58 = vld [vmem:[%s8387_s12 + $0xe88] sm:$0xff]  ;;  %v1076_v59 = vld [vmem:[%s8387_s12 + $0xe98] sm:$0xff] }
 0x1d7   : > { %3806 = vmatpush1.bf16.msra.mxu0 %v1873_v62  ;;  %3978 = vmatpush1.bf16.msra.mxu1 %v1875_v63  ;;  %v2050_v62 = vunpack.c.l.s8.bf16 %v1074_v58  ;;  %v2052_v63 = vunpack.c.l.s8.bf16 %v1076_v59 }
 0x1d8   : > { %3818 = vmatprep.subr.bf16.mxu0 %v1890_v0  ;;  %3990 = vmatprep.subr.bf16.mxu1 %v1892_v1  ;;  %v1073_v0 = vld [vmem:[%s8387_s12 + $0xe80] sm:$0xff]  ;;  %v1075_v1 = vld [vmem:[%s8387_s12 + $0xe90] sm:$0xff] }
 0x1d9   : > { %v2049_v2 = vunpack.c.l.s8.bf16 %v1073_v0  ;;  %v2051_v3 = vunpack.c.l.s8.bf16 %v1075_v1  ;;  %v2067_v9 = vunpack.c.h.s8.bf16 %v1075_v1 }
 0x1da   : > { %3808 = vmatmul.mubr.bf16.vlgmr.msra.gmra.mrb[0].mxu0 %v3685_v4  ;;  %3980 = vmatmul.mubr.bf16.vlgmr.msra.gmra.mrb[0].mxu1 %v3685_v4  ;;  %v2066_v4 = vunpack.c.h.s8.bf16 %v1074_v58 }
 0x1db   : > { %3819 = vmatpush1.bf16.msra.mxu0 %v1889_v5  ;;  %3991 = vmatpush1.bf16.msra.mxu1 %v1891_v6  ;;  %v2068_v5 = vunpack.c.h.s8.bf16 %v1076_v59  ;;  %v1090_v6 = vld [vmem:[%s8387_s12 + $0xf08] sm:$0xff] }
 0x1dc   : > { %3820 = vmatprep.subr.bf16.mxu0 %v1906_v7  ;;  %3992 = vmatprep.subr.bf16.mxu1 %v1908_v8  ;;  %v1092_v7 = vld [vmem:[%s8387_s12 + $0xf18] sm:$0xff]  ;;  %v2065_v8 = vunpack.c.h.s8.bf16 %v1073_v0  ;;  %v2082_v10 = vunpack.c.l.s8.bf16 %v1090_v6  ;;  %v2098_v16 = vunpack.c.h.s8.bf16 %v1090_v6 }
 0x1dd   : > { %3850 = vmatprep.mubr.bf16.mxu0 %v3688_v11  ;;  %4022 = vmatprep.mubr.bf16.mxu1 %v3688_v11  ;;  %v2084_v11 = vunpack.c.l.s8.bf16 %v1092_v7  ;;  %v2100_v17 = vunpack.c.h.s8.bf16 %v1092_v7 }
 0x1df   : > { %3821 = vmatpush1.bf16.msra.mxu0 %v1905_v12  ;;  %3993 = vmatpush1.bf16.msra.mxu1 %v1907_v13  ;;  %v1089_v12 = vld [vmem:[%s8387_s12 + $0xf00] sm:$0xff]  ;;  %v1091_v13 = vld [vmem:[%s8387_s12 + $0xf10] sm:$0xff] }
 0x1e0   : > { %3822 = vmatprep.subr.bf16.mxu0 %v1922_v14  ;;  %3994 = vmatprep.subr.bf16.mxu1 %v1924_v15  ;;  %v2081_v14 = vunpack.c.l.s8.bf16 %v1089_v12  ;;  %v2083_v15 = vunpack.c.l.s8.bf16 %v1091_v13 }
 0x1e3   : > { %3823 = vmatpush1.bf16.msra.mxu0 %v1921_v18  ;;  %3995 = vmatpush1.bf16.msra.mxu1 %v1923_v19  ;;  %v1106_v18 = vld [vmem:[%s8387_s12 + $0xf88] sm:$0xff]  ;;  %v1108_v19 = vld [vmem:[%s8387_s12 + $0xf98] sm:$0xff] }
 0x1e4   : > { %3824 = vmatprep.subr.bf16.mxu0 %v1938_v20  ;;  %3996 = vmatprep.subr.bf16.mxu1 %v1940_v21  ;;  %v2097_v20 = vunpack.c.h.s8.bf16 %v1089_v12  ;;  %v2099_v21 = vunpack.c.h.s8.bf16 %v1091_v13  ;;  %v2114_v22 = vunpack.c.l.s8.bf16 %v1106_v18  ;;  %v2116_v23 = vunpack.c.l.s8.bf16 %v1108_v19 }
 0x1e5   : > { %v2130_v28 = vunpack.c.h.s8.bf16 %v1106_v18  ;;  %v2132_v29 = vunpack.c.h.s8.bf16 %v1108_v19 }
 0x1e7   : > { %3825 = vmatpush1.bf16.msra.mxu0 %v1937_v24  ;;  %3997 = vmatpush1.bf16.msra.mxu1 %v1939_v25  ;;  %v1105_v24 = vld [vmem:[%s8387_s12 + $0xf80] sm:$0xff]  ;;  %v1107_v25 = vld [vmem:[%s8387_s12 + $0xf90] sm:$0xff] }
 0x1e8   : > { %3826 = vmatprep.subr.bf16.mxu0 %v1954_v26  ;;  %3998 = vmatprep.subr.bf16.mxu1 %v1956_v27  ;;  %v2113_v26 = vunpack.c.l.s8.bf16 %v1105_v24  ;;  %v2115_v27 = vunpack.c.l.s8.bf16 %v1107_v25 }
 0x1eb   : > { %3827 = vmatpush1.bf16.msra.mxu0 %v1953_v30  ;;  %3999 = vmatpush1.bf16.msra.mxu1 %v1955_v31  ;;  %v614_v30 = vld [vmem:[%s8387_s12 + $0x28] sm:$0xff]  ;;  %v616_v31 = vld [vmem:[%s8387_s12 + $0x38] sm:$0xff] }
 0x1ec   : > { %3828 = vmatprep.subr.bf16.mxu0 %v1970_v32  ;;  %4000 = vmatprep.subr.bf16.mxu1 %v1972_v33  ;;  %v2129_v32 = vunpack.c.h.s8.bf16 %v1105_v24  ;;  %v2131_v33 = vunpack.c.h.s8.bf16 %v1107_v25  ;;  %v1126_v34 = vunpack.c.l.s8.bf16 %v614_v30  ;;  %v1128_v35 = vunpack.c.l.s8.bf16 %v616_v31 }
 0x1ed   : > { %v1142_v41 = vunpack.c.h.s8.bf16 %v614_v30 }
 0x1ef   : > { %3829 = vmatpush1.bf16.msra.mxu0 %v1969_v36  ;;  %4001 = vmatpush1.bf16.msra.mxu1 %v1971_v37  ;;  %v613_v36 = vld [vmem:[%s8387_s12 + $0x20] sm:$0xff]  ;;  %v615_v37 = vld [vmem:[%s8387_s12 + $0x30] sm:$0xff] }
 0x1f0   : > { %3830 = vmatprep.subr.bf16.mxu0 %v1986_v38  ;;  %4002 = vmatprep.subr.bf16.mxu1 %v1988_v39  ;;  %v3687_v38 = vld [vmem:[#allocation2 + $0x30] sm:$0xff]  ;;  %v1125_v39 = vunpack.c.l.s8.bf16 %v613_v36  ;;  %v1127_v40 = vunpack.c.l.s8.bf16 %v615_v37  ;;  %v1143_v46 = vunpack.c.h.s8.bf16 %v615_v37 }
 0x1f3   : > { %3831 = vmatpush1.bf16.msra.mxu0 %v1985_v42  ;;  %4003 = vmatpush1.bf16.msra.mxu1 %v1987_v43  ;;  %v1144_v42 = vunpack.c.h.s8.bf16 %v616_v31  ;;  %v630_v43 = vld [vmem:[%s8387_s12 + $0xa8] sm:$0xff] }
 0x1f4   : > { %3832 = vmatprep.subr.bf16.mxu0 %v2002_v44  ;;  %4004 = vmatprep.subr.bf16.mxu1 %v2004_v45  ;;  %v632_v44 = vld [vmem:[%s8387_s12 + $0xb8] sm:$0xff]  ;;  %v1141_v45 = vunpack.c.h.s8.bf16 %v613_v36  ;;  %v1158_v47 = vunpack.c.l.s8.bf16 %v630_v43 }
 0x1f7   : > { %3833 = vmatpush1.bf16.msra.mxu0 %v2001_v48  ;;  %4005 = vmatpush1.bf16.msra.mxu1 %v2003_v49  ;;  %v1160_v48 = vunpack.c.l.s8.bf16 %v632_v44  ;;  %v629_v49 = vld [vmem:[%s8387_s12 + $0xa0] sm:$0xff] }
 0x1f8   : > { %3834 = vmatprep.subr.bf16.mxu0 %v2018_v50  ;;  %4006 = vmatprep.subr.bf16.mxu1 %v2020_v51  ;;  %v631_v50 = vld [vmem:[%s8387_s12 + $0xb0] sm:$0xff]  ;;  %v7668_v51 = vld [vmem:[#allocation2 + $0x8] sm:$0xff]  ;;  %v1157_v52 = vunpack.c.l.s8.bf16 %v629_v49  ;;  %v1173_v58 = vunpack.c.h.s8.bf16 %v629_v49 }
 0x1f9   : > { %v1159_v53 = vunpack.c.l.s8.bf16 %v631_v50  ;;  %v1175_v59 = vunpack.c.h.s8.bf16 %v631_v50 }
 0x1fb   : > { %3835 = vmatpush1.bf16.msra.mxu0 %v2017_v54  ;;  %4007 = vmatpush1.bf16.msra.mxu1 %v2019_v55  ;;  %v1174_v54 = vunpack.c.h.s8.bf16 %v630_v43  ;;  %v1176_v55 = vunpack.c.h.s8.bf16 %v632_v44 }
 0x1fc   : > { %3836 = vmatprep.subr.bf16.mxu0 %v2034_v56  ;;  %4008 = vmatprep.subr.bf16.mxu1 %v2036_v57  ;;  %v646_v56 = vld [vmem:[%s8387_s12 + $0x128] sm:$0xff]  ;;  %v648_v57 = vld [vmem:[%s8387_s12 + $0x138] sm:$0xff] }
 0x1ff   : > { %3837 = vmatpush1.bf16.msra.mxu0 %v2033_v60  ;;  %4009 = vmatpush1.bf16.msra.mxu1 %v2035_v61  ;;  %v1190_v60 = vunpack.c.l.s8.bf16 %v646_v56  ;;  %v1192_v61 = vunpack.c.l.s8.bf16 %v648_v57 }
 0x200   : > { %3838 = vmatprep.subr.bf16.mxu0 %v2050_v62  ;;  %4010 = vmatprep.subr.bf16.mxu1 %v2052_v63  ;;  %v645_v62 = vld [vmem:[%s8387_s12 + $0x120] sm:$0xff]  ;;  %v647_v63 = vld [vmem:[%s8387_s12 + $0x130] sm:$0xff] }
 0x201   : > { %v1189_v0 = vunpack.c.l.s8.bf16 %v645_v62  ;;  %v1191_v1 = vunpack.c.l.s8.bf16 %v647_v63  ;;  %v1205_v6 = vunpack.c.h.s8.bf16 %v645_v62  ;;  %v1207_v7 = vunpack.c.h.s8.bf16 %v647_v63 }
 0x203   : > { %3839 = vmatpush1.bf16.msra.mxu0 %v2049_v2  ;;  %4011 = vmatpush1.bf16.msra.mxu1 %v2051_v3  ;;  %v1206_v2 = vunpack.c.h.s8.bf16 %v646_v56  ;;  %v1208_v3 = vunpack.c.h.s8.bf16 %v648_v57 }
 0x204   : > { %3840 = vmatprep.subr.bf16.mxu0 %v2066_v4  ;;  %4012 = vmatprep.subr.bf16.mxu1 %v2068_v5  ;;  %v662_v4 = vld [vmem:[%s8387_s12 + $0x1a8] sm:$0xff]  ;;  %v664_v5 = vld [vmem:[%s8387_s12 + $0x1b8] sm:$0xff] }
 0x207   : > { %3841 = vmatpush1.bf16.msra.mxu0 %v2065_v8  ;;  %4013 = vmatpush1.bf16.msra.mxu1 %v2067_v9  ;;  %v1222_v8 = vunpack.c.l.s8.bf16 %v662_v4  ;;  %v1224_v9 = vunpack.c.l.s8.bf16 %v664_v5 }
 0x208   : > { %3842 = vmatprep.subr.bf16.mxu0 %v2082_v10  ;;  %4014 = vmatprep.subr.bf16.mxu1 %v2084_v11  ;;  %v661_v10 = vld [vmem:[%s8387_s12 + $0x1a0] sm:$0xff]  ;;  %v663_v11 = vld [vmem:[%s8387_s12 + $0x1b0] sm:$0xff] }
 0x209   : > { %v1221_v12 = vunpack.c.l.s8.bf16 %v661_v10  ;;  %v1223_v13 = vunpack.c.l.s8.bf16 %v663_v11  ;;  %v1237_v18 = vunpack.c.h.s8.bf16 %v661_v10  ;;  %v1239_v19 = vunpack.c.h.s8.bf16 %v663_v11 }
 0x20b   : > { %3843 = vmatpush1.bf16.msra.mxu0 %v2081_v14  ;;  %4015 = vmatpush1.bf16.msra.mxu1 %v2083_v15  ;;  %v1238_v14 = vunpack.c.h.s8.bf16 %v662_v4  ;;  %v1240_v15 = vunpack.c.h.s8.bf16 %v664_v5 }
 0x20c   : > { %3844 = vmatprep.subr.bf16.mxu0 %v2098_v16  ;;  %4016 = vmatprep.subr.bf16.mxu1 %v2100_v17  ;;  %v678_v16 = vld [vmem:[%s8387_s12 + $0x228] sm:$0xff]  ;;  %v680_v17 = vld [vmem:[%s8387_s12 + $0x238] sm:$0xff] }
 0x20f   : > { %3845 = vmatpush1.bf16.msra.mxu0 %v2097_v20  ;;  %4017 = vmatpush1.bf16.msra.mxu1 %v2099_v21  ;;  %v1254_v20 = vunpack.c.l.s8.bf16 %v678_v16  ;;  %v1256_v21 = vunpack.c.l.s8.bf16 %v680_v17 }
 0x210   : > { %3846 = vmatprep.subr.bf16.mxu0 %v2114_v22  ;;  %4018 = vmatprep.subr.bf16.mxu1 %v2116_v23  ;;  %v677_v22 = vld [vmem:[%s8387_s12 + $0x220] sm:$0xff]  ;;  %v679_v23 = vld [vmem:[%s8387_s12 + $0x230] sm:$0xff] }
 0x211   : > { %v1253_v24 = vunpack.c.l.s8.bf16 %v677_v22  ;;  %v1255_v25 = vunpack.c.l.s8.bf16 %v679_v23  ;;  %v1269_v30 = vunpack.c.h.s8.bf16 %v677_v22  ;;  %v1271_v31 = vunpack.c.h.s8.bf16 %v679_v23 }
 0x213   : > { %3847 = vmatpush1.bf16.msra.mxu0 %v2113_v26  ;;  %4019 = vmatpush1.bf16.msra.mxu1 %v2115_v27  ;;  %v1270_v26 = vunpack.c.h.s8.bf16 %v678_v16  ;;  %v1272_v27 = vunpack.c.h.s8.bf16 %v680_v17 }
 0x214   : > { %3848 = vmatprep.subr.bf16.mxu0 %v2130_v28  ;;  %4020 = vmatprep.subr.bf16.mxu1 %v2132_v29  ;;  %v694_v28 = vld [vmem:[%s8387_s12 + $0x2a8] sm:$0xff]  ;;  %v696_v29 = vld [vmem:[%s8387_s12 + $0x2b8] sm:$0xff] }
 0x217   : > { %3849 = vmatpush1.bf16.msra.mxu0 %v2129_v32  ;;  %4021 = vmatpush1.bf16.msra.mxu1 %v2131_v33  ;;  %v1286_v32 = vunpack.c.l.s8.bf16 %v694_v28  ;;  %v1288_v33 = vunpack.c.l.s8.bf16 %v696_v29 }
 0x218   : > { %4033 = vmatprep.subr.bf16.mxu0 %v1126_v34  ;;  %4205 = vmatprep.subr.bf16.mxu1 %v1128_v35  ;;  %v693_v34 = vld [vmem:[%s8387_s12 + $0x2a0] sm:$0xff]  ;;  %v695_v35 = vld [vmem:[%s8387_s12 + $0x2b0] sm:$0xff] }
 0x219   : > { %v1285_v36 = vunpack.c.l.s8.bf16 %v693_v34  ;;  %v1287_v37 = vunpack.c.l.s8.bf16 %v695_v35  ;;  %v1303_v43 = vunpack.c.h.s8.bf16 %v695_v35 }
 0x21a   : > { %3851 = vmatmul.mubr.bf16.vlgmr.msra.gmra.mrb[0].mxu0 %v3687_v38  ;;  %4023 = vmatmul.mubr.bf16.vlgmr.msra.gmra.mrb[0].mxu1 %v3687_v38  ;;  %v1302_v38 = vunpack.c.h.s8.bf16 %v694_v28 }
 0x21b   : > { %4034 = vmatpush1.bf16.msra.mxu0 %v1125_v39  ;;  %4206 = vmatpush1.bf16.msra.mxu1 %v1127_v40  ;;  %v1304_v39 = vunpack.c.h.s8.bf16 %v696_v29  ;;  %v710_v40 = vld [vmem:[%s8387_s12 + $0x328] sm:$0xff] }
 0x21c   : > { %4035 = vmatprep.subr.bf16.mxu0 %v1142_v41  ;;  %4207 = vmatprep.subr.bf16.mxu1 %v1144_v42  ;;  %v712_v41 = vld [vmem:[%s8387_s12 + $0x338] sm:$0xff]  ;;  %v1301_v42 = vunpack.c.h.s8.bf16 %v693_v34  ;;  %v1318_v44 = vunpack.c.l.s8.bf16 %v710_v40  ;;  %v1334_v50 = vunpack.c.h.s8.bf16 %v710_v40 }
 0x21d   : > { %4065 = vmatprep.mubr.bf16.mxu0 %v7668_v51  ;;  %4237 = vmatprep.mubr.bf16.mxu1 %v7668_v51  ;;  %v1336_v51 = vunpack.c.h.s8.bf16 %v712_v41 }
 0x21f   : > { %4036 = vmatpush1.bf16.msra.mxu0 %v1141_v45  ;;  %4208 = vmatpush1.bf16.msra.mxu1 %v1143_v46  ;;  %v1320_v45 = vunpack.c.l.s8.bf16 %v712_v41  ;;  %v709_v46 = vld [vmem:[%s8387_s12 + $0x320] sm:$0xff] }
 0x220   : > { %4037 = vmatprep.subr.bf16.mxu0 %v1158_v47  ;;  %4209 = vmatprep.subr.bf16.mxu1 %v1160_v48  ;;  %v711_v47 = vld [vmem:[%s8387_s12 + $0x330] sm:$0xff]  ;;  %v1317_v48 = vunpack.c.l.s8.bf16 %v709_v46 }
 0x221   : > { %v1319_v49 = vunpack.c.l.s8.bf16 %v711_v47 }
 0x223   : > { %4038 = vmatpush1.bf16.msra.mxu0 %v1157_v52  ;;  %4210 = vmatpush1.bf16.msra.mxu1 %v1159_v53  ;;  %v726_v52 = vld [vmem:[%s8387_s12 + $0x3a8] sm:$0xff]  ;;  %v728_v53 = vld [vmem:[%s8387_s12 + $0x3b8] sm:$0xff] }
 0x224   : > { %4039 = vmatprep.subr.bf16.mxu0 %v1174_v54  ;;  %4211 = vmatprep.subr.bf16.mxu1 %v1176_v55  ;;  %v1333_v54 = vunpack.c.h.s8.bf16 %v709_v46  ;;  %v1335_v55 = vunpack.c.h.s8.bf16 %v711_v47  ;;  %v1350_v56 = vunpack.c.l.s8.bf16 %v726_v52  ;;  %v1352_v57 = vunpack.c.l.s8.bf16 %v728_v53 }
 0x225   : > { %v1366_v62 = vunpack.c.h.s8.bf16 %v726_v52  ;;  %v1368_v63 = vunpack.c.h.s8.bf16 %v728_v53 }
 0x227   : > { %4040 = vmatpush1.bf16.msra.mxu0 %v1173_v58  ;;  %4212 = vmatpush1.bf16.msra.mxu1 %v1175_v59  ;;  %v725_v58 = vld [vmem:[%s8387_s12 + $0x3a0] sm:$0xff]  ;;  %v727_v59 = vld [vmem:[%s8387_s12 + $0x3b0] sm:$0xff] }
 0x228   : > { %4041 = vmatprep.subr.bf16.mxu0 %v1190_v60  ;;  %4213 = vmatprep.subr.bf16.mxu1 %v1192_v61  ;;  %v1349_v60 = vunpack.c.l.s8.bf16 %v725_v58  ;;  %v1351_v61 = vunpack.c.l.s8.bf16 %v727_v59 }
 0x22b   : > { %4042 = vmatpush1.bf16.msra.mxu0 %v1189_v0  ;;  %4214 = vmatpush1.bf16.msra.mxu1 %v1191_v1  ;;  %v742_v0 = vld [vmem:[%s8387_s12 + $0x428] sm:$0xff]  ;;  %v744_v1 = vld [vmem:[%s8387_s12 + $0x438] sm:$0xff] }
 0x22c   : > { %4043 = vmatprep.subr.bf16.mxu0 %v1206_v2  ;;  %4215 = vmatprep.subr.bf16.mxu1 %v1208_v3  ;;  %v1365_v2 = vunpack.c.h.s8.bf16 %v725_v58  ;;  %v1367_v3 = vunpack.c.h.s8.bf16 %v727_v59  ;;  %v1382_v4 = vunpack.c.l.s8.bf16 %v742_v0  ;;  %v1384_v5 = vunpack.c.l.s8.bf16 %v744_v1 }
 0x22d   : > { %v1398_v10 = vunpack.c.h.s8.bf16 %v742_v0  ;;  %v1400_v11 = vunpack.c.h.s8.bf16 %v744_v1 }
 0x22f   : > { %4044 = vmatpush1.bf16.msra.mxu0 %v1205_v6  ;;  %4216 = vmatpush1.bf16.msra.mxu1 %v1207_v7  ;;  %v741_v6 = vld [vmem:[%s8387_s12 + $0x420] sm:$0xff]  ;;  %v743_v7 = vld [vmem:[%s8387_s12 + $0x430] sm:$0xff] }
 0x230   : > { %4045 = vmatprep.subr.bf16.mxu0 %v1222_v8  ;;  %4217 = vmatprep.subr.bf16.mxu1 %v1224_v9  ;;  %v1381_v8 = vunpack.c.l.s8.bf16 %v741_v6  ;;  %v1383_v9 = vunpack.c.l.s8.bf16 %v743_v7  ;;  %v1399_v16 = vunpack.c.h.s8.bf16 %v743_v7 }
 0x233   : > { %4046 = vmatpush1.bf16.msra.mxu0 %v1221_v12  ;;  %4218 = vmatpush1.bf16.msra.mxu1 %v1223_v13  ;;  %v758_v12 = vld [vmem:[%s8387_s12 + $0x4a8] sm:$0xff]  ;;  %v760_v13 = vld [vmem:[%s8387_s12 + $0x4b8] sm:$0xff] }
 0x234   : > { %4047 = vmatprep.subr.bf16.mxu0 %v1238_v14  ;;  %4219 = vmatprep.subr.bf16.mxu1 %v1240_v15  ;;  %v7669_v14 = vld [vmem:[#allocation2] sm:$0xff]  ;;  %v1397_v15 = vunpack.c.h.s8.bf16 %v741_v6  ;;  %v1414_v17 = vunpack.c.l.s8.bf16 %v758_v12 }
 0x237   : > { %4048 = vmatpush1.bf16.msra.mxu0 %v1237_v18  ;;  %4220 = vmatpush1.bf16.msra.mxu1 %v1239_v19  ;;  %v1416_v18 = vunpack.c.l.s8.bf16 %v760_v13  ;;  %v757_v19 = vld [vmem:[%s8387_s12 + $0x4a0] sm:$0xff] }
 0x238   : > { %4049 = vmatprep.subr.bf16.mxu0 %v1254_v20  ;;  %4221 = vmatprep.subr.bf16.mxu1 %v1256_v21  ;;  %v759_v20 = vld [vmem:[%s8387_s12 + $0x4b0] sm:$0xff]  ;;  %v7670_v21 = vld [vmem:[#allocation2 + $0x18] sm:$0xff]  ;;  %v1413_v22 = vunpack.c.l.s8.bf16 %v757_v19  ;;  %v1429_v28 = vunpack.c.h.s8.bf16 %v757_v19 }
 0x239   : > { %v1415_v23 = vunpack.c.l.s8.bf16 %v759_v20  ;;  %v1431_v29 = vunpack.c.h.s8.bf16 %v759_v20 }
 0x23b   : > { %4050 = vmatpush1.bf16.msra.mxu0 %v1253_v24  ;;  %4222 = vmatpush1.bf16.msra.mxu1 %v1255_v25  ;;  %v1430_v24 = vunpack.c.h.s8.bf16 %v758_v12  ;;  %v1432_v25 = vunpack.c.h.s8.bf16 %v760_v13 }
 0x23c   : > { %4051 = vmatprep.subr.bf16.mxu0 %v1270_v26  ;;  %4223 = vmatprep.subr.bf16.mxu1 %v1272_v27  ;;  %v774_v26 = vld [vmem:[%s8387_s12 + $0x528] sm:$0xff]  ;;  %v776_v27 = vld [vmem:[%s8387_s12 + $0x538] sm:$0xff] }
 0x23f   : > { %4052 = vmatpush1.bf16.msra.mxu0 %v1269_v30  ;;  %4224 = vmatpush1.bf16.msra.mxu1 %v1271_v31  ;;  %v1446_v30 = vunpack.c.l.s8.bf16 %v774_v26  ;;  %v1448_v31 = vunpack.c.l.s8.bf16 %v776_v27 }
 0x240   : > { %4053 = vmatprep.subr.bf16.mxu0 %v1286_v32  ;;  %4225 = vmatprep.subr.bf16.mxu1 %v1288_v33  ;;  %v773_v32 = vld [vmem:[%s8387_s12 + $0x520] sm:$0xff]  ;;  %v775_v33 = vld [vmem:[%s8387_s12 + $0x530] sm:$0xff] }
 0x241   : > { %v1445_v34 = vunpack.c.l.s8.bf16 %v773_v32  ;;  %v1447_v35 = vunpack.c.l.s8.bf16 %v775_v33  ;;  %v1461_v40 = vunpack.c.h.s8.bf16 %v773_v32  ;;  %v1463_v41 = vunpack.c.h.s8.bf16 %v775_v33 }
 0x243   : > { %4054 = vmatpush1.bf16.msra.mxu0 %v1285_v36  ;;  %4226 = vmatpush1.bf16.msra.mxu1 %v1287_v37  ;;  %v1462_v36 = vunpack.c.h.s8.bf16 %v774_v26  ;;  %v1464_v37 = vunpack.c.h.s8.bf16 %v776_v27 }
 0x244   : > { %4055 = vmatprep.subr.bf16.mxu0 %v1302_v38  ;;  %4227 = vmatprep.subr.bf16.mxu1 %v1304_v39  ;;  %v790_v38 = vld [vmem:[%s8387_s12 + $0x5a8] sm:$0xff]  ;;  %v792_v39 = vld [vmem:[%s8387_s12 + $0x5b8] sm:$0xff] }
 0x247   : > { %4056 = vmatpush1.bf16.msra.mxu0 %v1301_v42  ;;  %4228 = vmatpush1.bf16.msra.mxu1 %v1303_v43  ;;  %v1478_v42 = vunpack.c.l.s8.bf16 %v790_v38  ;;  %v1480_v43 = vunpack.c.l.s8.bf16 %v792_v39 }
 0x248   : > { %4057 = vmatprep.subr.bf16.mxu0 %v1318_v44  ;;  %4229 = vmatprep.subr.bf16.mxu1 %v1320_v45  ;;  %v789_v44 = vld [vmem:[%s8387_s12 + $0x5a0] sm:$0xff]  ;;  %v791_v45 = vld [vmem:[%s8387_s12 + $0x5b0] sm:$0xff] }
 0x249   : > { %v1477_v46 = vunpack.c.l.s8.bf16 %v789_v44  ;;  %v1479_v47 = vunpack.c.l.s8.bf16 %v791_v45  ;;  %v1493_v52 = vunpack.c.h.s8.bf16 %v789_v44  ;;  %v1495_v53 = vunpack.c.h.s8.bf16 %v791_v45 }
 0x24b   : > { %4058 = vmatpush1.bf16.msra.mxu0 %v1317_v48  ;;  %4230 = vmatpush1.bf16.msra.mxu1 %v1319_v49  ;;  %v1494_v48 = vunpack.c.h.s8.bf16 %v790_v38  ;;  %v1496_v49 = vunpack.c.h.s8.bf16 %v792_v39 }
 0x24c   : > { %4059 = vmatprep.subr.bf16.mxu0 %v1334_v50  ;;  %4231 = vmatprep.subr.bf16.mxu1 %v1336_v51  ;;  %v806_v50 = vld [vmem:[%s8387_s12 + $0x628] sm:$0xff]  ;;  %v808_v51 = vld [vmem:[%s8387_s12 + $0x638] sm:$0xff] }
 0x24f   : > { %4060 = vmatpush1.bf16.msra.mxu0 %v1333_v54  ;;  %4232 = vmatpush1.bf16.msra.mxu1 %v1335_v55  ;;  %v1510_v54 = vunpack.c.l.s8.bf16 %v806_v50  ;;  %v1512_v55 = vunpack.c.l.s8.bf16 %v808_v51 }
 0x250   : > { %4061 = vmatprep.subr.bf16.mxu0 %v1350_v56  ;;  %4233 = vmatprep.subr.bf16.mxu1 %v1352_v57  ;;  %v805_v56 = vld [vmem:[%s8387_s12 + $0x620] sm:$0xff]  ;;  %v807_v57 = vld [vmem:[%s8387_s12 + $0x630] sm:$0xff] }
 0x251   : > { %v1509_v58 = vunpack.c.l.s8.bf16 %v805_v56  ;;  %v1511_v59 = vunpack.c.l.s8.bf16 %v807_v57  ;;  %v1525_v0 = vunpack.c.h.s8.bf16 %v805_v56  ;;  %v1527_v1 = vunpack.c.h.s8.bf16 %v807_v57 }
 0x253   : > { %4062 = vmatpush1.bf16.msra.mxu0 %v1349_v60  ;;  %4234 = vmatpush1.bf16.msra.mxu1 %v1351_v61  ;;  %v1526_v60 = vunpack.c.h.s8.bf16 %v806_v50  ;;  %v1528_v61 = vunpack.c.h.s8.bf16 %v808_v51 }
 0x254   : > { %4063 = vmatprep.subr.bf16.mxu0 %v1366_v62  ;;  %4235 = vmatprep.subr.bf16.mxu1 %v1368_v63  ;;  %v822_v62 = vld [vmem:[%s8387_s12 + $0x6a8] sm:$0xff]  ;;  %v824_v63 = vld [vmem:[%s8387_s12 + $0x6b8] sm:$0xff] }
 0x257   : > { %4064 = vmatpush1.bf16.msra.mxu0 %v1365_v2  ;;  %4236 = vmatpush1.bf16.msra.mxu1 %v1367_v3  ;;  %v1542_v2 = vunpack.c.l.s8.bf16 %v822_v62  ;;  %v1544_v3 = vunpack.c.l.s8.bf16 %v824_v63 }
 0x258   : > { %4076 = vmatprep.subr.bf16.mxu0 %v1382_v4  ;;  %4248 = vmatprep.subr.bf16.mxu1 %v1384_v5  ;;  %v821_v4 = vld [vmem:[%s8387_s12 + $0x6a0] sm:$0xff]  ;;  %v823_v5 = vld [vmem:[%s8387_s12 + $0x6b0] sm:$0xff] }
 0x259   : > { %v1541_v6 = vunpack.c.l.s8.bf16 %v821_v4  ;;  %v1543_v7 = vunpack.c.l.s8.bf16 %v823_v5  ;;  %v1557_v12 = vunpack.c.h.s8.bf16 %v821_v4  ;;  %v1559_v13 = vunpack.c.h.s8.bf16 %v823_v5 }
 0x25a   : > { %4066 = vmatmul.mubr.bf16.vlgmr.msra.gmra.mrb[4].mxu0 %v7669_v14  ;;  %4238 = vmatmul.mubr.bf16.vlgmr.msra.gmra.mrb[4].mxu1 %v7669_v14 }
 0x25b   : > { %4077 = vmatpush1.bf16.msra.mxu0 %v1381_v8  ;;  %4249 = vmatpush1.bf16.msra.mxu1 %v1383_v9  ;;  %v1558_v8 = vunpack.c.h.s8.bf16 %v822_v62  ;;  %v1560_v9 = vunpack.c.h.s8.bf16 %v824_v63 }
 0x25c   : > { %4078 = vmatprep.subr.bf16.mxu0 %v1398_v10  ;;  %4250 = vmatprep.subr.bf16.mxu1 %v1400_v11  ;;  %v838_v10 = vld [vmem:[%s8387_s12 + $0x728] sm:$0xff]  ;;  %v840_v11 = vld [vmem:[%s8387_s12 + $0x738] sm:$0xff] }
 0x25d   : > { %4108 = vmatprep.mubr.bf16.mxu0 %v7670_v21  ;;  %4280 = vmatprep.mubr.bf16.mxu1 %v7670_v21  ;;  %v1574_v14 = vunpack.c.l.s8.bf16 %v838_v10  ;;  %v1590_v20 = vunpack.c.h.s8.bf16 %v838_v10  ;;  %v1592_v21 = vunpack.c.h.s8.bf16 %v840_v11 }
 0x25f   : > { %4079 = vmatpush1.bf16.msra.mxu0 %v1397_v15  ;;  %4251 = vmatpush1.bf16.msra.mxu1 %v1399_v16  ;;  %v1576_v15 = vunpack.c.l.s8.bf16 %v840_v11  ;;  %v837_v16 = vld [vmem:[%s8387_s12 + $0x720] sm:$0xff] }
 0x260   : > { %4080 = vmatprep.subr.bf16.mxu0 %v1414_v17  ;;  %4252 = vmatprep.subr.bf16.mxu1 %v1416_v18  ;;  %v839_v17 = vld [vmem:[%s8387_s12 + $0x730] sm:$0xff]  ;;  %v1573_v18 = vunpack.c.l.s8.bf16 %v837_v16 }
 0x261   : > { %v1575_v19 = vunpack.c.l.s8.bf16 %v839_v17 }
 0x263   : > { %4081 = vmatpush1.bf16.msra.mxu0 %v1413_v22  ;;  %4253 = vmatpush1.bf16.msra.mxu1 %v1415_v23  ;;  %v854_v22 = vld [vmem:[%s8387_s12 + $0x7a8] sm:$0xff]  ;;  %v856_v23 = vld [vmem:[%s8387_s12 + $0x7b8] sm:$0xff] }
 0x264   : > { %4082 = vmatprep.subr.bf16.mxu0 %v1430_v24  ;;  %4254 = vmatprep.subr.bf16.mxu1 %v1432_v25  ;;  %v1589_v24 = vunpack.c.h.s8.bf16 %v837_v16  ;;  %v1591_v25 = vunpack.c.h.s8.bf16 %v839_v17  ;;  %v1606_v26 = vunpack.c.l.s8.bf16 %v854_v22  ;;  %v1608_v27 = vunpack.c.l.s8.bf16 %v856_v23 }
 0x265   : > { %v1622_v32 = vunpack.c.h.s8.bf16 %v854_v22  ;;  %v1624_v33 = vunpack.c.h.s8.bf16 %v856_v23 }
 0x267   : > { %4083 = vmatpush1.bf16.msra.mxu0 %v1429_v28  ;;  %4255 = vmatpush1.bf16.msra.mxu1 %v1431_v29  ;;  %v853_v28 = vld [vmem:[%s8387_s12 + $0x7a0] sm:$0xff]  ;;  %v855_v29 = vld [vmem:[%s8387_s12 + $0x7b0] sm:$0xff] }
 0x268   : > { %4084 = vmatprep.subr.bf16.mxu0 %v1446_v30  ;;  %4256 = vmatprep.subr.bf16.mxu1 %v1448_v31  ;;  %v1605_v30 = vunpack.c.l.s8.bf16 %v853_v28  ;;  %v1607_v31 = vunpack.c.l.s8.bf16 %v855_v29 }
 0x26b   : > { %4085 = vmatpush1.bf16.msra.mxu0 %v1445_v34  ;;  %4257 = vmatpush1.bf16.msra.mxu1 %v1447_v35  ;;  %v870_v34 = vld [vmem:[%s8387_s12 + $0x828] sm:$0xff]  ;;  %v872_v35 = vld [vmem:[%s8387_s12 + $0x838] sm:$0xff] }
 0x26c   : > { %4086 = vmatprep.subr.bf16.mxu0 %v1462_v36  ;;  %4258 = vmatprep.subr.bf16.mxu1 %v1464_v37  ;;  %v1621_v36 = vunpack.c.h.s8.bf16 %v853_v28  ;;  %v1623_v37 = vunpack.c.h.s8.bf16 %v855_v29  ;;  %v1638_v38 = vunpack.c.l.s8.bf16 %v870_v34  ;;  %v1640_v39 = vunpack.c.l.s8.bf16 %v872_v35 }
 0x26d   : > { %v1654_v44 = vunpack.c.h.s8.bf16 %v870_v34  ;;  %v1656_v45 = vunpack.c.h.s8.bf16 %v872_v35 }
 0x26f   : > { %4087 = vmatpush1.bf16.msra.mxu0 %v1461_v40  ;;  %4259 = vmatpush1.bf16.msra.mxu1 %v1463_v41  ;;  %v869_v40 = vld [vmem:[%s8387_s12 + $0x820] sm:$0xff]  ;;  %v871_v41 = vld [vmem:[%s8387_s12 + $0x830] sm:$0xff] }
 0x270   : > { %4088 = vmatprep.subr.bf16.mxu0 %v1478_v42  ;;  %4260 = vmatprep.subr.bf16.mxu1 %v1480_v43  ;;  %v1637_v42 = vunpack.c.l.s8.bf16 %v869_v40  ;;  %v1639_v43 = vunpack.c.l.s8.bf16 %v871_v41  ;;  %v1655_v50 = vunpack.c.h.s8.bf16 %v871_v41 }
 0x273   : > { %4089 = vmatpush1.bf16.msra.mxu0 %v1477_v46  ;;  %4261 = vmatpush1.bf16.msra.mxu1 %v1479_v47  ;;  %v886_v46 = vld [vmem:[%s8387_s12 + $0x8a8] sm:$0xff]  ;;  %v888_v47 = vld [vmem:[%s8387_s12 + $0x8b8] sm:$0xff] }
 0x274   : > { %4090 = vmatprep.subr.bf16.mxu0 %v1494_v48  ;;  %4262 = vmatprep.subr.bf16.mxu1 %v1496_v49  ;;  %v7671_v48 = vld [vmem:[#allocation2 + $0x10] sm:$0xff]  ;;  %v1653_v49 = vunpack.c.h.s8.bf16 %v869_v40  ;;  %v1670_v51 = vunpack.c.l.s8.bf16 %v886_v46 }
 0x277   : > { %4091 = vmatpush1.bf16.msra.mxu0 %v1493_v52  ;;  %4263 = vmatpush1.bf16.msra.mxu1 %v1495_v53  ;;  %v1672_v52 = vunpack.c.l.s8.bf16 %v888_v47  ;;  %v885_v53 = vld [vmem:[%s8387_s12 + $0x8a0] sm:$0xff] }
 0x278   : > { %4092 = vmatprep.subr.bf16.mxu0 %v1510_v54  ;;  %4264 = vmatprep.subr.bf16.mxu1 %v1512_v55  ;;  %v887_v54 = vld [vmem:[%s8387_s12 + $0x8b0] sm:$0xff]  ;;  %v7672_v55 = vld [vmem:[#allocation2 + $0x28] sm:$0xff]  ;;  %v1669_v56 = vunpack.c.l.s8.bf16 %v885_v53  ;;  %v1685_v62 = vunpack.c.h.s8.bf16 %v885_v53 }
 0x279   : > { %v1671_v57 = vunpack.c.l.s8.bf16 %v887_v54  ;;  %v1687_v63 = vunpack.c.h.s8.bf16 %v887_v54 }
 0x27b   : > { %4093 = vmatpush1.bf16.msra.mxu0 %v1509_v58  ;;  %4265 = vmatpush1.bf16.msra.mxu1 %v1511_v59  ;;  %v1686_v58 = vunpack.c.h.s8.bf16 %v886_v46  ;;  %v1688_v59 = vunpack.c.h.s8.bf16 %v888_v47 }
 0x27c   : > { %4094 = vmatprep.subr.bf16.mxu0 %v1526_v60  ;;  %4266 = vmatprep.subr.bf16.mxu1 %v1528_v61  ;;  %v902_v60 = vld [vmem:[%s8387_s12 + $0x928] sm:$0xff]  ;;  %v904_v61 = vld [vmem:[%s8387_s12 + $0x938] sm:$0xff] }
 0x27f   : > { %4095 = vmatpush1.bf16.msra.mxu0 %v1525_v0  ;;  %4267 = vmatpush1.bf16.msra.mxu1 %v1527_v1  ;;  %v1702_v0 = vunpack.c.l.s8.bf16 %v902_v60  ;;  %v1704_v1 = vunpack.c.l.s8.bf16 %v904_v61 }
 0x280   : > { %4096 = vmatprep.subr.bf16.mxu0 %v1542_v2  ;;  %4268 = vmatprep.subr.bf16.mxu1 %v1544_v3  ;;  %v901_v2 = vld [vmem:[%s8387_s12 + $0x920] sm:$0xff]  ;;  %v903_v3 = vld [vmem:[%s8387_s12 + $0x930] sm:$0xff] }
 0x281   : > { %v1701_v4 = vunpack.c.l.s8.bf16 %v901_v2  ;;  %v1703_v5 = vunpack.c.l.s8.bf16 %v903_v3  ;;  %v1717_v10 = vunpack.c.h.s8.bf16 %v901_v2  ;;  %v1719_v11 = vunpack.c.h.s8.bf16 %v903_v3 }
 0x283   : > { %4097 = vmatpush1.bf16.msra.mxu0 %v1541_v6  ;;  %4269 = vmatpush1.bf16.msra.mxu1 %v1543_v7  ;;  %v1718_v6 = vunpack.c.h.s8.bf16 %v902_v60  ;;  %v1720_v7 = vunpack.c.h.s8.bf16 %v904_v61 }
 0x284   : > { %4098 = vmatprep.subr.bf16.mxu0 %v1558_v8  ;;  %4270 = vmatprep.subr.bf16.mxu1 %v1560_v9  ;;  %v918_v8 = vld [vmem:[%s8387_s12 + $0x9a8] sm:$0xff]  ;;  %v920_v9 = vld [vmem:[%s8387_s12 + $0x9b8] sm:$0xff] }
 0x287   : > { %4099 = vmatpush1.bf16.msra.mxu0 %v1557_v12  ;;  %4271 = vmatpush1.bf16.msra.mxu1 %v1559_v13  ;;  %v1734_v12 = vunpack.c.l.s8.bf16 %v918_v8  ;;  %v1736_v13 = vunpack.c.l.s8.bf16 %v920_v9 }
 0x288   : > { %4100 = vmatprep.subr.bf16.mxu0 %v1574_v14  ;;  %4272 = vmatprep.subr.bf16.mxu1 %v1576_v15  ;;  %v917_v14 = vld [vmem:[%s8387_s12 + $0x9a0] sm:$0xff]  ;;  %v919_v15 = vld [vmem:[%s8387_s12 + $0x9b0] sm:$0xff] }
 0x289   : > { %v1733_v16 = vunpack.c.l.s8.bf16 %v917_v14  ;;  %v1735_v17 = vunpack.c.l.s8.bf16 %v919_v15  ;;  %v1749_v22 = vunpack.c.h.s8.bf16 %v917_v14  ;;  %v1751_v23 = vunpack.c.h.s8.bf16 %v919_v15 }
 0x28b   : > { %4101 = vmatpush1.bf16.msra.mxu0 %v1573_v18  ;;  %4273 = vmatpush1.bf16.msra.mxu1 %v1575_v19  ;;  %v1750_v18 = vunpack.c.h.s8.bf16 %v918_v8  ;;  %v1752_v19 = vunpack.c.h.s8.bf16 %v920_v9 }
 0x28c   : > { %4102 = vmatprep.subr.bf16.mxu0 %v1590_v20  ;;  %4274 = vmatprep.subr.bf16.mxu1 %v1592_v21  ;;  %v934_v20 = vld [vmem:[%s8387_s12 + $0xa28] sm:$0xff]  ;;  %v936_v21 = vld [vmem:[%s8387_s12 + $0xa38] sm:$0xff] }
 0x28f   : > { %4103 = vmatpush1.bf16.msra.mxu0 %v1589_v24  ;;  %4275 = vmatpush1.bf16.msra.mxu1 %v1591_v25  ;;  %v1766_v24 = vunpack.c.l.s8.bf16 %v934_v20  ;;  %v1768_v25 = vunpack.c.l.s8.bf16 %v936_v21 }
 0x290   : > { %4104 = vmatprep.subr.bf16.mxu0 %v1606_v26  ;;  %4276 = vmatprep.subr.bf16.mxu1 %v1608_v27  ;;  %v933_v26 = vld [vmem:[%s8387_s12 + $0xa20] sm:$0xff]  ;;  %v935_v27 = vld [vmem:[%s8387_s12 + $0xa30] sm:$0xff] }
 0x291   : > { %v1765_v28 = vunpack.c.l.s8.bf16 %v933_v26  ;;  %v1767_v29 = vunpack.c.l.s8.bf16 %v935_v27  ;;  %v1781_v34 = vunpack.c.h.s8.bf16 %v933_v26  ;;  %v1783_v35 = vunpack.c.h.s8.bf16 %v935_v27 }
 0x292   : > { %v5069_v26 = vlaneseq }
 0x293   : > { %4105 = vmatpush1.bf16.msra.mxu0 %v1605_v30  ;;  %4277 = vmatpush1.bf16.msra.mxu1 %v1607_v31  ;;  %v1782_v30 = vunpack.c.h.s8.bf16 %v934_v20  ;;  %v1784_v31 = vunpack.c.h.s8.bf16 %v936_v21 }
 0x294   : > { %4106 = vmatprep.subr.bf16.mxu0 %v1622_v32  ;;  %4278 = vmatprep.subr.bf16.mxu1 %v1624_v33  ;;  %v950_v32 = vld [vmem:[%s8387_s12 + $0xaa8] sm:$0xff]  ;;  %v952_v33 = vld [vmem:[%s8387_s12 + $0xab8] sm:$0xff] }
 0x297   : > { %4107 = vmatpush1.bf16.msra.mxu0 %v1621_v36  ;;  %4279 = vmatpush1.bf16.msra.mxu1 %v1623_v37  ;;  %v1798_v36 = vunpack.c.l.s8.bf16 %v950_v32  ;;  %v1800_v37 = vunpack.c.l.s8.bf16 %v952_v33 }
 0x298   : > { %4119 = vmatprep.subr.bf16.mxu0 %v1638_v38  ;;  %4291 = vmatprep.subr.bf16.mxu1 %v1640_v39  ;;  %v949_v38 = vld [vmem:[%s8387_s12 + $0xaa0] sm:$0xff]  ;;  %v951_v39 = vld [vmem:[%s8387_s12 + $0xab0] sm:$0xff] }
 0x299   : > { %v1797_v40 = vunpack.c.l.s8.bf16 %v949_v38  ;;  %v1799_v41 = vunpack.c.l.s8.bf16 %v951_v39  ;;  %v1813_v46 = vunpack.c.h.s8.bf16 %v949_v38  ;;  %v1815_v47 = vunpack.c.h.s8.bf16 %v951_v39  ;;  %v1029_v38 = vld [vmem:[%s8387_s12 + $0xd20] sm:$0xff]  ;;  %v1031_v39 = vld [vmem:[%s8387_s12 + $0xd30] sm:$0xff] }
 0x29a   : > { %4109 = vmatmul.mubr.bf16.vlgmr.msra.gmra.mrb[4].mxu0 %v7671_v48  ;;  %4281 = vmatmul.mubr.bf16.vlgmr.msra.gmra.mrb[4].mxu1 %v7671_v48 }
 0x29b   : > { %4120 = vmatpush1.bf16.msra.mxu0 %v1637_v42  ;;  %4292 = vmatpush1.bf16.msra.mxu1 %v1639_v43  ;;  %v1814_v42 = vunpack.c.h.s8.bf16 %v950_v32  ;;  %v1816_v43 = vunpack.c.h.s8.bf16 %v952_v33  ;;  %v1032_v32 = vld [vmem:[%s8387_s12 + $0xd38] sm:$0xff]  ;;  %v8707_v33 = vshrl.u32 %v5069_v26, 7 }
 0x29c   : > { %4121 = vmatprep.subr.bf16.mxu0 %v1654_v44  ;;  %4293 = vmatprep.subr.bf16.mxu1 %v1656_v45  ;;  %v966_v44 = vld [vmem:[%s8387_s12 + $0xb28] sm:$0xff]  ;;  %v968_v45 = vld [vmem:[%s8387_s12 + $0xb38] sm:$0xff] }
 0x29d   : > { %4151 = vmatprep.mubr.bf16.mxu0 %v7672_v55  ;;  %4323 = vmatprep.mubr.bf16.mxu1 %v7672_v55  ;;  %v1830_v48 = vunpack.c.l.s8.bf16 %v966_v44  ;;  %v1846_v54 = vunpack.c.h.s8.bf16 %v966_v44  ;;  %v1848_v55 = vunpack.c.h.s8.bf16 %v968_v45  ;;  %v5065_v44 = vld [vmem:[%s8395_s22] sm:$0xff] }
 0x29f   : > { %4122 = vmatpush1.bf16.msra.mxu0 %v1653_v49  ;;  %4294 = vmatpush1.bf16.msra.mxu1 %v1655_v50  ;;  %v1832_v49 = vunpack.c.l.s8.bf16 %v968_v45  ;;  %v965_v50 = vld [vmem:[%s8387_s12 + $0xb20] sm:$0xff]  ;;  %v8719_v45 = vsub.s32 1, %v8707_v33 }
 0x2a0   : > { %4123 = vmatprep.subr.bf16.mxu0 %v1670_v51  ;;  %4295 = vmatprep.subr.bf16.mxu1 %v1672_v52  ;;  %v967_v51 = vld [vmem:[%s8387_s12 + $0xb30] sm:$0xff]  ;;  %v1829_v52 = vunpack.c.l.s8.bf16 %v965_v50 }
 0x2a1   : > { %v1831_v53 = vunpack.c.l.s8.bf16 %v967_v51 }
 0x2a3   : > { %4124 = vmatpush1.bf16.msra.mxu0 %v1669_v56  ;;  %4296 = vmatpush1.bf16.msra.mxu1 %v1671_v57  ;;  %v982_v56 = vld [vmem:[%s8387_s12 + $0xba8] sm:$0xff]  ;;  %v984_v57 = vld [vmem:[%s8387_s12 + $0xbb8] sm:$0xff] }
 0x2a4   : > { %4125 = vmatprep.subr.bf16.mxu0 %v1686_v58  ;;  %4297 = vmatprep.subr.bf16.mxu1 %v1688_v59  ;;  %v1845_v58 = vunpack.c.h.s8.bf16 %v965_v50  ;;  %v1847_v59 = vunpack.c.h.s8.bf16 %v967_v51  ;;  %v1862_v60 = vunpack.c.l.s8.bf16 %v982_v56  ;;  %v1864_v61 = vunpack.c.l.s8.bf16 %v984_v57  ;;  %v8726_v50 = vld [vmem:[%s8387_s12 + $0xda8] sm:$0xff] }
 0x2a5   : > { %v1878_v2 = vunpack.c.h.s8.bf16 %v982_v56  ;;  %v1880_v3 = vunpack.c.h.s8.bf16 %v984_v57  ;;  %v1973_v56 = vunpack.c.h.s8.bf16 %v1029_v38  ;;  %v1975_v57 = vunpack.c.h.s8.bf16 %v1031_v39 }
 0x2a7   : > { %4126 = vmatpush1.bf16.msra.mxu0 %v1685_v62  ;;  %4298 = vmatpush1.bf16.msra.mxu1 %v1687_v63  ;;  %v981_v62 = vld [vmem:[%s8387_s12 + $0xba0] sm:$0xff]  ;;  %v983_v63 = vld [vmem:[%s8387_s12 + $0xbb0] sm:$0xff] }
 0x2a8   : > { %4127 = vmatprep.subr.bf16.mxu0 %v1702_v0  ;;  %4299 = vmatprep.subr.bf16.mxu1 %v1704_v1  ;;  %v1861_v0 = vunpack.c.l.s8.bf16 %v981_v62  ;;  %v1863_v1 = vunpack.c.l.s8.bf16 %v983_v63 }
 0x2ab   : > { %4128 = vmatpush1.bf16.msra.mxu0 %v1701_v4  ;;  %4300 = vmatpush1.bf16.msra.mxu1 %v1703_v5  ;;  %v998_v4 = vld [vmem:[%s8387_s12 + $0xc28] sm:$0xff]  ;;  %v1000_v5 = vld [vmem:[%s8387_s12 + $0xc38] sm:$0xff] }
 0x2ac   : > { %4129 = vmatprep.subr.bf16.mxu0 %v1718_v6  ;;  %4301 = vmatprep.subr.bf16.mxu1 %v1720_v7  ;;  %v1877_v6 = vunpack.c.h.s8.bf16 %v981_v62  ;;  %v1879_v7 = vunpack.c.h.s8.bf16 %v983_v63  ;;  %v1894_v8 = vunpack.c.l.s8.bf16 %v998_v4  ;;  %v1896_v9 = vunpack.c.l.s8.bf16 %v1000_v5 }
 0x2ad   : > { %v1910_v14 = vunpack.c.h.s8.bf16 %v998_v4  ;;  %v1912_v15 = vunpack.c.h.s8.bf16 %v1000_v5  ;;  %v1990_v62 = vunpack.c.l.s8.bf16 %v8726_v50 }
 0x2af   : > { %4130 = vmatpush1.bf16.msra.mxu0 %v1717_v10  ;;  %4302 = vmatpush1.bf16.msra.mxu1 %v1719_v11  ;;  %v997_v10 = vld [vmem:[%s8387_s12 + $0xc20] sm:$0xff]  ;;  %v999_v11 = vld [vmem:[%s8387_s12 + $0xc30] sm:$0xff] }
 0x2b0   : > { %4131 = vmatprep.subr.bf16.mxu0 %v1734_v12  ;;  %4303 = vmatprep.subr.bf16.mxu1 %v1736_v13  ;;  %v1893_v12 = vunpack.c.l.s8.bf16 %v997_v10  ;;  %v1895_v13 = vunpack.c.l.s8.bf16 %v999_v11  ;;  %v1911_v20 = vunpack.c.h.s8.bf16 %v999_v11 }
 0x2b3   : > { %4132 = vmatpush1.bf16.msra.mxu0 %v1733_v16  ;;  %4304 = vmatpush1.bf16.msra.mxu1 %v1735_v17  ;;  %v1014_v16 = vld [vmem:[%s8387_s12 + $0xca8] sm:$0xff]  ;;  %v1016_v17 = vld [vmem:[%s8387_s12 + $0xcb8] sm:$0xff] }
 0x2b4   : > { %4133 = vmatprep.subr.bf16.mxu0 %v1750_v18  ;;  %4305 = vmatprep.subr.bf16.mxu1 %v1752_v19  ;;  %v7673_v18 = vld [vmem:[#allocation2 + $0x20] sm:$0xff]  ;;  %v1909_v19 = vunpack.c.h.s8.bf16 %v997_v10  ;;  %v1926_v21 = vunpack.c.l.s8.bf16 %v1014_v16 }
 0x2b7   : > { %4134 = vmatpush1.bf16.msra.mxu0 %v1749_v22  ;;  %4306 = vmatpush1.bf16.msra.mxu1 %v1751_v23  ;;  %v1928_v22 = vunpack.c.l.s8.bf16 %v1016_v17  ;;  %v1013_v23 = vld [vmem:[%s8387_s12 + $0xca0] sm:$0xff] }
 0x2b8   : > { %4135 = vmatprep.subr.bf16.mxu0 %v1766_v24  ;;  %4307 = vmatprep.subr.bf16.mxu1 %v1768_v25  ;;  %v1015_v24 = vld [vmem:[%s8387_s12 + $0xcb0] sm:$0xff]  ;;  %v7674_v25 = vld [vmem:[#allocation2 + $0x38] sm:$0xff]  ;;  %v1925_v27 = vunpack.c.l.s8.bf16 %v1013_v23 }
 0x2bb   : > { %4136 = vmatpush1.bf16.msra.mxu0 %v1765_v28  ;;  %4308 = vmatpush1.bf16.msra.mxu1 %v1767_v29  ;;  %v1927_v28 = vunpack.c.l.s8.bf16 %v1015_v24  ;;  %v1942_v29 = vunpack.c.h.s8.bf16 %v1014_v16 }
 0x2bc   : > { %4137 = vmatprep.subr.bf16.mxu0 %v1782_v30  ;;  %4309 = vmatprep.subr.bf16.mxu1 %v1784_v31  ;;  %v1944_v30 = vunpack.c.h.s8.bf16 %v1016_v17  ;;  %v1030_v31 = vld [vmem:[%s8387_s12 + $0xd28] sm:$0xff] }
 0x2bf   : > { %4138 = vmatpush1.bf16.msra.mxu0 %v1781_v34  ;;  %4310 = vmatpush1.bf16.msra.mxu1 %v1783_v35  ;;  %v1941_v34 = vunpack.c.h.s8.bf16 %v1013_v23  ;;  %v1943_v35 = vunpack.c.h.s8.bf16 %v1015_v24  ;;  %v1064_v23 = vld [vmem:[%s8387_s12 + $0xe38] sm:$0xff] }
 0x2c0   : > { %4139 = vmatprep.subr.bf16.mxu0 %v1798_v36  ;;  %4311 = vmatprep.subr.bf16.mxu1 %v1800_v37  ;;  %v1958_v36 = vunpack.c.l.s8.bf16 %v1030_v31  ;;  %v1960_v37 = vunpack.c.l.s8.bf16 %v1032_v32 }
 0x2c3   : > { %4140 = vmatpush1.bf16.msra.mxu0 %v1797_v40  ;;  %4312 = vmatpush1.bf16.msra.mxu1 %v1799_v41  ;;  %v8712_v40 = vsub.s32 0, %v8707_v33  ;;  %v8715_v41 = vsub.s32 2, %v8707_v33 }
 0x2c4   : > { %4141 = vmatprep.subr.bf16.mxu0 %v1814_v42  ;;  %4313 = vmatprep.subr.bf16.mxu1 %v1816_v43  ;;  %v1957_v42 = vunpack.c.l.s8.bf16 %v1029_v38  ;;  %v1959_v43 = vunpack.c.l.s8.bf16 %v1031_v39 }
 0x2c5   : > { %v5072_v51 = vrot.slane %v5065_v44, %v8712_v40 }
 0x2c7   : > { %4142 = vmatpush1.bf16.msra.mxu0 %v1813_v46  ;;  %4314 = vmatpush1.bf16.msra.mxu1 %v1815_v47  ;;  %v8722_v46 = vsub.s32 3, %v8707_v33  ;;  %v1974_v47 = vunpack.c.h.s8.bf16 %v1030_v31 }
 0x2c8   : > { %4143 = vmatprep.subr.bf16.mxu0 %v1830_v48  ;;  %4315 = vmatprep.subr.bf16.mxu1 %v1832_v49  ;;  %v1976_v48 = vunpack.c.h.s8.bf16 %v1032_v32  ;;  %v5181_v49 = vld [vmem:[%s8401_s30] sm:$0xff] }
 0x2cb   : > { %4144 = vmatpush1.bf16.msra.mxu0 %v1829_v52  ;;  %4316 = vmatpush1.bf16.msra.mxu1 %v1831_v53  ;;  %v5080_v52 = vrot.slane %v5065_v44, %v8715_v41  ;;  %v1048_v53 = vld [vmem:[%s8387_s12 + $0xdb8] sm:$0xff] }
 0x2cc   : > { %4145 = vmatprep.subr.bf16.mxu0 %v1846_v54  ;;  %4317 = vmatprep.subr.bf16.mxu1 %v1848_v55  ;;  %v5076_v54 = vrot.slane %v5065_v44, %v8719_v45  ;;  %v5084_v55 = vrot.slane %v5065_v44, %v8722_v46  ;;  %v1063_v44 = vld [vmem:[%s8387_s12 + $0xe30] sm:$0xff] }
 0x2cf   : > { %4146 = vmatpush1.bf16.msra.mxu0 %v1845_v58  ;;  %4318 = vmatpush1.bf16.msra.mxu1 %v1847_v59  ;;  %v8734_v58 = vld [vmem:[%s8387_s12 + $0xda0] sm:$0xff]  ;;  %v8737_v59 = vld [vmem:[%s8387_s12 + $0xdb0] sm:$0xff] }
 0x2d0   : > { %4147 = vmatprep.subr.bf16.mxu0 %v1862_v60  ;;  %4319 = vmatprep.subr.bf16.mxu1 %v1864_v61  ;;  %v5188_v60 = vrot.slane %v5181_v49, %v8712_v40  ;;  %v5196_v61 = vrot.slane %v5181_v49, %v8715_v41  ;;  %v2007_v31 = vunpack.c.h.s8.bf16 %v8737_v59 }
 0x2d3   : > { %4148 = vmatpush1.bf16.msra.mxu0 %v1861_v0  ;;  %4320 = vmatpush1.bf16.msra.mxu1 %v1863_v1  ;;  %v5192_v1 = vrot.slane %v5181_v49, %v8719_v45 }
 0x2d4   : > { %4149 = vmatprep.subr.bf16.mxu0 %v1878_v2  ;;  %4321 = vmatprep.subr.bf16.mxu1 %v1880_v3  ;;  %v5200_v2 = vrot.slane %v5181_v49, %v8722_v46  ;;  %v1992_v3 = vunpack.c.l.s8.bf16 %v1048_v53 }
 0x2d7   : > { %4150 = vmatpush1.bf16.msra.mxu0 %v1877_v6  ;;  %4322 = vmatpush1.bf16.msra.mxu1 %v1879_v7 }
 0x2d8   : > { %4162 = vmatprep.subr.bf16.mxu0 %v1894_v8  ;;  %4334 = vmatprep.subr.bf16.mxu1 %v1896_v9  ;;  %v1989_v8 = vunpack.c.l.s8.bf16 %v8734_v58  ;;  %v1991_v9 = vunpack.c.l.s8.bf16 %v8737_v59  ;;  %v1078_v59 = vld [vmem:[%s8387_s12 + $0xea8] sm:$0xff] }
 0x2da   : > { %4152 = vmatmul.mubr.bf16.vlgmr.msra.gmra.mrb[4].mxu0 %v7673_v18  ;;  %4324 = vmatmul.mubr.bf16.vlgmr.msra.gmra.mrb[4].mxu1 %v7673_v18 }
 0x2db   : > { %4163 = vmatpush1.bf16.msra.mxu0 %v1893_v12  ;;  %4335 = vmatpush1.bf16.msra.mxu1 %v1895_v13 }
 0x2dc   : > { %4164 = vmatprep.subr.bf16.mxu0 %v1910_v14  ;;  %4336 = vmatprep.subr.bf16.mxu1 %v1912_v15  ;;  %v2006_v14 = vunpack.c.h.s8.bf16 %v8726_v50  ;;  %v2008_v15 = vunpack.c.h.s8.bf16 %v1048_v53 }
 0x2dd   : > { %4194 = vmatprep.mubr.bf16.mxu0 %v7674_v25  ;;  %4366 = vmatprep.mubr.bf16.mxu1 %v7674_v25 }
 0x2df   : > { %4165 = vmatpush1.bf16.msra.mxu0 %v1909_v19  ;;  %4337 = vmatpush1.bf16.msra.mxu1 %v1911_v20 }
 0x2e0   : > { %4166 = vmatprep.subr.bf16.mxu0 %v1926_v21  ;;  %4338 = vmatprep.subr.bf16.mxu1 %v1928_v22  ;;  %v1062_v22 = vld [vmem:[%s8387_s12 + $0xe28] sm:$0xff] }
 0x2e3   : > { %4167 = vmatpush1.bf16.msra.mxu0 %v1925_v27  ;;  %4339 = vmatpush1.bf16.msra.mxu1 %v1927_v28 }
 0x2e4   : > { %4168 = vmatprep.subr.bf16.mxu0 %v1942_v29  ;;  %4340 = vmatprep.subr.bf16.mxu1 %v1944_v30  ;;  %v2005_v30 = vunpack.c.h.s8.bf16 %v8734_v58  ;;  %v2040_v58 = vunpack.c.h.s8.bf16 %v1064_v23 }
 0x2e7   : > { %4169 = vmatpush1.bf16.msra.mxu0 %v1941_v34  ;;  %4341 = vmatpush1.bf16.msra.mxu1 %v1943_v35  ;;  %v2022_v35 = vunpack.c.l.s8.bf16 %v1062_v22 }
 0x2e8   : > { %4170 = vmatprep.subr.bf16.mxu0 %v1958_v36  ;;  %4342 = vmatprep.subr.bf16.mxu1 %v1960_v37  ;;  %v2024_v36 = vunpack.c.l.s8.bf16 %v1064_v23 }
 0x2eb   : > { %4171 = vmatpush1.bf16.msra.mxu0 %v1957_v42  ;;  %4343 = vmatpush1.bf16.msra.mxu1 %v1959_v43  ;;  %v1061_v43 = vld [vmem:[%s8387_s12 + $0xe20] sm:$0xff] }
 0x2ec   : > { %4172 = vmatprep.subr.bf16.mxu0 %v1974_v47  ;;  %4344 = vmatprep.subr.bf16.mxu1 %v1976_v48 }
 0x2ed   : > { %v3852_v63 = vpop.f32.mrb[0].mxu0  ;;  %v4024_v0 = vpop.f32.mrb[0].mxu1 }
 0x2ee   : > { %v5149_v4 = vmul.f32 %v5072_v51, %v3852_v63  ;;  %v5151_v5 = vmul.f32 %v5080_v52, %v4024_v0  ;;  %v3854_v6 = vpop.f32.mrb[1].mxu0  ;;  %v4026_v7 = vpop.f32.mrb[1].mxu1  ;;  %v2054_v63 = vunpack.c.l.s8.bf16 %v1078_v59 }
 0x2ef   : > { %v5150_v10 = vmul.f32 %v5076_v54, %v3854_v6  ;;  %v5152_v11 = vmul.f32 %v5084_v55, %v4026_v7  ;;  %v3856_v12 = vpop.f32.mrb[2].mxu0  ;;  %v4028_v13 = vpop.f32.mrb[2].mxu1  ;;  %4173 = vmatpush1.bf16.msra.mxu0 %v1973_v56  ;;  %4345 = vmatpush1.bf16.msra.mxu1 %v1975_v57  ;;  %v2023_v56 = vunpack.c.l.s8.bf16 %v1063_v44  ;;  %v2038_v57 = vunpack.c.h.s8.bf16 %v1062_v22  ;;  %v1094_v7 = vld [vmem:[%s8387_s12 + $0xf28] sm:$0xff] }
 0x2f0   : > { %v5265_v16 = vadd.f32 %v5188_v60, %v5149_v4  ;;  %v5267_v17 = vadd.f32 %v5196_v61, %v5151_v5  ;;  %v5165_v18 = vmul.f32 %v5072_v51, %v3856_v12  ;;  %v5167_v19 = vmul.f32 %v5080_v52, %v4028_v13  ;;  %v3858_v20 = vpop.f32.mrb[3].mxu0  ;;  %v4030_v21 = vpop.f32.mrb[3].mxu1  ;;  %4174 = vmatprep.subr.bf16.mxu0 %v1990_v62  ;;  %v1093_v13 = vld [vmem:[%s8387_s12 + $0xf20] sm:$0xff] }
 0x2f1   : > { %v5266_v24 = vadd.f32 %v5192_v1, %v5150_v10  ;;  %v5268_v25 = vadd.f32 %v5200_v2, %v5152_v11  ;;  %v5166_v26 = vmul.f32 %v5076_v54, %v3858_v20  ;;  %v5168_v27 = vmul.f32 %v5084_v55, %v4030_v21  ;;  %4346 = vmatprep.subr.bf16.mxu1 %v1992_v3  ;;  %v1112_v20 = vld [vmem:[%s8387_s12 + $0xfb8] sm:$0xff] }
 0x2f2   : > { %v5281_v28 = vadd.f32 %v5188_v60, %v5165_v18  ;;  %v5283_v29 = vadd.f32 %v5196_v61, %v5167_v19  ;;  %v5297_v37 = vmax.f32 %v5265_v16, 0.0  ;;  %v5299_v38 = vmax.f32 %v5267_v17, 0.0  ;;  %v1080_v60 = vld [vmem:[%s8387_s12 + $0xeb8] sm:$0xff]  ;;  %v1110_v19 = vld [vmem:[%s8387_s12 + $0xfa8] sm:$0xff] }
 0x2f3   : > { %v5282_v32 = vadd.f32 %v5192_v1, %v5166_v26  ;;  %v5284_v34 = vadd.f32 %v5200_v2, %v5168_v27  ;;  %4175 = vmatpush1.bf16.msra.mxu0 %v1989_v8  ;;  %4347 = vmatpush1.bf16.msra.mxu1 %v1991_v9  ;;  %v5298_v47 = vmax.f32 %v5266_v24, 0.0  ;;  %v5300_v48 = vmax.f32 %v5268_v25, 0.0  ;;  %v1077_v1 = vld [vmem:[%s8387_s12 + $0xea0] sm:$0xff]  ;;  %v1079_v2 = vld [vmem:[%s8387_s12 + $0xeb0] sm:$0xff]  ;;  %v1096_v8 = vld [vmem:[%s8387_s12 + $0xf38] sm:$0xff] }
 0x2f4   : > { %v5313_v39 = vmax.f32 %v5281_v28, 0.0  ;;  %v5315_v42 = vmax.f32 %v5283_v29, 0.0  ;;  %4176 = vmatprep.subr.bf16.mxu0 %v2006_v14  ;;  %4348 = vmatprep.subr.bf16.mxu1 %v2008_v15  ;;  %v2021_v55 = vunpack.c.l.s8.bf16 %v1061_v43  ;;  %v2037_v61 = vunpack.c.h.s8.bf16 %v1061_v43  ;;  %v1095_v14 = vld [vmem:[%s8387_s12 + $0xf30] sm:$0xff]  ;;  %v1109_v25 = vld [vmem:[%s8387_s12 + $0xfa0] sm:$0xff] }
 0x2f5   : > { %v5314_v49 = vmax.f32 %v5282_v32, 0.0  ;;  %v5316_v50 = vmax.f32 %v5284_v34, 0.0  ;;  %v2039_v62 = vunpack.c.h.s8.bf16 %v1063_v44  ;;  %v2056_v0 = vunpack.c.l.s8.bf16 %v1080_v60  ;;  %v1111_v26 = vld [vmem:[%s8387_s12 + $0xfb0] sm:$0xff]  ;;  %v620_v32 = vld [vmem:[%s8387_s12 + $0x58] sm:$0xff] }
 0x2f6   : > { %v8753_v51 = vpack.c.bf16 %v5313_v39, %v5297_v37  ;;  %v8755_v52 = vpack.c.bf16 %v5315_v42, %v5299_v38  ;;  %v2053_v3 = vunpack.c.l.s8.bf16 %v1077_v1  ;;  %v2055_v4 = vunpack.c.l.s8.bf16 %v1079_v2  ;;  %v617_v38 = vld [vmem:[%s8387_s12 + $0x40] sm:$0xff]  ;;  %v619_v39 = vld [vmem:[%s8387_s12 + $0x50] sm:$0xff] }
 0x2f7   : > { %v8757_v53 = vpack.c.bf16 %v5314_v49, %v5298_v47  ;;  %v8759_v54 = vpack.c.bf16 %v5316_v50, %v5300_v48  ;;  %4177 = vmatpush1.bf16.msra.mxu0 %v2005_v30  ;;  %4349 = vmatpush1.bf16.msra.mxu1 %v2007_v31  ;;  %v2070_v5 = vunpack.c.h.s8.bf16 %v1078_v59  ;;  %v2072_v6 = vunpack.c.h.s8.bf16 %v1080_v60  ;;  %v618_v31 = vld [vmem:[%s8387_s12 + $0x48] sm:$0xff]  ;;  %v636_v49 = vld [vmem:[%s8387_s12 + $0xd8] sm:$0xff]  ;;  %v7675_v50 = vld [vmem:[#allocation2 + $0x30] sm:$0xff] }
 0x2f8   : > { %4178 = vmatprep.subr.bf16.mxu0 %v2022_v35  ;;  %4350 = vmatprep.subr.bf16.mxu1 %v2024_v36  ;;  %v2069_v9 = vunpack.c.h.s8.bf16 %v1077_v1  ;;  %v2071_v10 = vunpack.c.h.s8.bf16 %v1079_v2  ;;  %v2086_v11 = vunpack.c.l.s8.bf16 %v1094_v7  ;;  %v2088_v12 = vunpack.c.l.s8.bf16 %v1096_v8  ;;  %v634_v48 = vld [vmem:[%s8387_s12 + $0xc8] sm:$0xff]  ;;  %v633_v59 = vld [vmem:[%s8387_s12 + $0xc0] sm:$0xff]  ;;  %v635_v60 = vld [vmem:[%s8387_s12 + $0xd0] sm:$0xff] }
 0x2f9   : > { %v2085_v15 = vunpack.c.l.s8.bf16 %v1093_v13  ;;  %v2087_v16 = vunpack.c.l.s8.bf16 %v1095_v14  ;;  %v2102_v17 = vunpack.c.h.s8.bf16 %v1094_v7  ;;  %v2104_v18 = vunpack.c.h.s8.bf16 %v1096_v8  ;;  %v650_v2 = vld [vmem:[%s8387_s12 + $0x148] sm:$0xff]  ;;  %v649_v8 = vld [vmem:[%s8387_s12 + $0x140] sm:$0xff] }
 0x2fa   : > { %v2101_v21 = vunpack.c.h.s8.bf16 %v1093_v13  ;;  %v2103_v22 = vunpack.c.h.s8.bf16 %v1095_v14  ;;  %v2118_v23 = vunpack.c.l.s8.bf16 %v1110_v19  ;;  %v2120_v24 = vunpack.c.l.s8.bf16 %v1112_v20  ;;  %v666_v14 = vld [vmem:[%s8387_s12 + $0x1c8] sm:$0xff] }
 0x2fb   : > { %4179 = vmatpush1.bf16.msra.mxu0 %v2021_v55  ;;  %4351 = vmatpush1.bf16.msra.mxu1 %v2023_v56  ;;  %v2117_v27 = vunpack.c.l.s8.bf16 %v1109_v25  ;;  %v2119_v28 = vunpack.c.l.s8.bf16 %v1111_v26  ;;  %v2134_v29 = vunpack.c.h.s8.bf16 %v1110_v19  ;;  %v2136_v30 = vunpack.c.h.s8.bf16 %v1112_v20  ;;  %v665_v20 = vld [vmem:[%s8387_s12 + $0x1c0] sm:$0xff] }
 0x2fc   : > { %4180 = vmatprep.subr.bf16.mxu0 %v2038_v57  ;;  %4352 = vmatprep.subr.bf16.mxu1 %v2040_v58  ;;  %v2133_v34 = vunpack.c.h.s8.bf16 %v1109_v25  ;;  %v2135_v35 = vunpack.c.h.s8.bf16 %v1111_v26  ;;  %v1130_v36 = vunpack.c.l.s8.bf16 %v618_v31  ;;  %v1132_v37 = vunpack.c.l.s8.bf16 %v620_v32  ;;  %v682_v26 = vld [vmem:[%s8387_s12 + $0x248] sm:$0xff] }
 0x2fd   : > { %v1129_v42 = vunpack.c.l.s8.bf16 %v617_v38  ;;  %v1131_v43 = vunpack.c.l.s8.bf16 %v619_v39  ;;  %v1146_v44 = vunpack.c.h.s8.bf16 %v618_v31  ;;  %v1148_v47 = vunpack.c.h.s8.bf16 %v620_v32  ;;  %v681_v32 = vld [vmem:[%s8387_s12 + $0x240] sm:$0xff] }
 0x2fe   : > { %v1145_v55 = vunpack.c.h.s8.bf16 %v617_v38  ;;  %v1147_v56 = vunpack.c.h.s8.bf16 %v619_v39  ;;  %v1162_v57 = vunpack.c.l.s8.bf16 %v634_v48  ;;  %v1164_v58 = vunpack.c.l.s8.bf16 %v636_v49  ;;  %v698_v39 = vld [vmem:[%s8387_s12 + $0x2c8] sm:$0xff] }
 0x2ff   : > { %4181 = vmatpush1.bf16.msra.mxu0 %v2037_v61  ;;  %4353 = vmatpush1.bf16.msra.mxu1 %v2039_v62  ;;  %v7676_v61 = vld [vmem:[#allocation2 + $0x8] sm:$0xff]  ;;  %v1161_v62 = vunpack.c.l.s8.bf16 %v633_v59  ;;  %v1180_v1 = vunpack.c.h.s8.bf16 %v636_v49  ;;  %v697_v49 = vld [vmem:[%s8387_s12 + $0x2c0] sm:$0xff] }
 0x300   : > { %4182 = vmatprep.subr.bf16.mxu0 %v2054_v63  ;;  %4354 = vmatprep.subr.bf16.mxu1 %v2056_v0  ;;  %v1163_v63 = vunpack.c.l.s8.bf16 %v635_v60  ;;  %v1178_v0 = vunpack.c.h.s8.bf16 %v634_v48 }
 0x303   : > { %4183 = vmatpush1.bf16.msra.mxu0 %v2053_v3  ;;  %4355 = vmatpush1.bf16.msra.mxu1 %v2055_v4  ;;  %v652_v3 = vld [vmem:[%s8387_s12 + $0x158] sm:$0xff]  ;;  %v1177_v4 = vunpack.c.h.s8.bf16 %v633_v59  ;;  %v714_v59 = vld [vmem:[%s8387_s12 + $0x348] sm:$0xff] }
 0x304   : > { %4184 = vmatprep.subr.bf16.mxu0 %v2070_v5  ;;  %4356 = vmatprep.subr.bf16.mxu1 %v2072_v6  ;;  %v1179_v5 = vunpack.c.h.s8.bf16 %v635_v60  ;;  %v1194_v6 = vunpack.c.l.s8.bf16 %v650_v2  ;;  %v1196_v7 = vunpack.c.l.s8.bf16 %v652_v3  ;;  %v1212_v13 = vunpack.c.h.s8.bf16 %v652_v3  ;;  %v716_v60 = vld [vmem:[%s8387_s12 + $0x358] sm:$0xff] }
 0x307   : > { %4185 = vmatpush1.bf16.msra.mxu0 %v2069_v9  ;;  %4357 = vmatpush1.bf16.msra.mxu1 %v2071_v10  ;;  %v651_v9 = vld [vmem:[%s8387_s12 + $0x150] sm:$0xff]  ;;  %v1193_v10 = vunpack.c.l.s8.bf16 %v649_v8 }
 0x308   : > { %4186 = vmatprep.subr.bf16.mxu0 %v2086_v11  ;;  %4358 = vmatprep.subr.bf16.mxu1 %v2088_v12  ;;  %v1195_v11 = vunpack.c.l.s8.bf16 %v651_v9  ;;  %v1210_v12 = vunpack.c.h.s8.bf16 %v650_v2  ;;  %v715_v2 = vld [vmem:[%s8387_s12 + $0x350] sm:$0xff] }
 0x30b   : > { %4187 = vmatpush1.bf16.msra.mxu0 %v2085_v15  ;;  %4359 = vmatpush1.bf16.msra.mxu1 %v2087_v16  ;;  %v668_v15 = vld [vmem:[%s8387_s12 + $0x1d8] sm:$0xff]  ;;  %v1209_v16 = vunpack.c.h.s8.bf16 %v649_v8 }
 0x30c   : > { %4188 = vmatprep.subr.bf16.mxu0 %v2102_v17  ;;  %4360 = vmatprep.subr.bf16.mxu1 %v2104_v18  ;;  %v1211_v17 = vunpack.c.h.s8.bf16 %v651_v9  ;;  %v1226_v18 = vunpack.c.l.s8.bf16 %v666_v14  ;;  %v1228_v19 = vunpack.c.l.s8.bf16 %v668_v15  ;;  %v1244_v25 = vunpack.c.h.s8.bf16 %v668_v15  ;;  %v732_v8 = vld [vmem:[%s8387_s12 + $0x3d8] sm:$0xff] }
 0x30f   : > { %4189 = vmatpush1.bf16.msra.mxu0 %v2101_v21  ;;  %4361 = vmatpush1.bf16.msra.mxu1 %v2103_v22  ;;  %v667_v21 = vld [vmem:[%s8387_s12 + $0x1d0] sm:$0xff]  ;;  %v1225_v22 = vunpack.c.l.s8.bf16 %v665_v20 }
 0x310   : > { %4190 = vmatprep.subr.bf16.mxu0 %v2118_v23  ;;  %4362 = vmatprep.subr.bf16.mxu1 %v2120_v24  ;;  %v1227_v23 = vunpack.c.l.s8.bf16 %v667_v21  ;;  %v1242_v24 = vunpack.c.h.s8.bf16 %v666_v14  ;;  %v731_v14 = vld [vmem:[%s8387_s12 + $0x3d0] sm:$0xff] }
 0x313   : > { %4191 = vmatpush1.bf16.msra.mxu0 %v2117_v27  ;;  %4363 = vmatpush1.bf16.msra.mxu1 %v2119_v28  ;;  %v684_v27 = vld [vmem:[%s8387_s12 + $0x258] sm:$0xff]  ;;  %v1241_v28 = vunpack.c.h.s8.bf16 %v665_v20 }
 0x314   : > { %4192 = vmatprep.subr.bf16.mxu0 %v2134_v29  ;;  %4364 = vmatprep.subr.bf16.mxu1 %v2136_v30  ;;  %v1243_v29 = vunpack.c.h.s8.bf16 %v667_v21  ;;  %v1258_v30 = vunpack.c.l.s8.bf16 %v682_v26  ;;  %v1260_v31 = vunpack.c.l.s8.bf16 %v684_v27  ;;  %v1276_v38 = vunpack.c.h.s8.bf16 %v684_v27  ;;  %v748_v20 = vld [vmem:[%s8387_s12 + $0x458] sm:$0xff] }
 0x317   : > { %4193 = vmatpush1.bf16.msra.mxu0 %v2133_v34  ;;  %4365 = vmatpush1.bf16.msra.mxu1 %v2135_v35  ;;  %v683_v34 = vld [vmem:[%s8387_s12 + $0x250] sm:$0xff]  ;;  %v1257_v35 = vunpack.c.l.s8.bf16 %v681_v32 }
 0x318   : > { %4377 = vmatprep.subr.bf16.mxu0 %v1130_v36  ;;  %4549 = vmatprep.subr.bf16.mxu1 %v1132_v37  ;;  %v1259_v36 = vunpack.c.l.s8.bf16 %v683_v34  ;;  %v1274_v37 = vunpack.c.h.s8.bf16 %v682_v26  ;;  %v747_v26 = vld [vmem:[%s8387_s12 + $0x450] sm:$0xff] }
 0x31a   : > { %4195 = vmatmul.mubr.bf16.vlgmr.msra.gmra.mrb[4].mxu0 %v7675_v50  ;;  %4367 = vmatmul.mubr.bf16.vlgmr.msra.gmra.mrb[4].mxu1 %v7675_v50  ;;  %v699_v50 = vld [vmem:[%s8387_s12 + $0x2d0] sm:$0xff] }
 0x31b   : > { %4378 = vmatpush1.bf16.msra.mxu0 %v1129_v42  ;;  %4550 = vmatpush1.bf16.msra.mxu1 %v1131_v43  ;;  %v700_v42 = vld [vmem:[%s8387_s12 + $0x2d8] sm:$0xff]  ;;  %v1273_v43 = vunpack.c.h.s8.bf16 %v681_v32 }
 0x31c   : > { %4379 = vmatprep.subr.bf16.mxu0 %v1146_v44  ;;  %4551 = vmatprep.subr.bf16.mxu1 %v1148_v47  ;;  %v1275_v44 = vunpack.c.h.s8.bf16 %v683_v34  ;;  %v1290_v47 = vunpack.c.l.s8.bf16 %v698_v39  ;;  %v1292_v48 = vunpack.c.l.s8.bf16 %v700_v42  ;;  %v764_v32 = vld [vmem:[%s8387_s12 + $0x4d8] sm:$0xff]  ;;  %v7677_v34 = vld [vmem:[#allocation2] sm:$0xff] }
 0x31d   : > { %4409 = vmatprep.mubr.bf16.mxu0 %v7676_v61  ;;  %4581 = vmatprep.mubr.bf16.mxu1 %v7676_v61  ;;  %v1305_v61 = vunpack.c.h.s8.bf16 %v697_v49 }
 0x31f   : > { %4380 = vmatpush1.bf16.msra.mxu0 %v1145_v55  ;;  %4552 = vmatpush1.bf16.msra.mxu1 %v1147_v56  ;;  %v1289_v55 = vunpack.c.l.s8.bf16 %v697_v49  ;;  %v1291_v56 = vunpack.c.l.s8.bf16 %v699_v50  ;;  %v1436_v49 = vunpack.c.h.s8.bf16 %v764_v32 }
 0x320   : > { %4381 = vmatprep.subr.bf16.mxu0 %v1162_v57  ;;  %4553 = vmatprep.subr.bf16.mxu1 %v1164_v58  ;;  %v1306_v57 = vunpack.c.h.s8.bf16 %v698_v39  ;;  %v1308_v58 = vunpack.c.h.s8.bf16 %v700_v42  ;;  %v761_v39 = vld [vmem:[%s8387_s12 + $0x4c0] sm:$0xff]  ;;  %v763_v42 = vld [vmem:[%s8387_s12 + $0x4d0] sm:$0xff] }
 0x323   : > { %4382 = vmatpush1.bf16.msra.mxu0 %v1161_v62  ;;  %4554 = vmatpush1.bf16.msra.mxu1 %v1163_v63  ;;  %v1307_v62 = vunpack.c.h.s8.bf16 %v699_v50  ;;  %v1322_v63 = vunpack.c.l.s8.bf16 %v714_v59  ;;  %v778_v50 = vld [vmem:[%s8387_s12 + $0x548] sm:$0xff] }
 0x324   : > { %4383 = vmatprep.subr.bf16.mxu0 %v1178_v0  ;;  %4555 = vmatprep.subr.bf16.mxu1 %v1180_v1  ;;  %v1324_v0 = vunpack.c.l.s8.bf16 %v716_v60  ;;  %v713_v1 = vld [vmem:[%s8387_s12 + $0x340] sm:$0xff] }
 0x325   : > { %v1321_v3 = vunpack.c.l.s8.bf16 %v713_v1  ;;  %v1337_v9 = vunpack.c.h.s8.bf16 %v713_v1 }
 0x327   : > { %4384 = vmatpush1.bf16.msra.mxu0 %v1177_v4  ;;  %4556 = vmatpush1.bf16.msra.mxu1 %v1179_v5  ;;  %v1323_v4 = vunpack.c.l.s8.bf16 %v715_v2  ;;  %v1338_v5 = vunpack.c.h.s8.bf16 %v714_v59 }
 0x328   : > { %4385 = vmatprep.subr.bf16.mxu0 %v1194_v6  ;;  %4557 = vmatprep.subr.bf16.mxu1 %v1196_v7  ;;  %v1340_v6 = vunpack.c.h.s8.bf16 %v716_v60  ;;  %v730_v7 = vld [vmem:[%s8387_s12 + $0x3c8] sm:$0xff]  ;;  %v777_v60 = vld [vmem:[%s8387_s12 + $0x540] sm:$0xff] }
 0x32b   : > { %4386 = vmatpush1.bf16.msra.mxu0 %v1193_v10  ;;  %4558 = vmatpush1.bf16.msra.mxu1 %v1195_v11  ;;  %v1339_v10 = vunpack.c.h.s8.bf16 %v715_v2  ;;  %v1354_v11 = vunpack.c.l.s8.bf16 %v730_v7  ;;  %v794_v2 = vld [vmem:[%s8387_s12 + $0x5c8] sm:$0xff] }
 0x32c   : > { %4387 = vmatprep.subr.bf16.mxu0 %v1210_v12  ;;  %4559 = vmatprep.subr.bf16.mxu1 %v1212_v13  ;;  %v1356_v12 = vunpack.c.l.s8.bf16 %v732_v8  ;;  %v729_v13 = vld [vmem:[%s8387_s12 + $0x3c0] sm:$0xff] }
 0x32d   : > { %v1353_v15 = vunpack.c.l.s8.bf16 %v729_v13  ;;  %v1369_v21 = vunpack.c.h.s8.bf16 %v729_v13 }
 0x32f   : > { %4388 = vmatpush1.bf16.msra.mxu0 %v1209_v16  ;;  %4560 = vmatpush1.bf16.msra.mxu1 %v1211_v17  ;;  %v1355_v16 = vunpack.c.l.s8.bf16 %v731_v14  ;;  %v1370_v17 = vunpack.c.h.s8.bf16 %v730_v7 }
 0x330   : > { %4389 = vmatprep.subr.bf16.mxu0 %v1226_v18  ;;  %4561 = vmatprep.subr.bf16.mxu1 %v1228_v19  ;;  %v1372_v18 = vunpack.c.h.s8.bf16 %v732_v8  ;;  %v746_v19 = vld [vmem:[%s8387_s12 + $0x448] sm:$0xff]  ;;  %v793_v8 = vld [vmem:[%s8387_s12 + $0x5c0] sm:$0xff] }
 0x333   : > { %4390 = vmatpush1.bf16.msra.mxu0 %v1225_v22  ;;  %4562 = vmatpush1.bf16.msra.mxu1 %v1227_v23  ;;  %v1371_v22 = vunpack.c.h.s8.bf16 %v731_v14  ;;  %v1386_v23 = vunpack.c.l.s8.bf16 %v746_v19  ;;  %v810_v14 = vld [vmem:[%s8387_s12 + $0x648] sm:$0xff] }
 0x334   : > { %4391 = vmatprep.subr.bf16.mxu0 %v1242_v24  ;;  %4563 = vmatprep.subr.bf16.mxu1 %v1244_v25  ;;  %v1388_v24 = vunpack.c.l.s8.bf16 %v748_v20  ;;  %v745_v25 = vld [vmem:[%s8387_s12 + $0x440] sm:$0xff] }
 0x335   : > { %v1385_v27 = vunpack.c.l.s8.bf16 %v745_v25 }
 0x337   : > { %4392 = vmatpush1.bf16.msra.mxu0 %v1241_v28  ;;  %4564 = vmatpush1.bf16.msra.mxu1 %v1243_v29  ;;  %v1387_v28 = vunpack.c.l.s8.bf16 %v747_v26  ;;  %v1402_v29 = vunpack.c.h.s8.bf16 %v746_v19 }
 0x338   : > { %4393 = vmatprep.subr.bf16.mxu0 %v1258_v30  ;;  %4565 = vmatprep.subr.bf16.mxu1 %v1260_v31  ;;  %v1404_v30 = vunpack.c.h.s8.bf16 %v748_v20  ;;  %v762_v31 = vld [vmem:[%s8387_s12 + $0x4c8] sm:$0xff]  ;;  %v809_v20 = vld [vmem:[%s8387_s12 + $0x640] sm:$0xff] }
 0x33b   : > { %4394 = vmatpush1.bf16.msra.mxu0 %v1257_v35  ;;  %4566 = vmatpush1.bf16.msra.mxu1 %v1259_v36  ;;  %v1401_v35 = vunpack.c.h.s8.bf16 %v745_v25  ;;  %v1403_v36 = vunpack.c.h.s8.bf16 %v747_v26  ;;  %v826_v26 = vld [vmem:[%s8387_s12 + $0x6c8] sm:$0xff] }
 0x33c   : > { %4395 = vmatprep.subr.bf16.mxu0 %v1274_v37  ;;  %4567 = vmatprep.subr.bf16.mxu1 %v1276_v38  ;;  %v1418_v37 = vunpack.c.l.s8.bf16 %v762_v31  ;;  %v1420_v38 = vunpack.c.l.s8.bf16 %v764_v32  ;;  %v825_v32 = vld [vmem:[%s8387_s12 + $0x6c0] sm:$0xff] }
 0x33f   : > { %4396 = vmatpush1.bf16.msra.mxu0 %v1273_v43  ;;  %4568 = vmatpush1.bf16.msra.mxu1 %v1275_v44  ;;  %v7678_v43 = vld [vmem:[#allocation2 + $0x18] sm:$0xff]  ;;  %v1417_v44 = vunpack.c.l.s8.bf16 %v761_v39 }
 0x340   : > { %4397 = vmatprep.subr.bf16.mxu0 %v1290_v47  ;;  %4569 = vmatprep.subr.bf16.mxu1 %v1292_v48  ;;  %v1419_v47 = vunpack.c.l.s8.bf16 %v763_v42  ;;  %v1434_v48 = vunpack.c.h.s8.bf16 %v762_v31 }
 0x343   : > { %4398 = vmatpush1.bf16.msra.mxu0 %v1289_v55  ;;  %4570 = vmatpush1.bf16.msra.mxu1 %v1291_v56  ;;  %v780_v55 = vld [vmem:[%s8387_s12 + $0x558] sm:$0xff]  ;;  %v1433_v56 = vunpack.c.h.s8.bf16 %v761_v39  ;;  %v842_v39 = vld [vmem:[%s8387_s12 + $0x748] sm:$0xff] }
 0x344   : > { %4399 = vmatprep.subr.bf16.mxu0 %v1306_v57  ;;  %4571 = vmatprep.subr.bf16.mxu1 %v1308_v58  ;;  %v1435_v57 = vunpack.c.h.s8.bf16 %v763_v42  ;;  %v1450_v58 = vunpack.c.l.s8.bf16 %v778_v50  ;;  %v1452_v59 = vunpack.c.l.s8.bf16 %v780_v55  ;;  %v1468_v1 = vunpack.c.h.s8.bf16 %v780_v55  ;;  %v844_v42 = vld [vmem:[%s8387_s12 + $0x758] sm:$0xff] }
 0x347   : > { %4400 = vmatpush1.bf16.msra.mxu0 %v1305_v61  ;;  %4572 = vmatpush1.bf16.msra.mxu1 %v1307_v62  ;;  %v779_v61 = vld [vmem:[%s8387_s12 + $0x550] sm:$0xff]  ;;  %v1449_v62 = vunpack.c.l.s8.bf16 %v777_v60 }
 0x348   : > { %4401 = vmatprep.subr.bf16.mxu0 %v1322_v63  ;;  %4573 = vmatprep.subr.bf16.mxu1 %v1324_v0  ;;  %v1451_v63 = vunpack.c.l.s8.bf16 %v779_v61  ;;  %v1466_v0 = vunpack.c.h.s8.bf16 %v778_v50  ;;  %v843_v50 = vld [vmem:[%s8387_s12 + $0x750] sm:$0xff] }
 0x34b   : > { %4402 = vmatpush1.bf16.msra.mxu0 %v1321_v3  ;;  %4574 = vmatpush1.bf16.msra.mxu1 %v1323_v4  ;;  %v796_v3 = vld [vmem:[%s8387_s12 + $0x5d8] sm:$0xff]  ;;  %v1465_v4 = vunpack.c.h.s8.bf16 %v777_v60 }
 0x34c   : > { %4403 = vmatprep.subr.bf16.mxu0 %v1338_v5  ;;  %4575 = vmatprep.subr.bf16.mxu1 %v1340_v6  ;;  %v1467_v5 = vunpack.c.h.s8.bf16 %v779_v61  ;;  %v1482_v6 = vunpack.c.l.s8.bf16 %v794_v2  ;;  %v1484_v7 = vunpack.c.l.s8.bf16 %v796_v3  ;;  %v1500_v13 = vunpack.c.h.s8.bf16 %v796_v3  ;;  %v860_v60 = vld [vmem:[%s8387_s12 + $0x7d8] sm:$0xff] }
 0x34f   : > { %4404 = vmatpush1.bf16.msra.mxu0 %v1337_v9  ;;  %4576 = vmatpush1.bf16.msra.mxu1 %v1339_v10  ;;  %v795_v9 = vld [vmem:[%s8387_s12 + $0x5d0] sm:$0xff]  ;;  %v1481_v10 = vunpack.c.l.s8.bf16 %v793_v8 }
 0x350   : > { %4405 = vmatprep.subr.bf16.mxu0 %v1354_v11  ;;  %4577 = vmatprep.subr.bf16.mxu1 %v1356_v12  ;;  %v1483_v11 = vunpack.c.l.s8.bf16 %v795_v9  ;;  %v1498_v12 = vunpack.c.h.s8.bf16 %v794_v2  ;;  %v859_v2 = vld [vmem:[%s8387_s12 + $0x7d0] sm:$0xff] }
 0x353   : > { %4406 = vmatpush1.bf16.msra.mxu0 %v1353_v15  ;;  %4578 = vmatpush1.bf16.msra.mxu1 %v1355_v16  ;;  %v812_v15 = vld [vmem:[%s8387_s12 + $0x658] sm:$0xff]  ;;  %v1497_v16 = vunpack.c.h.s8.bf16 %v793_v8 }
 0x354   : > { %4407 = vmatprep.subr.bf16.mxu0 %v1370_v17  ;;  %4579 = vmatprep.subr.bf16.mxu1 %v1372_v18  ;;  %v1499_v17 = vunpack.c.h.s8.bf16 %v795_v9  ;;  %v1514_v18 = vunpack.c.l.s8.bf16 %v810_v14  ;;  %v1516_v19 = vunpack.c.l.s8.bf16 %v812_v15  ;;  %v1532_v25 = vunpack.c.h.s8.bf16 %v812_v15  ;;  %v876_v8 = vld [vmem:[%s8387_s12 + $0x858] sm:$0xff] }
 0x357   : > { %4408 = vmatpush1.bf16.msra.mxu0 %v1369_v21  ;;  %4580 = vmatpush1.bf16.msra.mxu1 %v1371_v22  ;;  %v811_v21 = vld [vmem:[%s8387_s12 + $0x650] sm:$0xff]  ;;  %v1513_v22 = vunpack.c.l.s8.bf16 %v809_v20 }
 0x358   : > { %4420 = vmatprep.subr.bf16.mxu0 %v1386_v23  ;;  %4592 = vmatprep.subr.bf16.mxu1 %v1388_v24  ;;  %v1515_v23 = vunpack.c.l.s8.bf16 %v811_v21  ;;  %v1530_v24 = vunpack.c.h.s8.bf16 %v810_v14  ;;  %v875_v14 = vld [vmem:[%s8387_s12 + $0x850] sm:$0xff] }
 0x35a   : > { %4410 = vmatmul.mubr.bf16.vlgmr.msra.gmra.mrb[8].mxu0 %v7677_v34  ;;  %4582 = vmatmul.mubr.bf16.vlgmr.msra.gmra.mrb[8].mxu1 %v7677_v34  ;;  %v827_v34 = vld [vmem:[%s8387_s12 + $0x6d0] sm:$0xff] }
 0x35b   : > { %4421 = vmatpush1.bf16.msra.mxu0 %v1385_v27  ;;  %4593 = vmatpush1.bf16.msra.mxu1 %v1387_v28  ;;  %v828_v27 = vld [vmem:[%s8387_s12 + $0x6d8] sm:$0xff]  ;;  %v1529_v28 = vunpack.c.h.s8.bf16 %v809_v20 }
 0x35c   : > { %4422 = vmatprep.subr.bf16.mxu0 %v1402_v29  ;;  %4594 = vmatprep.subr.bf16.mxu1 %v1404_v30  ;;  %v1531_v29 = vunpack.c.h.s8.bf16 %v811_v21  ;;  %v1546_v30 = vunpack.c.l.s8.bf16 %v826_v26  ;;  %v1548_v31 = vunpack.c.l.s8.bf16 %v828_v27  ;;  %v892_v20 = vld [vmem:[%s8387_s12 + $0x8d8] sm:$0xff]  ;;  %v7679_v21 = vld [vmem:[#allocation2 + $0x10] sm:$0xff] }
 0x35d   : > { %4452 = vmatprep.mubr.bf16.mxu0 %v7678_v43  ;;  %4624 = vmatprep.mubr.bf16.mxu1 %v7678_v43  ;;  %v1561_v43 = vunpack.c.h.s8.bf16 %v825_v32 }
 0x35f   : > { %4423 = vmatpush1.bf16.msra.mxu0 %v1401_v35  ;;  %4595 = vmatpush1.bf16.msra.mxu1 %v1403_v36  ;;  %v1545_v35 = vunpack.c.l.s8.bf16 %v825_v32  ;;  %v1547_v36 = vunpack.c.l.s8.bf16 %v827_v34  ;;  %v1692_v32 = vunpack.c.h.s8.bf16 %v892_v20 }
 0x360   : > { %4424 = vmatprep.subr.bf16.mxu0 %v1418_v37  ;;  %4596 = vmatprep.subr.bf16.mxu1 %v1420_v38  ;;  %v1562_v37 = vunpack.c.h.s8.bf16 %v826_v26  ;;  %v1564_v38 = vunpack.c.h.s8.bf16 %v828_v27  ;;  %v889_v26 = vld [vmem:[%s8387_s12 + $0x8c0] sm:$0xff]  ;;  %v891_v27 = vld [vmem:[%s8387_s12 + $0x8d0] sm:$0xff] }
 0x363   : > { %4425 = vmatpush1.bf16.msra.mxu0 %v1417_v44  ;;  %4597 = vmatpush1.bf16.msra.mxu1 %v1419_v47  ;;  %v1563_v44 = vunpack.c.h.s8.bf16 %v827_v34  ;;  %v1578_v47 = vunpack.c.l.s8.bf16 %v842_v39  ;;  %v906_v34 = vld [vmem:[%s8387_s12 + $0x948] sm:$0xff] }
 0x364   : > { %4426 = vmatprep.subr.bf16.mxu0 %v1434_v48  ;;  %4598 = vmatprep.subr.bf16.mxu1 %v1436_v49  ;;  %v1580_v48 = vunpack.c.l.s8.bf16 %v844_v42  ;;  %v841_v49 = vld [vmem:[%s8387_s12 + $0x740] sm:$0xff] }
 0x365   : > { %v1577_v55 = vunpack.c.l.s8.bf16 %v841_v49  ;;  %v1593_v61 = vunpack.c.h.s8.bf16 %v841_v49 }
 0x367   : > { %4427 = vmatpush1.bf16.msra.mxu0 %v1433_v56  ;;  %4599 = vmatpush1.bf16.msra.mxu1 %v1435_v57  ;;  %v1579_v56 = vunpack.c.l.s8.bf16 %v843_v50  ;;  %v1594_v57 = vunpack.c.h.s8.bf16 %v842_v39 }
 0x368   : > { %4428 = vmatprep.subr.bf16.mxu0 %v1450_v58  ;;  %4600 = vmatprep.subr.bf16.mxu1 %v1452_v59  ;;  %v1596_v58 = vunpack.c.h.s8.bf16 %v844_v42  ;;  %v858_v59 = vld [vmem:[%s8387_s12 + $0x7c8] sm:$0xff]  ;;  %v905_v42 = vld [vmem:[%s8387_s12 + $0x940] sm:$0xff] }
 0x36b   : > { %4429 = vmatpush1.bf16.msra.mxu0 %v1449_v62  ;;  %4601 = vmatpush1.bf16.msra.mxu1 %v1451_v63  ;;  %v1595_v62 = vunpack.c.h.s8.bf16 %v843_v50  ;;  %v1610_v63 = vunpack.c.l.s8.bf16 %v858_v59  ;;  %v922_v50 = vld [vmem:[%s8387_s12 + $0x9c8] sm:$0xff] }
 0x36c   : > { %4430 = vmatprep.subr.bf16.mxu0 %v1466_v0  ;;  %4602 = vmatprep.subr.bf16.mxu1 %v1468_v1  ;;  %v1612_v0 = vunpack.c.l.s8.bf16 %v860_v60  ;;  %v857_v1 = vld [vmem:[%s8387_s12 + $0x7c0] sm:$0xff] }
 0x36d   : > { %v1609_v3 = vunpack.c.l.s8.bf16 %v857_v1  ;;  %v1625_v9 = vunpack.c.h.s8.bf16 %v857_v1 }
 0x36f   : > { %4431 = vmatpush1.bf16.msra.mxu0 %v1465_v4  ;;  %4603 = vmatpush1.bf16.msra.mxu1 %v1467_v5  ;;  %v1611_v4 = vunpack.c.l.s8.bf16 %v859_v2  ;;  %v1626_v5 = vunpack.c.h.s8.bf16 %v858_v59 }
 0x370   : > { %4432 = vmatprep.subr.bf16.mxu0 %v1482_v6  ;;  %4604 = vmatprep.subr.bf16.mxu1 %v1484_v7  ;;  %v1628_v6 = vunpack.c.h.s8.bf16 %v860_v60  ;;  %v874_v7 = vld [vmem:[%s8387_s12 + $0x848] sm:$0xff]  ;;  %v921_v60 = vld [vmem:[%s8387_s12 + $0x9c0] sm:$0xff] }
 0x373   : > { %4433 = vmatpush1.bf16.msra.mxu0 %v1481_v10  ;;  %4605 = vmatpush1.bf16.msra.mxu1 %v1483_v11  ;;  %v1627_v10 = vunpack.c.h.s8.bf16 %v859_v2  ;;  %v1642_v11 = vunpack.c.l.s8.bf16 %v874_v7  ;;  %v938_v2 = vld [vmem:[%s8387_s12 + $0xa48] sm:$0xff] }
 0x374   : > { %4434 = vmatprep.subr.bf16.mxu0 %v1498_v12  ;;  %4606 = vmatprep.subr.bf16.mxu1 %v1500_v13  ;;  %v1644_v12 = vunpack.c.l.s8.bf16 %v876_v8  ;;  %v873_v13 = vld [vmem:[%s8387_s12 + $0x840] sm:$0xff] }
 0x375   : > { %v1641_v15 = vunpack.c.l.s8.bf16 %v873_v13 }
 0x377   : > { %4435 = vmatpush1.bf16.msra.mxu0 %v1497_v16  ;;  %4607 = vmatpush1.bf16.msra.mxu1 %v1499_v17  ;;  %v1643_v16 = vunpack.c.l.s8.bf16 %v875_v14  ;;  %v1658_v17 = vunpack.c.h.s8.bf16 %v874_v7 }
 0x378   : > { %4436 = vmatprep.subr.bf16.mxu0 %v1514_v18  ;;  %4608 = vmatprep.subr.bf16.mxu1 %v1516_v19  ;;  %v1660_v18 = vunpack.c.h.s8.bf16 %v876_v8  ;;  %v890_v19 = vld [vmem:[%s8387_s12 + $0x8c8] sm:$0xff]  ;;  %v937_v8 = vld [vmem:[%s8387_s12 + $0xa40] sm:$0xff] }
 0x37b   : > { %4437 = vmatpush1.bf16.msra.mxu0 %v1513_v22  ;;  %4609 = vmatpush1.bf16.msra.mxu1 %v1515_v23  ;;  %v1657_v22 = vunpack.c.h.s8.bf16 %v873_v13  ;;  %v1659_v23 = vunpack.c.h.s8.bf16 %v875_v14  ;;  %v954_v14 = vld [vmem:[%s8387_s12 + $0xac8] sm:$0xff] }
 0x37c   : > { %4438 = vmatprep.subr.bf16.mxu0 %v1530_v24  ;;  %4610 = vmatprep.subr.bf16.mxu1 %v1532_v25  ;;  %v1674_v24 = vunpack.c.l.s8.bf16 %v890_v19  ;;  %v1676_v25 = vunpack.c.l.s8.bf16 %v892_v20  ;;  %v953_v20 = vld [vmem:[%s8387_s12 + $0xac0] sm:$0xff] }
 0x37f   : > { %4439 = vmatpush1.bf16.msra.mxu0 %v1529_v28  ;;  %4611 = vmatpush1.bf16.msra.mxu1 %v1531_v29  ;;  %v7680_v28 = vld [vmem:[#allocation2 + $0x28] sm:$0xff]  ;;  %v1673_v29 = vunpack.c.l.s8.bf16 %v889_v26 }
 0x380   : > { %4440 = vmatprep.subr.bf16.mxu0 %v1546_v30  ;;  %4612 = vmatprep.subr.bf16.mxu1 %v1548_v31  ;;  %v1675_v30 = vunpack.c.l.s8.bf16 %v891_v27  ;;  %v1690_v31 = vunpack.c.h.s8.bf16 %v890_v19 }
 0x383   : > { %4441 = vmatpush1.bf16.msra.mxu0 %v1545_v35  ;;  %4613 = vmatpush1.bf16.msra.mxu1 %v1547_v36  ;;  %v908_v35 = vld [vmem:[%s8387_s12 + $0x958] sm:$0xff]  ;;  %v1689_v36 = vunpack.c.h.s8.bf16 %v889_v26  ;;  %v970_v26 = vld [vmem:[%s8387_s12 + $0xb48] sm:$0xff] }
 0x384   : > { %4442 = vmatprep.subr.bf16.mxu0 %v1562_v37  ;;  %4614 = vmatprep.subr.bf16.mxu1 %v1564_v38  ;;  %v1691_v37 = vunpack.c.h.s8.bf16 %v891_v27  ;;  %v1706_v38 = vunpack.c.l.s8.bf16 %v906_v34  ;;  %v1708_v39 = vunpack.c.l.s8.bf16 %v908_v35  ;;  %v1724_v49 = vunpack.c.h.s8.bf16 %v908_v35  ;;  %v972_v27 = vld [vmem:[%s8387_s12 + $0xb58] sm:$0xff] }
 0x387   : > { %4443 = vmatpush1.bf16.msra.mxu0 %v1561_v43  ;;  %4615 = vmatpush1.bf16.msra.mxu1 %v1563_v44  ;;  %v907_v43 = vld [vmem:[%s8387_s12 + $0x950] sm:$0xff]  ;;  %v1705_v44 = vunpack.c.l.s8.bf16 %v905_v42 }
 0x388   : > { %4444 = vmatprep.subr.bf16.mxu0 %v1578_v47  ;;  %4616 = vmatprep.subr.bf16.mxu1 %v1580_v48  ;;  %v1707_v47 = vunpack.c.l.s8.bf16 %v907_v43  ;;  %v1722_v48 = vunpack.c.h.s8.bf16 %v906_v34  ;;  %v971_v34 = vld [vmem:[%s8387_s12 + $0xb50] sm:$0xff] }
 0x38b   : > { %4445 = vmatpush1.bf16.msra.mxu0 %v1577_v55  ;;  %4617 = vmatpush1.bf16.msra.mxu1 %v1579_v56  ;;  %v924_v55 = vld [vmem:[%s8387_s12 + $0x9d8] sm:$0xff]  ;;  %v1721_v56 = vunpack.c.h.s8.bf16 %v905_v42 }
 0x38c   : > { %4446 = vmatprep.subr.bf16.mxu0 %v1594_v57  ;;  %4618 = vmatprep.subr.bf16.mxu1 %v1596_v58  ;;  %v1723_v57 = vunpack.c.h.s8.bf16 %v907_v43  ;;  %v1738_v58 = vunpack.c.l.s8.bf16 %v922_v50  ;;  %v1740_v59 = vunpack.c.l.s8.bf16 %v924_v55  ;;  %v1756_v1 = vunpack.c.h.s8.bf16 %v924_v55  ;;  %v988_v42 = vld [vmem:[%s8387_s12 + $0xbd8] sm:$0xff] }
 0x38f   : > { %4447 = vmatpush1.bf16.msra.mxu0 %v1593_v61  ;;  %4619 = vmatpush1.bf16.msra.mxu1 %v1595_v62  ;;  %v923_v61 = vld [vmem:[%s8387_s12 + $0x9d0] sm:$0xff]  ;;  %v1737_v62 = vunpack.c.l.s8.bf16 %v921_v60 }
 0x390   : > { %4448 = vmatprep.subr.bf16.mxu0 %v1610_v63  ;;  %4620 = vmatprep.subr.bf16.mxu1 %v1612_v0  ;;  %v1739_v63 = vunpack.c.l.s8.bf16 %v923_v61  ;;  %v1754_v0 = vunpack.c.h.s8.bf16 %v922_v50  ;;  %v987_v50 = vld [vmem:[%s8387_s12 + $0xbd0] sm:$0xff] }
 0x393   : > { %4449 = vmatpush1.bf16.msra.mxu0 %v1609_v3  ;;  %4621 = vmatpush1.bf16.msra.mxu1 %v1611_v4  ;;  %v940_v3 = vld [vmem:[%s8387_s12 + $0xa58] sm:$0xff]  ;;  %v1753_v4 = vunpack.c.h.s8.bf16 %v921_v60 }
 0x394   : > { %4450 = vmatprep.subr.bf16.mxu0 %v1626_v5  ;;  %4622 = vmatprep.subr.bf16.mxu1 %v1628_v6  ;;  %v1755_v5 = vunpack.c.h.s8.bf16 %v923_v61  ;;  %v1770_v6 = vunpack.c.l.s8.bf16 %v938_v2  ;;  %v1772_v7 = vunpack.c.l.s8.bf16 %v940_v3  ;;  %v1788_v13 = vunpack.c.h.s8.bf16 %v940_v3  ;;  %v1004_v60 = vld [vmem:[%s8387_s12 + $0xc58] sm:$0xff] }
 0x397   : > { %4451 = vmatpush1.bf16.msra.mxu0 %v1625_v9  ;;  %4623 = vmatpush1.bf16.msra.mxu1 %v1627_v10  ;;  %v939_v9 = vld [vmem:[%s8387_s12 + $0xa50] sm:$0xff]  ;;  %v1769_v10 = vunpack.c.l.s8.bf16 %v937_v8 }
 0x398   : > { %4463 = vmatprep.subr.bf16.mxu0 %v1642_v11  ;;  %4635 = vmatprep.subr.bf16.mxu1 %v1644_v12  ;;  %v1771_v11 = vunpack.c.l.s8.bf16 %v939_v9  ;;  %v1786_v12 = vunpack.c.h.s8.bf16 %v938_v2  ;;  %v1003_v2 = vld [vmem:[%s8387_s12 + $0xc50] sm:$0xff] }
 0x39a   : > { %4453 = vmatmul.mubr.bf16.vlgmr.msra.gmra.mrb[8].mxu0 %v7679_v21  ;;  %4625 = vmatmul.mubr.bf16.vlgmr.msra.gmra.mrb[8].mxu1 %v7679_v21  ;;  %v955_v21 = vld [vmem:[%s8387_s12 + $0xad0] sm:$0xff] }
 0x39b   : > { %4464 = vmatpush1.bf16.msra.mxu0 %v1641_v15  ;;  %4636 = vmatpush1.bf16.msra.mxu1 %v1643_v16  ;;  %v956_v15 = vld [vmem:[%s8387_s12 + $0xad8] sm:$0xff]  ;;  %v1785_v16 = vunpack.c.h.s8.bf16 %v937_v8 }
 0x39c   : > { %4465 = vmatprep.subr.bf16.mxu0 %v1658_v17  ;;  %4637 = vmatprep.subr.bf16.mxu1 %v1660_v18  ;;  %v1787_v17 = vunpack.c.h.s8.bf16 %v939_v9  ;;  %v1802_v18 = vunpack.c.l.s8.bf16 %v954_v14  ;;  %v1804_v19 = vunpack.c.l.s8.bf16 %v956_v15  ;;  %v1020_v8 = vld [vmem:[%s8387_s12 + $0xcd8] sm:$0xff]  ;;  %v7681_v9 = vld [vmem:[#allocation2 + $0x20] sm:$0xff] }
 0x39d   : > { %4495 = vmatprep.mubr.bf16.mxu0 %v7680_v28  ;;  %4667 = vmatprep.mubr.bf16.mxu1 %v7680_v28  ;;  %v1817_v28 = vunpack.c.h.s8.bf16 %v953_v20 }
 0x39f   : > { %4466 = vmatpush1.bf16.msra.mxu0 %v1657_v22  ;;  %4638 = vmatpush1.bf16.msra.mxu1 %v1659_v23  ;;  %v1801_v22 = vunpack.c.l.s8.bf16 %v953_v20  ;;  %v1803_v23 = vunpack.c.l.s8.bf16 %v955_v21  ;;  %v1948_v20 = vunpack.c.h.s8.bf16 %v1020_v8 }
 0x3a0   : > { %4467 = vmatprep.subr.bf16.mxu0 %v1674_v24  ;;  %4639 = vmatprep.subr.bf16.mxu1 %v1676_v25  ;;  %v1818_v24 = vunpack.c.h.s8.bf16 %v954_v14  ;;  %v1820_v25 = vunpack.c.h.s8.bf16 %v956_v15  ;;  %v1017_v14 = vld [vmem:[%s8387_s12 + $0xcc0] sm:$0xff]  ;;  %v1019_v15 = vld [vmem:[%s8387_s12 + $0xcd0] sm:$0xff] }
 0x3a3   : > { %4468 = vmatpush1.bf16.msra.mxu0 %v1673_v29  ;;  %4640 = vmatpush1.bf16.msra.mxu1 %v1675_v30  ;;  %v1819_v29 = vunpack.c.h.s8.bf16 %v955_v21  ;;  %v1834_v30 = vunpack.c.l.s8.bf16 %v970_v26  ;;  %v1034_v21 = vld [vmem:[%s8387_s12 + $0xd48] sm:$0xff] }
 0x3a4   : > { %4469 = vmatprep.subr.bf16.mxu0 %v1690_v31  ;;  %4641 = vmatprep.subr.bf16.mxu1 %v1692_v32  ;;  %v1836_v31 = vunpack.c.l.s8.bf16 %v972_v27  ;;  %v969_v32 = vld [vmem:[%s8387_s12 + $0xb40] sm:$0xff] }
 0x3a5   : > { %v1833_v35 = vunpack.c.l.s8.bf16 %v969_v32  ;;  %v1849_v43 = vunpack.c.h.s8.bf16 %v969_v32 }
 0x3a7   : > { %4470 = vmatpush1.bf16.msra.mxu0 %v1689_v36  ;;  %4642 = vmatpush1.bf16.msra.mxu1 %v1691_v37  ;;  %v1835_v36 = vunpack.c.l.s8.bf16 %v971_v34  ;;  %v1850_v37 = vunpack.c.h.s8.bf16 %v970_v26 }
 0x3a8   : > { %4471 = vmatprep.subr.bf16.mxu0 %v1706_v38  ;;  %4643 = vmatprep.subr.bf16.mxu1 %v1708_v39  ;;  %v1852_v38 = vunpack.c.h.s8.bf16 %v972_v27  ;;  %v986_v39 = vld [vmem:[%s8387_s12 + $0xbc8] sm:$0xff]  ;;  %v1033_v27 = vld [vmem:[%s8387_s12 + $0xd40] sm:$0xff] }
 0x3ab   : > { %4472 = vmatpush1.bf16.msra.mxu0 %v1705_v44  ;;  %4644 = vmatpush1.bf16.msra.mxu1 %v1707_v47  ;;  %v1851_v44 = vunpack.c.h.s8.bf16 %v971_v34  ;;  %v1866_v47 = vunpack.c.l.s8.bf16 %v986_v39  ;;  %v8888_v34 = vsub.s32 5, %v8707_v33 }
 0x3ac   : > { %4473 = vmatprep.subr.bf16.mxu0 %v1722_v48  ;;  %4645 = vmatprep.subr.bf16.mxu1 %v1724_v49  ;;  %v1868_v48 = vunpack.c.l.s8.bf16 %v988_v42  ;;  %v985_v49 = vld [vmem:[%s8387_s12 + $0xbc0] sm:$0xff] }
 0x3ad   : > { %v1865_v55 = vunpack.c.l.s8.bf16 %v985_v49  ;;  %v1881_v61 = vunpack.c.h.s8.bf16 %v985_v49 }
 0x3af   : > { %4474 = vmatpush1.bf16.msra.mxu0 %v1721_v56  ;;  %4646 = vmatpush1.bf16.msra.mxu1 %v1723_v57  ;;  %v1867_v56 = vunpack.c.l.s8.bf16 %v987_v50  ;;  %v1882_v57 = vunpack.c.h.s8.bf16 %v986_v39  ;;  %v7683_v39 = vld [vmem:[%s8395_s22] sm:$0xff] }
 0x3b0   : > { %4475 = vmatprep.subr.bf16.mxu0 %v1738_v58  ;;  %4647 = vmatprep.subr.bf16.mxu1 %v1740_v59  ;;  %v1884_v58 = vunpack.c.h.s8.bf16 %v988_v42  ;;  %v1002_v59 = vld [vmem:[%s8387_s12 + $0xc48] sm:$0xff] }
 0x3b3   : > { %4476 = vmatpush1.bf16.msra.mxu0 %v1737_v62  ;;  %4648 = vmatpush1.bf16.msra.mxu1 %v1739_v63  ;;  %v1883_v62 = vunpack.c.h.s8.bf16 %v987_v50  ;;  %v1898_v63 = vunpack.c.l.s8.bf16 %v1002_v59  ;;  %v8905_v50 = vld [vmem:[%s8387_s12 + $0xdc0] sm:$0xff] }
 0x3b4   : > { %4477 = vmatprep.subr.bf16.mxu0 %v1754_v0  ;;  %4649 = vmatprep.subr.bf16.mxu1 %v1756_v1  ;;  %v1900_v0 = vunpack.c.l.s8.bf16 %v1004_v60  ;;  %v1001_v1 = vld [vmem:[%s8387_s12 + $0xc40] sm:$0xff] }
 0x3b5   : > { %v1897_v3 = vunpack.c.l.s8.bf16 %v1001_v1 }
 0x3b7   : > { %4478 = vmatpush1.bf16.msra.mxu0 %v1753_v4  ;;  %4650 = vmatpush1.bf16.msra.mxu1 %v1755_v5  ;;  %v1899_v4 = vunpack.c.l.s8.bf16 %v1003_v2  ;;  %v1914_v5 = vunpack.c.h.s8.bf16 %v1002_v59 }
 0x3b8   : > { %4479 = vmatprep.subr.bf16.mxu0 %v1770_v6  ;;  %4651 = vmatprep.subr.bf16.mxu1 %v1772_v7  ;;  %v1916_v6 = vunpack.c.h.s8.bf16 %v1004_v60  ;;  %v1018_v7 = vld [vmem:[%s8387_s12 + $0xcc8] sm:$0xff] }
 0x3bb   : > { %4480 = vmatpush1.bf16.msra.mxu0 %v1769_v10  ;;  %4652 = vmatpush1.bf16.msra.mxu1 %v1771_v11  ;;  %v1913_v10 = vunpack.c.h.s8.bf16 %v1001_v1  ;;  %v1915_v11 = vunpack.c.h.s8.bf16 %v1003_v2 }
 0x3bc   : > { %4481 = vmatprep.subr.bf16.mxu0 %v1786_v12  ;;  %4653 = vmatprep.subr.bf16.mxu1 %v1788_v13  ;;  %v1930_v12 = vunpack.c.l.s8.bf16 %v1018_v7  ;;  %v1932_v13 = vunpack.c.l.s8.bf16 %v1020_v8 }
 0x3bf   : > { %4482 = vmatpush1.bf16.msra.mxu0 %v1785_v16  ;;  %4654 = vmatpush1.bf16.msra.mxu1 %v1787_v17  ;;  %v7682_v16 = vld [vmem:[#allocation2 + $0x38] sm:$0xff]  ;;  %v1929_v17 = vunpack.c.l.s8.bf16 %v1017_v14 }
 0x3c0   : > { %4483 = vmatprep.subr.bf16.mxu0 %v1802_v18  ;;  %4655 = vmatprep.subr.bf16.mxu1 %v1804_v19  ;;  %v1931_v18 = vunpack.c.l.s8.bf16 %v1019_v15  ;;  %v1946_v19 = vunpack.c.h.s8.bf16 %v1018_v7 }
 0x3c3   : > { %4484 = vmatpush1.bf16.msra.mxu0 %v1801_v22  ;;  %4656 = vmatpush1.bf16.msra.mxu1 %v1803_v23  ;;  %v1036_v22 = vld [vmem:[%s8387_s12 + $0xd58] sm:$0xff]  ;;  %v1945_v23 = vunpack.c.h.s8.bf16 %v1017_v14 }
 0x3c4   : > { %4485 = vmatprep.subr.bf16.mxu0 %v1818_v24  ;;  %4657 = vmatprep.subr.bf16.mxu1 %v1820_v25  ;;  %v1947_v24 = vunpack.c.h.s8.bf16 %v1019_v15  ;;  %v1962_v25 = vunpack.c.l.s8.bf16 %v1034_v21  ;;  %v1964_v26 = vunpack.c.l.s8.bf16 %v1036_v22 }
 0x3c7   : > { %4486 = vmatpush1.bf16.msra.mxu0 %v1817_v28  ;;  %4658 = vmatpush1.bf16.msra.mxu1 %v1819_v29  ;;  %v1035_v28 = vld [vmem:[%s8387_s12 + $0xd50] sm:$0xff]  ;;  %v8882_v29 = vsub.s32 4, %v8707_v33 }
 0x3c8   : > { %4487 = vmatprep.subr.bf16.mxu0 %v1834_v30  ;;  %4659 = vmatprep.subr.bf16.mxu1 %v1836_v31  ;;  %v8885_v30 = vsub.s32 6, %v8707_v33  ;;  %v1961_v31 = vunpack.c.l.s8.bf16 %v1033_v27  ;;  %v1963_v32 = vunpack.c.l.s8.bf16 %v1035_v28  ;;  %v1979_v49 = vunpack.c.h.s8.bf16 %v1035_v28 }
 0x3c9   : > { %v5088_v42 = vrot.slane %v7683_v39, %v8882_v29 }
 0x3cb   : > { %4488 = vmatpush1.bf16.msra.mxu0 %v1833_v35  ;;  %4660 = vmatpush1.bf16.msra.mxu1 %v1835_v36  ;;  %v8891_v35 = vsub.s32 7, %v8707_v33  ;;  %v1978_v36 = vunpack.c.h.s8.bf16 %v1034_v21  ;;  %v5092_v33 = vrot.slane %v7683_v39, %v8888_v34 }
 0x3cc   : > { %4489 = vmatprep.subr.bf16.mxu0 %v1850_v37  ;;  %4661 = vmatprep.subr.bf16.mxu1 %v1852_v38  ;;  %v1980_v37 = vunpack.c.h.s8.bf16 %v1036_v22  ;;  %v8894_v38 = vld [vmem:[%s8387_s12 + $0xdc8] sm:$0xff] }
 0x3cd   : > { %v1994_v59 = vunpack.c.l.s8.bf16 %v8894_v38 }
 0x3cf   : > { %4490 = vmatpush1.bf16.msra.mxu0 %v1849_v43  ;;  %4662 = vmatpush1.bf16.msra.mxu1 %v1851_v44  ;;  %v5096_v43 = vrot.slane %v7683_v39, %v8885_v30  ;;  %v8900_v44 = vld [vmem:[%s8387_s12 + $0xdd8] sm:$0xff] }
 0x3d0   : > { %4491 = vmatprep.subr.bf16.mxu0 %v1866_v47  ;;  %4663 = vmatprep.subr.bf16.mxu1 %v1868_v48  ;;  %v5100_v47 = vrot.slane %v7683_v39, %v8891_v35  ;;  %v1977_v48 = vunpack.c.h.s8.bf16 %v1033_v27  ;;  %v2009_v27 = vunpack.c.h.s8.bf16 %v8905_v50 }
 0x3d3   : > { %4492 = vmatpush1.bf16.msra.mxu0 %v1865_v55  ;;  %4664 = vmatpush1.bf16.msra.mxu1 %v1867_v56  ;;  %v8908_v55 = vld [vmem:[%s8387_s12 + $0xdd0] sm:$0xff] }
 0x3d4   : > { %4493 = vmatprep.subr.bf16.mxu0 %v1882_v57  ;;  %4665 = vmatprep.subr.bf16.mxu1 %v1884_v58  ;;  %v7684_v56 = vld [vmem:[%s8401_s30] sm:$0xff]  ;;  %v2011_v28 = vunpack.c.h.s8.bf16 %v8908_v55 }
 0x3d5   : > { %v5204_v57 = vrot.slane %v7684_v56, %v8882_v29  ;;  %v5212_v58 = vrot.slane %v7684_v56, %v8885_v30 }
 0x3d7   : > { %4494 = vmatpush1.bf16.msra.mxu0 %v1881_v61  ;;  %4666 = vmatpush1.bf16.msra.mxu1 %v1883_v62  ;;  %v5208_v62 = vrot.slane %v7684_v56, %v8888_v34 }
 0x3d8   : > { %4506 = vmatprep.subr.bf16.mxu0 %v1898_v63  ;;  %4678 = vmatprep.subr.bf16.mxu1 %v1900_v0  ;;  %v5216_v63 = vrot.slane %v7684_v56, %v8891_v35  ;;  %v1996_v0 = vunpack.c.l.s8.bf16 %v8900_v44 }
 0x3da   : > { %4496 = vmatmul.mubr.bf16.vlgmr.msra.gmra.mrb[8].mxu0 %v7681_v9  ;;  %4668 = vmatmul.mubr.bf16.vlgmr.msra.gmra.mrb[8].mxu1 %v7681_v9 }
 0x3db   : > { %4507 = vmatpush1.bf16.msra.mxu0 %v1897_v3  ;;  %4679 = vmatpush1.bf16.msra.mxu1 %v1899_v4 }
 0x3dc   : > { %4508 = vmatprep.subr.bf16.mxu0 %v1914_v5  ;;  %4680 = vmatprep.subr.bf16.mxu1 %v1916_v6  ;;  %v1993_v5 = vunpack.c.l.s8.bf16 %v8905_v50  ;;  %v1995_v6 = vunpack.c.l.s8.bf16 %v8908_v55 }
 0x3dd   : > { %4538 = vmatprep.mubr.bf16.mxu0 %v7682_v16  ;;  %4710 = vmatprep.mubr.bf16.mxu1 %v7682_v16 }
 0x3df   : > { %4509 = vmatpush1.bf16.msra.mxu0 %v1913_v10  ;;  %4681 = vmatpush1.bf16.msra.mxu1 %v1915_v11  ;;  %v2010_v11 = vunpack.c.h.s8.bf16 %v8894_v38 }
 0x3e0   : > { %4510 = vmatprep.subr.bf16.mxu0 %v1930_v12  ;;  %4682 = vmatprep.subr.bf16.mxu1 %v1932_v13  ;;  %v2012_v12 = vunpack.c.h.s8.bf16 %v8900_v44  ;;  %v1065_v44 = vld [vmem:[%s8387_s12 + $0xe40] sm:$0xff] }
 0x3e3   : > { %4511 = vmatpush1.bf16.msra.mxu0 %v1929_v17  ;;  %4683 = vmatpush1.bf16.msra.mxu1 %v1931_v18 }
 0x3e4   : > { %4512 = vmatprep.subr.bf16.mxu0 %v1946_v19  ;;  %4684 = vmatprep.subr.bf16.mxu1 %v1948_v20  ;;  %v1066_v19 = vld [vmem:[%s8387_s12 + $0xe48] sm:$0xff]  ;;  %v1068_v20 = vld [vmem:[%s8387_s12 + $0xe58] sm:$0xff] }
 0x3e7   : > { %4513 = vmatpush1.bf16.msra.mxu0 %v1945_v23  ;;  %4685 = vmatpush1.bf16.msra.mxu1 %v1947_v24 }
 0x3e8   : > { %4514 = vmatprep.subr.bf16.mxu0 %v1962_v25  ;;  %4686 = vmatprep.subr.bf16.mxu1 %v1964_v26 }
 0x3eb   : > { %4515 = vmatpush1.bf16.msra.mxu0 %v1961_v31  ;;  %4687 = vmatpush1.bf16.msra.mxu1 %v1963_v32 }
 0x3ec   : > { %4516 = vmatprep.subr.bf16.mxu0 %v1978_v36  ;;  %4688 = vmatprep.subr.bf16.mxu1 %v1980_v37  ;;  %v2026_v36 = vunpack.c.l.s8.bf16 %v1066_v19  ;;  %v2028_v37 = vunpack.c.l.s8.bf16 %v1068_v20 }
 0x3ed   : > { %v4196_v60 = vpop.f32.mrb[4].mxu0  ;;  %v4368_v61 = vpop.f32.mrb[4].mxu1 }
 0x3ee   : > { %v5153_v1 = vmul.f32 %v5088_v42, %v4196_v60  ;;  %v5155_v2 = vmul.f32 %v5096_v43, %v4368_v61  ;;  %v4198_v3 = vpop.f32.mrb[5].mxu0  ;;  %v4370_v4 = vpop.f32.mrb[5].mxu1  ;;  %v2042_v61 = vunpack.c.h.s8.bf16 %v1066_v19 }
 0x3ef   : > { %v5154_v7 = vmul.f32 %v5092_v33, %v4198_v3  ;;  %v5156_v8 = vmul.f32 %v5100_v47, %v4370_v4  ;;  %v4200_v9 = vpop.f32.mrb[6].mxu0  ;;  %v4372_v10 = vpop.f32.mrb[6].mxu1  ;;  %4517 = vmatpush1.bf16.msra.mxu0 %v1977_v48  ;;  %4689 = vmatpush1.bf16.msra.mxu1 %v1979_v49 }
 0x3f0   : > { %v5269_v13 = vadd.f32 %v5204_v57, %v5153_v1  ;;  %v5271_v14 = vadd.f32 %v5212_v58, %v5155_v2  ;;  %v5169_v15 = vmul.f32 %v5088_v42, %v4200_v9  ;;  %v5171_v16 = vmul.f32 %v5096_v43, %v4372_v10  ;;  %v4202_v17 = vpop.f32.mrb[7].mxu0  ;;  %v4374_v18 = vpop.f32.mrb[7].mxu1  ;;  %4518 = vmatprep.subr.bf16.mxu0 %v1994_v59 }
 0x3f1   : > { %v5270_v21 = vadd.f32 %v5208_v62, %v5154_v7  ;;  %v5272_v22 = vadd.f32 %v5216_v63, %v5156_v8  ;;  %v5170_v23 = vmul.f32 %v5092_v33, %v4202_v17  ;;  %v5172_v24 = vmul.f32 %v5100_v47, %v4374_v18  ;;  %4690 = vmatprep.subr.bf16.mxu1 %v1996_v0  ;;  %v1067_v33 = vld [vmem:[%s8387_s12 + $0xe50] sm:$0xff]  ;;  %v1084_v0 = vld [vmem:[%s8387_s12 + $0xed8] sm:$0xff]  ;;  %v1097_v17 = vld [vmem:[%s8387_s12 + $0xf40] sm:$0xff] }
 0x3f2   : > { %v5285_v25 = vadd.f32 %v5204_v57, %v5169_v15  ;;  %v5287_v26 = vadd.f32 %v5212_v58, %v5171_v16  ;;  %v5301_v38 = vmax.f32 %v5269_v13, 0.0  ;;  %v5303_v39 = vmax.f32 %v5271_v14, 0.0  ;;  %v1099_v18 = vld [vmem:[%s8387_s12 + $0xf50] sm:$0xff] }
 0x3f3   : > { %v5286_v31 = vadd.f32 %v5208_v62, %v5170_v23  ;;  %v5288_v32 = vadd.f32 %v5216_v63, %v5172_v24  ;;  %4519 = vmatpush1.bf16.msra.mxu0 %v1993_v5  ;;  %4691 = vmatpush1.bf16.msra.mxu1 %v1995_v6  ;;  %v5302_v47 = vmax.f32 %v5270_v21, 0.0  ;;  %v5304_v48 = vmax.f32 %v5272_v22, 0.0  ;;  %v1082_v63 = vld [vmem:[%s8387_s12 + $0xec8] sm:$0xff]  ;;  %v1081_v5 = vld [vmem:[%s8387_s12 + $0xec0] sm:$0xff]  ;;  %v1083_v6 = vld [vmem:[%s8387_s12 + $0xed0] sm:$0xff] }
 0x3f4   : > { %v5317_v42 = vmax.f32 %v5285_v25, 0.0  ;;  %v5319_v43 = vmax.f32 %v5287_v26, 0.0  ;;  %4520 = vmatprep.subr.bf16.mxu0 %v2010_v11  ;;  %4692 = vmatprep.subr.bf16.mxu1 %v2012_v12  ;;  %v2025_v59 = vunpack.c.l.s8.bf16 %v1065_v44  ;;  %v2027_v60 = vunpack.c.l.s8.bf16 %v1067_v33  ;;  %v1098_v11 = vld [vmem:[%s8387_s12 + $0xf48] sm:$0xff]  ;;  %v1100_v12 = vld [vmem:[%s8387_s12 + $0xf58] sm:$0xff] }
 0x3f5   : > { %v5318_v49 = vmax.f32 %v5286_v31, 0.0  ;;  %v5320_v50 = vmax.f32 %v5288_v32, 0.0  ;;  %v2044_v62 = vunpack.c.h.s8.bf16 %v1068_v20  ;;  %v2041_v1 = vunpack.c.h.s8.bf16 %v1065_v44  ;;  %v1114_v23 = vld [vmem:[%s8387_s12 + $0xfc8] sm:$0xff]  ;;  %v1116_v24 = vld [vmem:[%s8387_s12 + $0xfd8] sm:$0xff]  ;;  %v1113_v31 = vld [vmem:[%s8387_s12 + $0xfc0] sm:$0xff] }
 0x3f6   : > { %v8927_v55 = vpack.c.bf16 %v5317_v42, %v5301_v38  ;;  %v8929_v56 = vpack.c.bf16 %v5319_v43, %v5303_v39  ;;  %v2043_v2 = vunpack.c.h.s8.bf16 %v1067_v33  ;;  %v2058_v3 = vunpack.c.l.s8.bf16 %v1082_v63  ;;  %v1115_v32 = vld [vmem:[%s8387_s12 + $0xfd0] sm:$0xff]  ;;  %v622_v42 = vld [vmem:[%s8387_s12 + $0x68] sm:$0xff]  ;;  %v624_v43 = vld [vmem:[%s8387_s12 + $0x78] sm:$0xff] }
 0x3f7   : > { %v8931_v57 = vpack.c.bf16 %v5318_v49, %v5302_v47  ;;  %v8933_v58 = vpack.c.bf16 %v5320_v50, %v5304_v48  ;;  %4521 = vmatpush1.bf16.msra.mxu0 %v2009_v27  ;;  %4693 = vmatpush1.bf16.msra.mxu1 %v2011_v28  ;;  %v2060_v4 = vunpack.c.l.s8.bf16 %v1084_v0  ;;  %v2057_v7 = vunpack.c.l.s8.bf16 %v1081_v5  ;;  %v621_v49 = vld [vmem:[%s8387_s12 + $0x60] sm:$0xff]  ;;  %v623_v50 = vld [vmem:[%s8387_s12 + $0x70] sm:$0xff] }
 0x3f8   : > { %4522 = vmatprep.subr.bf16.mxu0 %v2026_v36  ;;  %4694 = vmatprep.subr.bf16.mxu1 %v2028_v37  ;;  %v2059_v8 = vunpack.c.l.s8.bf16 %v1083_v6  ;;  %v2074_v9 = vunpack.c.h.s8.bf16 %v1082_v63  ;;  %v2076_v10 = vunpack.c.h.s8.bf16 %v1084_v0  ;;  %v2073_v13 = vunpack.c.h.s8.bf16 %v1081_v5  ;;  %v638_v63 = vld [vmem:[%s8387_s12 + $0xe8] sm:$0xff]  ;;  %v640_v0 = vld [vmem:[%s8387_s12 + $0xf8] sm:$0xff] }
 0x3f9   : > { %v2075_v14 = vunpack.c.h.s8.bf16 %v1083_v6  ;;  %v2090_v15 = vunpack.c.l.s8.bf16 %v1098_v11  ;;  %v2092_v16 = vunpack.c.l.s8.bf16 %v1100_v12  ;;  %v2089_v19 = vunpack.c.l.s8.bf16 %v1097_v17  ;;  %v637_v6 = vld [vmem:[%s8387_s12 + $0xe0] sm:$0xff] }
 0x3fa   : > { %v2091_v20 = vunpack.c.l.s8.bf16 %v1099_v18  ;;  %v2106_v21 = vunpack.c.h.s8.bf16 %v1098_v11  ;;  %v2108_v22 = vunpack.c.h.s8.bf16 %v1100_v12  ;;  %v2105_v25 = vunpack.c.h.s8.bf16 %v1097_v17 }
 0x3fb   : > { %4523 = vmatpush1.bf16.msra.mxu0 %v2025_v59  ;;  %4695 = vmatpush1.bf16.msra.mxu1 %v2027_v60  ;;  %v2107_v26 = vunpack.c.h.s8.bf16 %v1099_v18  ;;  %v2122_v27 = vunpack.c.l.s8.bf16 %v1114_v23  ;;  %v2124_v28 = vunpack.c.l.s8.bf16 %v1116_v24  ;;  %v2121_v36 = vunpack.c.l.s8.bf16 %v1113_v31 }
 0x3fc   : > { %4524 = vmatprep.subr.bf16.mxu0 %v2042_v61  ;;  %4696 = vmatprep.subr.bf16.mxu1 %v2044_v62  ;;  %v2123_v37 = vunpack.c.l.s8.bf16 %v1115_v32  ;;  %v2138_v38 = vunpack.c.h.s8.bf16 %v1114_v23  ;;  %v2140_v39 = vunpack.c.h.s8.bf16 %v1116_v24  ;;  %v2137_v44 = vunpack.c.h.s8.bf16 %v1113_v31 }
 0x3fd   : > { %v2139_v33 = vunpack.c.h.s8.bf16 %v1115_v32  ;;  %v1134_v47 = vunpack.c.l.s8.bf16 %v622_v42  ;;  %v1136_v48 = vunpack.c.l.s8.bf16 %v624_v43  ;;  %v1133_v59 = vunpack.c.l.s8.bf16 %v621_v49 }
 0x3fe   : > { %v1135_v60 = vunpack.c.l.s8.bf16 %v623_v50  ;;  %v1150_v61 = vunpack.c.h.s8.bf16 %v622_v42  ;;  %v1152_v62 = vunpack.c.h.s8.bf16 %v624_v43  ;;  %v1168_v5 = vunpack.c.l.s8.bf16 %v640_v0 }
 0x3ff   : > { %4525 = vmatpush1.bf16.msra.mxu0 %v2041_v1  ;;  %4697 = vmatpush1.bf16.msra.mxu1 %v2043_v2  ;;  %v7685_v1 = vld [vmem:[#allocation2 + $0x30] sm:$0xff]  ;;  %v1149_v2 = vunpack.c.h.s8.bf16 %v621_v49  ;;  %v1182_v11 = vunpack.c.h.s8.bf16 %v638_v63  ;;  %v1184_v12 = vunpack.c.h.s8.bf16 %v640_v0 }
 0x400   : > { %4526 = vmatprep.subr.bf16.mxu0 %v2058_v3  ;;  %4698 = vmatprep.subr.bf16.mxu1 %v2060_v4  ;;  %v1151_v3 = vunpack.c.h.s8.bf16 %v623_v50  ;;  %v1166_v4 = vunpack.c.l.s8.bf16 %v638_v63 }
 0x403   : > { %4527 = vmatpush1.bf16.msra.mxu0 %v2057_v7  ;;  %4699 = vmatpush1.bf16.msra.mxu1 %v2059_v8  ;;  %v639_v7 = vld [vmem:[%s8387_s12 + $0xf0] sm:$0xff]  ;;  %v7686_v8 = vld [vmem:[#allocation2 + $0x8] sm:$0xff] }
 0x404   : > { %4528 = vmatprep.subr.bf16.mxu0 %v2074_v9  ;;  %4700 = vmatprep.subr.bf16.mxu1 %v2076_v10  ;;  %v1165_v9 = vunpack.c.l.s8.bf16 %v637_v6  ;;  %v1167_v10 = vunpack.c.l.s8.bf16 %v639_v7 }
 0x407   : > { %4529 = vmatpush1.bf16.msra.mxu0 %v2073_v13  ;;  %4701 = vmatpush1.bf16.msra.mxu1 %v2075_v14  ;;  %v654_v13 = vld [vmem:[%s8387_s12 + $0x168] sm:$0xff]  ;;  %v656_v14 = vld [vmem:[%s8387_s12 + $0x178] sm:$0xff] }
 0x408   : > { %4530 = vmatprep.subr.bf16.mxu0 %v2090_v15  ;;  %4702 = vmatprep.subr.bf16.mxu1 %v2092_v16  ;;  %v1181_v15 = vunpack.c.h.s8.bf16 %v637_v6  ;;  %v1183_v16 = vunpack.c.h.s8.bf16 %v639_v7  ;;  %v1198_v17 = vunpack.c.l.s8.bf16 %v654_v13  ;;  %v1200_v18 = vunpack.c.l.s8.bf16 %v656_v14  ;;  %v701_v7 = vld [vmem:[%s8387_s12 + $0x2e0] sm:$0xff] }
 0x409   : > { %v1214_v23 = vunpack.c.h.s8.bf16 %v654_v13  ;;  %v1216_v24 = vunpack.c.h.s8.bf16 %v656_v14  ;;  %v718_v13 = vld [vmem:[%s8387_s12 + $0x368] sm:$0xff]  ;;  %v720_v14 = vld [vmem:[%s8387_s12 + $0x378] sm:$0xff] }
 0x40b   : > { %4531 = vmatpush1.bf16.msra.mxu0 %v2089_v19  ;;  %4703 = vmatpush1.bf16.msra.mxu1 %v2091_v20  ;;  %v653_v19 = vld [vmem:[%s8387_s12 + $0x160] sm:$0xff]  ;;  %v655_v20 = vld [vmem:[%s8387_s12 + $0x170] sm:$0xff] }
 0x40c   : > { %4532 = vmatprep.subr.bf16.mxu0 %v2106_v21  ;;  %4704 = vmatprep.subr.bf16.mxu1 %v2108_v22  ;;  %v1197_v21 = vunpack.c.l.s8.bf16 %v653_v19  ;;  %v1199_v22 = vunpack.c.l.s8.bf16 %v655_v20 }
 0x40f   : > { %4533 = vmatpush1.bf16.msra.mxu0 %v2105_v25  ;;  %4705 = vmatpush1.bf16.msra.mxu1 %v2107_v26  ;;  %v670_v25 = vld [vmem:[%s8387_s12 + $0x1e8] sm:$0xff]  ;;  %v672_v26 = vld [vmem:[%s8387_s12 + $0x1f8] sm:$0xff] }
 0x410   : > { %4534 = vmatprep.subr.bf16.mxu0 %v2122_v27  ;;  %4706 = vmatprep.subr.bf16.mxu1 %v2124_v28  ;;  %v1213_v27 = vunpack.c.h.s8.bf16 %v653_v19  ;;  %v1215_v28 = vunpack.c.h.s8.bf16 %v655_v20  ;;  %v1230_v31 = vunpack.c.l.s8.bf16 %v670_v25  ;;  %v1232_v32 = vunpack.c.l.s8.bf16 %v672_v26  ;;  %v717_v19 = vld [vmem:[%s8387_s12 + $0x360] sm:$0xff]  ;;  %v719_v20 = vld [vmem:[%s8387_s12 + $0x370] sm:$0xff] }
 0x411   : > { %v1246_v42 = vunpack.c.h.s8.bf16 %v670_v25  ;;  %v1248_v43 = vunpack.c.h.s8.bf16 %v672_v26  ;;  %v734_v25 = vld [vmem:[%s8387_s12 + $0x3e8] sm:$0xff]  ;;  %v736_v26 = vld [vmem:[%s8387_s12 + $0x3f8] sm:$0xff] }
 0x413   : > { %4535 = vmatpush1.bf16.msra.mxu0 %v2121_v36  ;;  %4707 = vmatpush1.bf16.msra.mxu1 %v2123_v37  ;;  %v669_v36 = vld [vmem:[%s8387_s12 + $0x1e0] sm:$0xff]  ;;  %v671_v37 = vld [vmem:[%s8387_s12 + $0x1f0] sm:$0xff] }
 0x414   : > { %4536 = vmatprep.subr.bf16.mxu0 %v2138_v38  ;;  %4708 = vmatprep.subr.bf16.mxu1 %v2140_v39  ;;  %v1229_v38 = vunpack.c.l.s8.bf16 %v669_v36  ;;  %v1231_v39 = vunpack.c.l.s8.bf16 %v671_v37 }
 0x417   : > { %4537 = vmatpush1.bf16.msra.mxu0 %v2137_v44  ;;  %4709 = vmatpush1.bf16.msra.mxu1 %v2139_v33  ;;  %v686_v44 = vld [vmem:[%s8387_s12 + $0x268] sm:$0xff]  ;;  %v688_v33 = vld [vmem:[%s8387_s12 + $0x278] sm:$0xff] }
 0x418   : > { %4721 = vmatprep.subr.bf16.mxu0 %v1134_v47  ;;  %4893 = vmatprep.subr.bf16.mxu1 %v1136_v48  ;;  %v1245_v47 = vunpack.c.h.s8.bf16 %v669_v36  ;;  %v1247_v48 = vunpack.c.h.s8.bf16 %v671_v37  ;;  %v1262_v49 = vunpack.c.l.s8.bf16 %v686_v44  ;;  %v1264_v50 = vunpack.c.l.s8.bf16 %v688_v33  ;;  %v733_v36 = vld [vmem:[%s8387_s12 + $0x3e0] sm:$0xff]  ;;  %v735_v37 = vld [vmem:[%s8387_s12 + $0x3f0] sm:$0xff] }
 0x419   : > { %v1278_v63 = vunpack.c.h.s8.bf16 %v686_v44  ;;  %v1280_v0 = vunpack.c.h.s8.bf16 %v688_v33  ;;  %v750_v44 = vld [vmem:[%s8387_s12 + $0x468] sm:$0xff]  ;;  %v752_v33 = vld [vmem:[%s8387_s12 + $0x478] sm:$0xff] }
 0x41a   : > { %4539 = vmatmul.mubr.bf16.vlgmr.msra.gmra.mrb[8].mxu0 %v7685_v1  ;;  %4711 = vmatmul.mubr.bf16.vlgmr.msra.gmra.mrb[8].mxu1 %v7685_v1  ;;  %v702_v1 = vld [vmem:[%s8387_s12 + $0x2e8] sm:$0xff] }
 0x41b   : > { %4722 = vmatpush1.bf16.msra.mxu0 %v1133_v59  ;;  %4894 = vmatpush1.bf16.msra.mxu1 %v1135_v60  ;;  %v685_v59 = vld [vmem:[%s8387_s12 + $0x260] sm:$0xff]  ;;  %v687_v60 = vld [vmem:[%s8387_s12 + $0x270] sm:$0xff] }
 0x41c   : > { %4723 = vmatprep.subr.bf16.mxu0 %v1150_v61  ;;  %4895 = vmatprep.subr.bf16.mxu1 %v1152_v62  ;;  %v1261_v61 = vunpack.c.l.s8.bf16 %v685_v59  ;;  %v1263_v62 = vunpack.c.l.s8.bf16 %v687_v60 }
 0x41d   : > { %4753 = vmatprep.mubr.bf16.mxu0 %v7686_v8  ;;  %4925 = vmatprep.mubr.bf16.mxu1 %v7686_v8  ;;  %v703_v8 = vld [vmem:[%s8387_s12 + $0x2f0] sm:$0xff] }
 0x41f   : > { %4724 = vmatpush1.bf16.msra.mxu0 %v1149_v2  ;;  %4896 = vmatpush1.bf16.msra.mxu1 %v1151_v3  ;;  %v704_v2 = vld [vmem:[%s8387_s12 + $0x2f8] sm:$0xff]  ;;  %v1277_v3 = vunpack.c.h.s8.bf16 %v685_v59  ;;  %v749_v59 = vld [vmem:[%s8387_s12 + $0x460] sm:$0xff] }
 0x420   : > { %4725 = vmatprep.subr.bf16.mxu0 %v1166_v4  ;;  %4897 = vmatprep.subr.bf16.mxu1 %v1168_v5  ;;  %v1279_v4 = vunpack.c.h.s8.bf16 %v687_v60  ;;  %v1294_v5 = vunpack.c.l.s8.bf16 %v702_v1  ;;  %v1296_v6 = vunpack.c.l.s8.bf16 %v704_v2  ;;  %v751_v60 = vld [vmem:[%s8387_s12 + $0x470] sm:$0xff] }
 0x423   : > { %4726 = vmatpush1.bf16.msra.mxu0 %v1165_v9  ;;  %4898 = vmatpush1.bf16.msra.mxu1 %v1167_v10  ;;  %v1293_v9 = vunpack.c.l.s8.bf16 %v701_v7  ;;  %v1295_v10 = vunpack.c.l.s8.bf16 %v703_v8 }
 0x424   : > { %4727 = vmatprep.subr.bf16.mxu0 %v1182_v11  ;;  %4899 = vmatprep.subr.bf16.mxu1 %v1184_v12  ;;  %v1310_v11 = vunpack.c.h.s8.bf16 %v702_v1  ;;  %v1312_v12 = vunpack.c.h.s8.bf16 %v704_v2  ;;  %v766_v1 = vld [vmem:[%s8387_s12 + $0x4e8] sm:$0xff]  ;;  %v768_v2 = vld [vmem:[%s8387_s12 + $0x4f8] sm:$0xff] }
 0x427   : > { %4728 = vmatpush1.bf16.msra.mxu0 %v1181_v15  ;;  %4900 = vmatpush1.bf16.msra.mxu1 %v1183_v16  ;;  %v1309_v15 = vunpack.c.h.s8.bf16 %v701_v7  ;;  %v1311_v16 = vunpack.c.h.s8.bf16 %v703_v8  ;;  %v1424_v7 = vunpack.c.l.s8.bf16 %v768_v2  ;;  %v765_v8 = vld [vmem:[%s8387_s12 + $0x4e0] sm:$0xff] }
 0x428   : > { %4729 = vmatprep.subr.bf16.mxu0 %v1198_v17  ;;  %4901 = vmatprep.subr.bf16.mxu1 %v1200_v18  ;;  %v1326_v17 = vunpack.c.l.s8.bf16 %v718_v13  ;;  %v1328_v18 = vunpack.c.l.s8.bf16 %v720_v14 }
 0x42b   : > { %4730 = vmatpush1.bf16.msra.mxu0 %v1197_v21  ;;  %4902 = vmatpush1.bf16.msra.mxu1 %v1199_v22  ;;  %v1325_v21 = vunpack.c.l.s8.bf16 %v717_v19  ;;  %v1327_v22 = vunpack.c.l.s8.bf16 %v719_v20 }
 0x42c   : > { %4731 = vmatprep.subr.bf16.mxu0 %v1214_v23  ;;  %4903 = vmatprep.subr.bf16.mxu1 %v1216_v24  ;;  %v1342_v23 = vunpack.c.h.s8.bf16 %v718_v13  ;;  %v1344_v24 = vunpack.c.h.s8.bf16 %v720_v14  ;;  %v1438_v13 = vunpack.c.h.s8.bf16 %v766_v1  ;;  %v1440_v14 = vunpack.c.h.s8.bf16 %v768_v2 }
 0x42f   : > { %4732 = vmatpush1.bf16.msra.mxu0 %v1213_v27  ;;  %4904 = vmatpush1.bf16.msra.mxu1 %v1215_v28  ;;  %v1341_v27 = vunpack.c.h.s8.bf16 %v717_v19  ;;  %v1343_v28 = vunpack.c.h.s8.bf16 %v719_v20 }
 0x430   : > { %4733 = vmatprep.subr.bf16.mxu0 %v1230_v31  ;;  %4905 = vmatprep.subr.bf16.mxu1 %v1232_v32  ;;  %v1358_v31 = vunpack.c.l.s8.bf16 %v734_v25  ;;  %v1360_v32 = vunpack.c.l.s8.bf16 %v736_v26 }
 0x433   : > { %4734 = vmatpush1.bf16.msra.mxu0 %v1229_v38  ;;  %4906 = vmatpush1.bf16.msra.mxu1 %v1231_v39  ;;  %v1357_v38 = vunpack.c.l.s8.bf16 %v733_v36  ;;  %v1359_v39 = vunpack.c.l.s8.bf16 %v735_v37 }
 0x434   : > { %4735 = vmatprep.subr.bf16.mxu0 %v1246_v42  ;;  %4907 = vmatprep.subr.bf16.mxu1 %v1248_v43  ;;  %v1374_v42 = vunpack.c.h.s8.bf16 %v734_v25  ;;  %v1376_v43 = vunpack.c.h.s8.bf16 %v736_v26 }
 0x437   : > { %4736 = vmatpush1.bf16.msra.mxu0 %v1245_v47  ;;  %4908 = vmatpush1.bf16.msra.mxu1 %v1247_v48  ;;  %v1373_v47 = vunpack.c.h.s8.bf16 %v733_v36  ;;  %v1375_v48 = vunpack.c.h.s8.bf16 %v735_v37 }
 0x438   : > { %4737 = vmatprep.subr.bf16.mxu0 %v1262_v49  ;;  %4909 = vmatprep.subr.bf16.mxu1 %v1264_v50  ;;  %v1390_v49 = vunpack.c.l.s8.bf16 %v750_v44  ;;  %v1392_v50 = vunpack.c.l.s8.bf16 %v752_v33 }
 0x43b   : > { %4738 = vmatpush1.bf16.msra.mxu0 %v1261_v61  ;;  %4910 = vmatpush1.bf16.msra.mxu1 %v1263_v62  ;;  %v1389_v61 = vunpack.c.l.s8.bf16 %v749_v59  ;;  %v1391_v62 = vunpack.c.l.s8.bf16 %v751_v60 }
 0x43c   : > { %4739 = vmatprep.subr.bf16.mxu0 %v1278_v63  ;;  %4911 = vmatprep.subr.bf16.mxu1 %v1280_v0  ;;  %v1406_v63 = vunpack.c.h.s8.bf16 %v750_v44  ;;  %v1408_v0 = vunpack.c.h.s8.bf16 %v752_v33 }
 0x43f   : > { %4740 = vmatpush1.bf16.msra.mxu0 %v1277_v3  ;;  %4912 = vmatpush1.bf16.msra.mxu1 %v1279_v4  ;;  %v7687_v3 = vld [vmem:[#allocation2] sm:$0xff]  ;;  %v1405_v4 = vunpack.c.h.s8.bf16 %v749_v59 }
 0x440   : > { %4741 = vmatprep.subr.bf16.mxu0 %v1294_v5  ;;  %4913 = vmatprep.subr.bf16.mxu1 %v1296_v6  ;;  %v1407_v5 = vunpack.c.h.s8.bf16 %v751_v60  ;;  %v1422_v6 = vunpack.c.l.s8.bf16 %v766_v1 }
 0x443   : > { %4742 = vmatpush1.bf16.msra.mxu0 %v1293_v9  ;;  %4914 = vmatpush1.bf16.msra.mxu1 %v1295_v10  ;;  %v767_v9 = vld [vmem:[%s8387_s12 + $0x4f0] sm:$0xff]  ;;  %v7688_v10 = vld [vmem:[#allocation2 + $0x18] sm:$0xff] }
 0x444   : > { %4743 = vmatprep.subr.bf16.mxu0 %v1310_v11  ;;  %4915 = vmatprep.subr.bf16.mxu1 %v1312_v12  ;;  %v1421_v11 = vunpack.c.l.s8.bf16 %v765_v8  ;;  %v1423_v12 = vunpack.c.l.s8.bf16 %v767_v9 }
 0x447   : > { %4744 = vmatpush1.bf16.msra.mxu0 %v1309_v15  ;;  %4916 = vmatpush1.bf16.msra.mxu1 %v1311_v16  ;;  %v782_v15 = vld [vmem:[%s8387_s12 + $0x568] sm:$0xff]  ;;  %v784_v16 = vld [vmem:[%s8387_s12 + $0x578] sm:$0xff] }
 0x448   : > { %4745 = vmatprep.subr.bf16.mxu0 %v1326_v17  ;;  %4917 = vmatprep.subr.bf16.mxu1 %v1328_v18  ;;  %v1437_v17 = vunpack.c.h.s8.bf16 %v765_v8  ;;  %v1439_v18 = vunpack.c.h.s8.bf16 %v767_v9  ;;  %v1454_v19 = vunpack.c.l.s8.bf16 %v782_v15  ;;  %v1456_v20 = vunpack.c.l.s8.bf16 %v784_v16  ;;  %v829_v9 = vld [vmem:[%s8387_s12 + $0x6e0] sm:$0xff] }
 0x449   : > { %v1470_v25 = vunpack.c.h.s8.bf16 %v782_v15  ;;  %v1472_v26 = vunpack.c.h.s8.bf16 %v784_v16  ;;  %v846_v15 = vld [vmem:[%s8387_s12 + $0x768] sm:$0xff]  ;;  %v848_v16 = vld [vmem:[%s8387_s12 + $0x778] sm:$0xff] }
 0x44b   : > { %4746 = vmatpush1.bf16.msra.mxu0 %v1325_v21  ;;  %4918 = vmatpush1.bf16.msra.mxu1 %v1327_v22  ;;  %v781_v21 = vld [vmem:[%s8387_s12 + $0x560] sm:$0xff]  ;;  %v783_v22 = vld [vmem:[%s8387_s12 + $0x570] sm:$0xff] }
 0x44c   : > { %4747 = vmatprep.subr.bf16.mxu0 %v1342_v23  ;;  %4919 = vmatprep.subr.bf16.mxu1 %v1344_v24  ;;  %v1453_v23 = vunpack.c.l.s8.bf16 %v781_v21  ;;  %v1455_v24 = vunpack.c.l.s8.bf16 %v783_v22 }
 0x44f   : > { %4748 = vmatpush1.bf16.msra.mxu0 %v1341_v27  ;;  %4920 = vmatpush1.bf16.msra.mxu1 %v1343_v28  ;;  %v798_v27 = vld [vmem:[%s8387_s12 + $0x5e8] sm:$0xff]  ;;  %v800_v28 = vld [vmem:[%s8387_s12 + $0x5f8] sm:$0xff] }
 0x450   : > { %4749 = vmatprep.subr.bf16.mxu0 %v1358_v31  ;;  %4921 = vmatprep.subr.bf16.mxu1 %v1360_v32  ;;  %v1469_v31 = vunpack.c.h.s8.bf16 %v781_v21  ;;  %v1471_v32 = vunpack.c.h.s8.bf16 %v783_v22  ;;  %v1486_v36 = vunpack.c.l.s8.bf16 %v798_v27  ;;  %v1488_v37 = vunpack.c.l.s8.bf16 %v800_v28  ;;  %v845_v21 = vld [vmem:[%s8387_s12 + $0x760] sm:$0xff]  ;;  %v847_v22 = vld [vmem:[%s8387_s12 + $0x770] sm:$0xff] }
 0x451   : > { %v1502_v44 = vunpack.c.h.s8.bf16 %v798_v27  ;;  %v1504_v33 = vunpack.c.h.s8.bf16 %v800_v28  ;;  %v862_v27 = vld [vmem:[%s8387_s12 + $0x7e8] sm:$0xff]  ;;  %v864_v28 = vld [vmem:[%s8387_s12 + $0x7f8] sm:$0xff] }
 0x453   : > { %4750 = vmatpush1.bf16.msra.mxu0 %v1357_v38  ;;  %4922 = vmatpush1.bf16.msra.mxu1 %v1359_v39  ;;  %v797_v38 = vld [vmem:[%s8387_s12 + $0x5e0] sm:$0xff]  ;;  %v799_v39 = vld [vmem:[%s8387_s12 + $0x5f0] sm:$0xff] }
 0x454   : > { %4751 = vmatprep.subr.bf16.mxu0 %v1374_v42  ;;  %4923 = vmatprep.subr.bf16.mxu1 %v1376_v43  ;;  %v1485_v42 = vunpack.c.l.s8.bf16 %v797_v38  ;;  %v1487_v43 = vunpack.c.l.s8.bf16 %v799_v39 }
 0x457   : > { %4752 = vmatpush1.bf16.msra.mxu0 %v1373_v47  ;;  %4924 = vmatpush1.bf16.msra.mxu1 %v1375_v48  ;;  %v814_v47 = vld [vmem:[%s8387_s12 + $0x668] sm:$0xff]  ;;  %v816_v48 = vld [vmem:[%s8387_s12 + $0x678] sm:$0xff] }
 0x458   : > { %4764 = vmatprep.subr.bf16.mxu0 %v1390_v49  ;;  %4936 = vmatprep.subr.bf16.mxu1 %v1392_v50  ;;  %v1501_v49 = vunpack.c.h.s8.bf16 %v797_v38  ;;  %v1503_v50 = vunpack.c.h.s8.bf16 %v799_v39  ;;  %v1518_v59 = vunpack.c.l.s8.bf16 %v814_v47  ;;  %v1520_v60 = vunpack.c.l.s8.bf16 %v816_v48  ;;  %v861_v38 = vld [vmem:[%s8387_s12 + $0x7e0] sm:$0xff]  ;;  %v863_v39 = vld [vmem:[%s8387_s12 + $0x7f0] sm:$0xff] }
 0x459   : > { %v1534_v1 = vunpack.c.h.s8.bf16 %v814_v47  ;;  %v1536_v2 = vunpack.c.h.s8.bf16 %v816_v48  ;;  %v878_v47 = vld [vmem:[%s8387_s12 + $0x868] sm:$0xff]  ;;  %v880_v48 = vld [vmem:[%s8387_s12 + $0x878] sm:$0xff] }
 0x45a   : > { %4754 = vmatmul.mubr.bf16.vlgmr.msra.gmra.mrb[12].mxu0 %v7687_v3  ;;  %4926 = vmatmul.mubr.bf16.vlgmr.msra.gmra.mrb[12].mxu1 %v7687_v3  ;;  %v830_v3 = vld [vmem:[%s8387_s12 + $0x6e8] sm:$0xff] }
 0x45b   : > { %4765 = vmatpush1.bf16.msra.mxu0 %v1389_v61  ;;  %4937 = vmatpush1.bf16.msra.mxu1 %v1391_v62  ;;  %v813_v61 = vld [vmem:[%s8387_s12 + $0x660] sm:$0xff]  ;;  %v815_v62 = vld [vmem:[%s8387_s12 + $0x670] sm:$0xff] }
 0x45c   : > { %4766 = vmatprep.subr.bf16.mxu0 %v1406_v63  ;;  %4938 = vmatprep.subr.bf16.mxu1 %v1408_v0  ;;  %v1517_v63 = vunpack.c.l.s8.bf16 %v813_v61  ;;  %v1519_v0 = vunpack.c.l.s8.bf16 %v815_v62 }
 0x45d   : > { %4796 = vmatprep.mubr.bf16.mxu0 %v7688_v10  ;;  %4968 = vmatprep.mubr.bf16.mxu1 %v7688_v10  ;;  %v831_v10 = vld [vmem:[%s8387_s12 + $0x6f0] sm:$0xff] }
 0x45f   : > { %4767 = vmatpush1.bf16.msra.mxu0 %v1405_v4  ;;  %4939 = vmatpush1.bf16.msra.mxu1 %v1407_v5  ;;  %v832_v4 = vld [vmem:[%s8387_s12 + $0x6f8] sm:$0xff]  ;;  %v1533_v5 = vunpack.c.h.s8.bf16 %v813_v61  ;;  %v877_v61 = vld [vmem:[%s8387_s12 + $0x860] sm:$0xff] }
 0x460   : > { %4768 = vmatprep.subr.bf16.mxu0 %v1422_v6  ;;  %4940 = vmatprep.subr.bf16.mxu1 %v1424_v7  ;;  %v1535_v6 = vunpack.c.h.s8.bf16 %v815_v62  ;;  %v1550_v7 = vunpack.c.l.s8.bf16 %v830_v3  ;;  %v1552_v8 = vunpack.c.l.s8.bf16 %v832_v4  ;;  %v879_v62 = vld [vmem:[%s8387_s12 + $0x870] sm:$0xff] }
 0x463   : > { %4769 = vmatpush1.bf16.msra.mxu0 %v1421_v11  ;;  %4941 = vmatpush1.bf16.msra.mxu1 %v1423_v12  ;;  %v1549_v11 = vunpack.c.l.s8.bf16 %v829_v9  ;;  %v1551_v12 = vunpack.c.l.s8.bf16 %v831_v10 }
 0x464   : > { %4770 = vmatprep.subr.bf16.mxu0 %v1438_v13  ;;  %4942 = vmatprep.subr.bf16.mxu1 %v1440_v14  ;;  %v1566_v13 = vunpack.c.h.s8.bf16 %v830_v3  ;;  %v1568_v14 = vunpack.c.h.s8.bf16 %v832_v4  ;;  %v894_v3 = vld [vmem:[%s8387_s12 + $0x8e8] sm:$0xff]  ;;  %v896_v4 = vld [vmem:[%s8387_s12 + $0x8f8] sm:$0xff] }
 0x467   : > { %4771 = vmatpush1.bf16.msra.mxu0 %v1437_v17  ;;  %4943 = vmatpush1.bf16.msra.mxu1 %v1439_v18  ;;  %v1565_v17 = vunpack.c.h.s8.bf16 %v829_v9  ;;  %v1567_v18 = vunpack.c.h.s8.bf16 %v831_v10  ;;  %v1680_v9 = vunpack.c.l.s8.bf16 %v896_v4  ;;  %v893_v10 = vld [vmem:[%s8387_s12 + $0x8e0] sm:$0xff] }
 0x468   : > { %4772 = vmatprep.subr.bf16.mxu0 %v1454_v19  ;;  %4944 = vmatprep.subr.bf16.mxu1 %v1456_v20  ;;  %v1582_v19 = vunpack.c.l.s8.bf16 %v846_v15  ;;  %v1584_v20 = vunpack.c.l.s8.bf16 %v848_v16 }
 0x46b   : > { %4773 = vmatpush1.bf16.msra.mxu0 %v1453_v23  ;;  %4945 = vmatpush1.bf16.msra.mxu1 %v1455_v24  ;;  %v1581_v23 = vunpack.c.l.s8.bf16 %v845_v21  ;;  %v1583_v24 = vunpack.c.l.s8.bf16 %v847_v22 }
 0x46c   : > { %4774 = vmatprep.subr.bf16.mxu0 %v1470_v25  ;;  %4946 = vmatprep.subr.bf16.mxu1 %v1472_v26  ;;  %v1598_v25 = vunpack.c.h.s8.bf16 %v846_v15  ;;  %v1600_v26 = vunpack.c.h.s8.bf16 %v848_v16  ;;  %v1694_v15 = vunpack.c.h.s8.bf16 %v894_v3  ;;  %v1696_v16 = vunpack.c.h.s8.bf16 %v896_v4 }
 0x46f   : > { %4775 = vmatpush1.bf16.msra.mxu0 %v1469_v31  ;;  %4947 = vmatpush1.bf16.msra.mxu1 %v1471_v32  ;;  %v1597_v31 = vunpack.c.h.s8.bf16 %v845_v21  ;;  %v1599_v32 = vunpack.c.h.s8.bf16 %v847_v22 }
 0x470   : > { %4776 = vmatprep.subr.bf16.mxu0 %v1486_v36  ;;  %4948 = vmatprep.subr.bf16.mxu1 %v1488_v37  ;;  %v1614_v36 = vunpack.c.l.s8.bf16 %v862_v27  ;;  %v1616_v37 = vunpack.c.l.s8.bf16 %v864_v28 }
 0x473   : > { %4777 = vmatpush1.bf16.msra.mxu0 %v1485_v42  ;;  %4949 = vmatpush1.bf16.msra.mxu1 %v1487_v43  ;;  %v1613_v42 = vunpack.c.l.s8.bf16 %v861_v38  ;;  %v1615_v43 = vunpack.c.l.s8.bf16 %v863_v39 }
 0x474   : > { %4778 = vmatprep.subr.bf16.mxu0 %v1502_v44  ;;  %4950 = vmatprep.subr.bf16.mxu1 %v1504_v33  ;;  %v1630_v44 = vunpack.c.h.s8.bf16 %v862_v27  ;;  %v1632_v33 = vunpack.c.h.s8.bf16 %v864_v28 }
 0x477   : > { %4779 = vmatpush1.bf16.msra.mxu0 %v1501_v49  ;;  %4951 = vmatpush1.bf16.msra.mxu1 %v1503_v50  ;;  %v1629_v49 = vunpack.c.h.s8.bf16 %v861_v38  ;;  %v1631_v50 = vunpack.c.h.s8.bf16 %v863_v39 }
 0x478   : > { %4780 = vmatprep.subr.bf16.mxu0 %v1518_v59  ;;  %4952 = vmatprep.subr.bf16.mxu1 %v1520_v60  ;;  %v1646_v59 = vunpack.c.l.s8.bf16 %v878_v47  ;;  %v1648_v60 = vunpack.c.l.s8.bf16 %v880_v48 }
 0x47b   : > { %4781 = vmatpush1.bf16.msra.mxu0 %v1517_v63  ;;  %4953 = vmatpush1.bf16.msra.mxu1 %v1519_v0  ;;  %v1645_v63 = vunpack.c.l.s8.bf16 %v877_v61  ;;  %v1647_v0 = vunpack.c.l.s8.bf16 %v879_v62 }
 0x47c   : > { %4782 = vmatprep.subr.bf16.mxu0 %v1534_v1  ;;  %4954 = vmatprep.subr.bf16.mxu1 %v1536_v2  ;;  %v1662_v1 = vunpack.c.h.s8.bf16 %v878_v47  ;;  %v1664_v2 = vunpack.c.h.s8.bf16 %v880_v48 }
 0x47f   : > { %4783 = vmatpush1.bf16.msra.mxu0 %v1533_v5  ;;  %4955 = vmatpush1.bf16.msra.mxu1 %v1535_v6  ;;  %v7689_v5 = vld [vmem:[#allocation2 + $0x10] sm:$0xff]  ;;  %v1661_v6 = vunpack.c.h.s8.bf16 %v877_v61 }
 0x480   : > { %4784 = vmatprep.subr.bf16.mxu0 %v1550_v7  ;;  %4956 = vmatprep.subr.bf16.mxu1 %v1552_v8  ;;  %v1663_v7 = vunpack.c.h.s8.bf16 %v879_v62  ;;  %v1678_v8 = vunpack.c.l.s8.bf16 %v894_v3 }
 0x483   : > { %4785 = vmatpush1.bf16.msra.mxu0 %v1549_v11  ;;  %4957 = vmatpush1.bf16.msra.mxu1 %v1551_v12  ;;  %v895_v11 = vld [vmem:[%s8387_s12 + $0x8f0] sm:$0xff]  ;;  %v7690_v12 = vld [vmem:[#allocation2 + $0x28] sm:$0xff] }
 0x484   : > { %4786 = vmatprep.subr.bf16.mxu0 %v1566_v13  ;;  %4958 = vmatprep.subr.bf16.mxu1 %v1568_v14  ;;  %v1677_v13 = vunpack.c.l.s8.bf16 %v893_v10  ;;  %v1679_v14 = vunpack.c.l.s8.bf16 %v895_v11 }
 0x487   : > { %4787 = vmatpush1.bf16.msra.mxu0 %v1565_v17  ;;  %4959 = vmatpush1.bf16.msra.mxu1 %v1567_v18  ;;  %v910_v17 = vld [vmem:[%s8387_s12 + $0x968] sm:$0xff]  ;;  %v912_v18 = vld [vmem:[%s8387_s12 + $0x978] sm:$0xff] }
 0x488   : > { %4788 = vmatprep.subr.bf16.mxu0 %v1582_v19  ;;  %4960 = vmatprep.subr.bf16.mxu1 %v1584_v20  ;;  %v1693_v19 = vunpack.c.h.s8.bf16 %v893_v10  ;;  %v1695_v20 = vunpack.c.h.s8.bf16 %v895_v11  ;;  %v1710_v21 = vunpack.c.l.s8.bf16 %v910_v17  ;;  %v1712_v22 = vunpack.c.l.s8.bf16 %v912_v18  ;;  %v957_v11 = vld [vmem:[%s8387_s12 + $0xae0] sm:$0xff] }
 0x489   : > { %v1726_v27 = vunpack.c.h.s8.bf16 %v910_v17  ;;  %v1728_v28 = vunpack.c.h.s8.bf16 %v912_v18  ;;  %v974_v17 = vld [vmem:[%s8387_s12 + $0xb68] sm:$0xff]  ;;  %v976_v18 = vld [vmem:[%s8387_s12 + $0xb78] sm:$0xff] }
 0x48b   : > { %4789 = vmatpush1.bf16.msra.mxu0 %v1581_v23  ;;  %4961 = vmatpush1.bf16.msra.mxu1 %v1583_v24  ;;  %v909_v23 = vld [vmem:[%s8387_s12 + $0x960] sm:$0xff]  ;;  %v911_v24 = vld [vmem:[%s8387_s12 + $0x970] sm:$0xff] }
 0x48c   : > { %4790 = vmatprep.subr.bf16.mxu0 %v1598_v25  ;;  %4962 = vmatprep.subr.bf16.mxu1 %v1600_v26  ;;  %v1709_v25 = vunpack.c.l.s8.bf16 %v909_v23  ;;  %v1711_v26 = vunpack.c.l.s8.bf16 %v911_v24 }
 0x48f   : > { %4791 = vmatpush1.bf16.msra.mxu0 %v1597_v31  ;;  %4963 = vmatpush1.bf16.msra.mxu1 %v1599_v32  ;;  %v926_v31 = vld [vmem:[%s8387_s12 + $0x9e8] sm:$0xff]  ;;  %v928_v32 = vld [vmem:[%s8387_s12 + $0x9f8] sm:$0xff] }
 0x490   : > { %4792 = vmatprep.subr.bf16.mxu0 %v1614_v36  ;;  %4964 = vmatprep.subr.bf16.mxu1 %v1616_v37  ;;  %v1725_v36 = vunpack.c.h.s8.bf16 %v909_v23  ;;  %v1727_v37 = vunpack.c.h.s8.bf16 %v911_v24  ;;  %v1742_v38 = vunpack.c.l.s8.bf16 %v926_v31  ;;  %v1744_v39 = vunpack.c.l.s8.bf16 %v928_v32  ;;  %v973_v23 = vld [vmem:[%s8387_s12 + $0xb60] sm:$0xff]  ;;  %v975_v24 = vld [vmem:[%s8387_s12 + $0xb70] sm:$0xff] }
 0x491   : > { %v1758_v47 = vunpack.c.h.s8.bf16 %v926_v31  ;;  %v1760_v48 = vunpack.c.h.s8.bf16 %v928_v32  ;;  %v990_v31 = vld [vmem:[%s8387_s12 + $0xbe8] sm:$0xff]  ;;  %v992_v32 = vld [vmem:[%s8387_s12 + $0xbf8] sm:$0xff] }
 0x493   : > { %4793 = vmatpush1.bf16.msra.mxu0 %v1613_v42  ;;  %4965 = vmatpush1.bf16.msra.mxu1 %v1615_v43  ;;  %v925_v42 = vld [vmem:[%s8387_s12 + $0x9e0] sm:$0xff]  ;;  %v927_v43 = vld [vmem:[%s8387_s12 + $0x9f0] sm:$0xff] }
 0x494   : > { %4794 = vmatprep.subr.bf16.mxu0 %v1630_v44  ;;  %4966 = vmatprep.subr.bf16.mxu1 %v1632_v33  ;;  %v1741_v44 = vunpack.c.l.s8.bf16 %v925_v42  ;;  %v1743_v33 = vunpack.c.l.s8.bf16 %v927_v43 }
 0x497   : > { %4795 = vmatpush1.bf16.msra.mxu0 %v1629_v49  ;;  %4967 = vmatpush1.bf16.msra.mxu1 %v1631_v50  ;;  %v942_v49 = vld [vmem:[%s8387_s12 + $0xa68] sm:$0xff]  ;;  %v944_v50 = vld [vmem:[%s8387_s12 + $0xa78] sm:$0xff] }
 0x498   : > { %4807 = vmatprep.subr.bf16.mxu0 %v1646_v59  ;;  %4979 = vmatprep.subr.bf16.mxu1 %v1648_v60  ;;  %v1757_v59 = vunpack.c.h.s8.bf16 %v925_v42  ;;  %v1759_v60 = vunpack.c.h.s8.bf16 %v927_v43  ;;  %v1774_v61 = vunpack.c.l.s8.bf16 %v942_v49  ;;  %v1776_v62 = vunpack.c.l.s8.bf16 %v944_v50  ;;  %v989_v42 = vld [vmem:[%s8387_s12 + $0xbe0] sm:$0xff]  ;;  %v991_v43 = vld [vmem:[%s8387_s12 + $0xbf0] sm:$0xff] }
 0x499   : > { %v1790_v3 = vunpack.c.h.s8.bf16 %v942_v49  ;;  %v1792_v4 = vunpack.c.h.s8.bf16 %v944_v50  ;;  %v1006_v49 = vld [vmem:[%s8387_s12 + $0xc68] sm:$0xff]  ;;  %v1008_v50 = vld [vmem:[%s8387_s12 + $0xc78] sm:$0xff] }
 0x49a   : > { %4797 = vmatmul.mubr.bf16.vlgmr.msra.gmra.mrb[12].mxu0 %v7689_v5  ;;  %4969 = vmatmul.mubr.bf16.vlgmr.msra.gmra.mrb[12].mxu1 %v7689_v5  ;;  %v958_v5 = vld [vmem:[%s8387_s12 + $0xae8] sm:$0xff] }
 0x49b   : > { %4808 = vmatpush1.bf16.msra.mxu0 %v1645_v63  ;;  %4980 = vmatpush1.bf16.msra.mxu1 %v1647_v0  ;;  %v941_v63 = vld [vmem:[%s8387_s12 + $0xa60] sm:$0xff]  ;;  %v943_v0 = vld [vmem:[%s8387_s12 + $0xa70] sm:$0xff] }
 0x49c   : > { %4809 = vmatprep.subr.bf16.mxu0 %v1662_v1  ;;  %4981 = vmatprep.subr.bf16.mxu1 %v1664_v2  ;;  %v1773_v1 = vunpack.c.l.s8.bf16 %v941_v63  ;;  %v1775_v2 = vunpack.c.l.s8.bf16 %v943_v0 }
 0x49d   : > { %4839 = vmatprep.mubr.bf16.mxu0 %v7690_v12  ;;  %5011 = vmatprep.mubr.bf16.mxu1 %v7690_v12  ;;  %v959_v12 = vld [vmem:[%s8387_s12 + $0xaf0] sm:$0xff] }
 0x49f   : > { %4810 = vmatpush1.bf16.msra.mxu0 %v1661_v6  ;;  %4982 = vmatpush1.bf16.msra.mxu1 %v1663_v7  ;;  %v960_v6 = vld [vmem:[%s8387_s12 + $0xaf8] sm:$0xff]  ;;  %v1789_v7 = vunpack.c.h.s8.bf16 %v941_v63  ;;  %v1005_v63 = vld [vmem:[%s8387_s12 + $0xc60] sm:$0xff] }
 0x4a0   : > { %4811 = vmatprep.subr.bf16.mxu0 %v1678_v8  ;;  %4983 = vmatprep.subr.bf16.mxu1 %v1680_v9  ;;  %v1791_v8 = vunpack.c.h.s8.bf16 %v943_v0  ;;  %v1806_v9 = vunpack.c.l.s8.bf16 %v958_v5  ;;  %v1808_v10 = vunpack.c.l.s8.bf16 %v960_v6  ;;  %v1007_v0 = vld [vmem:[%s8387_s12 + $0xc70] sm:$0xff] }
 0x4a3   : > { %4812 = vmatpush1.bf16.msra.mxu0 %v1677_v13  ;;  %4984 = vmatpush1.bf16.msra.mxu1 %v1679_v14  ;;  %v1805_v13 = vunpack.c.l.s8.bf16 %v957_v11  ;;  %v1807_v14 = vunpack.c.l.s8.bf16 %v959_v12 }
 0x4a4   : > { %4813 = vmatprep.subr.bf16.mxu0 %v1694_v15  ;;  %4985 = vmatprep.subr.bf16.mxu1 %v1696_v16  ;;  %v1822_v15 = vunpack.c.h.s8.bf16 %v958_v5  ;;  %v1824_v16 = vunpack.c.h.s8.bf16 %v960_v6  ;;  %v1022_v5 = vld [vmem:[%s8387_s12 + $0xce8] sm:$0xff]  ;;  %v1024_v6 = vld [vmem:[%s8387_s12 + $0xcf8] sm:$0xff] }
 0x4a7   : > { %4814 = vmatpush1.bf16.msra.mxu0 %v1693_v19  ;;  %4986 = vmatpush1.bf16.msra.mxu1 %v1695_v20  ;;  %v1821_v19 = vunpack.c.h.s8.bf16 %v957_v11  ;;  %v1823_v20 = vunpack.c.h.s8.bf16 %v959_v12  ;;  %v1936_v11 = vunpack.c.l.s8.bf16 %v1024_v6  ;;  %v1021_v12 = vld [vmem:[%s8387_s12 + $0xce0] sm:$0xff] }
 0x4a8   : > { %4815 = vmatprep.subr.bf16.mxu0 %v1710_v21  ;;  %4987 = vmatprep.subr.bf16.mxu1 %v1712_v22  ;;  %v1838_v21 = vunpack.c.l.s8.bf16 %v974_v17  ;;  %v1840_v22 = vunpack.c.l.s8.bf16 %v976_v18 }
 0x4ab   : > { %4816 = vmatpush1.bf16.msra.mxu0 %v1709_v25  ;;  %4988 = vmatpush1.bf16.msra.mxu1 %v1711_v26  ;;  %v1837_v25 = vunpack.c.l.s8.bf16 %v973_v23  ;;  %v1839_v26 = vunpack.c.l.s8.bf16 %v975_v24 }
 0x4ac   : > { %4817 = vmatprep.subr.bf16.mxu0 %v1726_v27  ;;  %4989 = vmatprep.subr.bf16.mxu1 %v1728_v28  ;;  %v1854_v27 = vunpack.c.h.s8.bf16 %v974_v17  ;;  %v1856_v28 = vunpack.c.h.s8.bf16 %v976_v18  ;;  %v1950_v17 = vunpack.c.h.s8.bf16 %v1022_v5  ;;  %v1952_v18 = vunpack.c.h.s8.bf16 %v1024_v6 }
 0x4af   : > { %4818 = vmatpush1.bf16.msra.mxu0 %v1725_v36  ;;  %4990 = vmatpush1.bf16.msra.mxu1 %v1727_v37  ;;  %v1853_v36 = vunpack.c.h.s8.bf16 %v973_v23  ;;  %v1855_v37 = vunpack.c.h.s8.bf16 %v975_v24 }
 0x4b0   : > { %4819 = vmatprep.subr.bf16.mxu0 %v1742_v38  ;;  %4991 = vmatprep.subr.bf16.mxu1 %v1744_v39  ;;  %v1870_v38 = vunpack.c.l.s8.bf16 %v990_v31  ;;  %v1872_v39 = vunpack.c.l.s8.bf16 %v992_v32 }
 0x4b3   : > { %4820 = vmatpush1.bf16.msra.mxu0 %v1741_v44  ;;  %4992 = vmatpush1.bf16.msra.mxu1 %v1743_v33  ;;  %v1869_v44 = vunpack.c.l.s8.bf16 %v989_v42  ;;  %v1871_v33 = vunpack.c.l.s8.bf16 %v991_v43 }
 0x4b4   : > { %4821 = vmatprep.subr.bf16.mxu0 %v1758_v47  ;;  %4993 = vmatprep.subr.bf16.mxu1 %v1760_v48  ;;  %v1886_v47 = vunpack.c.h.s8.bf16 %v990_v31  ;;  %v1888_v48 = vunpack.c.h.s8.bf16 %v992_v32  ;;  %v5066_v31 = vld [vmem:[%s8395_s22 + $0x8] sm:$0xff] }
 0x4b7   : > { %4822 = vmatpush1.bf16.msra.mxu0 %v1757_v59  ;;  %4994 = vmatpush1.bf16.msra.mxu1 %v1759_v60  ;;  %v1885_v59 = vunpack.c.h.s8.bf16 %v989_v42  ;;  %v1887_v60 = vunpack.c.h.s8.bf16 %v991_v43  ;;  %v5112_v42 = vrot.slane %v5066_v31, %v8715_v41  ;;  %v1056_v43 = vld [vmem:[%s8387_s12 + $0xdf8] sm:$0xff] }
 0x4b8   : > { %4823 = vmatprep.subr.bf16.mxu0 %v1774_v61  ;;  %4995 = vmatprep.subr.bf16.mxu1 %v1776_v62  ;;  %v1902_v61 = vunpack.c.l.s8.bf16 %v1006_v49  ;;  %v1904_v62 = vunpack.c.l.s8.bf16 %v1008_v50 }
 0x4bb   : > { %4824 = vmatpush1.bf16.msra.mxu0 %v1773_v1  ;;  %4996 = vmatpush1.bf16.msra.mxu1 %v1775_v2  ;;  %v1901_v1 = vunpack.c.l.s8.bf16 %v1005_v63  ;;  %v1903_v2 = vunpack.c.l.s8.bf16 %v1007_v0 }
 0x4bc   : > { %4825 = vmatprep.subr.bf16.mxu0 %v1790_v3  ;;  %4997 = vmatprep.subr.bf16.mxu1 %v1792_v4  ;;  %v1918_v3 = vunpack.c.h.s8.bf16 %v1006_v49  ;;  %v1920_v4 = vunpack.c.h.s8.bf16 %v1008_v50  ;;  %v9066_v49 = vld [vmem:[%s8387_s12 + $0xde0] sm:$0xff]  ;;  %v9069_v50 = vld [vmem:[%s8387_s12 + $0xdf0] sm:$0xff] }
 0x4bf   : > { %4826 = vmatpush1.bf16.msra.mxu0 %v1789_v7  ;;  %4998 = vmatpush1.bf16.msra.mxu1 %v1791_v8  ;;  %v7691_v7 = vld [vmem:[#allocation2 + $0x20] sm:$0xff]  ;;  %v1917_v8 = vunpack.c.h.s8.bf16 %v1005_v63 }
 0x4c0   : > { %4827 = vmatprep.subr.bf16.mxu0 %v1806_v9  ;;  %4999 = vmatprep.subr.bf16.mxu1 %v1808_v10  ;;  %v1919_v9 = vunpack.c.h.s8.bf16 %v1007_v0  ;;  %v1934_v10 = vunpack.c.l.s8.bf16 %v1022_v5 }
 0x4c3   : > { %4828 = vmatpush1.bf16.msra.mxu0 %v1805_v13  ;;  %5000 = vmatpush1.bf16.msra.mxu1 %v1807_v14  ;;  %v1023_v13 = vld [vmem:[%s8387_s12 + $0xcf0] sm:$0xff]  ;;  %v7692_v14 = vld [vmem:[#allocation2 + $0x38] sm:$0xff] }
 0x4c4   : > { %4829 = vmatprep.subr.bf16.mxu0 %v1822_v15  ;;  %5001 = vmatprep.subr.bf16.mxu1 %v1824_v16  ;;  %v1933_v15 = vunpack.c.l.s8.bf16 %v1021_v12  ;;  %v1935_v16 = vunpack.c.l.s8.bf16 %v1023_v13 }
 0x4c7   : > { %4830 = vmatpush1.bf16.msra.mxu0 %v1821_v19  ;;  %5002 = vmatpush1.bf16.msra.mxu1 %v1823_v20  ;;  %v1038_v19 = vld [vmem:[%s8387_s12 + $0xd68] sm:$0xff]  ;;  %v1040_v20 = vld [vmem:[%s8387_s12 + $0xd78] sm:$0xff] }
 0x4c8   : > { %4831 = vmatprep.subr.bf16.mxu0 %v1838_v21  ;;  %5003 = vmatprep.subr.bf16.mxu1 %v1840_v22  ;;  %v1949_v21 = vunpack.c.h.s8.bf16 %v1021_v12  ;;  %v1951_v22 = vunpack.c.h.s8.bf16 %v1023_v13  ;;  %v1966_v23 = vunpack.c.l.s8.bf16 %v1038_v19  ;;  %v1968_v24 = vunpack.c.l.s8.bf16 %v1040_v20 }
 0x4c9   : > { %v1982_v32 = vunpack.c.h.s8.bf16 %v1038_v19 }
 0x4cb   : > { %4832 = vmatpush1.bf16.msra.mxu0 %v1837_v25  ;;  %5004 = vmatpush1.bf16.msra.mxu1 %v1839_v26  ;;  %v1037_v25 = vld [vmem:[%s8387_s12 + $0xd60] sm:$0xff]  ;;  %v1039_v26 = vld [vmem:[%s8387_s12 + $0xd70] sm:$0xff] }
 0x4cc   : > { %4833 = vmatprep.subr.bf16.mxu0 %v1854_v27  ;;  %5005 = vmatprep.subr.bf16.mxu1 %v1856_v28  ;;  %v1965_v27 = vunpack.c.l.s8.bf16 %v1037_v25  ;;  %v1967_v28 = vunpack.c.l.s8.bf16 %v1039_v26 }
 0x4cf   : > { %4834 = vmatpush1.bf16.msra.mxu0 %v1853_v36  ;;  %5006 = vmatpush1.bf16.msra.mxu1 %v1855_v37  ;;  %v1984_v36 = vunpack.c.h.s8.bf16 %v1040_v20  ;;  %v5182_v37 = vld [vmem:[%s8401_s30 + $0x8] sm:$0xff] }
 0x4d0   : > { %4835 = vmatprep.subr.bf16.mxu0 %v1870_v38  ;;  %5007 = vmatprep.subr.bf16.mxu1 %v1872_v39  ;;  %v9058_v38 = vld [vmem:[%s8387_s12 + $0xde8] sm:$0xff]  ;;  %v5104_v39 = vrot.slane %v5066_v31, %v8712_v40  ;;  %v5224_v0 = vrot.slane %v5182_v37, %v8719_v45 }
 0x4d1   : > { %v2014_v13 = vunpack.c.h.s8.bf16 %v9058_v38 }
 0x4d3   : > { %4836 = vmatpush1.bf16.msra.mxu0 %v1869_v44  ;;  %5008 = vmatpush1.bf16.msra.mxu1 %v1871_v33  ;;  %v5108_v44 = vrot.slane %v5066_v31, %v8719_v45  ;;  %v5116_v33 = vrot.slane %v5066_v31, %v8722_v46  ;;  %v2013_v31 = vunpack.c.h.s8.bf16 %v9066_v49 }
 0x4d4   : > { %4837 = vmatprep.subr.bf16.mxu0 %v1886_v47  ;;  %5009 = vmatprep.subr.bf16.mxu1 %v1888_v48  ;;  %v1981_v47 = vunpack.c.h.s8.bf16 %v1037_v25  ;;  %v1983_v48 = vunpack.c.h.s8.bf16 %v1039_v26 }
 0x4d7   : > { %4838 = vmatpush1.bf16.msra.mxu0 %v1885_v59  ;;  %5010 = vmatpush1.bf16.msra.mxu1 %v1887_v60  ;;  %v5220_v59 = vrot.slane %v5182_v37, %v8712_v40  ;;  %v5228_v60 = vrot.slane %v5182_v37, %v8715_v41 }
 0x4d8   : > { %4850 = vmatprep.subr.bf16.mxu0 %v1902_v61  ;;  %5022 = vmatprep.subr.bf16.mxu1 %v1904_v62  ;;  %v1998_v61 = vunpack.c.l.s8.bf16 %v9058_v38 }
 0x4da   : > { %4840 = vmatmul.mubr.bf16.vlgmr.msra.gmra.mrb[12].mxu0 %v7691_v7  ;;  %5012 = vmatmul.mubr.bf16.vlgmr.msra.gmra.mrb[12].mxu1 %v7691_v7  ;;  %v1997_v7 = vunpack.c.l.s8.bf16 %v9066_v49 }
 0x4db   : > { %4851 = vmatpush1.bf16.msra.mxu0 %v1901_v1  ;;  %5023 = vmatpush1.bf16.msra.mxu1 %v1903_v2  ;;  %v5232_v1 = vrot.slane %v5182_v37, %v8722_v46  ;;  %v2000_v2 = vunpack.c.l.s8.bf16 %v1056_v43 }
 0x4dc   : > { %4852 = vmatprep.subr.bf16.mxu0 %v1918_v3  ;;  %5024 = vmatprep.subr.bf16.mxu1 %v1920_v4 }
 0x4dd   : > { %4882 = vmatprep.mubr.bf16.mxu0 %v7692_v14  ;;  %5054 = vmatprep.mubr.bf16.mxu1 %v7692_v14  ;;  %v2016_v14 = vunpack.c.h.s8.bf16 %v1056_v43 }
 0x4df   : > { %4853 = vmatpush1.bf16.msra.mxu0 %v1917_v8  ;;  %5025 = vmatpush1.bf16.msra.mxu1 %v1919_v9  ;;  %v1999_v8 = vunpack.c.l.s8.bf16 %v9069_v50 }
 0x4e0   : > { %4854 = vmatprep.subr.bf16.mxu0 %v1934_v10  ;;  %5026 = vmatprep.subr.bf16.mxu1 %v1936_v11 }
 0x4e3   : > { %4855 = vmatpush1.bf16.msra.mxu0 %v1933_v15  ;;  %5027 = vmatpush1.bf16.msra.mxu1 %v1935_v16 }
 0x4e4   : > { %4856 = vmatprep.subr.bf16.mxu0 %v1950_v17  ;;  %5028 = vmatprep.subr.bf16.mxu1 %v1952_v18 }
 0x4e7   : > { %4857 = vmatpush1.bf16.msra.mxu0 %v1949_v21  ;;  %5029 = vmatpush1.bf16.msra.mxu1 %v1951_v22  ;;  %v1070_v21 = vld [vmem:[%s8387_s12 + $0xe68] sm:$0xff]  ;;  %v1072_v22 = vld [vmem:[%s8387_s12 + $0xe78] sm:$0xff] }
 0x4e8   : > { %4858 = vmatprep.subr.bf16.mxu0 %v1966_v23  ;;  %5030 = vmatprep.subr.bf16.mxu1 %v1968_v24  ;;  %v2030_v38 = vunpack.c.l.s8.bf16 %v1070_v21 }
 0x4eb   : > { %4859 = vmatpush1.bf16.msra.mxu0 %v1965_v27  ;;  %5031 = vmatpush1.bf16.msra.mxu1 %v1967_v28 }
 0x4ec   : > { %4860 = vmatprep.subr.bf16.mxu0 %v1982_v32  ;;  %5032 = vmatprep.subr.bf16.mxu1 %v1984_v36  ;;  %v2015_v32 = vunpack.c.h.s8.bf16 %v9069_v50 }
 0x4ed   : > { %v4540_v62 = vpop.f32.mrb[8].mxu0  ;;  %v4712_v63 = vpop.f32.mrb[8].mxu1 }
 0x4ee   : > { %v5157_v3 = vmul.f32 %v5104_v39, %v4540_v62  ;;  %v5159_v4 = vmul.f32 %v5112_v42, %v4712_v63  ;;  %v4542_v5 = vpop.f32.mrb[9].mxu0  ;;  %v4714_v6 = vpop.f32.mrb[9].mxu1 }
 0x4ef   : > { %v5158_v9 = vmul.f32 %v5108_v44, %v4542_v5  ;;  %v5160_v10 = vmul.f32 %v5116_v33, %v4714_v6  ;;  %v4544_v11 = vpop.f32.mrb[10].mxu0  ;;  %v4716_v12 = vpop.f32.mrb[10].mxu1  ;;  %4861 = vmatpush1.bf16.msra.mxu0 %v1981_v47  ;;  %5033 = vmatpush1.bf16.msra.mxu1 %v1983_v48  ;;  %v1071_v48 = vld [vmem:[%s8387_s12 + $0xe70] sm:$0xff]  ;;  %v1086_v5 = vld [vmem:[%s8387_s12 + $0xee8] sm:$0xff]  ;;  %v1088_v6 = vld [vmem:[%s8387_s12 + $0xef8] sm:$0xff] }
 0x4f0   : > { %v5273_v15 = vadd.f32 %v5220_v59, %v5157_v3  ;;  %v5275_v16 = vadd.f32 %v5228_v60, %v5159_v4  ;;  %v5173_v17 = vmul.f32 %v5104_v39, %v4544_v11  ;;  %v5175_v18 = vmul.f32 %v5112_v42, %v4716_v12  ;;  %v4546_v19 = vpop.f32.mrb[11].mxu0  ;;  %v4718_v20 = vpop.f32.mrb[11].mxu1  ;;  %4862 = vmatprep.subr.bf16.mxu0 %v1998_v61  ;;  %v1085_v11 = vld [vmem:[%s8387_s12 + $0xee0] sm:$0xff]  ;;  %v1087_v12 = vld [vmem:[%s8387_s12 + $0xef0] sm:$0xff] }
 0x4f1   : > { %v5274_v23 = vadd.f32 %v5224_v0, %v5158_v9  ;;  %v5276_v24 = vadd.f32 %v5232_v1, %v5160_v10  ;;  %v5174_v25 = vmul.f32 %v5108_v44, %v4546_v19  ;;  %v5176_v26 = vmul.f32 %v5116_v33, %v4718_v20  ;;  %5034 = vmatprep.subr.bf16.mxu1 %v2000_v2  ;;  %v1069_v33 = vld [vmem:[%s8387_s12 + $0xe60] sm:$0xff] }
 0x4f2   : > { %v5289_v27 = vadd.f32 %v5220_v59, %v5173_v17  ;;  %v5291_v28 = vadd.f32 %v5228_v60, %v5175_v18  ;;  %v2032_v39 = vunpack.c.l.s8.bf16 %v1072_v22  ;;  %v5305_v42 = vmax.f32 %v5273_v15, 0.0  ;;  %v1102_v17 = vld [vmem:[%s8387_s12 + $0xf68] sm:$0xff]  ;;  %v1104_v18 = vld [vmem:[%s8387_s12 + $0xf78] sm:$0xff] }
 0x4f3   : > { %v5290_v36 = vadd.f32 %v5224_v0, %v5174_v25  ;;  %v5292_v37 = vadd.f32 %v5232_v1, %v5176_v26  ;;  %4863 = vmatpush1.bf16.msra.mxu0 %v1997_v7  ;;  %5035 = vmatpush1.bf16.msra.mxu1 %v1999_v8  ;;  %v5307_v43 = vmax.f32 %v5275_v16, 0.0  ;;  %v5306_v59 = vmax.f32 %v5274_v23, 0.0  ;;  %v1101_v23 = vld [vmem:[%s8387_s12 + $0xf60] sm:$0xff] }
 0x4f4   : > { %v5321_v47 = vmax.f32 %v5289_v27, 0.0  ;;  %v5323_v44 = vmax.f32 %v5291_v28, 0.0  ;;  %4864 = vmatprep.subr.bf16.mxu0 %v2014_v13  ;;  %5036 = vmatprep.subr.bf16.mxu1 %v2016_v14  ;;  %v5308_v60 = vmax.f32 %v5276_v24, 0.0  ;;  %v2029_v1 = vunpack.c.l.s8.bf16 %v1069_v33  ;;  %v1103_v24 = vld [vmem:[%s8387_s12 + $0xf70] sm:$0xff] }
 0x4f5   : > { %v5322_v49 = vmax.f32 %v5290_v36, 0.0  ;;  %v5324_v50 = vmax.f32 %v5292_v37, 0.0  ;;  %v2031_v2 = vunpack.c.l.s8.bf16 %v1071_v48  ;;  %v2046_v3 = vunpack.c.h.s8.bf16 %v1070_v21 }
 0x4f6   : > { %v9085_v61 = vpack.c.bf16 %v5321_v47, %v5305_v42  ;;  %v9087_v62 = vpack.c.bf16 %v5323_v44, %v5307_v43  ;;  %v2048_v4 = vunpack.c.h.s8.bf16 %v1072_v22  ;;  %v2045_v7 = vunpack.c.h.s8.bf16 %v1069_v33  ;;  %v1117_v42 = vld [vmem:[%s8387_s12 + $0xfe0] sm:$0xff]  ;;  %v1119_v43 = vld [vmem:[%s8387_s12 + $0xff0] sm:$0xff] }
 0x4f7   : > { %v9089_v63 = vpack.c.bf16 %v5322_v49, %v5306_v59  ;;  %v9091_v0 = vpack.c.bf16 %v5324_v50, %v5308_v60  ;;  %4865 = vmatpush1.bf16.msra.mxu0 %v2013_v31  ;;  %5037 = vmatpush1.bf16.msra.mxu1 %v2015_v32  ;;  %v2047_v8 = vunpack.c.h.s8.bf16 %v1071_v48  ;;  %v2062_v9 = vunpack.c.l.s8.bf16 %v1086_v5  ;;  %v1118_v31 = vld [vmem:[%s8387_s12 + $0xfe8] sm:$0xff]  ;;  %v1120_v32 = vld [vmem:[%s8387_s12 + $0xff8] sm:$0xff]  ;;  %s9922_s12 = sld [smem:[#allocation21_spill]] }
 0x4f8   : > { %4866 = vmatprep.subr.bf16.mxu0 %v2030_v38  ;;  %5038 = vmatprep.subr.bf16.mxu1 %v2032_v39  ;;  %v2064_v10 = vunpack.c.l.s8.bf16 %v1088_v6  ;;  %v2061_v13 = vunpack.c.l.s8.bf16 %v1085_v11  ;;  %v2063_v14 = vunpack.c.l.s8.bf16 %v1087_v12  ;;  %v2078_v15 = vunpack.c.h.s8.bf16 %v1086_v5  ;;  %v2146_v59 = vld [vmem:[%s8403_s19 + $0x8] sm:$0xff]  ;;  %v2148_v60 = vld [vmem:[%s8403_s19 + $0x18] sm:$0xff] }
 0x4f9   : > { %v2080_v16 = vunpack.c.h.s8.bf16 %v1088_v6  ;;  %v2077_v19 = vunpack.c.h.s8.bf16 %v1085_v11  ;;  %v2079_v20 = vunpack.c.h.s8.bf16 %v1087_v12  ;;  %v2094_v21 = vunpack.c.l.s8.bf16 %v1102_v17  ;;  %v2156_v11 = vld [vmem:[%s8403_s19 + $0x58] sm:$0xff] }
 0x4fa   : > { %v2096_v22 = vunpack.c.l.s8.bf16 %v1104_v18  ;;  %v2093_v25 = vunpack.c.l.s8.bf16 %v1101_v23  ;;  %v2095_v26 = vunpack.c.l.s8.bf16 %v1103_v24  ;;  %v2110_v27 = vunpack.c.h.s8.bf16 %v1102_v17  ;;  %v2155_v17 = vld [vmem:[%s8403_s19 + $0x50] sm:$0xff] }
 0x4fb   : > { %4867 = vmatpush1.bf16.msra.mxu0 %v2029_v1  ;;  %5039 = vmatpush1.bf16.msra.mxu1 %v2031_v2  ;;  %v2112_v28 = vunpack.c.h.s8.bf16 %v1104_v18  ;;  %v2109_v36 = vunpack.c.h.s8.bf16 %v1101_v23  ;;  %v2111_v37 = vunpack.c.h.s8.bf16 %v1103_v24  ;;  %v2126_v38 = vunpack.c.l.s8.bf16 %v1118_v31  ;;  %v2164_v23 = vld [vmem:[%s8403_s19 + $0x98] sm:$0xff] }
 0x4fc   : > { %4868 = vmatprep.subr.bf16.mxu0 %v2046_v3  ;;  %5040 = vmatprep.subr.bf16.mxu1 %v2048_v4  ;;  %v2128_v39 = vunpack.c.l.s8.bf16 %v1120_v32  ;;  %v2125_v47 = vunpack.c.l.s8.bf16 %v1117_v42  ;;  %v2127_v44 = vunpack.c.l.s8.bf16 %v1119_v43  ;;  %v2142_v33 = vunpack.c.h.s8.bf16 %v1118_v31  ;;  %v2145_v3 = vld [vmem:[%s8403_s19] sm:$0xff]  ;;  %v2147_v4 = vld [vmem:[%s8403_s19 + $0x10] sm:$0xff] }
 0x4fd   : > { %v2144_v48 = vunpack.c.h.s8.bf16 %v1120_v32  ;;  %v2141_v49 = vunpack.c.h.s8.bf16 %v1117_v42  ;;  %v2143_v50 = vunpack.c.h.s8.bf16 %v1119_v43  ;;  %v2658_v1 = vunpack.c.l.s8.bf16 %v2146_v59  ;;  %v2163_v31 = vld [vmem:[%s8403_s19 + $0x90] sm:$0xff]  ;;  %v2172_v42 = vld [vmem:[%s8403_s19 + $0xd8] sm:$0xff]  ;;  %p6769_p4 = scmp.eq.s32.totalorder %s9922_s12, 1 }
 0x4fe   : > { %v2660_v2 = vunpack.c.l.s8.bf16 %v2148_v60  ;;  %v2657_v5 = vunpack.c.l.s8.bf16 %v2145_v3  ;;  %v2659_v6 = vunpack.c.l.s8.bf16 %v2147_v4  ;;  %v2665_v12 = vunpack.c.h.s8.bf16 %v2145_v3  ;;  %v2180_v3 = vld [vmem:[%s8403_s19 + $0x118] sm:$0xff] }
 0x4ff   : > { %4869 = vmatpush1.bf16.msra.mxu0 %v2045_v7  ;;  %5041 = vmatpush1.bf16.msra.mxu1 %v2047_v8  ;;  %v2666_v7 = vunpack.c.h.s8.bf16 %v2146_v59  ;;  %v2668_v8 = vunpack.c.h.s8.bf16 %v2148_v60  ;;  %v2171_v59 = vld [vmem:[%s8403_s19 + $0xd0] sm:$0xff] }
 0x500   : > { %4870 = vmatprep.subr.bf16.mxu0 %v2062_v9  ;;  %5042 = vmatprep.subr.bf16.mxu1 %v2064_v10  ;;  %v2154_v9 = vld [vmem:[%s8403_s19 + $0x48] sm:$0xff]  ;;  %v7693_v10 = vld [vmem:[#allocation2 + $0x30] sm:$0xff] }
 0x503   : > { %4871 = vmatpush1.bf16.msra.mxu0 %v2061_v13  ;;  %5043 = vmatpush1.bf16.msra.mxu1 %v2063_v14  ;;  %v2667_v13 = vunpack.c.h.s8.bf16 %v2147_v4  ;;  %v2674_v14 = vunpack.c.l.s8.bf16 %v2154_v9 }
 0x504   : > { %4872 = vmatprep.subr.bf16.mxu0 %v2078_v15  ;;  %5044 = vmatprep.subr.bf16.mxu1 %v2080_v16  ;;  %v2153_v15 = vld [vmem:[%s8403_s19 + $0x40] sm:$0xff]  ;;  %v2676_v16 = vunpack.c.l.s8.bf16 %v2156_v11 }
 0x505   : > { %v2673_v18 = vunpack.c.l.s8.bf16 %v2153_v15  ;;  %v2681_v24 = vunpack.c.h.s8.bf16 %v2153_v15  ;;  %v2188_v15 = vld [vmem:[%s8403_s19 + $0x158] sm:$0xff] }
 0x507   : > { %4873 = vmatpush1.bf16.msra.mxu0 %v2077_v19  ;;  %5045 = vmatpush1.bf16.msra.mxu1 %v2079_v20  ;;  %v2675_v19 = vunpack.c.l.s8.bf16 %v2155_v17  ;;  %v2682_v20 = vunpack.c.h.s8.bf16 %v2154_v9  ;;  %v2179_v9 = vld [vmem:[%s8403_s19 + $0x110] sm:$0xff] }
 0x508   : > { %4874 = vmatprep.subr.bf16.mxu0 %v2094_v21  ;;  %5046 = vmatprep.subr.bf16.mxu1 %v2096_v22  ;;  %v2684_v21 = vunpack.c.h.s8.bf16 %v2156_v11  ;;  %v2162_v22 = vld [vmem:[%s8403_s19 + $0x88] sm:$0xff]  ;;  %v2723_v11 = vunpack.c.l.s8.bf16 %v2179_v9 }
 0x50b   : > { %4875 = vmatpush1.bf16.msra.mxu0 %v2093_v25  ;;  %5047 = vmatpush1.bf16.msra.mxu1 %v2095_v26  ;;  %v2683_v25 = vunpack.c.h.s8.bf16 %v2155_v17  ;;  %v2690_v26 = vunpack.c.l.s8.bf16 %v2162_v22  ;;  %v2731_v17 = vunpack.c.h.s8.bf16 %v2179_v9 }
 0x50c   : > { %4876 = vmatprep.subr.bf16.mxu0 %v2110_v27  ;;  %5048 = vmatprep.subr.bf16.mxu1 %v2112_v28  ;;  %v2161_v27 = vld [vmem:[%s8403_s19 + $0x80] sm:$0xff]  ;;  %v2692_v28 = vunpack.c.l.s8.bf16 %v2164_v23 }
 0x50d   : > { %v2689_v32 = vunpack.c.l.s8.bf16 %v2161_v27  ;;  %v2697_v43 = vunpack.c.h.s8.bf16 %v2161_v27  ;;  %v2196_v27 = vld [vmem:[%s8403_s19 + $0x198] sm:$0xff] }
 0x50f   : > { %4877 = vmatpush1.bf16.msra.mxu0 %v2109_v36  ;;  %5049 = vmatpush1.bf16.msra.mxu1 %v2111_v37  ;;  %v2691_v36 = vunpack.c.l.s8.bf16 %v2163_v31  ;;  %v2698_v37 = vunpack.c.h.s8.bf16 %v2162_v22 }
 0x510   : > { %4878 = vmatprep.subr.bf16.mxu0 %v2126_v38  ;;  %5050 = vmatprep.subr.bf16.mxu1 %v2128_v39  ;;  %v2700_v38 = vunpack.c.h.s8.bf16 %v2164_v23  ;;  %v2170_v39 = vld [vmem:[%s8403_s19 + $0xc8] sm:$0xff] }
 0x513   : > { %4879 = vmatpush1.bf16.msra.mxu0 %v2125_v47  ;;  %5051 = vmatpush1.bf16.msra.mxu1 %v2127_v44  ;;  %v2699_v47 = vunpack.c.h.s8.bf16 %v2163_v31  ;;  %v2706_v44 = vunpack.c.l.s8.bf16 %v2170_v39 }
 0x514   : > { %4880 = vmatprep.subr.bf16.mxu0 %v2142_v33  ;;  %5052 = vmatprep.subr.bf16.mxu1 %v2144_v48  ;;  %v2169_v33 = vld [vmem:[%s8403_s19 + $0xc0] sm:$0xff]  ;;  %v2708_v48 = vunpack.c.l.s8.bf16 %v2172_v42 }
 0x515   : > { %v2705_v60 = vunpack.c.l.s8.bf16 %v2169_v33  ;;  %v2713_v4 = vunpack.c.h.s8.bf16 %v2169_v33  ;;  %v2204_v33 = vld [vmem:[%s8403_s19 + $0x1d8] sm:$0xff] }
 0x517   : > { %4881 = vmatpush1.bf16.msra.mxu0 %v2141_v49  ;;  %5053 = vmatpush1.bf16.msra.mxu1 %v2143_v50  ;;  %v2707_v49 = vunpack.c.l.s8.bf16 %v2171_v59  ;;  %v2714_v50 = vunpack.c.h.s8.bf16 %v2170_v39 }
 0x518   : > { %5361 = vmatprep.subr.bf16.mxu0 %v2658_v1  ;;  %5705 = vmatprep.subr.bf16.mxu1 %v2660_v2  ;;  %v2716_v1 = vunpack.c.h.s8.bf16 %v2172_v42  ;;  %v2178_v2 = vld [vmem:[%s8403_s19 + $0x108] sm:$0xff] }
 0x51a   : > { %4883 = vmatmul.mubr.bf16.vlgmr.msra.gmra.mrb[12].mxu0 %v7693_v10  ;;  %5055 = vmatmul.mubr.bf16.vlgmr.msra.gmra.mrb[12].mxu1 %v7693_v10 }
 0x51b   : > { %5362 = vmatpush1.bf16.msra.mxu0 %v2657_v5  ;;  %5393 = vmatprep.mubr.bf16.mxu0 %v8757_v53  ;;  %v2715_v5 = vunpack.c.h.s8.bf16 %v2171_v59 }
 0x51c   : > { %5706 = vmatpush1.bf16.msra.mxu1 %v2659_v6  ;;  %5737 = vmatprep.mubr.bf16.mxu1 %v8757_v53  ;;  %v2722_v6 = vunpack.c.l.s8.bf16 %v2178_v2 }
 0x51d   : > { %5363 = vmatprep.subr.bf16.mxu0 %v2666_v7  ;;  %5707 = vmatprep.subr.bf16.mxu1 %v2668_v8  ;;  %v2177_v7 = vld [vmem:[%s8403_s19 + $0x100] sm:$0xff]  ;;  %v2724_v8 = vunpack.c.l.s8.bf16 %v2180_v3 }
 0x51e   : > { %v2721_v10 = vunpack.c.l.s8.bf16 %v2177_v7 }
 0x51f   : > { %5364 = vmatpush1.bf16.msra.mxu0 %v2665_v12  ;;  %v2730_v12 = vunpack.c.h.s8.bf16 %v2178_v2 }
 0x520   : > { %5708 = vmatpush1.bf16.msra.mxu1 %v2667_v13  ;;  %5365 = vmatprep.subr.bf16.mxu0 %v2674_v14  ;;  %v2732_v13 = vunpack.c.h.s8.bf16 %v2180_v3  ;;  %v2186_v14 = vld [vmem:[%s8403_s19 + $0x148] sm:$0xff] }
 0x521   : > { %5709 = vmatprep.subr.bf16.mxu1 %v2676_v16  ;;  %v2729_v16 = vunpack.c.h.s8.bf16 %v2177_v7  ;;  %v2212_v7 = vld [vmem:[%s8403_s19 + $0x218] sm:$0xff] }
 0x523   : > { %5366 = vmatpush1.bf16.msra.mxu0 %v2673_v18  ;;  %v2738_v18 = vunpack.c.l.s8.bf16 %v2186_v14 }
 0x524   : > { %5710 = vmatpush1.bf16.msra.mxu1 %v2675_v19  ;;  %5367 = vmatprep.subr.bf16.mxu0 %v2682_v20  ;;  %v2185_v19 = vld [vmem:[%s8403_s19 + $0x140] sm:$0xff]  ;;  %v2740_v20 = vunpack.c.l.s8.bf16 %v2188_v15 }
 0x525   : > { %5711 = vmatprep.subr.bf16.mxu1 %v2684_v21  ;;  %v2187_v21 = vld [vmem:[%s8403_s19 + $0x150] sm:$0xff]  ;;  %v2737_v22 = vunpack.c.l.s8.bf16 %v2185_v19 }
 0x526   : > { %v2739_v23 = vunpack.c.l.s8.bf16 %v2187_v21  ;;  %v2747_v31 = vunpack.c.h.s8.bf16 %v2187_v21 }
 0x527   : > { %5368 = vmatpush1.bf16.msra.mxu0 %v2681_v24  ;;  %v2746_v24 = vunpack.c.h.s8.bf16 %v2186_v14 }
 0x528   : > { %5712 = vmatpush1.bf16.msra.mxu1 %v2683_v25  ;;  %5369 = vmatprep.subr.bf16.mxu0 %v2690_v26  ;;  %v2748_v25 = vunpack.c.h.s8.bf16 %v2188_v15  ;;  %v2194_v26 = vld [vmem:[%s8403_s19 + $0x188] sm:$0xff] }
 0x529   : > { %5713 = vmatprep.subr.bf16.mxu1 %v2692_v28  ;;  %v2745_v28 = vunpack.c.h.s8.bf16 %v2185_v19  ;;  %v2220_v19 = vld [vmem:[%s8403_s19 + $0x258] sm:$0xff] }
 0x52b   : > { %5370 = vmatpush1.bf16.msra.mxu0 %v2689_v32  ;;  %v2754_v32 = vunpack.c.l.s8.bf16 %v2194_v26 }
 0x52c   : > { %5714 = vmatpush1.bf16.msra.mxu1 %v2691_v36  ;;  %5371 = vmatprep.subr.bf16.mxu0 %v2698_v37  ;;  %v2193_v36 = vld [vmem:[%s8403_s19 + $0x180] sm:$0xff]  ;;  %v2756_v37 = vunpack.c.l.s8.bf16 %v2196_v27 }
 0x52d   : > { %5715 = vmatprep.subr.bf16.mxu1 %v2700_v38  ;;  %v2195_v38 = vld [vmem:[%s8403_s19 + $0x190] sm:$0xff]  ;;  %v2753_v39 = vunpack.c.l.s8.bf16 %v2193_v36 }
 0x52e   : > { %v2755_v42 = vunpack.c.l.s8.bf16 %v2195_v38  ;;  %v2763_v59 = vunpack.c.h.s8.bf16 %v2195_v38 }
 0x52f   : > { %5372 = vmatpush1.bf16.msra.mxu0 %v2697_v43  ;;  %v2762_v43 = vunpack.c.h.s8.bf16 %v2194_v26 }
 0x530   : > { %5716 = vmatpush1.bf16.msra.mxu1 %v2699_v47  ;;  %5373 = vmatprep.subr.bf16.mxu0 %v2706_v44  ;;  %v2764_v47 = vunpack.c.h.s8.bf16 %v2196_v27  ;;  %v2202_v44 = vld [vmem:[%s8403_s19 + $0x1c8] sm:$0xff] }
 0x531   : > { %5717 = vmatprep.subr.bf16.mxu1 %v2708_v48  ;;  %v2761_v48 = vunpack.c.h.s8.bf16 %v2193_v36  ;;  %v2228_v36 = vld [vmem:[%s8403_s19 + $0x298] sm:$0xff] }
 0x533   : > { %5374 = vmatpush1.bf16.msra.mxu0 %v2705_v60  ;;  %v2770_v60 = vunpack.c.l.s8.bf16 %v2202_v44 }
 0x534   : > { %5718 = vmatpush1.bf16.msra.mxu1 %v2707_v49  ;;  %5375 = vmatprep.subr.bf16.mxu0 %v2714_v50  ;;  %v2201_v49 = vld [vmem:[%s8403_s19 + $0x1c0] sm:$0xff]  ;;  %v2772_v50 = vunpack.c.l.s8.bf16 %v2204_v33 }
 0x535   : > { %5719 = vmatprep.subr.bf16.mxu1 %v2716_v1  ;;  %v2203_v1 = vld [vmem:[%s8403_s19 + $0x1d0] sm:$0xff]  ;;  %v2769_v2 = vunpack.c.l.s8.bf16 %v2201_v49 }
 0x536   : > { %v2771_v3 = vunpack.c.l.s8.bf16 %v2203_v1  ;;  %v2779_v9 = vunpack.c.h.s8.bf16 %v2203_v1 }
 0x537   : > { %5376 = vmatpush1.bf16.msra.mxu0 %v2713_v4  ;;  %v2778_v4 = vunpack.c.h.s8.bf16 %v2202_v44 }
 0x538   : > { %5720 = vmatpush1.bf16.msra.mxu1 %v2715_v5  ;;  %5377 = vmatprep.subr.bf16.mxu0 %v2722_v6  ;;  %v2780_v5 = vunpack.c.h.s8.bf16 %v2204_v33  ;;  %v2210_v6 = vld [vmem:[%s8403_s19 + $0x208] sm:$0xff] }
 0x539   : > { %5721 = vmatprep.subr.bf16.mxu1 %v2724_v8  ;;  %v2777_v8 = vunpack.c.h.s8.bf16 %v2201_v49  ;;  %v2236_v49 = vld [vmem:[%s8403_s19 + $0x2d8] sm:$0xff] }
 0x53b   : > { %5378 = vmatpush1.bf16.msra.mxu0 %v2721_v10  ;;  %v2786_v10 = vunpack.c.l.s8.bf16 %v2210_v6 }
 0x53c   : > { %5722 = vmatpush1.bf16.msra.mxu1 %v2723_v11  ;;  %5379 = vmatprep.subr.bf16.mxu0 %v2730_v12  ;;  %v2209_v11 = vld [vmem:[%s8403_s19 + $0x200] sm:$0xff]  ;;  %v2788_v12 = vunpack.c.l.s8.bf16 %v2212_v7 }
 0x53d   : > { %5723 = vmatprep.subr.bf16.mxu1 %v2732_v13  ;;  %v2211_v13 = vld [vmem:[%s8403_s19 + $0x210] sm:$0xff]  ;;  %v2785_v14 = vunpack.c.l.s8.bf16 %v2209_v11 }
 0x53e   : > { %v2787_v15 = vunpack.c.l.s8.bf16 %v2211_v13  ;;  %v2795_v21 = vunpack.c.h.s8.bf16 %v2211_v13 }
 0x53f   : > { %5380 = vmatpush1.bf16.msra.mxu0 %v2729_v16  ;;  %v2794_v16 = vunpack.c.h.s8.bf16 %v2210_v6 }
 0x540   : > { %5724 = vmatpush1.bf16.msra.mxu1 %v2731_v17  ;;  %5381 = vmatprep.subr.bf16.mxu0 %v2738_v18  ;;  %v2218_v17 = vld [vmem:[%s8403_s19 + $0x248] sm:$0xff]  ;;  %v2796_v18 = vunpack.c.h.s8.bf16 %v2212_v7 }
 0x541   : > { %5725 = vmatprep.subr.bf16.mxu1 %v2740_v20  ;;  %v2793_v20 = vunpack.c.h.s8.bf16 %v2209_v11  ;;  %v2244_v11 = vld [vmem:[%s8403_s19 + $0x318] sm:$0xff] }
 0x543   : > { %5382 = vmatpush1.bf16.msra.mxu0 %v2737_v22  ;;  %v2802_v22 = vunpack.c.l.s8.bf16 %v2218_v17 }
 0x544   : > { %5726 = vmatpush1.bf16.msra.mxu1 %v2739_v23  ;;  %5383 = vmatprep.subr.bf16.mxu0 %v2746_v24  ;;  %v2217_v23 = vld [vmem:[%s8403_s19 + $0x240] sm:$0xff]  ;;  %v2804_v24 = vunpack.c.l.s8.bf16 %v2220_v19 }
 0x545   : > { %5727 = vmatprep.subr.bf16.mxu1 %v2748_v25  ;;  %v2219_v25 = vld [vmem:[%s8403_s19 + $0x250] sm:$0xff]  ;;  %v2801_v26 = vunpack.c.l.s8.bf16 %v2217_v23 }
 0x546   : > { %v2803_v27 = vunpack.c.l.s8.bf16 %v2219_v25  ;;  %v2811_v38 = vunpack.c.h.s8.bf16 %v2219_v25 }
 0x547   : > { %5384 = vmatpush1.bf16.msra.mxu0 %v2745_v28  ;;  %v2810_v28 = vunpack.c.h.s8.bf16 %v2218_v17  ;;  %v2243_v17 = vld [vmem:[%s8403_s19 + $0x310] sm:$0xff] }
 0x548   : > { %5728 = vmatpush1.bf16.msra.mxu1 %v2747_v31  ;;  %5385 = vmatprep.subr.bf16.mxu0 %v2754_v32  ;;  %v2812_v31 = vunpack.c.h.s8.bf16 %v2220_v19  ;;  %v2226_v32 = vld [vmem:[%s8403_s19 + $0x288] sm:$0xff]  ;;  %v2851_v19 = vunpack.c.l.s8.bf16 %v2243_v17  ;;  %v2859_v25 = vunpack.c.h.s8.bf16 %v2243_v17 }
 0x549   : > { %5729 = vmatprep.subr.bf16.mxu1 %v2756_v37  ;;  %v2809_v37 = vunpack.c.h.s8.bf16 %v2217_v23  ;;  %v2252_v23 = vld [vmem:[%s8403_s19 + $0x358] sm:$0xff] }
 0x54b   : > { %5386 = vmatpush1.bf16.msra.mxu0 %v2753_v39  ;;  %v2818_v39 = vunpack.c.l.s8.bf16 %v2226_v32 }
 0x54c   : > { %5730 = vmatpush1.bf16.msra.mxu1 %v2755_v42  ;;  %5387 = vmatprep.subr.bf16.mxu0 %v2762_v43  ;;  %v2225_v42 = vld [vmem:[%s8403_s19 + $0x280] sm:$0xff]  ;;  %v2820_v43 = vunpack.c.l.s8.bf16 %v2228_v36 }
 0x54d   : > { %5731 = vmatprep.subr.bf16.mxu1 %v2764_v47  ;;  %v2227_v47 = vld [vmem:[%s8403_s19 + $0x290] sm:$0xff]  ;;  %v2817_v44 = vunpack.c.l.s8.bf16 %v2225_v42 }
 0x54e   : > { %v2819_v33 = vunpack.c.l.s8.bf16 %v2227_v47  ;;  %v2827_v1 = vunpack.c.h.s8.bf16 %v2227_v47 }
 0x54f   : > { %5388 = vmatpush1.bf16.msra.mxu0 %v2761_v48  ;;  %v2826_v48 = vunpack.c.h.s8.bf16 %v2226_v32 }
 0x550   : > { %5732 = vmatpush1.bf16.msra.mxu1 %v2763_v59  ;;  %5389 = vmatprep.subr.bf16.mxu0 %v2770_v60  ;;  %v2828_v59 = vunpack.c.h.s8.bf16 %v2228_v36  ;;  %v2234_v60 = vld [vmem:[%s8403_s19 + $0x2c8] sm:$0xff] }
 0x551   : > { %5733 = vmatprep.subr.bf16.mxu1 %v2772_v50  ;;  %v2825_v50 = vunpack.c.h.s8.bf16 %v2225_v42  ;;  %v2260_v42 = vld [vmem:[%s8403_s19 + $0x398] sm:$0xff] }
 0x553   : > { %5390 = vmatpush1.bf16.msra.mxu0 %v2769_v2  ;;  %v2834_v2 = vunpack.c.l.s8.bf16 %v2234_v60 }
 0x554   : > { %5734 = vmatpush1.bf16.msra.mxu1 %v2771_v3  ;;  %5391 = vmatprep.subr.bf16.mxu0 %v2778_v4  ;;  %v2233_v3 = vld [vmem:[%s8403_s19 + $0x2c0] sm:$0xff]  ;;  %v2836_v4 = vunpack.c.l.s8.bf16 %v2236_v49 }
 0x555   : > { %5735 = vmatprep.subr.bf16.mxu1 %v2780_v5  ;;  %v2235_v5 = vld [vmem:[%s8403_s19 + $0x2d0] sm:$0xff]  ;;  %v2833_v6 = vunpack.c.l.s8.bf16 %v2233_v3 }
 0x556   : > { %v2835_v7 = vunpack.c.l.s8.bf16 %v2235_v5  ;;  %v2843_v13 = vunpack.c.h.s8.bf16 %v2235_v5 }
 0x557   : > { %5392 = vmatpush1.bf16.msra.mxu0 %v2777_v8  ;;  %v2842_v8 = vunpack.c.h.s8.bf16 %v2234_v60 }
 0x558   : > { %5736 = vmatpush1.bf16.msra.mxu1 %v2779_v9  ;;  %5404 = vmatprep.subr.bf16.mxu0 %v2786_v10  ;;  %v2844_v9 = vunpack.c.h.s8.bf16 %v2236_v49  ;;  %v2242_v10 = vld [vmem:[%s8403_s19 + $0x308] sm:$0xff] }
 0x559   : > { %5748 = vmatprep.subr.bf16.mxu1 %v2788_v12  ;;  %v2841_v12 = vunpack.c.h.s8.bf16 %v2233_v3  ;;  %v2268_v3 = vld [vmem:[%s8403_s19 + $0x3d8] sm:$0xff] }
 0x55a   : > { %5394 = vmatmul.mubr.bf16.vlgmr.msra.gmra.mrb[16].mxu0 %v8753_v51 }
 0x55b   : > { %5738 = vmatmul.mubr.bf16.vlgmr.msra.gmra.mrb[16].mxu1 %v8753_v51  ;;  %5405 = vmatpush1.bf16.msra.mxu0 %v2785_v14  ;;  %v2850_v14 = vunpack.c.l.s8.bf16 %v2242_v10 }
 0x55c   : > { %5436 = vmatprep.mubr.bf16.mxu0 %v8759_v54  ;;  %5749 = vmatpush1.bf16.msra.mxu1 %v2787_v15  ;;  %v2241_v15 = vld [vmem:[%s8403_s19 + $0x300] sm:$0xff] }
 0x55d   : > { %5780 = vmatprep.mubr.bf16.mxu1 %v8759_v54  ;;  %5406 = vmatprep.subr.bf16.mxu0 %v2794_v16  ;;  %v2852_v16 = vunpack.c.l.s8.bf16 %v2244_v11 }
 0x55e   : > { %5750 = vmatprep.subr.bf16.mxu1 %v2796_v18  ;;  %v2849_v18 = vunpack.c.l.s8.bf16 %v2241_v15 }
 0x55f   : > { %5407 = vmatpush1.bf16.msra.mxu0 %v2793_v20  ;;  %v2858_v20 = vunpack.c.h.s8.bf16 %v2242_v10 }
 0x560   : > { %5751 = vmatpush1.bf16.msra.mxu1 %v2795_v21  ;;  %5408 = vmatprep.subr.bf16.mxu0 %v2802_v22  ;;  %v2860_v21 = vunpack.c.h.s8.bf16 %v2244_v11  ;;  %v2250_v22 = vld [vmem:[%s8403_s19 + $0x348] sm:$0xff] }
 0x561   : > { %5752 = vmatprep.subr.bf16.mxu1 %v2804_v24  ;;  %v2857_v24 = vunpack.c.h.s8.bf16 %v2241_v15  ;;  %v2276_v15 = vld [vmem:[%s8403_s19 + $0x418] sm:$0xff] }
 0x563   : > { %5409 = vmatpush1.bf16.msra.mxu0 %v2801_v26  ;;  %v2866_v26 = vunpack.c.l.s8.bf16 %v2250_v22 }
 0x564   : > { %5753 = vmatpush1.bf16.msra.mxu1 %v2803_v27  ;;  %5410 = vmatprep.subr.bf16.mxu0 %v2810_v28  ;;  %v2249_v27 = vld [vmem:[%s8403_s19 + $0x340] sm:$0xff]  ;;  %v2868_v28 = vunpack.c.l.s8.bf16 %v2252_v23 }
 0x565   : > { %5754 = vmatprep.subr.bf16.mxu1 %v2812_v31  ;;  %v2251_v31 = vld [vmem:[%s8403_s19 + $0x350] sm:$0xff]  ;;  %v2865_v32 = vunpack.c.l.s8.bf16 %v2249_v27 }
 0x566   : > { %v2867_v36 = vunpack.c.l.s8.bf16 %v2251_v31  ;;  %v2875_v47 = vunpack.c.h.s8.bf16 %v2251_v31 }
 0x567   : > { %5411 = vmatpush1.bf16.msra.mxu0 %v2809_v37  ;;  %v2874_v37 = vunpack.c.h.s8.bf16 %v2250_v22 }
 0x568   : > { %5755 = vmatpush1.bf16.msra.mxu1 %v2811_v38  ;;  %5412 = vmatprep.subr.bf16.mxu0 %v2818_v39  ;;  %v2876_v38 = vunpack.c.h.s8.bf16 %v2252_v23  ;;  %v2258_v39 = vld [vmem:[%s8403_s19 + $0x388] sm:$0xff] }
 0x569   : > { %5756 = vmatprep.subr.bf16.mxu1 %v2820_v43  ;;  %v2873_v43 = vunpack.c.h.s8.bf16 %v2249_v27  ;;  %v2284_v27 = vld [vmem:[%s8403_s19 + $0x458] sm:$0xff] }
 0x56b   : > { %5413 = vmatpush1.bf16.msra.mxu0 %v2817_v44  ;;  %v2882_v44 = vunpack.c.l.s8.bf16 %v2258_v39 }
 0x56c   : > { %5757 = vmatpush1.bf16.msra.mxu1 %v2819_v33  ;;  %5414 = vmatprep.subr.bf16.mxu0 %v2826_v48  ;;  %v2257_v33 = vld [vmem:[%s8403_s19 + $0x380] sm:$0xff]  ;;  %v2884_v48 = vunpack.c.l.s8.bf16 %v2260_v42 }
 0x56d   : > { %5758 = vmatprep.subr.bf16.mxu1 %v2828_v59  ;;  %v2259_v59 = vld [vmem:[%s8403_s19 + $0x390] sm:$0xff]  ;;  %v2881_v60 = vunpack.c.l.s8.bf16 %v2257_v33 }
 0x56e   : > { %v2883_v49 = vunpack.c.l.s8.bf16 %v2259_v59  ;;  %v2891_v5 = vunpack.c.h.s8.bf16 %v2259_v59 }
 0x56f   : > { %5415 = vmatpush1.bf16.msra.mxu0 %v2825_v50  ;;  %v2890_v50 = vunpack.c.h.s8.bf16 %v2258_v39 }
 0x570   : > { %5759 = vmatpush1.bf16.msra.mxu1 %v2827_v1  ;;  %5416 = vmatprep.subr.bf16.mxu0 %v2834_v2  ;;  %v2892_v1 = vunpack.c.h.s8.bf16 %v2260_v42  ;;  %v2266_v2 = vld [vmem:[%s8403_s19 + $0x3c8] sm:$0xff] }
 0x571   : > { %5760 = vmatprep.subr.bf16.mxu1 %v2836_v4  ;;  %v2889_v4 = vunpack.c.h.s8.bf16 %v2257_v33  ;;  %v2292_v33 = vld [vmem:[%s8403_s19 + $0x498] sm:$0xff] }
 0x573   : > { %5417 = vmatpush1.bf16.msra.mxu0 %v2833_v6  ;;  %v2898_v6 = vunpack.c.l.s8.bf16 %v2266_v2 }
 0x574   : > { %5761 = vmatpush1.bf16.msra.mxu1 %v2835_v7  ;;  %5418 = vmatprep.subr.bf16.mxu0 %v2842_v8  ;;  %v2265_v7 = vld [vmem:[%s8403_s19 + $0x3c0] sm:$0xff]  ;;  %v2900_v8 = vunpack.c.l.s8.bf16 %v2268_v3 }
 0x575   : > { %5762 = vmatprep.subr.bf16.mxu1 %v2844_v9  ;;  %v2267_v9 = vld [vmem:[%s8403_s19 + $0x3d0] sm:$0xff]  ;;  %v2897_v10 = vunpack.c.l.s8.bf16 %v2265_v7 }
 0x576   : > { %v2899_v11 = vunpack.c.l.s8.bf16 %v2267_v9  ;;  %v2907_v17 = vunpack.c.h.s8.bf16 %v2267_v9 }
 0x577   : > { %5419 = vmatpush1.bf16.msra.mxu0 %v2841_v12  ;;  %v2906_v12 = vunpack.c.h.s8.bf16 %v2266_v2 }
 0x578   : > { %5763 = vmatpush1.bf16.msra.mxu1 %v2843_v13  ;;  %5420 = vmatprep.subr.bf16.mxu0 %v2850_v14  ;;  %v2908_v13 = vunpack.c.h.s8.bf16 %v2268_v3  ;;  %v2274_v14 = vld [vmem:[%s8403_s19 + $0x408] sm:$0xff] }
 0x579   : > { %5764 = vmatprep.subr.bf16.mxu1 %v2852_v16  ;;  %v2905_v16 = vunpack.c.h.s8.bf16 %v2265_v7  ;;  %v2300_v7 = vld [vmem:[%s8403_s19 + $0x4d8] sm:$0xff] }
 0x57b   : > { %5421 = vmatpush1.bf16.msra.mxu0 %v2849_v18  ;;  %v2914_v18 = vunpack.c.l.s8.bf16 %v2274_v14 }
 0x57c   : > { %5765 = vmatpush1.bf16.msra.mxu1 %v2851_v19  ;;  %5422 = vmatprep.subr.bf16.mxu0 %v2858_v20  ;;  %v2273_v19 = vld [vmem:[%s8403_s19 + $0x400] sm:$0xff]  ;;  %v2916_v20 = vunpack.c.l.s8.bf16 %v2276_v15 }
 0x57d   : > { %5766 = vmatprep.subr.bf16.mxu1 %v2860_v21  ;;  %v2275_v21 = vld [vmem:[%s8403_s19 + $0x410] sm:$0xff]  ;;  %v2913_v22 = vunpack.c.l.s8.bf16 %v2273_v19 }
 0x57e   : > { %v2915_v23 = vunpack.c.l.s8.bf16 %v2275_v21  ;;  %v2923_v31 = vunpack.c.h.s8.bf16 %v2275_v21 }
 0x57f   : > { %5423 = vmatpush1.bf16.msra.mxu0 %v2857_v24  ;;  %v2922_v24 = vunpack.c.h.s8.bf16 %v2274_v14 }
 0x580   : > { %5767 = vmatpush1.bf16.msra.mxu1 %v2859_v25  ;;  %5424 = vmatprep.subr.bf16.mxu0 %v2866_v26  ;;  %v2282_v25 = vld [vmem:[%s8403_s19 + $0x448] sm:$0xff]  ;;  %v2924_v26 = vunpack.c.h.s8.bf16 %v2276_v15 }
 0x581   : > { %5768 = vmatprep.subr.bf16.mxu1 %v2868_v28  ;;  %v2921_v28 = vunpack.c.h.s8.bf16 %v2273_v19  ;;  %v2308_v19 = vld [vmem:[%s8403_s19 + $0x518] sm:$0xff] }
 0x583   : > { %5425 = vmatpush1.bf16.msra.mxu0 %v2865_v32  ;;  %v2930_v32 = vunpack.c.l.s8.bf16 %v2282_v25 }
 0x584   : > { %5769 = vmatpush1.bf16.msra.mxu1 %v2867_v36  ;;  %5426 = vmatprep.subr.bf16.mxu0 %v2874_v37  ;;  %v2281_v36 = vld [vmem:[%s8403_s19 + $0x440] sm:$0xff]  ;;  %v2932_v37 = vunpack.c.l.s8.bf16 %v2284_v27 }
 0x585   : > { %5770 = vmatprep.subr.bf16.mxu1 %v2876_v38  ;;  %v2283_v38 = vld [vmem:[%s8403_s19 + $0x450] sm:$0xff]  ;;  %v2929_v39 = vunpack.c.l.s8.bf16 %v2281_v36 }
 0x586   : > { %v2931_v42 = vunpack.c.l.s8.bf16 %v2283_v38  ;;  %v2939_v59 = vunpack.c.h.s8.bf16 %v2283_v38 }
 0x587   : > { %5427 = vmatpush1.bf16.msra.mxu0 %v2873_v43  ;;  %v2938_v43 = vunpack.c.h.s8.bf16 %v2282_v25  ;;  %v2307_v25 = vld [vmem:[%s8403_s19 + $0x510] sm:$0xff] }
 0x588   : > { %5771 = vmatpush1.bf16.msra.mxu1 %v2875_v47  ;;  %5428 = vmatprep.subr.bf16.mxu0 %v2882_v44  ;;  %v2940_v47 = vunpack.c.h.s8.bf16 %v2284_v27  ;;  %v2290_v44 = vld [vmem:[%s8403_s19 + $0x488] sm:$0xff]  ;;  %v2979_v27 = vunpack.c.l.s8.bf16 %v2307_v25  ;;  %v2987_v38 = vunpack.c.h.s8.bf16 %v2307_v25 }
 0x589   : > { %5772 = vmatprep.subr.bf16.mxu1 %v2884_v48  ;;  %v2937_v48 = vunpack.c.h.s8.bf16 %v2281_v36  ;;  %v2316_v36 = vld [vmem:[%s8403_s19 + $0x558] sm:$0xff] }
 0x58b   : > { %5429 = vmatpush1.bf16.msra.mxu0 %v2881_v60  ;;  %v2946_v60 = vunpack.c.l.s8.bf16 %v2290_v44 }
 0x58c   : > { %5773 = vmatpush1.bf16.msra.mxu1 %v2883_v49  ;;  %5430 = vmatprep.subr.bf16.mxu0 %v2890_v50  ;;  %v2289_v49 = vld [vmem:[%s8403_s19 + $0x480] sm:$0xff]  ;;  %v2948_v50 = vunpack.c.l.s8.bf16 %v2292_v33 }
 0x58d   : > { %5774 = vmatprep.subr.bf16.mxu1 %v2892_v1  ;;  %v2291_v1 = vld [vmem:[%s8403_s19 + $0x490] sm:$0xff]  ;;  %v2945_v2 = vunpack.c.l.s8.bf16 %v2289_v49 }
 0x58e   : > { %v2947_v3 = vunpack.c.l.s8.bf16 %v2291_v1  ;;  %v2955_v9 = vunpack.c.h.s8.bf16 %v2291_v1 }
 0x58f   : > { %5431 = vmatpush1.bf16.msra.mxu0 %v2889_v4  ;;  %v2954_v4 = vunpack.c.h.s8.bf16 %v2290_v44 }
 0x590   : > { %5775 = vmatpush1.bf16.msra.mxu1 %v2891_v5  ;;  %5432 = vmatprep.subr.bf16.mxu0 %v2898_v6  ;;  %v2956_v5 = vunpack.c.h.s8.bf16 %v2292_v33  ;;  %v2298_v6 = vld [vmem:[%s8403_s19 + $0x4c8] sm:$0xff] }
 0x591   : > { %5776 = vmatprep.subr.bf16.mxu1 %v2900_v8  ;;  %v2953_v8 = vunpack.c.h.s8.bf16 %v2289_v49  ;;  %v2324_v49 = vld [vmem:[%s8403_s19 + $0x598] sm:$0xff] }
 0x593   : > { %5433 = vmatpush1.bf16.msra.mxu0 %v2897_v10  ;;  %v2962_v10 = vunpack.c.l.s8.bf16 %v2298_v6 }
 0x594   : > { %5777 = vmatpush1.bf16.msra.mxu1 %v2899_v11  ;;  %5434 = vmatprep.subr.bf16.mxu0 %v2906_v12  ;;  %v2297_v11 = vld [vmem:[%s8403_s19 + $0x4c0] sm:$0xff]  ;;  %v2964_v12 = vunpack.c.l.s8.bf16 %v2300_v7 }
 0x595   : > { %5778 = vmatprep.subr.bf16.mxu1 %v2908_v13  ;;  %v2299_v13 = vld [vmem:[%s8403_s19 + $0x4d0] sm:$0xff]  ;;  %v2961_v14 = vunpack.c.l.s8.bf16 %v2297_v11 }
 0x596   : > { %v2963_v15 = vunpack.c.l.s8.bf16 %v2299_v13  ;;  %v2971_v21 = vunpack.c.h.s8.bf16 %v2299_v13 }
 0x597   : > { %5435 = vmatpush1.bf16.msra.mxu0 %v2905_v16  ;;  %v2970_v16 = vunpack.c.h.s8.bf16 %v2298_v6 }
 0x598   : > { %5779 = vmatpush1.bf16.msra.mxu1 %v2907_v17  ;;  %5447 = vmatprep.subr.bf16.mxu0 %v2914_v18  ;;  %v2972_v17 = vunpack.c.h.s8.bf16 %v2300_v7  ;;  %v2306_v18 = vld [vmem:[%s8403_s19 + $0x508] sm:$0xff] }
 0x599   : > { %5791 = vmatprep.subr.bf16.mxu1 %v2916_v20  ;;  %v2969_v20 = vunpack.c.h.s8.bf16 %v2297_v11  ;;  %v2332_v11 = vld [vmem:[%s8403_s19 + $0x5d8] sm:$0xff] }
 0x59a   : > { %5437 = vmatmul.mubr.bf16.vlgmr.msra.gmra.mrb[16].mxu0 %v8755_v52 }
 0x59b   : > { %5781 = vmatmul.mubr.bf16.vlgmr.msra.gmra.mrb[16].mxu1 %v8755_v52  ;;  %5448 = vmatpush1.bf16.msra.mxu0 %v2913_v22  ;;  %v2978_v22 = vunpack.c.l.s8.bf16 %v2306_v18 }
 0x59c   : > { %5479 = vmatprep.mubr.bf16.mxu0 %v8931_v57  ;;  %5792 = vmatpush1.bf16.msra.mxu1 %v2915_v23  ;;  %v2305_v23 = vld [vmem:[%s8403_s19 + $0x500] sm:$0xff] }
 0x59d   : > { %5823 = vmatprep.mubr.bf16.mxu1 %v8931_v57  ;;  %5449 = vmatprep.subr.bf16.mxu0 %v2922_v24  ;;  %v2980_v24 = vunpack.c.l.s8.bf16 %v2308_v19 }
 0x59e   : > { %5793 = vmatprep.subr.bf16.mxu1 %v2924_v26  ;;  %v2977_v26 = vunpack.c.l.s8.bf16 %v2305_v23 }
 0x59f   : > { %5450 = vmatpush1.bf16.msra.mxu0 %v2921_v28  ;;  %v2986_v28 = vunpack.c.h.s8.bf16 %v2306_v18 }
 0x5a0   : > { %5794 = vmatpush1.bf16.msra.mxu1 %v2923_v31  ;;  %5451 = vmatprep.subr.bf16.mxu0 %v2930_v32  ;;  %v2988_v31 = vunpack.c.h.s8.bf16 %v2308_v19  ;;  %v2314_v32 = vld [vmem:[%s8403_s19 + $0x548] sm:$0xff] }
 0x5a1   : > { %5795 = vmatprep.subr.bf16.mxu1 %v2932_v37  ;;  %v2985_v37 = vunpack.c.h.s8.bf16 %v2305_v23  ;;  %v2340_v23 = vld [vmem:[%s8403_s19 + $0x618] sm:$0xff] }
 0x5a3   : > { %5452 = vmatpush1.bf16.msra.mxu0 %v2929_v39  ;;  %v2994_v39 = vunpack.c.l.s8.bf16 %v2314_v32 }
 0x5a4   : > { %5796 = vmatpush1.bf16.msra.mxu1 %v2931_v42  ;;  %5453 = vmatprep.subr.bf16.mxu0 %v2938_v43  ;;  %v2313_v42 = vld [vmem:[%s8403_s19 + $0x540] sm:$0xff]  ;;  %v2996_v43 = vunpack.c.l.s8.bf16 %v2316_v36 }
 0x5a5   : > { %5797 = vmatprep.subr.bf16.mxu1 %v2940_v47  ;;  %v2315_v47 = vld [vmem:[%s8403_s19 + $0x550] sm:$0xff]  ;;  %v2993_v44 = vunpack.c.l.s8.bf16 %v2313_v42 }
 0x5a6   : > { %v2995_v33 = vunpack.c.l.s8.bf16 %v2315_v47  ;;  %v3003_v1 = vunpack.c.h.s8.bf16 %v2315_v47 }
 0x5a7   : > { %5454 = vmatpush1.bf16.msra.mxu0 %v2937_v48  ;;  %v3002_v48 = vunpack.c.h.s8.bf16 %v2314_v32 }
 0x5a8   : > { %5798 = vmatpush1.bf16.msra.mxu1 %v2939_v59  ;;  %5455 = vmatprep.subr.bf16.mxu0 %v2946_v60  ;;  %v3004_v59 = vunpack.c.h.s8.bf16 %v2316_v36  ;;  %v2322_v60 = vld [vmem:[%s8403_s19 + $0x588] sm:$0xff] }
 0x5a9   : > { %5799 = vmatprep.subr.bf16.mxu1 %v2948_v50  ;;  %v3001_v50 = vunpack.c.h.s8.bf16 %v2313_v42  ;;  %v2348_v42 = vld [vmem:[%s8403_s19 + $0x658] sm:$0xff] }
 0x5ab   : > { %5456 = vmatpush1.bf16.msra.mxu0 %v2945_v2  ;;  %v3010_v2 = vunpack.c.l.s8.bf16 %v2322_v60 }
 0x5ac   : > { %5800 = vmatpush1.bf16.msra.mxu1 %v2947_v3  ;;  %5457 = vmatprep.subr.bf16.mxu0 %v2954_v4  ;;  %v2321_v3 = vld [vmem:[%s8403_s19 + $0x580] sm:$0xff]  ;;  %v3012_v4 = vunpack.c.l.s8.bf16 %v2324_v49 }
 0x5ad   : > { %5801 = vmatprep.subr.bf16.mxu1 %v2956_v5  ;;  %v2323_v5 = vld [vmem:[%s8403_s19 + $0x590] sm:$0xff]  ;;  %v3009_v6 = vunpack.c.l.s8.bf16 %v2321_v3 }
 0x5ae   : > { %v3011_v7 = vunpack.c.l.s8.bf16 %v2323_v5  ;;  %v3019_v13 = vunpack.c.h.s8.bf16 %v2323_v5 }
 0x5af   : > { %5458 = vmatpush1.bf16.msra.mxu0 %v2953_v8  ;;  %v3018_v8 = vunpack.c.h.s8.bf16 %v2322_v60 }
 0x5b0   : > { %5802 = vmatpush1.bf16.msra.mxu1 %v2955_v9  ;;  %5459 = vmatprep.subr.bf16.mxu0 %v2962_v10  ;;  %v3020_v9 = vunpack.c.h.s8.bf16 %v2324_v49  ;;  %v2330_v10 = vld [vmem:[%s8403_s19 + $0x5c8] sm:$0xff] }
 0x5b1   : > { %5803 = vmatprep.subr.bf16.mxu1 %v2964_v12  ;;  %v3017_v12 = vunpack.c.h.s8.bf16 %v2321_v3  ;;  %v2356_v3 = vld [vmem:[%s8403_s19 + $0x698] sm:$0xff] }
 0x5b3   : > { %5460 = vmatpush1.bf16.msra.mxu0 %v2961_v14  ;;  %v3026_v14 = vunpack.c.l.s8.bf16 %v2330_v10 }
 0x5b4   : > { %5804 = vmatpush1.bf16.msra.mxu1 %v2963_v15  ;;  %5461 = vmatprep.subr.bf16.mxu0 %v2970_v16  ;;  %v2329_v15 = vld [vmem:[%s8403_s19 + $0x5c0] sm:$0xff]  ;;  %v3028_v16 = vunpack.c.l.s8.bf16 %v2332_v11 }
 0x5b5   : > { %5805 = vmatprep.subr.bf16.mxu1 %v2972_v17  ;;  %v2331_v17 = vld [vmem:[%s8403_s19 + $0x5d0] sm:$0xff]  ;;  %v3025_v18 = vunpack.c.l.s8.bf16 %v2329_v15 }
 0x5b6   : > { %v3027_v19 = vunpack.c.l.s8.bf16 %v2331_v17  ;;  %v3035_v25 = vunpack.c.h.s8.bf16 %v2331_v17  ;;  %v9231_v17 = vld [vmem:[%s8403_s19 + $0x6c8] sm:$0xff] }
 0x5b7   : > { %5462 = vmatpush1.bf16.msra.mxu0 %v2969_v20  ;;  %v3034_v20 = vunpack.c.h.s8.bf16 %v2330_v10 }
 0x5b8   : > { %5806 = vmatpush1.bf16.msra.mxu1 %v2971_v21  ;;  %5463 = vmatprep.subr.bf16.mxu0 %v2978_v22  ;;  %v3036_v21 = vunpack.c.h.s8.bf16 %v2332_v11  ;;  %v2338_v22 = vld [vmem:[%s8403_s19 + $0x608] sm:$0xff] }
 0x5b9   : > { %5807 = vmatprep.subr.bf16.mxu1 %v2980_v24  ;;  %v3033_v24 = vunpack.c.h.s8.bf16 %v2329_v15 }
 0x5bb   : > { %5464 = vmatpush1.bf16.msra.mxu0 %v2977_v26  ;;  %v3042_v26 = vunpack.c.l.s8.bf16 %v2338_v22 }
 0x5bc   : > { %5808 = vmatpush1.bf16.msra.mxu1 %v2979_v27  ;;  %5465 = vmatprep.subr.bf16.mxu0 %v2986_v28  ;;  %v2337_v27 = vld [vmem:[%s8403_s19 + $0x600] sm:$0xff]  ;;  %v3044_v28 = vunpack.c.l.s8.bf16 %v2340_v23 }
 0x5bd   : > { %5809 = vmatprep.subr.bf16.mxu1 %v2988_v31  ;;  %v2339_v31 = vld [vmem:[%s8403_s19 + $0x610] sm:$0xff]  ;;  %v3041_v32 = vunpack.c.l.s8.bf16 %v2337_v27 }
 0x5be   : > { %v3043_v36 = vunpack.c.l.s8.bf16 %v2339_v31  ;;  %v3051_v47 = vunpack.c.h.s8.bf16 %v2339_v31 }
 0x5bf   : > { %5466 = vmatpush1.bf16.msra.mxu0 %v2985_v37  ;;  %v3050_v37 = vunpack.c.h.s8.bf16 %v2338_v22  ;;  %v9239_v22 = vld [vmem:[%s8403_s19 + $0x6c0] sm:$0xff] }
 0x5c0   : > { %5810 = vmatpush1.bf16.msra.mxu1 %v2987_v38  ;;  %5467 = vmatprep.subr.bf16.mxu0 %v2994_v39  ;;  %v2346_v38 = vld [vmem:[%s8403_s19 + $0x648] sm:$0xff]  ;;  %v3052_v39 = vunpack.c.h.s8.bf16 %v2340_v23  ;;  %v9242_v23 = vld [vmem:[%s8403_s19 + $0x6d0] sm:$0xff] }
 0x5c1   : > { %5811 = vmatprep.subr.bf16.mxu1 %v2996_v43  ;;  %v3049_v43 = vunpack.c.h.s8.bf16 %v2337_v27 }
 0x5c3   : > { %5468 = vmatpush1.bf16.msra.mxu0 %v2993_v44  ;;  %v3058_v44 = vunpack.c.l.s8.bf16 %v2346_v38 }
 0x5c4   : > { %5812 = vmatpush1.bf16.msra.mxu1 %v2995_v33  ;;  %5469 = vmatprep.subr.bf16.mxu0 %v3002_v48  ;;  %v2345_v33 = vld [vmem:[%s8403_s19 + $0x640] sm:$0xff]  ;;  %v3060_v48 = vunpack.c.l.s8.bf16 %v2348_v42 }
 0x5c5   : > { %5813 = vmatprep.subr.bf16.mxu1 %v3004_v59  ;;  %v2347_v59 = vld [vmem:[%s8403_s19 + $0x650] sm:$0xff]  ;;  %v3057_v60 = vunpack.c.l.s8.bf16 %v2345_v33 }
 0x5c6   : > { %v3059_v49 = vunpack.c.l.s8.bf16 %v2347_v59  ;;  %v3067_v5 = vunpack.c.h.s8.bf16 %v2347_v59 }
 0x5c7   : > { %5470 = vmatpush1.bf16.msra.mxu0 %v3001_v50  ;;  %v3066_v50 = vunpack.c.h.s8.bf16 %v2346_v38 }
 0x5c8   : > { %5814 = vmatpush1.bf16.msra.mxu1 %v3003_v1  ;;  %5471 = vmatprep.subr.bf16.mxu0 %v3010_v2  ;;  %v3068_v1 = vunpack.c.h.s8.bf16 %v2348_v42  ;;  %v2354_v2 = vld [vmem:[%s8403_s19 + $0x688] sm:$0xff] }
 0x5c9   : > { %5815 = vmatprep.subr.bf16.mxu1 %v3012_v4  ;;  %v3065_v4 = vunpack.c.h.s8.bf16 %v2345_v33  ;;  %v3091_v33 = vunpack.c.l.s8.bf16 %v9242_v23 }
 0x5cb   : > { %5472 = vmatpush1.bf16.msra.mxu0 %v3009_v6  ;;  %v3074_v6 = vunpack.c.l.s8.bf16 %v2354_v2 }
 0x5cc   : > { %5816 = vmatpush1.bf16.msra.mxu1 %v3011_v7  ;;  %5473 = vmatprep.subr.bf16.mxu0 %v3018_v8  ;;  %v2353_v7 = vld [vmem:[%s8403_s19 + $0x680] sm:$0xff]  ;;  %v3076_v8 = vunpack.c.l.s8.bf16 %v2356_v3 }
 0x5cd   : > { %5817 = vmatprep.subr.bf16.mxu1 %v3020_v9  ;;  %v2355_v9 = vld [vmem:[%s8403_s19 + $0x690] sm:$0xff]  ;;  %v3073_v10 = vunpack.c.l.s8.bf16 %v2353_v7 }
 0x5ce   : > { %v3075_v11 = vunpack.c.l.s8.bf16 %v2355_v9  ;;  %v3083_v27 = vunpack.c.h.s8.bf16 %v2355_v9  ;;  %v2372_v9 = vld [vmem:[%s8403_s19 + $0x718] sm:$0xff] }
 0x5cf   : > { %5474 = vmatpush1.bf16.msra.mxu0 %v3017_v12  ;;  %v3082_v12 = vunpack.c.h.s8.bf16 %v2354_v2 }
 0x5d0   : > { %5818 = vmatpush1.bf16.msra.mxu1 %v3019_v13  ;;  %5475 = vmatprep.subr.bf16.mxu0 %v3026_v14  ;;  %v3084_v13 = vunpack.c.h.s8.bf16 %v2356_v3  ;;  %v7694_v14 = vld [vmem:[%s8395_s22 + $0x8] sm:$0xff]  ;;  %s9923_s22 = sld [smem:[#allocation22_spill]] }
 0x5d1   : > { %5819 = vmatprep.subr.bf16.mxu1 %v3028_v16  ;;  %v5120_v15 = vrot.slane %v7694_v14, %v8882_v29  ;;  %v5128_v16 = vrot.slane %v7694_v14, %v8885_v30 }
 0x5d3   : > { %5476 = vmatpush1.bf16.msra.mxu0 %v3025_v18  ;;  %v9234_v18 = vld [vmem:[%s8403_s19 + $0x6d8] sm:$0xff] }
 0x5d4   : > { %5820 = vmatpush1.bf16.msra.mxu1 %v3027_v19  ;;  %5477 = vmatprep.subr.bf16.mxu0 %v3034_v20  ;;  %v5124_v19 = vrot.slane %v7694_v14, %v8888_v34  ;;  %v5132_v20 = vrot.slane %v7694_v14, %v8891_v35  ;;  %v3092_v38 = vunpack.c.l.s8.bf16 %v9234_v18 }
 0x5d5   : > { %5821 = vmatprep.subr.bf16.mxu1 %v3036_v21  ;;  %v3081_v21 = vunpack.c.h.s8.bf16 %v2353_v7 }
 0x5d6   : > { %p6770_p8 = scmp.ne.s32.totalorder %s9923_s22, 1 }
 0x5d7   : > { %5478 = vmatpush1.bf16.msra.mxu0 %v3033_v24  ;;  %v7695_v24 = vld [vmem:[%s8401_s30 + $0x8] sm:$0xff] }
 0x5d8   : > { %5822 = vmatpush1.bf16.msra.mxu1 %v3035_v25  ;;  %5490 = vmatprep.subr.bf16.mxu0 %v3042_v26  ;;  %v5236_v25 = vrot.slane %v7695_v24, %v8882_v29  ;;  %v5244_v26 = vrot.slane %v7695_v24, %v8885_v30  ;;  %p9719_p11 = pnand %p6770_p8, %p6769_p4 }
 0x5d9   : > { %5834 = vmatprep.subr.bf16.mxu1 %v3044_v28 }
 0x5da   : > { %5480 = vmatmul.mubr.bf16.vlgmr.msra.gmra.mrb[16].mxu0 %v8927_v55 }
 0x5db   : > { %5824 = vmatmul.mubr.bf16.vlgmr.msra.gmra.mrb[16].mxu1 %v8927_v55  ;;  %5491 = vmatpush1.bf16.msra.mxu0 %v3041_v32  ;;  %v5240_v32 = vrot.slane %v7695_v24, %v8888_v34 }
 0x5dc   : > { %5522 = vmatprep.mubr.bf16.mxu0 %v8933_v58  ;;  %5835 = vmatpush1.bf16.msra.mxu1 %v3043_v36  ;;  %v5248_v36 = vrot.slane %v7695_v24, %v8891_v35 }
 0x5dd   : > { %5866 = vmatprep.mubr.bf16.mxu1 %v8933_v58  ;;  %5492 = vmatprep.subr.bf16.mxu0 %v3050_v37  ;;  %v3090_v37 = vunpack.c.l.s8.bf16 %v9231_v17 }
 0x5de   : > { %5836 = vmatprep.subr.bf16.mxu1 %v3052_v39 }
 0x5df   : > { %5493 = vmatpush1.bf16.msra.mxu0 %v3049_v43 }
 0x5e0   : > { %5837 = vmatpush1.bf16.msra.mxu1 %v3051_v47  ;;  %5494 = vmatprep.subr.bf16.mxu0 %v3058_v44  ;;  %v3089_v44 = vunpack.c.l.s8.bf16 %v9239_v22 }
 0x5e1   : > { %5838 = vmatprep.subr.bf16.mxu1 %v3060_v48 }
 0x5e3   : > { %5495 = vmatpush1.bf16.msra.mxu0 %v3057_v60 }
 0x5e4   : > { %5839 = vmatpush1.bf16.msra.mxu1 %v3059_v49  ;;  %5496 = vmatprep.subr.bf16.mxu0 %v3066_v50  ;;  %v3098_v50 = vunpack.c.h.s8.bf16 %v9231_v17  ;;  %v3097_v17 = vunpack.c.h.s8.bf16 %v9239_v22 }
 0x5e5   : > { %5840 = vmatprep.subr.bf16.mxu1 %v3068_v1  ;;  %v3100_v1 = vunpack.c.h.s8.bf16 %v9234_v18  ;;  %v3099_v18 = vunpack.c.h.s8.bf16 %v9242_v23  ;;  %v2371_v23 = vld [vmem:[%s8403_s19 + $0x710] sm:$0xff] }
 0x5e7   : > { %5497 = vmatpush1.bf16.msra.mxu0 %v3065_v4 }
 0x5e8   : > { %5841 = vmatpush1.bf16.msra.mxu1 %v3067_v5  ;;  %5498 = vmatprep.subr.bf16.mxu0 %v3074_v6 }
 0x5e9   : > { %5842 = vmatprep.subr.bf16.mxu1 %v3076_v8  ;;  %v2370_v8 = vld [vmem:[%s8403_s19 + $0x708] sm:$0xff] }
 0x5ea   : > { %v3106_v24 = vunpack.c.l.s8.bf16 %v2370_v8 }
 0x5eb   : > { %5499 = vmatpush1.bf16.msra.mxu0 %v3073_v10 }
 0x5ec   : > { %5843 = vmatpush1.bf16.msra.mxu1 %v3075_v11  ;;  %5500 = vmatprep.subr.bf16.mxu0 %v3082_v12 }
 0x5ed   : > { %v4884_v28 = vpop.f32.mrb[12].mxu0  ;;  %v5056_v31 = vpop.f32.mrb[12].mxu1  ;;  %5844 = vmatprep.subr.bf16.mxu1 %v3084_v13 }
 0x5ee   : > { %v5161_v39 = vmul.f32 %v5120_v15, %v4884_v28  ;;  %v5163_v42 = vmul.f32 %v5128_v16, %v5056_v31  ;;  %v4886_v43 = vpop.f32.mrb[13].mxu0  ;;  %v5058_v47 = vpop.f32.mrb[13].mxu1 }
 0x5ef   : > { %v5162_v48 = vmul.f32 %v5124_v19, %v4886_v43  ;;  %v5164_v59 = vmul.f32 %v5132_v20, %v5058_v47  ;;  %v4888_v60 = vpop.f32.mrb[14].mxu0  ;;  %v5060_v49 = vpop.f32.mrb[14].mxu1  ;;  %5501 = vmatpush1.bf16.msra.mxu0 %v3081_v21  ;;  %v3107_v47 = vunpack.c.l.s8.bf16 %v2371_v23 }
 0x5f0   : > { %v5277_v2 = vadd.f32 %v5236_v25, %v5161_v39  ;;  %v5279_v3 = vadd.f32 %v5244_v26, %v5163_v42  ;;  %v5177_v4 = vmul.f32 %v5120_v15, %v4888_v60  ;;  %v5179_v5 = vmul.f32 %v5128_v16, %v5060_v49  ;;  %5845 = vmatpush1.bf16.msra.mxu1 %v3083_v27  ;;  %v4890_v6 = vpop.f32.mrb[15].mxu0  ;;  %v5062_v7 = vpop.f32.mrb[15].mxu1 }
 0x5f1   : > { %v5278_v10 = vadd.f32 %v5240_v32, %v5162_v48  ;;  %v5280_v11 = vadd.f32 %v5248_v36, %v5164_v59  ;;  %v5178_v12 = vmul.f32 %v5124_v19, %v4890_v6  ;;  %v5180_v13 = vmul.f32 %v5132_v20, %v5062_v7  ;;  %5502 = vmatprep.subr.bf16.mxu0 %v3090_v37  ;;  %v2369_v20 = vld [vmem:[%s8403_s19 + $0x700] sm:$0xff]  ;;  %v2378_v48 = vld [vmem:[%s8403_s19 + $0x748] sm:$0xff]  ;;  %v2380_v59 = vld [vmem:[%s8403_s19 + $0x758] sm:$0xff] }
 0x5f2   : > { %v5293_v14 = vadd.f32 %v5236_v25, %v5177_v4  ;;  %v5295_v21 = vadd.f32 %v5244_v26, %v5179_v5  ;;  %5846 = vmatprep.subr.bf16.mxu1 %v3092_v38  ;;  %v3108_v27 = vunpack.c.l.s8.bf16 %v2372_v9  ;;  %v5309_v28 = vmax.f32 %v5277_v2, 0.0 }
 0x5f3   : > { %v5294_v15 = vadd.f32 %v5240_v32, %v5178_v12  ;;  %v5296_v16 = vadd.f32 %v5248_v36, %v5180_v13  ;;  %5503 = vmatpush1.bf16.msra.mxu0 %v3089_v44  ;;  %v5311_v31 = vmax.f32 %v5279_v3, 0.0  ;;  %v5310_v25 = vmax.f32 %v5278_v10, 0.0  ;;  %v2379_v3 = vld [vmem:[%s8403_s19 + $0x750] sm:$0xff]  ;;  %v2385_v13 = vld [vmem:[%s8403_s19 + $0x780] sm:$0xff] }
 0x5f4   : > { %v5325_v39 = vmax.f32 %v5293_v14, 0.0  ;;  %v5327_v19 = vmax.f32 %v5295_v21, 0.0  ;;  %5847 = vmatpush1.bf16.msra.mxu1 %v3091_v33  ;;  %5504 = vmatprep.subr.bf16.mxu0 %v3098_v50  ;;  %v5312_v26 = vmax.f32 %v5280_v11, 0.0  ;;  %v3105_v43 = vunpack.c.l.s8.bf16 %v2369_v20  ;;  %v2387_v21 = vld [vmem:[%s8403_s19 + $0x790] sm:$0xff] }
 0x5f5   : > { %v5326_v37 = vmax.f32 %v5294_v15, 0.0  ;;  %v5328_v22 = vmax.f32 %v5296_v16, 0.0  ;;  %5848 = vmatprep.subr.bf16.mxu1 %v3100_v1  ;;  %v3114_v44 = vunpack.c.h.s8.bf16 %v2370_v8  ;;  %v3116_v33 = vunpack.c.h.s8.bf16 %v2372_v9  ;;  %v2377_v1 = vld [vmem:[%s8403_s19 + $0x740] sm:$0xff]  ;;  %v2386_v8 = vld [vmem:[%s8403_s19 + $0x788] sm:$0xff]  ;;  %v2388_v9 = vld [vmem:[%s8403_s19 + $0x798] sm:$0xff] }
 0x5f6   : > { %v9261_v32 = vpack.c.bf16 %v5325_v39, %v5309_v28  ;;  %v9263_v36 = vpack.c.bf16 %v5327_v19, %v5311_v31  ;;  %v3113_v60 = vunpack.c.h.s8.bf16 %v2369_v20  ;;  %v3115_v49 = vunpack.c.h.s8.bf16 %v2371_v23  ;;  %v2393_v19 = vld [vmem:[%s8403_s19 + $0x7c0] sm:$0xff] }
 0x5f7   : > { %v9265_v38 = vpack.c.bf16 %v5326_v37, %v5310_v25  ;;  %v9267_v42 = vpack.c.bf16 %v5328_v22, %v5312_v26  ;;  %5505 = vmatpush1.bf16.msra.mxu0 %v3097_v17  ;;  %v3122_v50 = vunpack.c.l.s8.bf16 %v2378_v48  ;;  %v3124_v2 = vunpack.c.l.s8.bf16 %v2380_v59  ;;  %v2395_v25 = vld [vmem:[%s8403_s19 + $0x7d0] sm:$0xff] }
 0x5f8   : > { %5849 = vmatpush1.bf16.msra.mxu1 %v3099_v18  ;;  %5506 = vmatprep.subr.bf16.mxu0 %v3106_v24  ;;  %v3121_v4 = vunpack.c.l.s8.bf16 %v2377_v1  ;;  %v3123_v5 = vunpack.c.l.s8.bf16 %v2379_v3  ;;  %v3130_v6 = vunpack.c.h.s8.bf16 %v2378_v48  ;;  %v3132_v7 = vunpack.c.h.s8.bf16 %v2380_v59  ;;  %v2394_v24 = vld [vmem:[%s8403_s19 + $0x7c8] sm:$0xff]  ;;  %v2401_v59 = vld [vmem:[%s8403_s19 + $0x800] sm:$0xff] }
 0x5f9   : > { %5850 = vmatprep.subr.bf16.mxu1 %v3108_v27  ;;  %v3129_v10 = vunpack.c.h.s8.bf16 %v2377_v1  ;;  %v3131_v11 = vunpack.c.h.s8.bf16 %v2379_v3  ;;  %v3138_v12 = vunpack.c.l.s8.bf16 %v2386_v8  ;;  %v3140_v14 = vunpack.c.l.s8.bf16 %v2388_v9  ;;  %v2396_v27 = vld [vmem:[%s8403_s19 + $0x7d8] sm:$0xff]  ;;  %v2410_v3 = vld [vmem:[%s8403_s19 + $0x848] sm:$0xff] }
 0x5fa   : > { %v3137_v17 = vunpack.c.l.s8.bf16 %v2385_v13  ;;  %v3139_v18 = vunpack.c.l.s8.bf16 %v2387_v21  ;;  %v3146_v15 = vunpack.c.h.s8.bf16 %v2386_v8  ;;  %v3148_v16 = vunpack.c.h.s8.bf16 %v2388_v9  ;;  %v2409_v9 = vld [vmem:[%s8403_s19 + $0x840] sm:$0xff] }
 0x5fb   : > { %5507 = vmatpush1.bf16.msra.mxu0 %v3105_v43  ;;  %v3145_v28 = vunpack.c.h.s8.bf16 %v2385_v13  ;;  %v3147_v31 = vunpack.c.h.s8.bf16 %v2387_v21  ;;  %v3154_v39 = vunpack.c.l.s8.bf16 %v2394_v24  ;;  %v3156_v20 = vunpack.c.l.s8.bf16 %v2396_v27  ;;  %v2402_v43 = vld [vmem:[%s8403_s19 + $0x808] sm:$0xff] }
 0x5fc   : > { %5851 = vmatpush1.bf16.msra.mxu1 %v3107_v47  ;;  %5508 = vmatprep.subr.bf16.mxu0 %v3114_v44  ;;  %v3153_v26 = vunpack.c.l.s8.bf16 %v2393_v19  ;;  %v3155_v37 = vunpack.c.l.s8.bf16 %v2395_v25  ;;  %v3162_v22 = vunpack.c.h.s8.bf16 %v2394_v24  ;;  %v3164_v23 = vunpack.c.h.s8.bf16 %v2396_v27  ;;  %v2404_v47 = vld [vmem:[%s8403_s19 + $0x818] sm:$0xff]  ;;  %v2417_v27 = vld [vmem:[%s8403_s19 + $0x880] sm:$0xff] }
 0x5fd   : > { %5852 = vmatprep.subr.bf16.mxu1 %v3116_v33  ;;  %v3161_v44 = vunpack.c.h.s8.bf16 %v2393_v19  ;;  %v3163_v33 = vunpack.c.h.s8.bf16 %v2395_v25  ;;  %v3170_v48 = vunpack.c.l.s8.bf16 %v2402_v43  ;;  %v3186_v8 = vunpack.c.l.s8.bf16 %v2410_v3 }
 0x5ff   : > { %5509 = vmatpush1.bf16.msra.mxu0 %v3113_v60  ;;  %v3172_v60 = vunpack.c.l.s8.bf16 %v2404_v47 }
 0x600   : > { %5853 = vmatpush1.bf16.msra.mxu1 %v3115_v49  ;;  %5510 = vmatprep.subr.bf16.mxu0 %v3122_v50  ;;  %v2403_v49 = vld [vmem:[%s8403_s19 + $0x810] sm:$0xff]  ;;  %v3169_v50 = vunpack.c.l.s8.bf16 %v2401_v59 }
 0x601   : > { %5854 = vmatprep.subr.bf16.mxu1 %v3124_v2  ;;  %v3171_v1 = vunpack.c.l.s8.bf16 %v2403_v49  ;;  %v3178_v2 = vunpack.c.h.s8.bf16 %v2402_v43 }
 0x603   : > { %5511 = vmatpush1.bf16.msra.mxu0 %v3121_v4  ;;  %v3180_v4 = vunpack.c.h.s8.bf16 %v2404_v47  ;;  %v2425_v47 = vld [vmem:[%s8403_s19 + $0x8c0] sm:$0xff] }
 0x604   : > { %5855 = vmatpush1.bf16.msra.mxu1 %v3123_v5  ;;  %5512 = vmatprep.subr.bf16.mxu0 %v3130_v6  ;;  %v2412_v5 = vld [vmem:[%s8403_s19 + $0x858] sm:$0xff]  ;;  %v3177_v6 = vunpack.c.h.s8.bf16 %v2401_v59 }
 0x605   : > { %5856 = vmatprep.subr.bf16.mxu1 %v3132_v7  ;;  %v3179_v7 = vunpack.c.h.s8.bf16 %v2403_v49  ;;  %v3196_v21 = vunpack.c.h.s8.bf16 %v2412_v5 }
 0x607   : > { %5513 = vmatpush1.bf16.msra.mxu0 %v3129_v10  ;;  %v3188_v10 = vunpack.c.l.s8.bf16 %v2412_v5  ;;  %v2433_v5 = vld [vmem:[%s8403_s19 + $0x900] sm:$0xff] }
 0x608   : > { %5857 = vmatpush1.bf16.msra.mxu1 %v3131_v11  ;;  %5514 = vmatprep.subr.bf16.mxu0 %v3138_v12  ;;  %v2411_v11 = vld [vmem:[%s8403_s19 + $0x850] sm:$0xff]  ;;  %v3185_v12 = vunpack.c.l.s8.bf16 %v2409_v9 }
 0x609   : > { %5858 = vmatprep.subr.bf16.mxu1 %v3140_v14  ;;  %v3187_v13 = vunpack.c.l.s8.bf16 %v2411_v11  ;;  %v3194_v14 = vunpack.c.h.s8.bf16 %v2410_v3 }
 0x60b   : > { %5515 = vmatpush1.bf16.msra.mxu0 %v3137_v17  ;;  %v2418_v17 = vld [vmem:[%s8403_s19 + $0x888] sm:$0xff] }
 0x60c   : > { %5859 = vmatpush1.bf16.msra.mxu1 %v3139_v18  ;;  %5516 = vmatprep.subr.bf16.mxu0 %v3146_v15  ;;  %v2420_v18 = vld [vmem:[%s8403_s19 + $0x898] sm:$0xff]  ;;  %v3193_v15 = vunpack.c.h.s8.bf16 %v2409_v9  ;;  %v3202_v24 = vunpack.c.l.s8.bf16 %v2418_v17 }
 0x60d   : > { %5860 = vmatprep.subr.bf16.mxu1 %v3148_v16  ;;  %v3195_v16 = vunpack.c.h.s8.bf16 %v2411_v11  ;;  %v3212_v25 = vunpack.c.h.s8.bf16 %v2420_v18 }
 0x60f   : > { %5517 = vmatpush1.bf16.msra.mxu0 %v3145_v28  ;;  %v3204_v28 = vunpack.c.l.s8.bf16 %v2420_v18  ;;  %v2441_v18 = vld [vmem:[%s8403_s19 + $0x940] sm:$0xff] }
 0x610   : > { %5861 = vmatpush1.bf16.msra.mxu1 %v3147_v31  ;;  %5518 = vmatprep.subr.bf16.mxu0 %v3154_v39  ;;  %v2419_v31 = vld [vmem:[%s8403_s19 + $0x890] sm:$0xff]  ;;  %v3201_v39 = vunpack.c.l.s8.bf16 %v2417_v27 }
 0x611   : > { %5862 = vmatprep.subr.bf16.mxu1 %v3156_v20  ;;  %v3203_v19 = vunpack.c.l.s8.bf16 %v2419_v31  ;;  %v3210_v20 = vunpack.c.h.s8.bf16 %v2418_v17 }
 0x613   : > { %5519 = vmatpush1.bf16.msra.mxu0 %v3153_v26  ;;  %v2426_v26 = vld [vmem:[%s8403_s19 + $0x8c8] sm:$0xff] }
 0x614   : > { %5863 = vmatpush1.bf16.msra.mxu1 %v3155_v37  ;;  %5520 = vmatprep.subr.bf16.mxu0 %v3162_v22  ;;  %v2428_v37 = vld [vmem:[%s8403_s19 + $0x8d8] sm:$0xff]  ;;  %v3209_v22 = vunpack.c.h.s8.bf16 %v2417_v27  ;;  %v3218_v43 = vunpack.c.l.s8.bf16 %v2426_v26 }
 0x615   : > { %5864 = vmatprep.subr.bf16.mxu1 %v3164_v23  ;;  %v3211_v23 = vunpack.c.h.s8.bf16 %v2419_v31  ;;  %v3228_v49 = vunpack.c.h.s8.bf16 %v2428_v37 }
 0x617   : > { %5521 = vmatpush1.bf16.msra.mxu0 %v3161_v44  ;;  %v3220_v44 = vunpack.c.l.s8.bf16 %v2428_v37  ;;  %v2449_v37 = vld [vmem:[%s8403_s19 + $0x980] sm:$0xff] }
 0x618   : > { %5865 = vmatpush1.bf16.msra.mxu1 %v3163_v33  ;;  %5533 = vmatprep.subr.bf16.mxu0 %v3170_v48  ;;  %v2427_v33 = vld [vmem:[%s8403_s19 + $0x8d0] sm:$0xff]  ;;  %v3217_v48 = vunpack.c.l.s8.bf16 %v2425_v47 }
 0x619   : > { %5877 = vmatprep.subr.bf16.mxu1 %v3172_v60  ;;  %v3219_v59 = vunpack.c.l.s8.bf16 %v2427_v33  ;;  %v3226_v60 = vunpack.c.h.s8.bf16 %v2426_v26  ;;  %v3227_v3 = vunpack.c.h.s8.bf16 %v2427_v33 }
 0x61a   : > { %5523 = vmatmul.mubr.bf16.vlgmr.msra.gmra.mrb[16].mxu0 %v8929_v56 }
 0x61b   : > { %5867 = vmatmul.mubr.bf16.vlgmr.msra.gmra.mrb[16].mxu1 %v8929_v56  ;;  %5534 = vmatpush1.bf16.msra.mxu0 %v3169_v50  ;;  %v2434_v50 = vld [vmem:[%s8403_s19 + $0x908] sm:$0xff] }
 0x61c   : > { %5565 = vmatprep.mubr.bf16.mxu0 %v9089_v63  ;;  %5878 = vmatpush1.bf16.msra.mxu1 %v3171_v1  ;;  %v2436_v1 = vld [vmem:[%s8403_s19 + $0x918] sm:$0xff] }
 0x61d   : > { %5909 = vmatprep.mubr.bf16.mxu1 %v9089_v63  ;;  %5535 = vmatprep.subr.bf16.mxu0 %v3178_v2  ;;  %v3225_v2 = vunpack.c.h.s8.bf16 %v2425_v47  ;;  %v3244_v11 = vunpack.c.h.s8.bf16 %v2436_v1 }
 0x61e   : > { %5879 = vmatprep.subr.bf16.mxu1 %v3180_v4  ;;  %v3234_v4 = vunpack.c.l.s8.bf16 %v2434_v50 }
 0x61f   : > { %5536 = vmatpush1.bf16.msra.mxu0 %v3177_v6  ;;  %v3236_v6 = vunpack.c.l.s8.bf16 %v2436_v1  ;;  %v2457_v1 = vld [vmem:[%s8403_s19 + $0x9c0] sm:$0xff] }
 0x620   : > { %5880 = vmatpush1.bf16.msra.mxu1 %v3179_v7  ;;  %5537 = vmatprep.subr.bf16.mxu0 %v3186_v8  ;;  %v2435_v7 = vld [vmem:[%s8403_s19 + $0x910] sm:$0xff]  ;;  %v3233_v8 = vunpack.c.l.s8.bf16 %v2433_v5 }
 0x621   : > { %5881 = vmatprep.subr.bf16.mxu1 %v3188_v10  ;;  %v3235_v9 = vunpack.c.l.s8.bf16 %v2435_v7  ;;  %v3242_v10 = vunpack.c.h.s8.bf16 %v2434_v50 }
 0x623   : > { %5538 = vmatpush1.bf16.msra.mxu0 %v3185_v12  ;;  %v2442_v12 = vld [vmem:[%s8403_s19 + $0x948] sm:$0xff] }
 0x624   : > { %5882 = vmatpush1.bf16.msra.mxu1 %v3187_v13  ;;  %5539 = vmatprep.subr.bf16.mxu0 %v3194_v14  ;;  %v2444_v13 = vld [vmem:[%s8403_s19 + $0x958] sm:$0xff]  ;;  %v3241_v14 = vunpack.c.h.s8.bf16 %v2433_v5  ;;  %v3250_v17 = vunpack.c.l.s8.bf16 %v2442_v12 }
 0x625   : > { %5883 = vmatprep.subr.bf16.mxu1 %v3196_v21  ;;  %v3243_v21 = vunpack.c.h.s8.bf16 %v2435_v7  ;;  %v3260_v31 = vunpack.c.h.s8.bf16 %v2444_v13 }
 0x627   : > { %5540 = vmatpush1.bf16.msra.mxu0 %v3193_v15  ;;  %v3252_v15 = vunpack.c.l.s8.bf16 %v2444_v13  ;;  %v2465_v13 = vld [vmem:[%s8403_s19 + $0xa00] sm:$0xff] }
 0x628   : > { %5884 = vmatpush1.bf16.msra.mxu1 %v3195_v16  ;;  %5541 = vmatprep.subr.bf16.mxu0 %v3202_v24  ;;  %v2443_v16 = vld [vmem:[%s8403_s19 + $0x950] sm:$0xff]  ;;  %v3249_v24 = vunpack.c.l.s8.bf16 %v2441_v18 }
 0x629   : > { %5885 = vmatprep.subr.bf16.mxu1 %v3204_v28  ;;  %v3251_v27 = vunpack.c.l.s8.bf16 %v2443_v16  ;;  %v3258_v28 = vunpack.c.h.s8.bf16 %v2442_v12 }
 0x62b   : > { %5542 = vmatpush1.bf16.msra.mxu0 %v3201_v39  ;;  %v2450_v39 = vld [vmem:[%s8403_s19 + $0x988] sm:$0xff] }
 0x62c   : > { %5886 = vmatpush1.bf16.msra.mxu1 %v3203_v19  ;;  %5543 = vmatprep.subr.bf16.mxu0 %v3210_v20  ;;  %v2452_v19 = vld [vmem:[%s8403_s19 + $0x998] sm:$0xff]  ;;  %v3257_v20 = vunpack.c.h.s8.bf16 %v2441_v18  ;;  %v3266_v26 = vunpack.c.l.s8.bf16 %v2450_v39 }
 0x62d   : > { %5887 = vmatprep.subr.bf16.mxu1 %v3212_v25  ;;  %v3259_v25 = vunpack.c.h.s8.bf16 %v2443_v16  ;;  %v3276_v33 = vunpack.c.h.s8.bf16 %v2452_v19  ;;  %v2474_v16 = vld [vmem:[%s8403_s19 + $0xa48] sm:$0xff] }
 0x62f   : > { %5544 = vmatpush1.bf16.msra.mxu0 %v3209_v22  ;;  %v3268_v22 = vunpack.c.l.s8.bf16 %v2452_v19  ;;  %v2473_v19 = vld [vmem:[%s8403_s19 + $0xa40] sm:$0xff] }
 0x630   : > { %5888 = vmatpush1.bf16.msra.mxu1 %v3211_v23  ;;  %5545 = vmatprep.subr.bf16.mxu0 %v3218_v43  ;;  %v2451_v23 = vld [vmem:[%s8403_s19 + $0x990] sm:$0xff]  ;;  %v3265_v43 = vunpack.c.l.s8.bf16 %v2449_v37 }
 0x631   : > { %5889 = vmatprep.subr.bf16.mxu1 %v3220_v44  ;;  %v3267_v47 = vunpack.c.l.s8.bf16 %v2451_v23  ;;  %v3274_v44 = vunpack.c.h.s8.bf16 %v2450_v39  ;;  %v3314_v39 = vunpack.c.l.s8.bf16 %v2474_v16 }
 0x633   : > { %5546 = vmatpush1.bf16.msra.mxu0 %v3217_v48  ;;  %v2458_v48 = vld [vmem:[%s8403_s19 + $0x9c8] sm:$0xff] }
 0x634   : > { %5890 = vmatpush1.bf16.msra.mxu1 %v3219_v59  ;;  %5547 = vmatprep.subr.bf16.mxu0 %v3226_v60  ;;  %v2460_v59 = vld [vmem:[%s8403_s19 + $0x9d8] sm:$0xff]  ;;  %v3273_v60 = vunpack.c.h.s8.bf16 %v2449_v37  ;;  %v3282_v50 = vunpack.c.l.s8.bf16 %v2458_v48 }
 0x635   : > { %5891 = vmatprep.subr.bf16.mxu1 %v3228_v49  ;;  %v3275_v49 = vunpack.c.h.s8.bf16 %v2451_v23  ;;  %v3292_v7 = vunpack.c.h.s8.bf16 %v2460_v59 }
 0x637   : > { %5548 = vmatpush1.bf16.msra.mxu0 %v3225_v2  ;;  %v3284_v2 = vunpack.c.l.s8.bf16 %v2460_v59  ;;  %v2481_v59 = vld [vmem:[%s8403_s19 + $0xa80] sm:$0xff] }
 0x638   : > { %5892 = vmatpush1.bf16.msra.mxu1 %v3227_v3  ;;  %5549 = vmatprep.subr.bf16.mxu0 %v3234_v4  ;;  %v2459_v3 = vld [vmem:[%s8403_s19 + $0x9d0] sm:$0xff]  ;;  %v3281_v4 = vunpack.c.l.s8.bf16 %v2457_v1 }
 0x639   : > { %5893 = vmatprep.subr.bf16.mxu1 %v3236_v6  ;;  %v3283_v5 = vunpack.c.l.s8.bf16 %v2459_v3  ;;  %v3290_v6 = vunpack.c.h.s8.bf16 %v2458_v48 }
 0x63b   : > { %5550 = vmatpush1.bf16.msra.mxu0 %v3233_v8  ;;  %v2466_v8 = vld [vmem:[%s8403_s19 + $0xa08] sm:$0xff] }
 0x63c   : > { %5894 = vmatpush1.bf16.msra.mxu1 %v3235_v9  ;;  %5551 = vmatprep.subr.bf16.mxu0 %v3242_v10  ;;  %v2468_v9 = vld [vmem:[%s8403_s19 + $0xa18] sm:$0xff]  ;;  %v3289_v10 = vunpack.c.h.s8.bf16 %v2457_v1  ;;  %v3298_v12 = vunpack.c.l.s8.bf16 %v2466_v8 }
 0x63d   : > { %5895 = vmatprep.subr.bf16.mxu1 %v3244_v11  ;;  %v3291_v11 = vunpack.c.h.s8.bf16 %v2459_v3 }
 0x63f   : > { %5552 = vmatpush1.bf16.msra.mxu0 %v3241_v14  ;;  %v3300_v14 = vunpack.c.l.s8.bf16 %v2468_v9 }
 0x640   : > { %5896 = vmatpush1.bf16.msra.mxu1 %v3243_v21  ;;  %5553 = vmatprep.subr.bf16.mxu0 %v3250_v17  ;;  %v2467_v21 = vld [vmem:[%s8403_s19 + $0xa10] sm:$0xff]  ;;  %v3297_v17 = vunpack.c.l.s8.bf16 %v2465_v13 }
 0x641   : > { %5897 = vmatprep.subr.bf16.mxu1 %v3252_v15  ;;  %v3299_v18 = vunpack.c.l.s8.bf16 %v2467_v21  ;;  %v3306_v15 = vunpack.c.h.s8.bf16 %v2466_v8 }
 0x643   : > { %5554 = vmatpush1.bf16.msra.mxu0 %v3249_v24  ;;  %v3308_v24 = vunpack.c.h.s8.bf16 %v2468_v9  ;;  %v2489_v9 = vld [vmem:[%s8403_s19 + $0xac0] sm:$0xff] }
 0x644   : > { %5898 = vmatpush1.bf16.msra.mxu1 %v3251_v27  ;;  %5555 = vmatprep.subr.bf16.mxu0 %v3258_v28  ;;  %v2476_v27 = vld [vmem:[%s8403_s19 + $0xa58] sm:$0xff]  ;;  %v3305_v28 = vunpack.c.h.s8.bf16 %v2465_v13 }
 0x645   : > { %5899 = vmatprep.subr.bf16.mxu1 %v3260_v31  ;;  %v3307_v31 = vunpack.c.h.s8.bf16 %v2467_v21  ;;  %v3324_v23 = vunpack.c.h.s8.bf16 %v2476_v27 }
 0x647   : > { %5556 = vmatpush1.bf16.msra.mxu0 %v3257_v20  ;;  %v3316_v20 = vunpack.c.l.s8.bf16 %v2476_v27  ;;  %v2497_v27 = vld [vmem:[%s8403_s19 + $0xb00] sm:$0xff] }
 0x648   : > { %5900 = vmatpush1.bf16.msra.mxu1 %v3259_v25  ;;  %5557 = vmatprep.subr.bf16.mxu0 %v3266_v26  ;;  %v2475_v25 = vld [vmem:[%s8403_s19 + $0xa50] sm:$0xff]  ;;  %v3313_v26 = vunpack.c.l.s8.bf16 %v2473_v19 }
 0x649   : > { %5901 = vmatprep.subr.bf16.mxu1 %v3268_v22  ;;  %v3315_v37 = vunpack.c.l.s8.bf16 %v2475_v25  ;;  %v3322_v22 = vunpack.c.h.s8.bf16 %v2474_v16 }
 0x64b   : > { %5558 = vmatpush1.bf16.msra.mxu0 %v3265_v43  ;;  %v2482_v43 = vld [vmem:[%s8403_s19 + $0xa88] sm:$0xff] }
 0x64c   : > { %5902 = vmatpush1.bf16.msra.mxu1 %v3267_v47  ;;  %5559 = vmatprep.subr.bf16.mxu0 %v3274_v44  ;;  %v2484_v47 = vld [vmem:[%s8403_s19 + $0xa98] sm:$0xff]  ;;  %v3321_v44 = vunpack.c.h.s8.bf16 %v2473_v19  ;;  %v3330_v48 = vunpack.c.l.s8.bf16 %v2482_v43 }
 0x64d   : > { %5903 = vmatprep.subr.bf16.mxu1 %v3276_v33  ;;  %v3323_v33 = vunpack.c.h.s8.bf16 %v2475_v25  ;;  %v3340_v3 = vunpack.c.h.s8.bf16 %v2484_v47 }
 0x64f   : > { %5560 = vmatpush1.bf16.msra.mxu0 %v3273_v60  ;;  %v3332_v60 = vunpack.c.l.s8.bf16 %v2484_v47  ;;  %v2505_v47 = vld [vmem:[%s8403_s19 + $0xb40] sm:$0xff] }
 0x650   : > { %5904 = vmatpush1.bf16.msra.mxu1 %v3275_v49  ;;  %5561 = vmatprep.subr.bf16.mxu0 %v3282_v50  ;;  %v2483_v49 = vld [vmem:[%s8403_s19 + $0xa90] sm:$0xff]  ;;  %v3329_v50 = vunpack.c.l.s8.bf16 %v2481_v59 }
 0x651   : > { %5905 = vmatprep.subr.bf16.mxu1 %v3284_v2  ;;  %v3331_v1 = vunpack.c.l.s8.bf16 %v2483_v49  ;;  %v3338_v2 = vunpack.c.h.s8.bf16 %v2482_v43 }
 0x653   : > { %5562 = vmatpush1.bf16.msra.mxu0 %v3281_v4  ;;  %v2490_v4 = vld [vmem:[%s8403_s19 + $0xac8] sm:$0xff] }
 0x654   : > { %5906 = vmatpush1.bf16.msra.mxu1 %v3283_v5  ;;  %5563 = vmatprep.subr.bf16.mxu0 %v3290_v6  ;;  %v2492_v5 = vld [vmem:[%s8403_s19 + $0xad8] sm:$0xff]  ;;  %v3337_v6 = vunpack.c.h.s8.bf16 %v2481_v59  ;;  %v3346_v8 = vunpack.c.l.s8.bf16 %v2490_v4 }
 0x655   : > { %5907 = vmatprep.subr.bf16.mxu1 %v3292_v7  ;;  %v3339_v7 = vunpack.c.h.s8.bf16 %v2483_v49  ;;  %v3356_v21 = vunpack.c.h.s8.bf16 %v2492_v5 }
 0x657   : > { %5564 = vmatpush1.bf16.msra.mxu0 %v3289_v10  ;;  %v3348_v10 = vunpack.c.l.s8.bf16 %v2492_v5  ;;  %v2513_v5 = vld [vmem:[%s8403_s19 + $0xb80] sm:$0xff] }
 0x658   : > { %5908 = vmatpush1.bf16.msra.mxu1 %v3291_v11  ;;  %5576 = vmatprep.subr.bf16.mxu0 %v3298_v12  ;;  %v2491_v11 = vld [vmem:[%s8403_s19 + $0xad0] sm:$0xff]  ;;  %v3345_v12 = vunpack.c.l.s8.bf16 %v2489_v9 }
 0x659   : > { %5920 = vmatprep.subr.bf16.mxu1 %v3300_v14  ;;  %v3347_v13 = vunpack.c.l.s8.bf16 %v2491_v11  ;;  %v3354_v14 = vunpack.c.h.s8.bf16 %v2490_v4  ;;  %v3355_v16 = vunpack.c.h.s8.bf16 %v2491_v11 }
 0x65a   : > { %5566 = vmatmul.mubr.bf16.vlgmr.msra.gmra.mrb[16].mxu0 %v9085_v61 }
 0x65b   : > { %5910 = vmatmul.mubr.bf16.vlgmr.msra.gmra.mrb[16].mxu1 %v9085_v61  ;;  %5577 = vmatpush1.bf16.msra.mxu0 %v3297_v17  ;;  %v2498_v17 = vld [vmem:[%s8403_s19 + $0xb08] sm:$0xff] }
 0x65c   : > { %5608 = vmatprep.mubr.bf16.mxu0 %v9091_v0  ;;  %5921 = vmatpush1.bf16.msra.mxu1 %v3299_v18  ;;  %v2500_v18 = vld [vmem:[%s8403_s19 + $0xb18] sm:$0xff] }
 0x65d   : > { %5952 = vmatprep.mubr.bf16.mxu1 %v9091_v0  ;;  %5578 = vmatprep.subr.bf16.mxu0 %v3306_v15  ;;  %v3353_v15 = vunpack.c.h.s8.bf16 %v2489_v9  ;;  %v3372_v25 = vunpack.c.h.s8.bf16 %v2500_v18 }
 0x65e   : > { %5922 = vmatprep.subr.bf16.mxu1 %v3308_v24  ;;  %v3362_v24 = vunpack.c.l.s8.bf16 %v2498_v17 }
 0x65f   : > { %5579 = vmatpush1.bf16.msra.mxu0 %v3305_v28  ;;  %v3364_v28 = vunpack.c.l.s8.bf16 %v2500_v18  ;;  %v2521_v18 = vld [vmem:[%s8403_s19 + $0xbc0] sm:$0xff] }
 0x660   : > { %5923 = vmatpush1.bf16.msra.mxu1 %v3307_v31  ;;  %5580 = vmatprep.subr.bf16.mxu0 %v3314_v39  ;;  %v2499_v31 = vld [vmem:[%s8403_s19 + $0xb10] sm:$0xff]  ;;  %v3361_v39 = vunpack.c.l.s8.bf16 %v2497_v27 }
 0x661   : > { %5924 = vmatprep.subr.bf16.mxu1 %v3316_v20  ;;  %v3363_v19 = vunpack.c.l.s8.bf16 %v2499_v31  ;;  %v3370_v20 = vunpack.c.h.s8.bf16 %v2498_v17 }
 0x663   : > { %5581 = vmatpush1.bf16.msra.mxu0 %v3313_v26  ;;  %v2506_v26 = vld [vmem:[%s8403_s19 + $0xb48] sm:$0xff] }
 0x664   : > { %5925 = vmatpush1.bf16.msra.mxu1 %v3315_v37  ;;  %5582 = vmatprep.subr.bf16.mxu0 %v3322_v22  ;;  %v2508_v37 = vld [vmem:[%s8403_s19 + $0xb58] sm:$0xff]  ;;  %v3369_v22 = vunpack.c.h.s8.bf16 %v2497_v27  ;;  %v3378_v43 = vunpack.c.l.s8.bf16 %v2506_v26 }
 0x665   : > { %5926 = vmatprep.subr.bf16.mxu1 %v3324_v23  ;;  %v3371_v23 = vunpack.c.h.s8.bf16 %v2499_v31  ;;  %v3388_v49 = vunpack.c.h.s8.bf16 %v2508_v37 }
 0x667   : > { %5583 = vmatpush1.bf16.msra.mxu0 %v3321_v44  ;;  %v3380_v44 = vunpack.c.l.s8.bf16 %v2508_v37  ;;  %v2529_v37 = vld [vmem:[%s8403_s19 + $0xc00] sm:$0xff] }
 0x668   : > { %5927 = vmatpush1.bf16.msra.mxu1 %v3323_v33  ;;  %5584 = vmatprep.subr.bf16.mxu0 %v3330_v48  ;;  %v2507_v33 = vld [vmem:[%s8403_s19 + $0xb50] sm:$0xff]  ;;  %v3377_v48 = vunpack.c.l.s8.bf16 %v2505_v47 }
 0x669   : > { %5928 = vmatprep.subr.bf16.mxu1 %v3332_v60  ;;  %v3379_v59 = vunpack.c.l.s8.bf16 %v2507_v33  ;;  %v3386_v60 = vunpack.c.h.s8.bf16 %v2506_v26 }
 0x66b   : > { %5585 = vmatpush1.bf16.msra.mxu0 %v3329_v50  ;;  %v2514_v50 = vld [vmem:[%s8403_s19 + $0xb88] sm:$0xff] }
 0x66c   : > { %5929 = vmatpush1.bf16.msra.mxu1 %v3331_v1  ;;  %5586 = vmatprep.subr.bf16.mxu0 %v3338_v2  ;;  %v2516_v1 = vld [vmem:[%s8403_s19 + $0xb98] sm:$0xff]  ;;  %v3385_v2 = vunpack.c.h.s8.bf16 %v2505_v47  ;;  %v3394_v4 = vunpack.c.l.s8.bf16 %v2514_v50 }
 0x66d   : > { %5930 = vmatprep.subr.bf16.mxu1 %v3340_v3  ;;  %v3387_v3 = vunpack.c.h.s8.bf16 %v2507_v33  ;;  %v3404_v11 = vunpack.c.h.s8.bf16 %v2516_v1  ;;  %v2538_v33 = vld [vmem:[%s8403_s19 + $0xc48] sm:$0xff] }
 0x66f   : > { %5587 = vmatpush1.bf16.msra.mxu0 %v3337_v6  ;;  %v3396_v6 = vunpack.c.l.s8.bf16 %v2516_v1  ;;  %v2537_v1 = vld [vmem:[%s8403_s19 + $0xc40] sm:$0xff] }
 0x670   : > { %5931 = vmatpush1.bf16.msra.mxu1 %v3339_v7  ;;  %5588 = vmatprep.subr.bf16.mxu0 %v3346_v8  ;;  %v2515_v7 = vld [vmem:[%s8403_s19 + $0xb90] sm:$0xff]  ;;  %v3393_v8 = vunpack.c.l.s8.bf16 %v2513_v5 }
 0x671   : > { %5932 = vmatprep.subr.bf16.mxu1 %v3348_v10  ;;  %v3395_v9 = vunpack.c.l.s8.bf16 %v2515_v7  ;;  %v3402_v10 = vunpack.c.h.s8.bf16 %v2514_v50  ;;  %v3442_v50 = vunpack.c.l.s8.bf16 %v2538_v33 }
 0x673   : > { %5589 = vmatpush1.bf16.msra.mxu0 %v3345_v12  ;;  %v2522_v12 = vld [vmem:[%s8403_s19 + $0xbc8] sm:$0xff] }
 0x674   : > { %5933 = vmatpush1.bf16.msra.mxu1 %v3347_v13  ;;  %5590 = vmatprep.subr.bf16.mxu0 %v3354_v14  ;;  %v2524_v13 = vld [vmem:[%s8403_s19 + $0xbd8] sm:$0xff]  ;;  %v3401_v14 = vunpack.c.h.s8.bf16 %v2513_v5  ;;  %v3410_v17 = vunpack.c.l.s8.bf16 %v2522_v12 }
 0x675   : > { %5934 = vmatprep.subr.bf16.mxu1 %v3356_v21  ;;  %v3403_v21 = vunpack.c.h.s8.bf16 %v2515_v7  ;;  %v3420_v31 = vunpack.c.h.s8.bf16 %v2524_v13 }
 0x677   : > { %5591 = vmatpush1.bf16.msra.mxu0 %v3353_v15  ;;  %v3412_v15 = vunpack.c.l.s8.bf16 %v2524_v13  ;;  %v2545_v13 = vld [vmem:[%s8403_s19 + $0xc80] sm:$0xff] }
 0x678   : > { %5935 = vmatpush1.bf16.msra.mxu1 %v3355_v16  ;;  %5592 = vmatprep.subr.bf16.mxu0 %v3362_v24  ;;  %v2523_v16 = vld [vmem:[%s8403_s19 + $0xbd0] sm:$0xff]  ;;  %v3409_v24 = vunpack.c.l.s8.bf16 %v2521_v18 }
 0x679   : > { %5936 = vmatprep.subr.bf16.mxu1 %v3364_v28  ;;  %v3411_v27 = vunpack.c.l.s8.bf16 %v2523_v16  ;;  %v3418_v28 = vunpack.c.h.s8.bf16 %v2522_v12 }
 0x67b   : > { %5593 = vmatpush1.bf16.msra.mxu0 %v3361_v39  ;;  %v2530_v39 = vld [vmem:[%s8403_s19 + $0xc08] sm:$0xff] }
 0x67c   : > { %5937 = vmatpush1.bf16.msra.mxu1 %v3363_v19  ;;  %5594 = vmatprep.subr.bf16.mxu0 %v3370_v20  ;;  %v2532_v19 = vld [vmem:[%s8403_s19 + $0xc18] sm:$0xff]  ;;  %v3417_v20 = vunpack.c.h.s8.bf16 %v2521_v18  ;;  %v3426_v26 = vunpack.c.l.s8.bf16 %v2530_v39 }
 0x67d   : > { %5938 = vmatprep.subr.bf16.mxu1 %v3372_v25  ;;  %v3419_v25 = vunpack.c.h.s8.bf16 %v2523_v16 }
 0x67f   : > { %5595 = vmatpush1.bf16.msra.mxu0 %v3369_v22  ;;  %v3428_v22 = vunpack.c.l.s8.bf16 %v2532_v19 }
 0x680   : > { %5939 = vmatpush1.bf16.msra.mxu1 %v3371_v23  ;;  %5596 = vmatprep.subr.bf16.mxu0 %v3378_v43  ;;  %v2531_v23 = vld [vmem:[%s8403_s19 + $0xc10] sm:$0xff]  ;;  %v3425_v43 = vunpack.c.l.s8.bf16 %v2529_v37 }
 0x681   : > { %5940 = vmatprep.subr.bf16.mxu1 %v3380_v44  ;;  %v3427_v47 = vunpack.c.l.s8.bf16 %v2531_v23  ;;  %v3434_v44 = vunpack.c.h.s8.bf16 %v2530_v39 }
 0x683   : > { %5597 = vmatpush1.bf16.msra.mxu0 %v3377_v48  ;;  %v3436_v48 = vunpack.c.h.s8.bf16 %v2532_v19  ;;  %v2553_v19 = vld [vmem:[%s8403_s19 + $0xcc0] sm:$0xff] }
 0x684   : > { %5941 = vmatpush1.bf16.msra.mxu1 %v3379_v59  ;;  %5598 = vmatprep.subr.bf16.mxu0 %v3386_v60  ;;  %v2540_v59 = vld [vmem:[%s8403_s19 + $0xc58] sm:$0xff]  ;;  %v3433_v60 = vunpack.c.h.s8.bf16 %v2529_v37 }
 0x685   : > { %5942 = vmatprep.subr.bf16.mxu1 %v3388_v49  ;;  %v3435_v49 = vunpack.c.h.s8.bf16 %v2531_v23  ;;  %v3452_v7 = vunpack.c.h.s8.bf16 %v2540_v59 }
 0x687   : > { %5599 = vmatpush1.bf16.msra.mxu0 %v3385_v2  ;;  %v3444_v2 = vunpack.c.l.s8.bf16 %v2540_v59  ;;  %v2561_v59 = vld [vmem:[%s8403_s19 + $0xd00] sm:$0xff] }
 0x688   : > { %5943 = vmatpush1.bf16.msra.mxu1 %v3387_v3  ;;  %5600 = vmatprep.subr.bf16.mxu0 %v3394_v4  ;;  %v2539_v3 = vld [vmem:[%s8403_s19 + $0xc50] sm:$0xff]  ;;  %v3441_v4 = vunpack.c.l.s8.bf16 %v2537_v1 }
 0x689   : > { %5944 = vmatprep.subr.bf16.mxu1 %v3396_v6  ;;  %v3443_v5 = vunpack.c.l.s8.bf16 %v2539_v3  ;;  %v3450_v6 = vunpack.c.h.s8.bf16 %v2538_v33 }
 0x68b   : > { %5601 = vmatpush1.bf16.msra.mxu0 %v3393_v8  ;;  %v2546_v8 = vld [vmem:[%s8403_s19 + $0xc88] sm:$0xff] }
 0x68c   : > { %5945 = vmatpush1.bf16.msra.mxu1 %v3395_v9  ;;  %5602 = vmatprep.subr.bf16.mxu0 %v3402_v10  ;;  %v2548_v9 = vld [vmem:[%s8403_s19 + $0xc98] sm:$0xff]  ;;  %v3449_v10 = vunpack.c.h.s8.bf16 %v2537_v1  ;;  %v3458_v12 = vunpack.c.l.s8.bf16 %v2546_v8 }
 0x68d   : > { %5946 = vmatprep.subr.bf16.mxu1 %v3404_v11  ;;  %v3451_v11 = vunpack.c.h.s8.bf16 %v2539_v3  ;;  %v3468_v16 = vunpack.c.h.s8.bf16 %v2548_v9 }
 0x68f   : > { %5603 = vmatpush1.bf16.msra.mxu0 %v3401_v14  ;;  %v3460_v14 = vunpack.c.l.s8.bf16 %v2548_v9  ;;  %v2569_v9 = vld [vmem:[%s8403_s19 + $0xd40] sm:$0xff] }
 0x690   : > { %5947 = vmatpush1.bf16.msra.mxu1 %v3403_v21  ;;  %5604 = vmatprep.subr.bf16.mxu0 %v3410_v17  ;;  %v2547_v21 = vld [vmem:[%s8403_s19 + $0xc90] sm:$0xff]  ;;  %v3457_v17 = vunpack.c.l.s8.bf16 %v2545_v13 }
 0x691   : > { %5948 = vmatprep.subr.bf16.mxu1 %v3412_v15  ;;  %v3459_v18 = vunpack.c.l.s8.bf16 %v2547_v21  ;;  %v3466_v15 = vunpack.c.h.s8.bf16 %v2546_v8 }
 0x693   : > { %5605 = vmatpush1.bf16.msra.mxu0 %v3409_v24  ;;  %v2554_v24 = vld [vmem:[%s8403_s19 + $0xcc8] sm:$0xff] }
 0x694   : > { %5949 = vmatpush1.bf16.msra.mxu1 %v3411_v27  ;;  %5606 = vmatprep.subr.bf16.mxu0 %v3418_v28  ;;  %v2556_v27 = vld [vmem:[%s8403_s19 + $0xcd8] sm:$0xff]  ;;  %v3465_v28 = vunpack.c.h.s8.bf16 %v2545_v13  ;;  %v3474_v39 = vunpack.c.l.s8.bf16 %v2554_v24 }
 0x695   : > { %5950 = vmatprep.subr.bf16.mxu1 %v3420_v31  ;;  %v3467_v31 = vunpack.c.h.s8.bf16 %v2547_v21  ;;  %v3484_v23 = vunpack.c.h.s8.bf16 %v2556_v27 }
 0x697   : > { %5607 = vmatpush1.bf16.msra.mxu0 %v3417_v20  ;;  %v3476_v20 = vunpack.c.l.s8.bf16 %v2556_v27  ;;  %v2577_v27 = vld [vmem:[%s8403_s19 + $0xd80] sm:$0xff] }
 0x698   : > { %5951 = vmatpush1.bf16.msra.mxu1 %v3419_v25  ;;  %5619 = vmatprep.subr.bf16.mxu0 %v3426_v26  ;;  %v2555_v25 = vld [vmem:[%s8403_s19 + $0xcd0] sm:$0xff]  ;;  %v3473_v26 = vunpack.c.l.s8.bf16 %v2553_v19 }
 0x699   : > { %5963 = vmatprep.subr.bf16.mxu1 %v3428_v22  ;;  %v3475_v37 = vunpack.c.l.s8.bf16 %v2555_v25  ;;  %v3482_v22 = vunpack.c.h.s8.bf16 %v2554_v24  ;;  %v3483_v33 = vunpack.c.h.s8.bf16 %v2555_v25 }
 0x69a   : > { %5609 = vmatmul.mubr.bf16.vlgmr.msra.gmra.mrb[16].mxu0 %v9087_v62 }
 0x69b   : > { %5953 = vmatmul.mubr.bf16.vlgmr.msra.gmra.mrb[16].mxu1 %v9087_v62  ;;  %5620 = vmatpush1.bf16.msra.mxu0 %v3425_v43  ;;  %v2562_v43 = vld [vmem:[%s8403_s19 + $0xd08] sm:$0xff] }
 0x69c   : > { %5651 = vmatprep.mubr.bf16.mxu0 %v9265_v38  ;;  %5964 = vmatpush1.bf16.msra.mxu1 %v3427_v47  ;;  %v2564_v47 = vld [vmem:[%s8403_s19 + $0xd18] sm:$0xff] }
 0x69d   : > { %5995 = vmatprep.mubr.bf16.mxu1 %v9265_v38  ;;  %5621 = vmatprep.subr.bf16.mxu0 %v3434_v44  ;;  %v3481_v44 = vunpack.c.h.s8.bf16 %v2553_v19  ;;  %v3500_v3 = vunpack.c.h.s8.bf16 %v2564_v47 }
 0x69e   : > { %5965 = vmatprep.subr.bf16.mxu1 %v3436_v48  ;;  %v3490_v48 = vunpack.c.l.s8.bf16 %v2562_v43 }
 0x69f   : > { %5622 = vmatpush1.bf16.msra.mxu0 %v3433_v60  ;;  %v3492_v60 = vunpack.c.l.s8.bf16 %v2564_v47  ;;  %v2585_v47 = vld [vmem:[%s8403_s19 + $0xdc0] sm:$0xff] }
 0x6a0   : > { %5966 = vmatpush1.bf16.msra.mxu1 %v3435_v49  ;;  %5623 = vmatprep.subr.bf16.mxu0 %v3442_v50  ;;  %v2563_v49 = vld [vmem:[%s8403_s19 + $0xd10] sm:$0xff]  ;;  %v3489_v50 = vunpack.c.l.s8.bf16 %v2561_v59 }
 0x6a1   : > { %5967 = vmatprep.subr.bf16.mxu1 %v3444_v2  ;;  %v3491_v1 = vunpack.c.l.s8.bf16 %v2563_v49  ;;  %v3498_v2 = vunpack.c.h.s8.bf16 %v2562_v43 }
 0x6a3   : > { %5624 = vmatpush1.bf16.msra.mxu0 %v3441_v4  ;;  %v2570_v4 = vld [vmem:[%s8403_s19 + $0xd48] sm:$0xff] }
 0x6a4   : > { %5968 = vmatpush1.bf16.msra.mxu1 %v3443_v5  ;;  %5625 = vmatprep.subr.bf16.mxu0 %v3450_v6  ;;  %v2572_v5 = vld [vmem:[%s8403_s19 + $0xd58] sm:$0xff]  ;;  %v3497_v6 = vunpack.c.h.s8.bf16 %v2561_v59  ;;  %v3506_v8 = vunpack.c.l.s8.bf16 %v2570_v4 }
 0x6a5   : > { %5969 = vmatprep.subr.bf16.mxu1 %v3452_v7  ;;  %v3499_v7 = vunpack.c.h.s8.bf16 %v2563_v49  ;;  %v3516_v21 = vunpack.c.h.s8.bf16 %v2572_v5 }
 0x6a7   : > { %5626 = vmatpush1.bf16.msra.mxu0 %v3449_v10  ;;  %v3508_v10 = vunpack.c.l.s8.bf16 %v2572_v5  ;;  %v2593_v5 = vld [vmem:[%s8403_s19 + $0xe00] sm:$0xff] }
 0x6a8   : > { %5970 = vmatpush1.bf16.msra.mxu1 %v3451_v11  ;;  %5627 = vmatprep.subr.bf16.mxu0 %v3458_v12  ;;  %v2571_v11 = vld [vmem:[%s8403_s19 + $0xd50] sm:$0xff]  ;;  %v3505_v12 = vunpack.c.l.s8.bf16 %v2569_v9 }
 0x6a9   : > { %5971 = vmatprep.subr.bf16.mxu1 %v3460_v14  ;;  %v3507_v13 = vunpack.c.l.s8.bf16 %v2571_v11  ;;  %v3514_v14 = vunpack.c.h.s8.bf16 %v2570_v4 }
 0x6ab   : > { %5628 = vmatpush1.bf16.msra.mxu0 %v3457_v17  ;;  %v2578_v17 = vld [vmem:[%s8403_s19 + $0xd88] sm:$0xff] }
 0x6ac   : > { %5972 = vmatpush1.bf16.msra.mxu1 %v3459_v18  ;;  %5629 = vmatprep.subr.bf16.mxu0 %v3466_v15  ;;  %v2580_v18 = vld [vmem:[%s8403_s19 + $0xd98] sm:$0xff]  ;;  %v3513_v15 = vunpack.c.h.s8.bf16 %v2569_v9  ;;  %v3522_v24 = vunpack.c.l.s8.bf16 %v2578_v17 }
 0x6ad   : > { %5973 = vmatprep.subr.bf16.mxu1 %v3468_v16  ;;  %v3515_v16 = vunpack.c.h.s8.bf16 %v2571_v11  ;;  %v3532_v25 = vunpack.c.h.s8.bf16 %v2580_v18  ;;  %v2602_v11 = vld [vmem:[%s8403_s19 + $0xe48] sm:$0xff] }
 0x6af   : > { %5630 = vmatpush1.bf16.msra.mxu0 %v3465_v28  ;;  %v3524_v28 = vunpack.c.l.s8.bf16 %v2580_v18  ;;  %v2601_v18 = vld [vmem:[%s8403_s19 + $0xe40] sm:$0xff] }
 0x6b0   : > { %5974 = vmatpush1.bf16.msra.mxu1 %v3467_v31  ;;  %5631 = vmatprep.subr.bf16.mxu0 %v3474_v39  ;;  %v2579_v31 = vld [vmem:[%s8403_s19 + $0xd90] sm:$0xff]  ;;  %v3521_v39 = vunpack.c.l.s8.bf16 %v2577_v27 }
 0x6b1   : > { %5975 = vmatprep.subr.bf16.mxu1 %v3476_v20  ;;  %v3523_v19 = vunpack.c.l.s8.bf16 %v2579_v31  ;;  %v3530_v20 = vunpack.c.h.s8.bf16 %v2578_v17  ;;  %v3570_v17 = vunpack.c.l.s8.bf16 %v2602_v11 }
 0x6b3   : > { %5632 = vmatpush1.bf16.msra.mxu0 %v3473_v26  ;;  %v2586_v26 = vld [vmem:[%s8403_s19 + $0xdc8] sm:$0xff] }
 0x6b4   : > { %5976 = vmatpush1.bf16.msra.mxu1 %v3475_v37  ;;  %5633 = vmatprep.subr.bf16.mxu0 %v3482_v22  ;;  %v2588_v37 = vld [vmem:[%s8403_s19 + $0xdd8] sm:$0xff]  ;;  %v3529_v22 = vunpack.c.h.s8.bf16 %v2577_v27  ;;  %v3538_v43 = vunpack.c.l.s8.bf16 %v2586_v26 }
 0x6b5   : > { %5977 = vmatprep.subr.bf16.mxu1 %v3484_v23  ;;  %v3531_v23 = vunpack.c.h.s8.bf16 %v2579_v31  ;;  %v3548_v49 = vunpack.c.h.s8.bf16 %v2588_v37 }
 0x6b7   : > { %5634 = vmatpush1.bf16.msra.mxu0 %v3481_v44  ;;  %v3540_v44 = vunpack.c.l.s8.bf16 %v2588_v37  ;;  %v2609_v37 = vld [vmem:[%s8403_s19 + $0xe80] sm:$0xff] }
 0x6b8   : > { %5978 = vmatpush1.bf16.msra.mxu1 %v3483_v33  ;;  %5635 = vmatprep.subr.bf16.mxu0 %v3490_v48  ;;  %v2587_v33 = vld [vmem:[%s8403_s19 + $0xdd0] sm:$0xff]  ;;  %v3537_v48 = vunpack.c.l.s8.bf16 %v2585_v47 }
 0x6b9   : > { %5979 = vmatprep.subr.bf16.mxu1 %v3492_v60  ;;  %v3539_v59 = vunpack.c.l.s8.bf16 %v2587_v33  ;;  %v3546_v60 = vunpack.c.h.s8.bf16 %v2586_v26 }
 0x6bb   : > { %5636 = vmatpush1.bf16.msra.mxu0 %v3489_v50  ;;  %v2594_v50 = vld [vmem:[%s8403_s19 + $0xe08] sm:$0xff] }
 0x6bc   : > { %5980 = vmatpush1.bf16.msra.mxu1 %v3491_v1  ;;  %5637 = vmatprep.subr.bf16.mxu0 %v3498_v2  ;;  %v2596_v1 = vld [vmem:[%s8403_s19 + $0xe18] sm:$0xff]  ;;  %v3545_v2 = vunpack.c.h.s8.bf16 %v2585_v47  ;;  %v3554_v4 = vunpack.c.l.s8.bf16 %v2594_v50 }
 0x6bd   : > { %5981 = vmatprep.subr.bf16.mxu1 %v3500_v3  ;;  %v3547_v3 = vunpack.c.h.s8.bf16 %v2587_v33 }
 0x6bf   : > { %5638 = vmatpush1.bf16.msra.mxu0 %v3497_v6  ;;  %v3556_v6 = vunpack.c.l.s8.bf16 %v2596_v1 }
 0x6c0   : > { %5982 = vmatpush1.bf16.msra.mxu1 %v3499_v7  ;;  %5639 = vmatprep.subr.bf16.mxu0 %v3506_v8  ;;  %v2595_v7 = vld [vmem:[%s8403_s19 + $0xe10] sm:$0xff]  ;;  %v3553_v8 = vunpack.c.l.s8.bf16 %v2593_v5 }
 0x6c1   : > { %5983 = vmatprep.subr.bf16.mxu1 %v3508_v10  ;;  %v3555_v9 = vunpack.c.l.s8.bf16 %v2595_v7  ;;  %v3562_v10 = vunpack.c.h.s8.bf16 %v2594_v50 }
 0x6c3   : > { %5640 = vmatpush1.bf16.msra.mxu0 %v3505_v12  ;;  %v3564_v12 = vunpack.c.h.s8.bf16 %v2596_v1  ;;  %v2617_v1 = vld [vmem:[%s8403_s19 + $0xec0] sm:$0xff] }
 0x6c4   : > { %5984 = vmatpush1.bf16.msra.mxu1 %v3507_v13  ;;  %5641 = vmatprep.subr.bf16.mxu0 %v3514_v14  ;;  %v2604_v13 = vld [vmem:[%s8403_s19 + $0xe58] sm:$0xff]  ;;  %v3561_v14 = vunpack.c.h.s8.bf16 %v2593_v5 }
 0x6c5   : > { %5985 = vmatprep.subr.bf16.mxu1 %v3516_v21  ;;  %v3563_v21 = vunpack.c.h.s8.bf16 %v2595_v7  ;;  %v3580_v31 = vunpack.c.h.s8.bf16 %v2604_v13 }
 0x6c7   : > { %5642 = vmatpush1.bf16.msra.mxu0 %v3513_v15  ;;  %v3572_v15 = vunpack.c.l.s8.bf16 %v2604_v13  ;;  %v2625_v13 = vld [vmem:[%s8403_s19 + $0xf00] sm:$0xff] }
 0x6c8   : > { %5986 = vmatpush1.bf16.msra.mxu1 %v3515_v16  ;;  %5643 = vmatprep.subr.bf16.mxu0 %v3522_v24  ;;  %v2603_v16 = vld [vmem:[%s8403_s19 + $0xe50] sm:$0xff]  ;;  %v3569_v24 = vunpack.c.l.s8.bf16 %v2601_v18 }
 0x6c9   : > { %5987 = vmatprep.subr.bf16.mxu1 %v3524_v28  ;;  %v3571_v27 = vunpack.c.l.s8.bf16 %v2603_v16  ;;  %v3578_v28 = vunpack.c.h.s8.bf16 %v2602_v11 }
 0x6cb   : > { %5644 = vmatpush1.bf16.msra.mxu0 %v3521_v39  ;;  %v2610_v39 = vld [vmem:[%s8403_s19 + $0xe88] sm:$0xff] }
 0x6cc   : > { %5988 = vmatpush1.bf16.msra.mxu1 %v3523_v19  ;;  %5645 = vmatprep.subr.bf16.mxu0 %v3530_v20  ;;  %v2612_v19 = vld [vmem:[%s8403_s19 + $0xe98] sm:$0xff]  ;;  %v3577_v20 = vunpack.c.h.s8.bf16 %v2601_v18  ;;  %v3586_v26 = vunpack.c.l.s8.bf16 %v2610_v39 }
 0x6cd   : > { %5989 = vmatprep.subr.bf16.mxu1 %v3532_v25  ;;  %v3579_v25 = vunpack.c.h.s8.bf16 %v2603_v16  ;;  %v3596_v33 = vunpack.c.h.s8.bf16 %v2612_v19 }
 0x6cf   : > { %5646 = vmatpush1.bf16.msra.mxu0 %v3529_v22  ;;  %v3588_v22 = vunpack.c.l.s8.bf16 %v2612_v19  ;;  %v2633_v19 = vld [vmem:[%s8403_s19 + $0xf40] sm:$0xff] }
 0x6d0   : > { %5990 = vmatpush1.bf16.msra.mxu1 %v3531_v23  ;;  %5647 = vmatprep.subr.bf16.mxu0 %v3538_v43  ;;  %v2611_v23 = vld [vmem:[%s8403_s19 + $0xe90] sm:$0xff]  ;;  %v3585_v43 = vunpack.c.l.s8.bf16 %v2609_v37 }
 0x6d1   : > { %5991 = vmatprep.subr.bf16.mxu1 %v3540_v44  ;;  %v3587_v47 = vunpack.c.l.s8.bf16 %v2611_v23  ;;  %v3594_v44 = vunpack.c.h.s8.bf16 %v2610_v39 }
 0x6d3   : > { %5648 = vmatpush1.bf16.msra.mxu0 %v3537_v48  ;;  %v2618_v48 = vld [vmem:[%s8403_s19 + $0xec8] sm:$0xff] }
 0x6d4   : > { %5992 = vmatpush1.bf16.msra.mxu1 %v3539_v59  ;;  %5649 = vmatprep.subr.bf16.mxu0 %v3546_v60  ;;  %v2620_v59 = vld [vmem:[%s8403_s19 + $0xed8] sm:$0xff]  ;;  %v3593_v60 = vunpack.c.h.s8.bf16 %v2609_v37  ;;  %v3602_v50 = vunpack.c.l.s8.bf16 %v2618_v48 }
 0x6d5   : > { %5993 = vmatprep.subr.bf16.mxu1 %v3548_v49  ;;  %v3595_v49 = vunpack.c.h.s8.bf16 %v2611_v23  ;;  %v3612_v7 = vunpack.c.h.s8.bf16 %v2620_v59 }
 0x6d7   : > { %5650 = vmatpush1.bf16.msra.mxu0 %v3545_v2  ;;  %v3604_v2 = vunpack.c.l.s8.bf16 %v2620_v59  ;;  %v2641_v59 = vld [vmem:[%s8403_s19 + $0xf80] sm:$0xff] }
 0x6d8   : > { %5994 = vmatpush1.bf16.msra.mxu1 %v3547_v3  ;;  %5662 = vmatprep.subr.bf16.mxu0 %v3554_v4  ;;  %v2619_v3 = vld [vmem:[%s8403_s19 + $0xed0] sm:$0xff]  ;;  %v3601_v4 = vunpack.c.l.s8.bf16 %v2617_v1 }
 0x6d9   : > { %6006 = vmatprep.subr.bf16.mxu1 %v3556_v6  ;;  %v3603_v5 = vunpack.c.l.s8.bf16 %v2619_v3  ;;  %v3610_v6 = vunpack.c.h.s8.bf16 %v2618_v48  ;;  %v3611_v11 = vunpack.c.h.s8.bf16 %v2619_v3 }
 0x6da   : > { %5652 = vmatmul.mubr.bf16.vlgmr.msra.gmra.mrb[16].mxu0 %v9261_v32 }
 0x6db   : > { %5996 = vmatmul.mubr.bf16.vlgmr.msra.gmra.mrb[16].mxu1 %v9261_v32  ;;  %5663 = vmatpush1.bf16.msra.mxu0 %v3553_v8  ;;  %v2626_v8 = vld [vmem:[%s8403_s19 + $0xf08] sm:$0xff] }
 0x6dc   : > { %5694 = vmatprep.mubr.bf16.mxu0 %v9267_v42  ;;  %6007 = vmatpush1.bf16.msra.mxu1 %v3555_v9  ;;  %v2628_v9 = vld [vmem:[%s8403_s19 + $0xf18] sm:$0xff] }
 0x6dd   : > { %6038 = vmatprep.mubr.bf16.mxu1 %v9267_v42  ;;  %5664 = vmatprep.subr.bf16.mxu0 %v3562_v10  ;;  %v3609_v10 = vunpack.c.h.s8.bf16 %v2617_v1  ;;  %v3628_v16 = vunpack.c.h.s8.bf16 %v2628_v9 }
 0x6de   : > { %6008 = vmatprep.subr.bf16.mxu1 %v3564_v12  ;;  %v3618_v12 = vunpack.c.l.s8.bf16 %v2626_v8 }
 0x6df   : > { %5665 = vmatpush1.bf16.msra.mxu0 %v3561_v14  ;;  %v3620_v14 = vunpack.c.l.s8.bf16 %v2628_v9  ;;  %v2649_v9 = vld [vmem:[%s8403_s19 + $0xfc0] sm:$0xff] }
 0x6e0   : > { %6009 = vmatpush1.bf16.msra.mxu1 %v3563_v21  ;;  %5666 = vmatprep.subr.bf16.mxu0 %v3570_v17  ;;  %v2627_v21 = vld [vmem:[%s8403_s19 + $0xf10] sm:$0xff]  ;;  %v3617_v17 = vunpack.c.l.s8.bf16 %v2625_v13 }
 0x6e1   : > { %6010 = vmatprep.subr.bf16.mxu1 %v3572_v15  ;;  %v3619_v18 = vunpack.c.l.s8.bf16 %v2627_v21  ;;  %v3626_v15 = vunpack.c.h.s8.bf16 %v2626_v8 }
 0x6e3   : > { %5667 = vmatpush1.bf16.msra.mxu0 %v3569_v24  ;;  %v2634_v24 = vld [vmem:[%s8403_s19 + $0xf48] sm:$0xff] }
 0x6e4   : > { %6011 = vmatpush1.bf16.msra.mxu1 %v3571_v27  ;;  %5668 = vmatprep.subr.bf16.mxu0 %v3578_v28  ;;  %v2636_v27 = vld [vmem:[%s8403_s19 + $0xf58] sm:$0xff]  ;;  %v3625_v28 = vunpack.c.h.s8.bf16 %v2625_v13  ;;  %v3634_v39 = vunpack.c.l.s8.bf16 %v2634_v24 }
 0x6e5   : > { %6012 = vmatprep.subr.bf16.mxu1 %v3580_v31  ;;  %v3627_v31 = vunpack.c.h.s8.bf16 %v2627_v21  ;;  %v3644_v23 = vunpack.c.h.s8.bf16 %v2636_v27 }
 0x6e7   : > { %5669 = vmatpush1.bf16.msra.mxu0 %v3577_v20  ;;  %v3636_v20 = vunpack.c.l.s8.bf16 %v2636_v27  ;;  %v2149_v27 = vld [vmem:[%s8403_s19 + $0x20] sm:$0xff] }
 0x6e8   : > { %6013 = vmatpush1.bf16.msra.mxu1 %v3579_v25  ;;  %5670 = vmatprep.subr.bf16.mxu0 %v3586_v26  ;;  %v2635_v25 = vld [vmem:[%s8403_s19 + $0xf50] sm:$0xff]  ;;  %v3633_v26 = vunpack.c.l.s8.bf16 %v2633_v19 }
 0x6e9   : > { %6014 = vmatprep.subr.bf16.mxu1 %v3588_v22  ;;  %v3635_v37 = vunpack.c.l.s8.bf16 %v2635_v25  ;;  %v3642_v22 = vunpack.c.h.s8.bf16 %v2634_v24 }
 0x6eb   : > { %5671 = vmatpush1.bf16.msra.mxu0 %v3585_v43  ;;  %v2642_v43 = vld [vmem:[%s8403_s19 + $0xf88] sm:$0xff] }
 0x6ec   : > { %6015 = vmatpush1.bf16.msra.mxu1 %v3587_v47  ;;  %5672 = vmatprep.subr.bf16.mxu0 %v3594_v44  ;;  %v2644_v47 = vld [vmem:[%s8403_s19 + $0xf98] sm:$0xff]  ;;  %v3641_v44 = vunpack.c.h.s8.bf16 %v2633_v19  ;;  %v3650_v48 = vunpack.c.l.s8.bf16 %v2642_v43 }
 0x6ed   : > { %6016 = vmatprep.subr.bf16.mxu1 %v3596_v33  ;;  %v3643_v33 = vunpack.c.h.s8.bf16 %v2635_v25  ;;  %v3660_v3 = vunpack.c.h.s8.bf16 %v2644_v47  ;;  %v2158_v25 = vld [vmem:[%s8403_s19 + $0x68] sm:$0xff] }
 0x6ef   : > { %5673 = vmatpush1.bf16.msra.mxu0 %v3593_v60  ;;  %v3652_v60 = vunpack.c.l.s8.bf16 %v2644_v47  ;;  %v2157_v47 = vld [vmem:[%s8403_s19 + $0x60] sm:$0xff] }
 0x6f0   : > { %6017 = vmatpush1.bf16.msra.mxu1 %v3595_v49  ;;  %5674 = vmatprep.subr.bf16.mxu0 %v3602_v50  ;;  %v2643_v49 = vld [vmem:[%s8403_s19 + $0xf90] sm:$0xff]  ;;  %v3649_v50 = vunpack.c.l.s8.bf16 %v2641_v59 }
 0x6f1   : > { %6018 = vmatprep.subr.bf16.mxu1 %v3604_v2  ;;  %v3651_v1 = vunpack.c.l.s8.bf16 %v2643_v49  ;;  %v3658_v2 = vunpack.c.h.s8.bf16 %v2642_v43  ;;  %v2678_v43 = vunpack.c.l.s8.bf16 %v2158_v25 }
 0x6f3   : > { %5675 = vmatpush1.bf16.msra.mxu0 %v3601_v4  ;;  %v2650_v4 = vld [vmem:[%s8403_s19 + $0xfc8] sm:$0xff] }
 0x6f4   : > { %6019 = vmatpush1.bf16.msra.mxu1 %v3603_v5  ;;  %5676 = vmatprep.subr.bf16.mxu0 %v3610_v6  ;;  %v2652_v5 = vld [vmem:[%s8403_s19 + $0xfd8] sm:$0xff]  ;;  %v3657_v6 = vunpack.c.h.s8.bf16 %v2641_v59  ;;  %v3666_v8 = vunpack.c.l.s8.bf16 %v2650_v4 }
 0x6f5   : > { %6020 = vmatprep.subr.bf16.mxu1 %v3612_v7  ;;  %v3659_v7 = vunpack.c.h.s8.bf16 %v2643_v49  ;;  %v3676_v21 = vunpack.c.h.s8.bf16 %v2652_v5 }
 0x6f7   : > { %5677 = vmatpush1.bf16.msra.mxu0 %v3609_v10  ;;  %v3668_v10 = vunpack.c.l.s8.bf16 %v2652_v5 }
 0x6f8   : > { %6021 = vmatpush1.bf16.msra.mxu1 %v3611_v11  ;;  %5678 = vmatprep.subr.bf16.mxu0 %v3618_v12  ;;  %v2651_v11 = vld [vmem:[%s8403_s19 + $0xfd0] sm:$0xff]  ;;  %v3665_v12 = vunpack.c.l.s8.bf16 %v2649_v9 }
 0x6f9   : > { %6022 = vmatprep.subr.bf16.mxu1 %v3620_v14  ;;  %v3667_v13 = vunpack.c.l.s8.bf16 %v2651_v11  ;;  %v3674_v14 = vunpack.c.h.s8.bf16 %v2650_v4  ;;  %v2165_v4 = vld [vmem:[%s8403_s19 + $0xa0] sm:$0xff] }
 0x6fb   : > { %5679 = vmatpush1.bf16.msra.mxu0 %v3617_v17  ;;  %v2150_v17 = vld [vmem:[%s8403_s19 + $0x28] sm:$0xff] }
 0x6fc   : > { %6023 = vmatpush1.bf16.msra.mxu1 %v3619_v18  ;;  %5680 = vmatprep.subr.bf16.mxu0 %v3626_v15  ;;  %v2152_v18 = vld [vmem:[%s8403_s19 + $0x38] sm:$0xff]  ;;  %v3673_v15 = vunpack.c.h.s8.bf16 %v2649_v9  ;;  %v2662_v24 = vunpack.c.l.s8.bf16 %v2150_v17 }
 0x6fd   : > { %6024 = vmatprep.subr.bf16.mxu1 %v3628_v16  ;;  %v3675_v16 = vunpack.c.h.s8.bf16 %v2651_v11  ;;  %v2174_v11 = vld [vmem:[%s8403_s19 + $0xe8] sm:$0xff] }
 0x6ff   : > { %5681 = vmatpush1.bf16.msra.mxu0 %v3625_v28  ;;  %v2664_v28 = vunpack.c.l.s8.bf16 %v2152_v18 }
 0x700   : > { %6025 = vmatpush1.bf16.msra.mxu1 %v3627_v31  ;;  %5682 = vmatprep.subr.bf16.mxu0 %v3634_v39  ;;  %v2151_v31 = vld [vmem:[%s8403_s19 + $0x30] sm:$0xff]  ;;  %v2661_v39 = vunpack.c.l.s8.bf16 %v2149_v27 }
 0x701   : > { %6026 = vmatprep.subr.bf16.mxu1 %v3636_v20  ;;  %v2663_v19 = vunpack.c.l.s8.bf16 %v2151_v31  ;;  %v2670_v20 = vunpack.c.h.s8.bf16 %v2150_v17  ;;  %v2173_v17 = vld [vmem:[%s8403_s19 + $0xe0] sm:$0xff] }
 0x703   : > { %5683 = vmatpush1.bf16.msra.mxu0 %v3633_v26  ;;  %v2672_v26 = vunpack.c.h.s8.bf16 %v2152_v18 }
 0x704   : > { %6027 = vmatpush1.bf16.msra.mxu1 %v3635_v37  ;;  %5684 = vmatprep.subr.bf16.mxu0 %v3642_v22  ;;  %v2160_v37 = vld [vmem:[%s8403_s19 + $0x78] sm:$0xff]  ;;  %v2669_v22 = vunpack.c.h.s8.bf16 %v2149_v27  ;;  %v2718_v27 = vunpack.c.h.s8.bf16 %v2174_v11 }
 0x705   : > { %6028 = vmatprep.subr.bf16.mxu1 %v3644_v23  ;;  %v2671_v23 = vunpack.c.h.s8.bf16 %v2151_v31  ;;  %v2688_v49 = vunpack.c.h.s8.bf16 %v2160_v37  ;;  %v2182_v31 = vld [vmem:[%s8403_s19 + $0x128] sm:$0xff] }
 0x707   : > { %5685 = vmatpush1.bf16.msra.mxu0 %v3641_v44  ;;  %v2680_v44 = vunpack.c.l.s8.bf16 %v2160_v37 }
 0x708   : > { %6029 = vmatpush1.bf16.msra.mxu1 %v3643_v33  ;;  %5686 = vmatprep.subr.bf16.mxu0 %v3650_v48  ;;  %v2159_v33 = vld [vmem:[%s8403_s19 + $0x70] sm:$0xff]  ;;  %v2677_v48 = vunpack.c.l.s8.bf16 %v2157_v47 }
 0x709   : > { %6030 = vmatprep.subr.bf16.mxu1 %v3652_v60  ;;  %v2679_v59 = vunpack.c.l.s8.bf16 %v2159_v33  ;;  %v2686_v60 = vunpack.c.h.s8.bf16 %v2158_v25  ;;  %v2726_v25 = vunpack.c.l.s8.bf16 %v2182_v31 }
 0x70b   : > { %5687 = vmatpush1.bf16.msra.mxu0 %v3649_v50  ;;  %v2166_v50 = vld [vmem:[%s8403_s19 + $0xa8] sm:$0xff] }
 0x70c   : > { %6031 = vmatpush1.bf16.msra.mxu1 %v3651_v1  ;;  %5688 = vmatprep.subr.bf16.mxu0 %v3658_v2  ;;  %v2168_v1 = vld [vmem:[%s8403_s19 + $0xb8] sm:$0xff]  ;;  %v2685_v2 = vunpack.c.h.s8.bf16 %v2157_v47  ;;  %v2702_v9 = vunpack.c.h.s8.bf16 %v2166_v50  ;;  %v2734_v47 = vunpack.c.h.s8.bf16 %v2182_v31  ;;  %v2205_v31 = vld [vmem:[%s8403_s19 + $0x1e0] sm:$0xff] }
 0x70d   : > { %6032 = vmatprep.subr.bf16.mxu1 %v3660_v3  ;;  %v2694_v3 = vunpack.c.l.s8.bf16 %v2166_v50  ;;  %v2696_v5 = vunpack.c.l.s8.bf16 %v2168_v1  ;;  %v2189_v50 = vld [vmem:[%s8403_s19 + $0x160] sm:$0xff] }
 0x70f   : > { %5689 = vmatpush1.bf16.msra.mxu0 %v3657_v6  ;;  %v2167_v6 = vld [vmem:[%s8403_s19 + $0xb0] sm:$0xff] }
 0x710   : > { %6033 = vmatpush1.bf16.msra.mxu1 %v3659_v7  ;;  %5690 = vmatprep.subr.bf16.mxu0 %v3666_v8  ;;  %v2693_v7 = vunpack.c.l.s8.bf16 %v2165_v4  ;;  %v2695_v8 = vunpack.c.l.s8.bf16 %v2167_v6 }
 0x711   : > { %6034 = vmatprep.subr.bf16.mxu1 %v3668_v10  ;;  %v2704_v10 = vunpack.c.h.s8.bf16 %v2168_v1 }
 0x713   : > { %5691 = vmatpush1.bf16.msra.mxu0 %v3665_v12  ;;  %v2176_v12 = vld [vmem:[%s8403_s19 + $0xf8] sm:$0xff] }
 0x714   : > { %6035 = vmatpush1.bf16.msra.mxu1 %v3667_v13  ;;  %5692 = vmatprep.subr.bf16.mxu0 %v3674_v14  ;;  %v2701_v13 = vunpack.c.h.s8.bf16 %v2165_v4  ;;  %v2703_v14 = vunpack.c.h.s8.bf16 %v2167_v6  ;;  %v2712_v18 = vunpack.c.l.s8.bf16 %v2176_v12  ;;  %v2198_v6 = vld [vmem:[%s8403_s19 + $0x1a8] sm:$0xff] }
 0x715   : > { %6036 = vmatprep.subr.bf16.mxu1 %v3676_v21  ;;  %v2710_v21 = vunpack.c.l.s8.bf16 %v2174_v11  ;;  %v2197_v11 = vld [vmem:[%s8403_s19 + $0x1a0] sm:$0xff] }
 0x717   : > { %5693 = vmatpush1.bf16.msra.mxu0 %v3673_v15  ;;  %v2175_v15 = vld [vmem:[%s8403_s19 + $0xf0] sm:$0xff] }
 0x718   : > { %6037 = vmatpush1.bf16.msra.mxu1 %v3675_v16  ;;  %6049 = vmatprep.subr.bf16.mxu0 %v2662_v24  ;;  %v2709_v16 = vunpack.c.l.s8.bf16 %v2173_v17  ;;  %v2711_v24 = vunpack.c.l.s8.bf16 %v2175_v15 }
 0x719   : > { %6393 = vmatprep.subr.bf16.mxu1 %v2664_v28  ;;  %v2720_v28 = vunpack.c.h.s8.bf16 %v2176_v12 }
 0x71a   : > { %5695 = vmatmul.mubr.bf16.vlgmr.msra.gmra.mrb[16].mxu0 %v9263_v36 }
 0x71b   : > { %6039 = vmatmul.mubr.bf16.vlgmr.msra.gmra.mrb[16].mxu1 %v9263_v36  ;;  %6050 = vmatpush1.bf16.msra.mxu0 %v2661_v39  ;;  %v2184_v39 = vld [vmem:[%s8403_s19 + $0x138] sm:$0xff] }
 0x71c   : > { %6081 = vmatprep.mubr.bf16.mxu0 %v8757_v53  ;;  %6394 = vmatpush1.bf16.msra.mxu1 %v2663_v19  ;;  %v2717_v19 = vunpack.c.h.s8.bf16 %v2173_v17  ;;  %v2728_v37 = vunpack.c.l.s8.bf16 %v2184_v39  ;;  %v2766_v17 = vunpack.c.h.s8.bf16 %v2198_v6 }
 0x71d   : > { %6425 = vmatprep.mubr.bf16.mxu1 %v8757_v53  ;;  %6051 = vmatprep.subr.bf16.mxu0 %v2670_v20  ;;  %v2687_v53 = vunpack.c.h.s8.bf16 %v2159_v33  ;;  %v2719_v20 = vunpack.c.h.s8.bf16 %v2175_v15  ;;  %v2190_v33 = vld [vmem:[%s8403_s19 + $0x168] sm:$0xff] }
 0x71e   : > { %6395 = vmatprep.subr.bf16.mxu1 %v2672_v26  ;;  %v2181_v26 = vld [vmem:[%s8403_s19 + $0x120] sm:$0xff]  ;;  %v2750_v4 = vunpack.c.h.s8.bf16 %v2190_v33  ;;  %v2206_v15 = vld [vmem:[%s8403_s19 + $0x1e8] sm:$0xff] }
 0x71f   : > { %6052 = vmatpush1.bf16.msra.mxu0 %v2669_v22  ;;  %v2183_v22 = vld [vmem:[%s8403_s19 + $0x130] sm:$0xff] }
 0x720   : > { %6396 = vmatpush1.bf16.msra.mxu1 %v2671_v23  ;;  %6053 = vmatprep.subr.bf16.mxu0 %v2678_v43  ;;  %v2725_v23 = vunpack.c.l.s8.bf16 %v2181_v26  ;;  %v2727_v43 = vunpack.c.l.s8.bf16 %v2183_v22 }
 0x721   : > { %6397 = vmatprep.subr.bf16.mxu1 %v2680_v44  ;;  %v2736_v44 = vunpack.c.h.s8.bf16 %v2184_v39 }
 0x723   : > { %6054 = vmatpush1.bf16.msra.mxu0 %v2677_v48  ;;  %v2192_v48 = vld [vmem:[%s8403_s19 + $0x178] sm:$0xff] }
 0x724   : > { %6398 = vmatpush1.bf16.msra.mxu1 %v2679_v59  ;;  %6055 = vmatprep.subr.bf16.mxu0 %v2686_v60  ;;  %v2733_v59 = vunpack.c.h.s8.bf16 %v2181_v26  ;;  %v2735_v60 = vunpack.c.h.s8.bf16 %v2183_v22  ;;  %v2744_v1 = vunpack.c.l.s8.bf16 %v2192_v48  ;;  %v2782_v26 = vunpack.c.h.s8.bf16 %v2206_v15  ;;  %v2214_v22 = vld [vmem:[%s8403_s19 + $0x228] sm:$0xff] }
 0x725   : > { %6399 = vmatprep.subr.bf16.mxu1 %v2688_v49  ;;  %v2742_v49 = vunpack.c.l.s8.bf16 %v2190_v33  ;;  %v2213_v33 = vld [vmem:[%s8403_s19 + $0x220] sm:$0xff] }
 0x727   : > { %6056 = vmatpush1.bf16.msra.mxu0 %v2685_v2  ;;  %v2191_v2 = vld [vmem:[%s8403_s19 + $0x170] sm:$0xff] }
 0x728   : > { %6400 = vmatpush1.bf16.msra.mxu1 %v2687_v53  ;;  %6057 = vmatprep.subr.bf16.mxu0 %v2694_v3  ;;  %v2741_v53 = vunpack.c.l.s8.bf16 %v2189_v50  ;;  %v2743_v3 = vunpack.c.l.s8.bf16 %v2191_v2 }
 0x729   : > { %6401 = vmatprep.subr.bf16.mxu1 %v2696_v5  ;;  %v2752_v5 = vunpack.c.h.s8.bf16 %v2192_v48 }
 0x72b   : > { %6058 = vmatpush1.bf16.msra.mxu0 %v2693_v7  ;;  %v2200_v7 = vld [vmem:[%s8403_s19 + $0x1b8] sm:$0xff] }
 0x72c   : > { %6402 = vmatpush1.bf16.msra.mxu1 %v2695_v8  ;;  %6059 = vmatprep.subr.bf16.mxu0 %v2702_v9  ;;  %v2749_v8 = vunpack.c.h.s8.bf16 %v2189_v50  ;;  %v2751_v9 = vunpack.c.h.s8.bf16 %v2191_v2  ;;  %v2760_v12 = vunpack.c.l.s8.bf16 %v2200_v7  ;;  %v2798_v50 = vunpack.c.h.s8.bf16 %v2214_v22 }
 0x72d   : > { %6403 = vmatprep.subr.bf16.mxu1 %v2704_v10  ;;  %v2758_v10 = vunpack.c.l.s8.bf16 %v2198_v6  ;;  %v2221_v6 = vld [vmem:[%s8403_s19 + $0x260] sm:$0xff] }
 0x72f   : > { %6060 = vmatpush1.bf16.msra.mxu0 %v2701_v13  ;;  %v2199_v13 = vld [vmem:[%s8403_s19 + $0x1b0] sm:$0xff] }
 0x730   : > { %6404 = vmatpush1.bf16.msra.mxu1 %v2703_v14  ;;  %6061 = vmatprep.subr.bf16.mxu0 %v2710_v21  ;;  %v2757_v14 = vunpack.c.l.s8.bf16 %v2197_v11  ;;  %v2759_v21 = vunpack.c.l.s8.bf16 %v2199_v13 }
 0x731   : > { %6405 = vmatprep.subr.bf16.mxu1 %v2712_v18  ;;  %v2768_v18 = vunpack.c.h.s8.bf16 %v2200_v7 }
 0x733   : > { %6062 = vmatpush1.bf16.msra.mxu0 %v2709_v16  ;;  %v2208_v16 = vld [vmem:[%s8403_s19 + $0x1f8] sm:$0xff] }
 0x734   : > { %6406 = vmatpush1.bf16.msra.mxu1 %v2711_v24  ;;  %6063 = vmatprep.subr.bf16.mxu0 %v2718_v27  ;;  %v2765_v24 = vunpack.c.h.s8.bf16 %v2197_v11  ;;  %v2767_v27 = vunpack.c.h.s8.bf16 %v2199_v13  ;;  %v2776_v39 = vunpack.c.l.s8.bf16 %v2208_v16  ;;  %v2232_v13 = vld [vmem:[%s8403_s19 + $0x2b8] sm:$0xff] }
 0x735   : > { %6407 = vmatprep.subr.bf16.mxu1 %v2720_v28  ;;  %v2774_v28 = vunpack.c.l.s8.bf16 %v2206_v15  ;;  %v2231_v15 = vld [vmem:[%s8403_s19 + $0x2b0] sm:$0xff] }
 0x737   : > { %6064 = vmatpush1.bf16.msra.mxu0 %v2717_v19  ;;  %v2207_v19 = vld [vmem:[%s8403_s19 + $0x1f0] sm:$0xff] }
 0x738   : > { %6408 = vmatpush1.bf16.msra.mxu1 %v2719_v20  ;;  %6065 = vmatprep.subr.bf16.mxu0 %v2726_v25  ;;  %v2773_v20 = vunpack.c.l.s8.bf16 %v2205_v31  ;;  %v2775_v25 = vunpack.c.l.s8.bf16 %v2207_v19 }
 0x739   : > { %6409 = vmatprep.subr.bf16.mxu1 %v2728_v37  ;;  %v2784_v37 = vunpack.c.h.s8.bf16 %v2208_v16 }
 0x73b   : > { %6066 = vmatpush1.bf16.msra.mxu0 %v2725_v23  ;;  %v2216_v23 = vld [vmem:[%s8403_s19 + $0x238] sm:$0xff] }
 0x73c   : > { %6410 = vmatpush1.bf16.msra.mxu1 %v2727_v43  ;;  %6067 = vmatprep.subr.bf16.mxu0 %v2734_v47  ;;  %v2781_v43 = vunpack.c.h.s8.bf16 %v2205_v31  ;;  %v2783_v47 = vunpack.c.h.s8.bf16 %v2207_v19  ;;  %v2792_v48 = vunpack.c.l.s8.bf16 %v2216_v23  ;;  %v2800_v2 = vunpack.c.h.s8.bf16 %v2216_v23  ;;  %v2238_v31 = vld [vmem:[%s8403_s19 + $0x2e8] sm:$0xff] }
 0x73d   : > { %6411 = vmatprep.subr.bf16.mxu1 %v2736_v44  ;;  %v2790_v44 = vunpack.c.l.s8.bf16 %v2214_v22  ;;  %v2239_v22 = vld [vmem:[%s8403_s19 + $0x2f0] sm:$0xff] }
 0x73f   : > { %6068 = vmatpush1.bf16.msra.mxu0 %v2733_v59  ;;  %v2215_v59 = vld [vmem:[%s8403_s19 + $0x230] sm:$0xff] }
 0x740   : > { %6412 = vmatpush1.bf16.msra.mxu1 %v2735_v60  ;;  %6069 = vmatprep.subr.bf16.mxu0 %v2742_v49  ;;  %v2789_v60 = vunpack.c.l.s8.bf16 %v2213_v33  ;;  %v2791_v49 = vunpack.c.l.s8.bf16 %v2215_v59 }
 0x741   : > { %6413 = vmatprep.subr.bf16.mxu1 %v2744_v1  ;;  %v2222_v1 = vld [vmem:[%s8403_s19 + $0x268] sm:$0xff] }
 0x743   : > { %6070 = vmatpush1.bf16.msra.mxu0 %v2741_v53  ;;  %v2224_v53 = vld [vmem:[%s8403_s19 + $0x278] sm:$0xff] }
 0x744   : > { %6414 = vmatpush1.bf16.msra.mxu1 %v2743_v3  ;;  %6071 = vmatprep.subr.bf16.mxu0 %v2750_v4  ;;  %v2797_v3 = vunpack.c.h.s8.bf16 %v2213_v33  ;;  %v2799_v4 = vunpack.c.h.s8.bf16 %v2215_v59  ;;  %v2808_v7 = vunpack.c.l.s8.bf16 %v2224_v53  ;;  %v2816_v11 = vunpack.c.h.s8.bf16 %v2224_v53  ;;  %v2246_v33 = vld [vmem:[%s8403_s19 + $0x328] sm:$0xff] }
 0x745   : > { %6415 = vmatprep.subr.bf16.mxu1 %v2752_v5  ;;  %v2806_v5 = vunpack.c.l.s8.bf16 %v2222_v1 }
 0x747   : > { %6072 = vmatpush1.bf16.msra.mxu0 %v2749_v8  ;;  %v2223_v8 = vld [vmem:[%s8403_s19 + $0x270] sm:$0xff] }
 0x748   : > { %6416 = vmatpush1.bf16.msra.mxu1 %v2751_v9  ;;  %6073 = vmatprep.subr.bf16.mxu0 %v2758_v10  ;;  %v2805_v9 = vunpack.c.l.s8.bf16 %v2221_v6  ;;  %v2814_v10 = vunpack.c.h.s8.bf16 %v2222_v1 }
 0x749   : > { %6417 = vmatprep.subr.bf16.mxu1 %v2760_v12  ;;  %v2230_v12 = vld [vmem:[%s8403_s19 + $0x2a8] sm:$0xff] }
 0x74b   : > { %6074 = vmatpush1.bf16.msra.mxu0 %v2757_v14  ;;  %v2813_v14 = vunpack.c.h.s8.bf16 %v2221_v6  ;;  %v2254_v6 = vld [vmem:[%s8403_s19 + $0x368] sm:$0xff] }
 0x74c   : > { %6418 = vmatpush1.bf16.msra.mxu1 %v2759_v21  ;;  %6075 = vmatprep.subr.bf16.mxu0 %v2766_v17  ;;  %v2822_v21 = vunpack.c.l.s8.bf16 %v2230_v12  ;;  %v2229_v17 = vld [vmem:[%s8403_s19 + $0x2a0] sm:$0xff] }
 0x74d   : > { %6419 = vmatprep.subr.bf16.mxu1 %v2768_v18  ;;  %v2824_v18 = vunpack.c.l.s8.bf16 %v2232_v13  ;;  %v2821_v16 = vunpack.c.l.s8.bf16 %v2229_v17  ;;  %v2829_v19 = vunpack.c.h.s8.bf16 %v2229_v17  ;;  %v2262_v17 = vld [vmem:[%s8403_s19 + $0x3a8] sm:$0xff] }
 0x74f   : > { %6076 = vmatpush1.bf16.msra.mxu0 %v2765_v24  ;;  %v2823_v24 = vunpack.c.l.s8.bf16 %v2231_v15 }
 0x750   : > { %6420 = vmatpush1.bf16.msra.mxu1 %v2767_v27  ;;  %6077 = vmatprep.subr.bf16.mxu0 %v2774_v28  ;;  %v2830_v27 = vunpack.c.h.s8.bf16 %v2230_v12  ;;  %v2832_v28 = vunpack.c.h.s8.bf16 %v2232_v13  ;;  %v2255_v12 = vld [vmem:[%s8403_s19 + $0x370] sm:$0xff] }
 0x751   : > { %6421 = vmatprep.subr.bf16.mxu1 %v2776_v39  ;;  %v2240_v39 = vld [vmem:[%s8403_s19 + $0x2f8] sm:$0xff] }
 0x753   : > { %6078 = vmatpush1.bf16.msra.mxu0 %v2773_v20  ;;  %v2831_v20 = vunpack.c.h.s8.bf16 %v2231_v15 }
 0x754   : > { %6422 = vmatpush1.bf16.msra.mxu1 %v2775_v25  ;;  %6079 = vmatprep.subr.bf16.mxu0 %v2782_v26  ;;  %v2838_v25 = vunpack.c.l.s8.bf16 %v2238_v31  ;;  %v2237_v26 = vld [vmem:[%s8403_s19 + $0x2e0] sm:$0xff] }
 0x755   : > { %6423 = vmatprep.subr.bf16.mxu1 %v2784_v37  ;;  %v2840_v37 = vunpack.c.l.s8.bf16 %v2240_v39  ;;  %v2837_v23 = vunpack.c.l.s8.bf16 %v2237_v26  ;;  %v2845_v59 = vunpack.c.h.s8.bf16 %v2237_v26  ;;  %v2270_v26 = vld [vmem:[%s8403_s19 + $0x3e8] sm:$0xff] }
 0x757   : > { %6080 = vmatpush1.bf16.msra.mxu0 %v2781_v43  ;;  %v2839_v43 = vunpack.c.l.s8.bf16 %v2239_v22 }
 0x758   : > { %6424 = vmatpush1.bf16.msra.mxu1 %v2783_v47  ;;  %6092 = vmatprep.subr.bf16.mxu0 %v2790_v44  ;;  %v2846_v47 = vunpack.c.h.s8.bf16 %v2238_v31  ;;  %v2848_v44 = vunpack.c.h.s8.bf16 %v2240_v39  ;;  %v2263_v31 = vld [vmem:[%s8403_s19 + $0x3b0] sm:$0xff] }
 0x759   : > { %6436 = vmatprep.subr.bf16.mxu1 %v2792_v48  ;;  %v2248_v48 = vld [vmem:[%s8403_s19 + $0x338] sm:$0xff] }
 0x75a   : > { %6082 = vmatmul.mubr.bf16.vlgmr.msra.gmra.mrb[20].mxu0 %v8753_v51  ;;  %v2856_v1 = vunpack.c.l.s8.bf16 %v2248_v48 }
 0x75b   : > { %6426 = vmatmul.mubr.bf16.vlgmr.msra.gmra.mrb[20].mxu1 %v8753_v51  ;;  %6093 = vmatpush1.bf16.msra.mxu0 %v2789_v60  ;;  %v2807_v51 = vunpack.c.l.s8.bf16 %v2223_v8  ;;  %v2847_v60 = vunpack.c.h.s8.bf16 %v2239_v22 }
 0x75c   : > { %6124 = vmatprep.mubr.bf16.mxu0 %v8759_v54  ;;  %6437 = vmatpush1.bf16.msra.mxu1 %v2791_v49  ;;  %v2854_v49 = vunpack.c.l.s8.bf16 %v2246_v33 }
 0x75d   : > { %6468 = vmatprep.mubr.bf16.mxu1 %v8759_v54  ;;  %6094 = vmatprep.subr.bf16.mxu0 %v2798_v50  ;;  %v2815_v54 = vunpack.c.h.s8.bf16 %v2223_v8  ;;  %v2245_v50 = vld [vmem:[%s8403_s19 + $0x320] sm:$0xff] }
 0x75e   : > { %6438 = vmatprep.subr.bf16.mxu1 %v2800_v2  ;;  %v2247_v2 = vld [vmem:[%s8403_s19 + $0x330] sm:$0xff]  ;;  %v2853_v53 = vunpack.c.l.s8.bf16 %v2245_v50  ;;  %v2861_v8 = vunpack.c.h.s8.bf16 %v2245_v50  ;;  %v2278_v50 = vld [vmem:[%s8403_s19 + $0x428] sm:$0xff] }
 0x75f   : > { %6095 = vmatpush1.bf16.msra.mxu0 %v2797_v3  ;;  %v2855_v3 = vunpack.c.l.s8.bf16 %v2247_v2 }
 0x760   : > { %6439 = vmatpush1.bf16.msra.mxu1 %v2799_v4  ;;  %6096 = vmatprep.subr.bf16.mxu0 %v2806_v5  ;;  %v2862_v4 = vunpack.c.h.s8.bf16 %v2246_v33  ;;  %v2864_v5 = vunpack.c.h.s8.bf16 %v2248_v48  ;;  %v2271_v33 = vld [vmem:[%s8403_s19 + $0x3f0] sm:$0xff] }
 0x761   : > { %6440 = vmatprep.subr.bf16.mxu1 %v2808_v7  ;;  %v2256_v7 = vld [vmem:[%s8403_s19 + $0x378] sm:$0xff] }
 0x763   : > { %6097 = vmatpush1.bf16.msra.mxu0 %v2805_v9  ;;  %v2863_v9 = vunpack.c.h.s8.bf16 %v2247_v2 }
 0x764   : > { %6441 = vmatpush1.bf16.msra.mxu1 %v2807_v51  ;;  %6098 = vmatprep.subr.bf16.mxu0 %v2814_v10  ;;  %v2870_v51 = vunpack.c.l.s8.bf16 %v2254_v6  ;;  %v2253_v10 = vld [vmem:[%s8403_s19 + $0x360] sm:$0xff] }
 0x765   : > { %6442 = vmatprep.subr.bf16.mxu1 %v2816_v11  ;;  %v2872_v11 = vunpack.c.l.s8.bf16 %v2256_v7  ;;  %v2869_v13 = vunpack.c.l.s8.bf16 %v2253_v10  ;;  %v2877_v15 = vunpack.c.h.s8.bf16 %v2253_v10 }
 0x767   : > { %6099 = vmatpush1.bf16.msra.mxu0 %v2813_v14  ;;  %v2871_v14 = vunpack.c.l.s8.bf16 %v2255_v12 }
 0x768   : > { %6443 = vmatpush1.bf16.msra.mxu1 %v2815_v54  ;;  %6100 = vmatprep.subr.bf16.mxu0 %v2822_v21  ;;  %v2878_v54 = vunpack.c.h.s8.bf16 %v2254_v6  ;;  %v2880_v21 = vunpack.c.h.s8.bf16 %v2256_v7  ;;  %v2279_v6 = vld [vmem:[%s8403_s19 + $0x430] sm:$0xff] }
 0x769   : > { %6444 = vmatprep.subr.bf16.mxu1 %v2824_v18  ;;  %v2264_v18 = vld [vmem:[%s8403_s19 + $0x3b8] sm:$0xff] }
 0x76b   : > { %6101 = vmatpush1.bf16.msra.mxu0 %v2821_v16  ;;  %v2879_v16 = vunpack.c.h.s8.bf16 %v2255_v12 }
 0x76c   : > { %6445 = vmatpush1.bf16.msra.mxu1 %v2823_v24  ;;  %6102 = vmatprep.subr.bf16.mxu0 %v2830_v27  ;;  %v2886_v24 = vunpack.c.l.s8.bf16 %v2262_v17  ;;  %v2261_v27 = vld [vmem:[%s8403_s19 + $0x3a0] sm:$0xff] }
 0x76d   : > { %6446 = vmatprep.subr.bf16.mxu1 %v2832_v28  ;;  %v2888_v28 = vunpack.c.l.s8.bf16 %v2264_v18  ;;  %v2885_v39 = vunpack.c.l.s8.bf16 %v2261_v27  ;;  %v2893_v22 = vunpack.c.h.s8.bf16 %v2261_v27  ;;  %v2296_v27 = vld [vmem:[%s8403_s19 + $0x4b8] sm:$0xff] }
 0x76f   : > { %6103 = vmatpush1.bf16.msra.mxu0 %v2829_v19  ;;  %v2887_v19 = vunpack.c.l.s8.bf16 %v2263_v31 }
 0x770   : > { %6447 = vmatpush1.bf16.msra.mxu1 %v2831_v20  ;;  %6104 = vmatprep.subr.bf16.mxu0 %v2838_v25  ;;  %v2894_v20 = vunpack.c.h.s8.bf16 %v2262_v17  ;;  %v2896_v25 = vunpack.c.h.s8.bf16 %v2264_v18  ;;  %v2287_v17 = vld [vmem:[%s8403_s19 + $0x470] sm:$0xff] }
 0x771   : > { %6448 = vmatprep.subr.bf16.mxu1 %v2840_v37  ;;  %v2272_v37 = vld [vmem:[%s8403_s19 + $0x3f8] sm:$0xff] }
 0x773   : > { %6105 = vmatpush1.bf16.msra.mxu0 %v2837_v23  ;;  %v2895_v23 = vunpack.c.h.s8.bf16 %v2263_v31 }
 0x774   : > { %6449 = vmatpush1.bf16.msra.mxu1 %v2839_v43  ;;  %6106 = vmatprep.subr.bf16.mxu0 %v2846_v47  ;;  %v2902_v43 = vunpack.c.l.s8.bf16 %v2270_v26  ;;  %v2269_v47 = vld [vmem:[%s8403_s19 + $0x3e0] sm:$0xff] }
 0x775   : > { %6450 = vmatprep.subr.bf16.mxu1 %v2848_v44  ;;  %v2904_v44 = vunpack.c.l.s8.bf16 %v2272_v37  ;;  %v2901_v48 = vunpack.c.l.s8.bf16 %v2269_v47  ;;  %v2909_v2 = vunpack.c.h.s8.bf16 %v2269_v47 }
 0x777   : > { %6107 = vmatpush1.bf16.msra.mxu0 %v2845_v59  ;;  %v2903_v59 = vunpack.c.l.s8.bf16 %v2271_v33 }
 0x778   : > { %6451 = vmatpush1.bf16.msra.mxu1 %v2847_v60  ;;  %6108 = vmatprep.subr.bf16.mxu0 %v2854_v49  ;;  %v2910_v60 = vunpack.c.h.s8.bf16 %v2270_v26  ;;  %v2912_v49 = vunpack.c.h.s8.bf16 %v2272_v37 }
 0x779   : > { %6452 = vmatprep.subr.bf16.mxu1 %v2856_v1  ;;  %v2280_v1 = vld [vmem:[%s8403_s19 + $0x438] sm:$0xff] }
 0x77a   : > { %v2928_v10 = vunpack.c.h.s8.bf16 %v2280_v1 }
 0x77b   : > { %6109 = vmatpush1.bf16.msra.mxu0 %v2853_v53  ;;  %v2911_v53 = vunpack.c.h.s8.bf16 %v2271_v33 }
 0x77c   : > { %6453 = vmatpush1.bf16.msra.mxu1 %v2855_v3  ;;  %6110 = vmatprep.subr.bf16.mxu0 %v2862_v4  ;;  %v2918_v3 = vunpack.c.l.s8.bf16 %v2278_v50  ;;  %v2277_v4 = vld [vmem:[%s8403_s19 + $0x420] sm:$0xff] }
 0x77d   : > { %6454 = vmatprep.subr.bf16.mxu1 %v2864_v5  ;;  %v2920_v5 = vunpack.c.l.s8.bf16 %v2280_v1  ;;  %v2917_v7 = vunpack.c.l.s8.bf16 %v2277_v4  ;;  %v2925_v12 = vunpack.c.h.s8.bf16 %v2277_v4 }
 0x77f   : > { %6111 = vmatpush1.bf16.msra.mxu0 %v2861_v8  ;;  %v2919_v8 = vunpack.c.l.s8.bf16 %v2279_v6 }
 0x780   : > { %6455 = vmatpush1.bf16.msra.mxu1 %v2863_v9  ;;  %6112 = vmatprep.subr.bf16.mxu0 %v2870_v51  ;;  %v2926_v9 = vunpack.c.h.s8.bf16 %v2278_v50  ;;  %v2286_v51 = vld [vmem:[%s8403_s19 + $0x468] sm:$0xff] }
 0x781   : > { %6456 = vmatprep.subr.bf16.mxu1 %v2872_v11  ;;  %v2288_v11 = vld [vmem:[%s8403_s19 + $0x478] sm:$0xff] }
 0x783   : > { %6113 = vmatpush1.bf16.msra.mxu0 %v2869_v13  ;;  %v2927_v13 = vunpack.c.h.s8.bf16 %v2279_v6 }
 0x784   : > { %6457 = vmatpush1.bf16.msra.mxu1 %v2871_v14  ;;  %6114 = vmatprep.subr.bf16.mxu0 %v2878_v54  ;;  %v2934_v14 = vunpack.c.l.s8.bf16 %v2286_v51  ;;  %v2285_v54 = vld [vmem:[%s8403_s19 + $0x460] sm:$0xff] }
 0x785   : > { %6458 = vmatprep.subr.bf16.mxu1 %v2880_v21  ;;  %v2936_v21 = vunpack.c.l.s8.bf16 %v2288_v11  ;;  %v2933_v18 = vunpack.c.l.s8.bf16 %v2285_v54 }
 0x787   : > { %6115 = vmatpush1.bf16.msra.mxu0 %v2877_v15  ;;  %v2942_v15 = vunpack.c.h.s8.bf16 %v2286_v51 }
 0x788   : > { %6459 = vmatpush1.bf16.msra.mxu1 %v2879_v16  ;;  %6116 = vmatprep.subr.bf16.mxu0 %v2886_v24  ;;  %v2944_v16 = vunpack.c.h.s8.bf16 %v2288_v11  ;;  %v2294_v24 = vld [vmem:[%s8403_s19 + $0x4a8] sm:$0xff] }
 0x789   : > { %6460 = vmatprep.subr.bf16.mxu1 %v2888_v28  ;;  %v2941_v28 = vunpack.c.h.s8.bf16 %v2285_v54  ;;  %v2950_v31 = vunpack.c.l.s8.bf16 %v2294_v24  ;;  %v2958_v37 = vunpack.c.h.s8.bf16 %v2294_v24 }
 0x78b   : > { %6117 = vmatpush1.bf16.msra.mxu0 %v2885_v39  ;;  %v2293_v39 = vld [vmem:[%s8403_s19 + $0x4a0] sm:$0xff] }
 0x78c   : > { %6461 = vmatpush1.bf16.msra.mxu1 %v2887_v19  ;;  %6118 = vmatprep.subr.bf16.mxu0 %v2894_v20  ;;  %v2952_v19 = vunpack.c.l.s8.bf16 %v2296_v27  ;;  %v2295_v20 = vld [vmem:[%s8403_s19 + $0x4b0] sm:$0xff]  ;;  %v2957_v47 = vunpack.c.h.s8.bf16 %v2293_v39 }
 0x78d   : > { %6462 = vmatprep.subr.bf16.mxu1 %v2896_v25  ;;  %v2949_v25 = vunpack.c.l.s8.bf16 %v2293_v39  ;;  %v2951_v26 = vunpack.c.l.s8.bf16 %v2295_v20 }
 0x78f   : > { %6119 = vmatpush1.bf16.msra.mxu0 %v2893_v22  ;;  %v2960_v22 = vunpack.c.h.s8.bf16 %v2296_v27 }
 0x790   : > { %6463 = vmatpush1.bf16.msra.mxu1 %v2895_v23  ;;  %6120 = vmatprep.subr.bf16.mxu0 %v2902_v43  ;;  %v2302_v23 = vld [vmem:[%s8403_s19 + $0x4e8] sm:$0xff]  ;;  %v2304_v43 = vld [vmem:[%s8403_s19 + $0x4f8] sm:$0xff] }
 0x791   : > { %6464 = vmatprep.subr.bf16.mxu1 %v2904_v44  ;;  %v2959_v44 = vunpack.c.h.s8.bf16 %v2295_v20  ;;  %v2966_v33 = vunpack.c.l.s8.bf16 %v2302_v23  ;;  %v2974_v1 = vunpack.c.h.s8.bf16 %v2302_v23 }
 0x793   : > { %6121 = vmatpush1.bf16.msra.mxu0 %v2901_v48  ;;  %v2301_v48 = vld [vmem:[%s8403_s19 + $0x4e0] sm:$0xff] }
 0x794   : > { %6465 = vmatpush1.bf16.msra.mxu1 %v2903_v59  ;;  %6122 = vmatprep.subr.bf16.mxu0 %v2910_v60  ;;  %v2968_v59 = vunpack.c.l.s8.bf16 %v2304_v43  ;;  %v2303_v60 = vld [vmem:[%s8403_s19 + $0x4f0] sm:$0xff]  ;;  %v2973_v4 = vunpack.c.h.s8.bf16 %v2301_v48 }
 0x795   : > { %6466 = vmatprep.subr.bf16.mxu1 %v2912_v49  ;;  %v2965_v49 = vunpack.c.l.s8.bf16 %v2301_v48  ;;  %v2967_v50 = vunpack.c.l.s8.bf16 %v2303_v60 }
 0x797   : > { %6123 = vmatpush1.bf16.msra.mxu0 %v2909_v2  ;;  %v2976_v2 = vunpack.c.h.s8.bf16 %v2304_v43 }
 0x798   : > { %6467 = vmatpush1.bf16.msra.mxu1 %v2911_v53  ;;  %6135 = vmatprep.subr.bf16.mxu0 %v2918_v3  ;;  %v2310_v53 = vld [vmem:[%s8403_s19 + $0x528] sm:$0xff]  ;;  %v2312_v3 = vld [vmem:[%s8403_s19 + $0x538] sm:$0xff] }
 0x799   : > { %6479 = vmatprep.subr.bf16.mxu1 %v2920_v5  ;;  %v2975_v5 = vunpack.c.h.s8.bf16 %v2303_v60  ;;  %v2982_v6 = vunpack.c.l.s8.bf16 %v2310_v53  ;;  %v2990_v11 = vunpack.c.h.s8.bf16 %v2310_v53 }
 0x79a   : > { %6125 = vmatmul.mubr.bf16.vlgmr.msra.gmra.mrb[20].mxu0 %v8755_v52 }
 0x79b   : > { %6469 = vmatmul.mubr.bf16.vlgmr.msra.gmra.mrb[20].mxu1 %v8755_v52  ;;  %6136 = vmatpush1.bf16.msra.mxu0 %v2917_v7  ;;  %v2935_v52 = vunpack.c.l.s8.bf16 %v2287_v17  ;;  %v2309_v7 = vld [vmem:[%s8403_s19 + $0x520] sm:$0xff] }
 0x79c   : > { %6167 = vmatprep.mubr.bf16.mxu0 %v8931_v57  ;;  %6480 = vmatpush1.bf16.msra.mxu1 %v2919_v8  ;;  %v2984_v8 = vunpack.c.l.s8.bf16 %v2312_v3  ;;  %v2981_v51 = vunpack.c.l.s8.bf16 %v2309_v7  ;;  %v2989_v54 = vunpack.c.h.s8.bf16 %v2309_v7 }
 0x79d   : > { %6511 = vmatprep.mubr.bf16.mxu1 %v8931_v57  ;;  %6137 = vmatprep.subr.bf16.mxu0 %v2926_v9  ;;  %v2943_v57 = vunpack.c.h.s8.bf16 %v2287_v17  ;;  %v2311_v9 = vld [vmem:[%s8403_s19 + $0x530] sm:$0xff] }
 0x79e   : > { %6481 = vmatprep.subr.bf16.mxu1 %v2928_v10  ;;  %v2983_v10 = vunpack.c.l.s8.bf16 %v2311_v9 }
 0x79f   : > { %6138 = vmatpush1.bf16.msra.mxu0 %v2925_v12  ;;  %v2992_v12 = vunpack.c.h.s8.bf16 %v2312_v3 }
 0x7a0   : > { %6482 = vmatpush1.bf16.msra.mxu1 %v2927_v13  ;;  %6139 = vmatprep.subr.bf16.mxu0 %v2934_v14  ;;  %v2318_v13 = vld [vmem:[%s8403_s19 + $0x568] sm:$0xff]  ;;  %v2320_v14 = vld [vmem:[%s8403_s19 + $0x578] sm:$0xff] }
 0x7a1   : > { %6483 = vmatprep.subr.bf16.mxu1 %v2936_v21  ;;  %v2991_v21 = vunpack.c.h.s8.bf16 %v2311_v9  ;;  %v2998_v17 = vunpack.c.l.s8.bf16 %v2318_v13  ;;  %v3006_v27 = vunpack.c.h.s8.bf16 %v2318_v13 }
 0x7a3   : > { %6140 = vmatpush1.bf16.msra.mxu0 %v2933_v18  ;;  %v2317_v18 = vld [vmem:[%s8403_s19 + $0x560] sm:$0xff] }
 0x7a4   : > { %6484 = vmatpush1.bf16.msra.mxu1 %v2935_v52  ;;  %6141 = vmatprep.subr.bf16.mxu0 %v2942_v15  ;;  %v3000_v52 = vunpack.c.l.s8.bf16 %v2320_v14  ;;  %v2319_v15 = vld [vmem:[%s8403_s19 + $0x570] sm:$0xff]  ;;  %v3005_v39 = vunpack.c.h.s8.bf16 %v2317_v18 }
 0x7a5   : > { %6485 = vmatprep.subr.bf16.mxu1 %v2944_v16  ;;  %v2997_v16 = vunpack.c.l.s8.bf16 %v2317_v18  ;;  %v2999_v24 = vunpack.c.l.s8.bf16 %v2319_v15 }
 0x7a7   : > { %6142 = vmatpush1.bf16.msra.mxu0 %v2941_v28  ;;  %v3008_v28 = vunpack.c.h.s8.bf16 %v2320_v14 }
 0x7a8   : > { %6486 = vmatpush1.bf16.msra.mxu1 %v2943_v57  ;;  %6143 = vmatprep.subr.bf16.mxu0 %v2950_v31  ;;  %v2326_v57 = vld [vmem:[%s8403_s19 + $0x5a8] sm:$0xff]  ;;  %v2328_v31 = vld [vmem:[%s8403_s19 + $0x5b8] sm:$0xff] }
 0x7a9   : > { %6487 = vmatprep.subr.bf16.mxu1 %v2952_v19  ;;  %v3007_v19 = vunpack.c.h.s8.bf16 %v2319_v15  ;;  %v3014_v20 = vunpack.c.l.s8.bf16 %v2326_v57  ;;  %v3022_v43 = vunpack.c.h.s8.bf16 %v2326_v57 }
 0x7ab   : > { %6144 = vmatpush1.bf16.msra.mxu0 %v2949_v25  ;;  %v2325_v25 = vld [vmem:[%s8403_s19 + $0x5a0] sm:$0xff] }
 0x7ac   : > { %6488 = vmatpush1.bf16.msra.mxu1 %v2951_v26  ;;  %6145 = vmatprep.subr.bf16.mxu0 %v2958_v37  ;;  %v3016_v26 = vunpack.c.l.s8.bf16 %v2328_v31  ;;  %v2327_v37 = vld [vmem:[%s8403_s19 + $0x5b0] sm:$0xff]  ;;  %v3021_v48 = vunpack.c.h.s8.bf16 %v2325_v25 }
 0x7ad   : > { %6489 = vmatprep.subr.bf16.mxu1 %v2960_v22  ;;  %v3013_v22 = vunpack.c.l.s8.bf16 %v2325_v25  ;;  %v3015_v23 = vunpack.c.l.s8.bf16 %v2327_v37 }
 0x7af   : > { %6146 = vmatpush1.bf16.msra.mxu0 %v2957_v47  ;;  %v3024_v47 = vunpack.c.h.s8.bf16 %v2328_v31 }
 0x7b0   : > { %6490 = vmatpush1.bf16.msra.mxu1 %v2959_v44  ;;  %6147 = vmatprep.subr.bf16.mxu0 %v2966_v33  ;;  %v2334_v44 = vld [vmem:[%s8403_s19 + $0x5e8] sm:$0xff]  ;;  %v2336_v33 = vld [vmem:[%s8403_s19 + $0x5f8] sm:$0xff] }
 0x7b1   : > { %6491 = vmatprep.subr.bf16.mxu1 %v2968_v59  ;;  %v3023_v59 = vunpack.c.h.s8.bf16 %v2327_v37  ;;  %v3030_v60 = vunpack.c.l.s8.bf16 %v2334_v44  ;;  %v3038_v3 = vunpack.c.h.s8.bf16 %v2334_v44 }
 0x7b3   : > { %6148 = vmatpush1.bf16.msra.mxu0 %v2965_v49  ;;  %v2333_v49 = vld [vmem:[%s8403_s19 + $0x5e0] sm:$0xff] }
 0x7b4   : > { %6492 = vmatpush1.bf16.msra.mxu1 %v2967_v50  ;;  %6149 = vmatprep.subr.bf16.mxu0 %v2974_v1  ;;  %v3032_v50 = vunpack.c.l.s8.bf16 %v2336_v33  ;;  %v2335_v1 = vld [vmem:[%s8403_s19 + $0x5f0] sm:$0xff]  ;;  %v3037_v7 = vunpack.c.h.s8.bf16 %v2333_v49 }
 0x7b5   : > { %6493 = vmatprep.subr.bf16.mxu1 %v2976_v2  ;;  %v3029_v2 = vunpack.c.l.s8.bf16 %v2333_v49  ;;  %v3031_v53 = vunpack.c.l.s8.bf16 %v2335_v1  ;;  %v5331_v49 = vld [vmem:[#allocation3 + $0x10] sm:$0xff] }
 0x7b7   : > { %6150 = vmatpush1.bf16.msra.mxu0 %v2973_v4  ;;  %v3040_v4 = vunpack.c.h.s8.bf16 %v2336_v33  ;;  %v2366_v33 = vld [vmem:[%s8403_s19 + $0x6e8] sm:$0xff] }
 0x7b8   : > { %6494 = vmatpush1.bf16.msra.mxu1 %v2975_v5  ;;  %6151 = vmatprep.subr.bf16.mxu0 %v2982_v6  ;;  %v2342_v5 = vld [vmem:[%s8403_s19 + $0x628] sm:$0xff]  ;;  %v2344_v6 = vld [vmem:[%s8403_s19 + $0x638] sm:$0xff] }
 0x7b9   : > { %6495 = vmatprep.subr.bf16.mxu1 %v2984_v8  ;;  %v3039_v8 = vunpack.c.h.s8.bf16 %v2335_v1  ;;  %v3046_v9 = vunpack.c.l.s8.bf16 %v2342_v5  ;;  %v3054_v14 = vunpack.c.h.s8.bf16 %v2342_v5  ;;  %v5337_v5 = vld [vmem:[#allocation3 + $0x40] sm:$0xff] }
 0x7bb   : > { %6152 = vmatpush1.bf16.msra.mxu0 %v2981_v51  ;;  %v2341_v51 = vld [vmem:[%s8403_s19 + $0x620] sm:$0xff] }
 0x7bc   : > { %6496 = vmatpush1.bf16.msra.mxu1 %v2983_v10  ;;  %6153 = vmatprep.subr.bf16.mxu0 %v2990_v11  ;;  %v3048_v10 = vunpack.c.l.s8.bf16 %v2344_v6  ;;  %v2343_v11 = vld [vmem:[%s8403_s19 + $0x630] sm:$0xff]  ;;  %v3053_v18 = vunpack.c.h.s8.bf16 %v2341_v51 }
 0x7bd   : > { %6497 = vmatprep.subr.bf16.mxu1 %v2992_v12  ;;  %v3045_v12 = vunpack.c.l.s8.bf16 %v2341_v51  ;;  %v3047_v13 = vunpack.c.l.s8.bf16 %v2343_v11 }
 0x7bf   : > { %6154 = vmatpush1.bf16.msra.mxu0 %v2989_v54  ;;  %v2350_v54 = vld [vmem:[%s8403_s19 + $0x668] sm:$0xff] }
 0x7c0   : > { %6498 = vmatpush1.bf16.msra.mxu1 %v2991_v21  ;;  %6155 = vmatprep.subr.bf16.mxu0 %v2998_v17  ;;  %v3056_v21 = vunpack.c.h.s8.bf16 %v2344_v6  ;;  %v2352_v17 = vld [vmem:[%s8403_s19 + $0x678] sm:$0xff]  ;;  %v3062_v15 = vunpack.c.l.s8.bf16 %v2350_v54  ;;  %v3070_v57 = vunpack.c.h.s8.bf16 %v2350_v54 }
 0x7c1   : > { %6499 = vmatprep.subr.bf16.mxu1 %v3000_v52  ;;  %v3055_v52 = vunpack.c.h.s8.bf16 %v2343_v11  ;;  %v3072_v31 = vunpack.c.h.s8.bf16 %v2352_v17  ;;  %v5338_v11 = vld [vmem:[#allocation3 + $0x48] sm:$0xff] }
 0x7c3   : > { %6156 = vmatpush1.bf16.msra.mxu0 %v2997_v16  ;;  %v2349_v16 = vld [vmem:[%s8403_s19 + $0x660] sm:$0xff] }
 0x7c4   : > { %6500 = vmatpush1.bf16.msra.mxu1 %v2999_v24  ;;  %6157 = vmatprep.subr.bf16.mxu0 %v3006_v27  ;;  %v3064_v24 = vunpack.c.l.s8.bf16 %v2352_v17  ;;  %v2351_v27 = vld [vmem:[%s8403_s19 + $0x670] sm:$0xff] }
 0x7c5   : > { %6501 = vmatprep.subr.bf16.mxu1 %v3008_v28  ;;  %v3061_v28 = vunpack.c.l.s8.bf16 %v2349_v16 }
 0x7c7   : > { %6158 = vmatpush1.bf16.msra.mxu0 %v3005_v39  ;;  %v2358_v39 = vld [vmem:[%s8403_s19 + $0x6a8] sm:$0xff] }
 0x7c8   : > { %6502 = vmatpush1.bf16.msra.mxu1 %v3007_v19  ;;  %6159 = vmatprep.subr.bf16.mxu0 %v3014_v20  ;;  %v2360_v19 = vld [vmem:[%s8403_s19 + $0x6b8] sm:$0xff]  ;;  %v3069_v20 = vunpack.c.h.s8.bf16 %v2349_v16  ;;  %v3078_v25 = vunpack.c.l.s8.bf16 %v2358_v39 }
 0x7c9   : > { %6503 = vmatprep.subr.bf16.mxu1 %v3016_v26  ;;  %v2357_v26 = vld [vmem:[%s8403_s19 + $0x6a0] sm:$0xff]  ;;  %v3080_v37 = vunpack.c.l.s8.bf16 %v2360_v19  ;;  %v3088_v44 = vunpack.c.h.s8.bf16 %v2360_v19 }
 0x7cb   : > { %6160 = vmatpush1.bf16.msra.mxu0 %v3013_v22  ;;  %v2359_v22 = vld [vmem:[%s8403_s19 + $0x6b0] sm:$0xff] }
 0x7cc   : > { %6504 = vmatpush1.bf16.msra.mxu1 %v3015_v23  ;;  %6161 = vmatprep.subr.bf16.mxu0 %v3022_v43  ;;  %v3077_v23 = vunpack.c.l.s8.bf16 %v2357_v26  ;;  %v3079_v43 = vunpack.c.l.s8.bf16 %v2359_v22  ;;  %v3087_v1 = vunpack.c.h.s8.bf16 %v2359_v22 }
 0x7cd   : > { %6505 = vmatprep.subr.bf16.mxu1 %v3024_v47  ;;  %v3086_v47 = vunpack.c.h.s8.bf16 %v2358_v39  ;;  %v2374_v39 = vld [vmem:[%s8403_s19 + $0x728] sm:$0xff] }
 0x7cf   : > { %6162 = vmatpush1.bf16.msra.mxu0 %v3021_v48  ;;  %v2368_v48 = vld [vmem:[%s8403_s19 + $0x6f8] sm:$0xff] }
 0x7d0   : > { %6506 = vmatpush1.bf16.msra.mxu1 %v3023_v59  ;;  %6163 = vmatprep.subr.bf16.mxu0 %v3030_v60  ;;  %v5329_v59 = vld [vmem:[#allocation3] sm:$0xff]  ;;  %v3085_v60 = vunpack.c.h.s8.bf16 %v2357_v26  ;;  %v3096_v6 = vunpack.c.l.s8.bf16 %v2368_v48  ;;  %v3110_v26 = vunpack.c.l.s8.bf16 %v2374_v39 }
 0x7d1   : > { %6507 = vmatprep.subr.bf16.mxu1 %v3032_v50  ;;  %v5330_v50 = vld [vmem:[#allocation3 + $0x8] sm:$0xff] }
 0x7d3   : > { %6164 = vmatpush1.bf16.msra.mxu0 %v3029_v2  ;;  %v3094_v2 = vunpack.c.l.s8.bf16 %v2366_v33 }
 0x7d4   : > { %6508 = vmatpush1.bf16.msra.mxu1 %v3031_v53  ;;  %6165 = vmatprep.subr.bf16.mxu0 %v3038_v3  ;;  %v2365_v53 = vld [vmem:[%s8403_s19 + $0x6e0] sm:$0xff] }
 0x7d5   : > { %6509 = vmatprep.subr.bf16.mxu1 %v3040_v4  ;;  %v5332_v4 = vld [vmem:[#allocation3 + $0x18] sm:$0xff]  ;;  %v3093_v17 = vunpack.c.l.s8.bf16 %v2365_v53 }
 0x7d7   : > { %6166 = vmatpush1.bf16.msra.mxu0 %v3037_v7  ;;  %v2367_v7 = vld [vmem:[%s8403_s19 + $0x6f0] sm:$0xff] }
 0x7d8   : > { %6510 = vmatpush1.bf16.msra.mxu1 %v3039_v8  ;;  %6178 = vmatprep.subr.bf16.mxu0 %v3046_v9 }
 0x7d9   : > { %6522 = vmatprep.subr.bf16.mxu1 %v3048_v10  ;;  %v5339_v10 = vld [vmem:[#allocation3 + $0x50] sm:$0xff] }
 0x7da   : > { %6168 = vmatmul.mubr.bf16.vlgmr.msra.gmra.mrb[20].mxu0 %v8927_v55 }
 0x7db   : > { %6512 = vmatmul.mubr.bf16.vlgmr.msra.gmra.mrb[20].mxu1 %v8927_v55  ;;  %6179 = vmatpush1.bf16.msra.mxu0 %v3045_v12  ;;  %v3063_v55 = vunpack.c.l.s8.bf16 %v2351_v27 }
 0x7dc   : > { %6210 = vmatprep.mubr.bf16.mxu0 %v8933_v58  ;;  %6523 = vmatpush1.bf16.msra.mxu1 %v3047_v13 }
 0x7dd   : > { %6554 = vmatprep.mubr.bf16.mxu1 %v8933_v58  ;;  %6180 = vmatprep.subr.bf16.mxu0 %v3054_v14  ;;  %v3071_v58 = vunpack.c.h.s8.bf16 %v2351_v27  ;;  %v3102_v27 = vunpack.c.h.s8.bf16 %v2366_v33 }
 0x7de   : > { %6524 = vmatprep.subr.bf16.mxu1 %v3056_v21  ;;  %v5340_v21 = vld [vmem:[#allocation3 + $0x58] sm:$0xff] }
 0x7df   : > { %6181 = vmatpush1.bf16.msra.mxu0 %v3053_v18 }
 0x7e0   : > { %6525 = vmatpush1.bf16.msra.mxu1 %v3055_v52  ;;  %6182 = vmatprep.subr.bf16.mxu0 %v3062_v15 }
 0x7e1   : > { %6526 = vmatprep.subr.bf16.mxu1 %v3064_v24  ;;  %v3095_v24 = vunpack.c.l.s8.bf16 %v2367_v7 }
 0x7e3   : > { %6183 = vmatpush1.bf16.msra.mxu0 %v3061_v28 }
 0x7e4   : > { %6527 = vmatpush1.bf16.msra.mxu1 %v3063_v55  ;;  %6184 = vmatprep.subr.bf16.mxu0 %v3070_v57 }
 0x7e5   : > { %6528 = vmatprep.subr.bf16.mxu1 %v3072_v31  ;;  %v3104_v31 = vunpack.c.h.s8.bf16 %v2368_v48  ;;  %v2382_v48 = vld [vmem:[%s8403_s19 + $0x768] sm:$0xff] }
 0x7e7   : > { %6185 = vmatpush1.bf16.msra.mxu0 %v3069_v20  ;;  %v2376_v20 = vld [vmem:[%s8403_s19 + $0x738] sm:$0xff] }
 0x7e8   : > { %6529 = vmatpush1.bf16.msra.mxu1 %v3071_v58  ;;  %6186 = vmatprep.subr.bf16.mxu0 %v3078_v25  ;;  %v3101_v58 = vunpack.c.h.s8.bf16 %v2365_v53  ;;  %v3103_v25 = vunpack.c.h.s8.bf16 %v2367_v7  ;;  %v3112_v22 = vunpack.c.l.s8.bf16 %v2376_v20  ;;  %v3120_v33 = vunpack.c.h.s8.bf16 %v2376_v20  ;;  %v2383_v53 = vld [vmem:[%s8403_s19 + $0x770] sm:$0xff]  ;;  %v2390_v7 = vld [vmem:[%s8403_s19 + $0x7a8] sm:$0xff] }
 0x7e9   : > { %6530 = vmatprep.subr.bf16.mxu1 %v3080_v37  ;;  %v2373_v37 = vld [vmem:[%s8403_s19 + $0x720] sm:$0xff]  ;;  %v2406_v20 = vld [vmem:[%s8403_s19 + $0x828] sm:$0xff] }
 0x7eb   : > { %6187 = vmatpush1.bf16.msra.mxu0 %v3077_v23  ;;  %v2375_v23 = vld [vmem:[%s8403_s19 + $0x730] sm:$0xff] }
 0x7ec   : > { %6531 = vmatpush1.bf16.msra.mxu1 %v3079_v43  ;;  %6188 = vmatprep.subr.bf16.mxu0 %v3086_v47  ;;  %v3109_v43 = vunpack.c.l.s8.bf16 %v2373_v37  ;;  %v3111_v47 = vunpack.c.l.s8.bf16 %v2375_v23 }
 0x7ed   : > { %v5696_v3 = vpop.f32.mrb[16].mxu0  ;;  %6532 = vmatprep.subr.bf16.mxu1 %v3088_v44  ;;  %v3118_v44 = vunpack.c.h.s8.bf16 %v2374_v39 }
 0x7ee   : > { %v6737_v8 = vadd.f32 %v5696_v3, %v5329_v59  ;;  %v6040_v9 = vpop.f32.mrb[16].mxu1  ;;  %v5698_v51 = vpop.f32.mrb[17].mxu0  ;;  %v2384_v59 = vld [vmem:[%s8403_s19 + $0x778] sm:$0xff] }
 0x7ef   : > { %v6739_v12 = vadd.f32 %v6040_v9, %v5331_v49  ;;  %v6738_v13 = vadd.f32 %v5698_v51, %v5330_v50  ;;  %v6042_v14 = vpop.f32.mrb[17].mxu1  ;;  %v5700_v54 = vpop.f32.mrb[18].mxu0  ;;  %6189 = vmatpush1.bf16.msra.mxu0 %v3085_v60  ;;  %v3117_v60 = vunpack.c.h.s8.bf16 %v2373_v37  ;;  %v3119_v49 = vunpack.c.h.s8.bf16 %v2375_v23 }
 0x7f0   : > { %6753 = vst [vmem:[#allocation3] sm:$0xff] %v6737_v8  ;;  %v6740_v18 = vadd.f32 %v6042_v14, %v5332_v4  ;;  %v6745_v52 = vadd.f32 %v5700_v54, %v5337_v5  ;;  %v6044_v15 = vpop.f32.mrb[18].mxu1  ;;  %6533 = vmatpush1.bf16.msra.mxu1 %v3087_v1  ;;  %v5702_v16 = vpop.f32.mrb[19].mxu0  ;;  %6190 = vmatprep.subr.bf16.mxu0 %v3094_v2  ;;  %v3126_v50 = vunpack.c.l.s8.bf16 %v2382_v48  ;;  %v2381_v1 = vld [vmem:[%s8403_s19 + $0x760] sm:$0xff]  ;;  %v3128_v2 = vunpack.c.l.s8.bf16 %v2384_v59  ;;  %v2392_v8 = vld [vmem:[%s8403_s19 + $0x7b8] sm:$0xff] }
 0x7f1   : > { %6755 = vst [vmem:[#allocation3 + $0x10] sm:$0xff] %v6739_v12  ;;  %6754 = vst [vmem:[#allocation3 + $0x8] sm:$0xff] %v6738_v13  ;;  %v6747_v28 = vadd.f32 %v6044_v15, %v5339_v10  ;;  %v6746_v55 = vadd.f32 %v5702_v16, %v5338_v11  ;;  %v6046_v57 = vpop.f32.mrb[19].mxu1  ;;  %6534 = vmatprep.subr.bf16.mxu1 %v3096_v6  ;;  %v3125_v3 = vunpack.c.l.s8.bf16 %v2381_v1  ;;  %v3127_v4 = vunpack.c.l.s8.bf16 %v2383_v53  ;;  %v2389_v11 = vld [vmem:[%s8403_s19 + $0x7a0] sm:$0xff]  ;;  %v2391_v13 = vld [vmem:[%s8403_s19 + $0x7b0] sm:$0xff] }
 0x7f2   : > { %6756 = vst [vmem:[#allocation3 + $0x18] sm:$0xff] %v6740_v18  ;;  %6761 = vst [vmem:[#allocation3 + $0x40] sm:$0xff] %v6745_v52  ;;  %v6748_v19 = vadd.f32 %v6046_v57, %v5340_v21  ;;  %v3134_v5 = vunpack.c.h.s8.bf16 %v2382_v48  ;;  %v3136_v6 = vunpack.c.h.s8.bf16 %v2384_v59  ;;  %v3133_v9 = vunpack.c.h.s8.bf16 %v2381_v1  ;;  %v2398_v18 = vld [vmem:[%s8403_s19 + $0x7e8] sm:$0xff]  ;;  %v2400_v52 = vld [vmem:[%s8403_s19 + $0x7f8] sm:$0xff] }
 0x7f3   : > { %6763 = vst [vmem:[#allocation3 + $0x50] sm:$0xff] %v6747_v28  ;;  %6762 = vst [vmem:[#allocation3 + $0x48] sm:$0xff] %v6746_v55  ;;  %6191 = vmatpush1.bf16.msra.mxu0 %v3093_v17  ;;  %v3135_v51 = vunpack.c.h.s8.bf16 %v2383_v53  ;;  %v3142_v10 = vunpack.c.l.s8.bf16 %v2390_v7  ;;  %v3144_v12 = vunpack.c.l.s8.bf16 %v2392_v8  ;;  %v3141_v14 = vunpack.c.l.s8.bf16 %v2389_v11  ;;  %v2399_v55 = vld [vmem:[%s8403_s19 + $0x7f0] sm:$0xff]  ;;  %v2414_v48 = vld [vmem:[%s8403_s19 + $0x868] sm:$0xff] }
 0x7f4   : > { %6764 = vst [vmem:[#allocation3 + $0x58] sm:$0xff] %v6748_v19  ;;  %6535 = vmatpush1.bf16.msra.mxu1 %v3095_v24  ;;  %6192 = vmatprep.subr.bf16.mxu0 %v3102_v27  ;;  %v3143_v54 = vunpack.c.l.s8.bf16 %v2391_v13  ;;  %v3150_v21 = vunpack.c.h.s8.bf16 %v2390_v7  ;;  %v3152_v17 = vunpack.c.h.s8.bf16 %v2392_v8  ;;  %v3149_v15 = vunpack.c.h.s8.bf16 %v2389_v11  ;;  %v2397_v27 = vld [vmem:[%s8403_s19 + $0x7e0] sm:$0xff]  ;;  %v2422_v7 = vld [vmem:[%s8403_s19 + $0x8a8] sm:$0xff]  ;;  %v2424_v8 = vld [vmem:[%s8403_s19 + $0x8b8] sm:$0xff] }
 0x7f5   : > { %6536 = vmatprep.subr.bf16.mxu1 %v3104_v31  ;;  %v3151_v16 = vunpack.c.h.s8.bf16 %v2391_v13  ;;  %v3158_v24 = vunpack.c.l.s8.bf16 %v2398_v18  ;;  %v3160_v28 = vunpack.c.l.s8.bf16 %v2400_v52  ;;  %v3157_v57 = vunpack.c.l.s8.bf16 %v2397_v27 }
 0x7f6   : > { %v3159_v31 = vunpack.c.l.s8.bf16 %v2399_v55  ;;  %v3166_v39 = vunpack.c.h.s8.bf16 %v2398_v18  ;;  %v3168_v19 = vunpack.c.h.s8.bf16 %v2400_v52  ;;  %v3174_v37 = vunpack.c.l.s8.bf16 %v2406_v20  ;;  %v2432_v18 = vld [vmem:[%s8403_s19 + $0x8f8] sm:$0xff] }
 0x7f7   : > { %6193 = vmatpush1.bf16.msra.mxu0 %v3101_v58  ;;  %v2408_v58 = vld [vmem:[%s8403_s19 + $0x838] sm:$0xff]  ;;  %v3190_v1 = vunpack.c.l.s8.bf16 %v2414_v48  ;;  %v3208_v11 = vunpack.c.l.s8.bf16 %v2424_v8 }
 0x7f8   : > { %6537 = vmatpush1.bf16.msra.mxu1 %v3103_v25  ;;  %6194 = vmatprep.subr.bf16.mxu0 %v3110_v26  ;;  %v3165_v25 = vunpack.c.h.s8.bf16 %v2397_v27  ;;  %v3167_v26 = vunpack.c.h.s8.bf16 %v2399_v55  ;;  %v3176_v23 = vunpack.c.l.s8.bf16 %v2408_v58  ;;  %v3184_v59 = vunpack.c.h.s8.bf16 %v2408_v58 }
 0x7f9   : > { %6538 = vmatprep.subr.bf16.mxu1 %v3112_v22  ;;  %v2405_v22 = vld [vmem:[%s8403_s19 + $0x820] sm:$0xff]  ;;  %v3224_v27 = vunpack.c.l.s8.bf16 %v2432_v18 }
 0x7fb   : > { %6195 = vmatpush1.bf16.msra.mxu0 %v3109_v43  ;;  %v2407_v43 = vld [vmem:[%s8403_s19 + $0x830] sm:$0xff] }
 0x7fc   : > { %6539 = vmatpush1.bf16.msra.mxu1 %v3111_v47  ;;  %6196 = vmatprep.subr.bf16.mxu0 %v3118_v44  ;;  %v3173_v47 = vunpack.c.l.s8.bf16 %v2405_v22  ;;  %v3175_v44 = vunpack.c.l.s8.bf16 %v2407_v43 }
 0x7fd   : > { %6540 = vmatprep.subr.bf16.mxu1 %v3120_v33  ;;  %v3182_v33 = vunpack.c.h.s8.bf16 %v2406_v20  ;;  %v2440_v20 = vld [vmem:[%s8403_s19 + $0x938] sm:$0xff] }
 0x7ff   : > { %6197 = vmatpush1.bf16.msra.mxu0 %v3117_v60  ;;  %v2416_v60 = vld [vmem:[%s8403_s19 + $0x878] sm:$0xff] }
 0x800   : > { %6541 = vmatpush1.bf16.msra.mxu1 %v3119_v49  ;;  %6198 = vmatprep.subr.bf16.mxu0 %v3126_v50  ;;  %v3181_v49 = vunpack.c.h.s8.bf16 %v2405_v22  ;;  %v3183_v50 = vunpack.c.h.s8.bf16 %v2407_v43  ;;  %v3192_v53 = vunpack.c.l.s8.bf16 %v2416_v60  ;;  %v3240_v22 = vunpack.c.l.s8.bf16 %v2440_v20 }
 0x801   : > { %6542 = vmatprep.subr.bf16.mxu1 %v3128_v2  ;;  %v2413_v2 = vld [vmem:[%s8403_s19 + $0x860] sm:$0xff] }
 0x803   : > { %6199 = vmatpush1.bf16.msra.mxu0 %v3125_v3  ;;  %v2415_v3 = vld [vmem:[%s8403_s19 + $0x870] sm:$0xff] }
 0x804   : > { %6543 = vmatpush1.bf16.msra.mxu1 %v3127_v4  ;;  %6200 = vmatprep.subr.bf16.mxu0 %v3134_v5  ;;  %v3189_v4 = vunpack.c.l.s8.bf16 %v2413_v2  ;;  %v3198_v5 = vunpack.c.h.s8.bf16 %v2414_v48  ;;  %v2446_v48 = vld [vmem:[%s8403_s19 + $0x968] sm:$0xff] }
 0x805   : > { %6544 = vmatprep.subr.bf16.mxu1 %v3136_v6  ;;  %v3200_v6 = vunpack.c.h.s8.bf16 %v2416_v60 }
 0x807   : > { %6201 = vmatpush1.bf16.msra.mxu0 %v3133_v9  ;;  %v3197_v9 = vunpack.c.h.s8.bf16 %v2413_v2 }
 0x808   : > { %6545 = vmatpush1.bf16.msra.mxu1 %v3135_v51  ;;  %6202 = vmatprep.subr.bf16.mxu0 %v3142_v10  ;;  %v3206_v51 = vunpack.c.l.s8.bf16 %v2422_v7  ;;  %v2421_v10 = vld [vmem:[%s8403_s19 + $0x8a0] sm:$0xff] }
 0x809   : > { %6546 = vmatprep.subr.bf16.mxu1 %v3144_v12  ;;  %v2423_v12 = vld [vmem:[%s8403_s19 + $0x8b0] sm:$0xff]  ;;  %v3205_v13 = vunpack.c.l.s8.bf16 %v2421_v10  ;;  %v3213_v52 = vunpack.c.h.s8.bf16 %v2421_v10 }
 0x80b   : > { %6203 = vmatpush1.bf16.msra.mxu0 %v3141_v14  ;;  %v3207_v14 = vunpack.c.l.s8.bf16 %v2423_v12 }
 0x80c   : > { %6547 = vmatpush1.bf16.msra.mxu1 %v3143_v54  ;;  %6204 = vmatprep.subr.bf16.mxu0 %v3150_v21  ;;  %v3214_v54 = vunpack.c.h.s8.bf16 %v2422_v7  ;;  %v3216_v21 = vunpack.c.h.s8.bf16 %v2424_v8  ;;  %v2456_v7 = vld [vmem:[%s8403_s19 + $0x9b8] sm:$0xff] }
 0x80d   : > { %6548 = vmatprep.subr.bf16.mxu1 %v3152_v17  ;;  %v2430_v17 = vld [vmem:[%s8403_s19 + $0x8e8] sm:$0xff]  ;;  %v3272_v10 = vunpack.c.l.s8.bf16 %v2456_v7 }
 0x80f   : > { %6205 = vmatpush1.bf16.msra.mxu0 %v3149_v15  ;;  %v3215_v15 = vunpack.c.h.s8.bf16 %v2423_v12 }
 0x810   : > { %6549 = vmatpush1.bf16.msra.mxu1 %v3151_v16  ;;  %6206 = vmatprep.subr.bf16.mxu0 %v3158_v24  ;;  %v3222_v16 = vunpack.c.l.s8.bf16 %v2430_v17  ;;  %v2429_v24 = vld [vmem:[%s8403_s19 + $0x8e0] sm:$0xff] }
 0x811   : > { %6550 = vmatprep.subr.bf16.mxu1 %v3160_v28  ;;  %v2431_v28 = vld [vmem:[%s8403_s19 + $0x8f0] sm:$0xff]  ;;  %v3221_v55 = vunpack.c.l.s8.bf16 %v2429_v24  ;;  %v3229_v58 = vunpack.c.h.s8.bf16 %v2429_v24 }
 0x813   : > { %6207 = vmatpush1.bf16.msra.mxu0 %v3157_v57  ;;  %v3223_v57 = vunpack.c.l.s8.bf16 %v2431_v28 }
 0x814   : > { %6551 = vmatpush1.bf16.msra.mxu1 %v3159_v31  ;;  %6208 = vmatprep.subr.bf16.mxu0 %v3166_v39  ;;  %v3230_v31 = vunpack.c.h.s8.bf16 %v2430_v17  ;;  %v3232_v39 = vunpack.c.h.s8.bf16 %v2432_v18  ;;  %v2464_v17 = vld [vmem:[%s8403_s19 + $0x9f8] sm:$0xff] }
 0x815   : > { %6552 = vmatprep.subr.bf16.mxu1 %v3168_v19  ;;  %v2438_v19 = vld [vmem:[%s8403_s19 + $0x928] sm:$0xff]  ;;  %v3288_v24 = vunpack.c.l.s8.bf16 %v2464_v17 }
 0x817   : > { %6209 = vmatpush1.bf16.msra.mxu0 %v3165_v25  ;;  %v3231_v25 = vunpack.c.h.s8.bf16 %v2431_v28 }
 0x818   : > { %6553 = vmatpush1.bf16.msra.mxu1 %v3167_v26  ;;  %6221 = vmatprep.subr.bf16.mxu0 %v3174_v37  ;;  %v3238_v26 = vunpack.c.l.s8.bf16 %v2438_v19  ;;  %v2437_v37 = vld [vmem:[%s8403_s19 + $0x920] sm:$0xff] }
 0x819   : > { %6565 = vmatprep.subr.bf16.mxu1 %v3176_v23  ;;  %v2439_v23 = vld [vmem:[%s8403_s19 + $0x930] sm:$0xff]  ;;  %v3237_v43 = vunpack.c.l.s8.bf16 %v2437_v37  ;;  %v3245_v60 = vunpack.c.h.s8.bf16 %v2437_v37 }
 0x81a   : > { %6211 = vmatmul.mubr.bf16.vlgmr.msra.gmra.mrb[20].mxu0 %v8929_v56 }
 0x81b   : > { %6555 = vmatmul.mubr.bf16.vlgmr.msra.gmra.mrb[20].mxu1 %v8929_v56  ;;  %6222 = vmatpush1.bf16.msra.mxu0 %v3173_v47  ;;  %v3191_v56 = vunpack.c.l.s8.bf16 %v2415_v3  ;;  %v3239_v47 = vunpack.c.l.s8.bf16 %v2439_v23 }
 0x81c   : > { %6253 = vmatprep.mubr.bf16.mxu0 %v9089_v63  ;;  %6566 = vmatpush1.bf16.msra.mxu1 %v3175_v44  ;;  %v3246_v44 = vunpack.c.h.s8.bf16 %v2438_v19  ;;  %v2472_v19 = vld [vmem:[%s8403_s19 + $0xa38] sm:$0xff] }
 0x81d   : > { %6597 = vmatprep.mubr.bf16.mxu1 %v9089_v63  ;;  %6223 = vmatprep.subr.bf16.mxu0 %v3182_v33  ;;  %v3199_v63 = vunpack.c.h.s8.bf16 %v2415_v3  ;;  %v3248_v33 = vunpack.c.h.s8.bf16 %v2440_v20  ;;  %v3304_v37 = vunpack.c.l.s8.bf16 %v2472_v19 }
 0x81e   : > { %6567 = vmatprep.subr.bf16.mxu1 %v3184_v59  ;;  %v2448_v59 = vld [vmem:[%s8403_s19 + $0x978] sm:$0xff] }
 0x81f   : > { %6224 = vmatpush1.bf16.msra.mxu0 %v3181_v49  ;;  %v3247_v49 = vunpack.c.h.s8.bf16 %v2439_v23  ;;  %v3256_v2 = vunpack.c.l.s8.bf16 %v2448_v59 }
 0x820   : > { %6568 = vmatpush1.bf16.msra.mxu1 %v3183_v50  ;;  %6225 = vmatprep.subr.bf16.mxu0 %v3190_v1  ;;  %v3254_v50 = vunpack.c.l.s8.bf16 %v2446_v48  ;;  %v2445_v1 = vld [vmem:[%s8403_s19 + $0x960] sm:$0xff] }
 0x821   : > { %6569 = vmatprep.subr.bf16.mxu1 %v3192_v53  ;;  %v2447_v53 = vld [vmem:[%s8403_s19 + $0x970] sm:$0xff]  ;;  %v3253_v3 = vunpack.c.l.s8.bf16 %v2445_v1  ;;  %v3261_v8 = vunpack.c.h.s8.bf16 %v2445_v1 }
 0x823   : > { %6226 = vmatpush1.bf16.msra.mxu0 %v3189_v4  ;;  %v3255_v4 = vunpack.c.l.s8.bf16 %v2447_v53 }
 0x824   : > { %6570 = vmatpush1.bf16.msra.mxu1 %v3191_v56  ;;  %6227 = vmatprep.subr.bf16.mxu0 %v3198_v5  ;;  %v3262_v56 = vunpack.c.h.s8.bf16 %v2446_v48  ;;  %v3264_v5 = vunpack.c.h.s8.bf16 %v2448_v59  ;;  %v2480_v48 = vld [vmem:[%s8403_s19 + $0xa78] sm:$0xff] }
 0x825   : > { %6571 = vmatprep.subr.bf16.mxu1 %v3200_v6  ;;  %v2454_v6 = vld [vmem:[%s8403_s19 + $0x9a8] sm:$0xff]  ;;  %v3320_v1 = vunpack.c.l.s8.bf16 %v2480_v48 }
 0x827   : > { %6228 = vmatpush1.bf16.msra.mxu0 %v3197_v9  ;;  %v3263_v9 = vunpack.c.h.s8.bf16 %v2447_v53 }
 0x828   : > { %6572 = vmatpush1.bf16.msra.mxu1 %v3199_v63  ;;  %6229 = vmatprep.subr.bf16.mxu0 %v3206_v51  ;;  %v3270_v63 = vunpack.c.l.s8.bf16 %v2454_v6  ;;  %v2453_v51 = vld [vmem:[%s8403_s19 + $0x9a0] sm:$0xff] }
 0x829   : > { %6573 = vmatprep.subr.bf16.mxu1 %v3208_v11  ;;  %v2455_v11 = vld [vmem:[%s8403_s19 + $0x9b0] sm:$0xff]  ;;  %v3269_v12 = vunpack.c.l.s8.bf16 %v2453_v51  ;;  %v3277_v18 = vunpack.c.h.s8.bf16 %v2453_v51 }
 0x82b   : > { %6230 = vmatpush1.bf16.msra.mxu0 %v3205_v13  ;;  %v3271_v13 = vunpack.c.l.s8.bf16 %v2455_v11 }
 0x82c   : > { %6574 = vmatpush1.bf16.msra.mxu1 %v3207_v14  ;;  %6231 = vmatprep.subr.bf16.mxu0 %v3214_v54  ;;  %v3278_v14 = vunpack.c.h.s8.bf16 %v2454_v6  ;;  %v3280_v54 = vunpack.c.h.s8.bf16 %v2456_v7 }
 0x82d   : > { %6575 = vmatprep.subr.bf16.mxu1 %v3216_v21  ;;  %v2462_v21 = vld [vmem:[%s8403_s19 + $0x9e8] sm:$0xff] }
 0x82f   : > { %6232 = vmatpush1.bf16.msra.mxu0 %v3213_v52  ;;  %v3279_v52 = vunpack.c.h.s8.bf16 %v2455_v11 }
 0x830   : > { %6576 = vmatpush1.bf16.msra.mxu1 %v3215_v15  ;;  %6233 = vmatprep.subr.bf16.mxu0 %v3222_v16  ;;  %v3286_v15 = vunpack.c.l.s8.bf16 %v2462_v21  ;;  %v2461_v16 = vld [vmem:[%s8403_s19 + $0x9e0] sm:$0xff] }
 0x831   : > { %6577 = vmatprep.subr.bf16.mxu1 %v3224_v27  ;;  %v2463_v27 = vld [vmem:[%s8403_s19 + $0x9f0] sm:$0xff]  ;;  %v3285_v28 = vunpack.c.l.s8.bf16 %v2461_v16  ;;  %v3293_v20 = vunpack.c.h.s8.bf16 %v2461_v16 }
 0x833   : > { %6234 = vmatpush1.bf16.msra.mxu0 %v3221_v55  ;;  %v3287_v55 = vunpack.c.l.s8.bf16 %v2463_v27 }
 0x834   : > { %6578 = vmatpush1.bf16.msra.mxu1 %v3223_v57  ;;  %6235 = vmatprep.subr.bf16.mxu0 %v3230_v31  ;;  %v3294_v57 = vunpack.c.h.s8.bf16 %v2462_v21  ;;  %v3296_v31 = vunpack.c.h.s8.bf16 %v2464_v17 }
 0x835   : > { %6579 = vmatprep.subr.bf16.mxu1 %v3232_v39  ;;  %v2470_v39 = vld [vmem:[%s8403_s19 + $0xa28] sm:$0xff] }
 0x837   : > { %6236 = vmatpush1.bf16.msra.mxu0 %v3229_v58  ;;  %v3295_v58 = vunpack.c.h.s8.bf16 %v2463_v27 }
 0x838   : > { %6580 = vmatpush1.bf16.msra.mxu1 %v3231_v25  ;;  %6237 = vmatprep.subr.bf16.mxu0 %v3238_v26  ;;  %v3302_v25 = vunpack.c.l.s8.bf16 %v2470_v39  ;;  %v2469_v26 = vld [vmem:[%s8403_s19 + $0xa20] sm:$0xff] }
 0x839   : > { %6581 = vmatprep.subr.bf16.mxu1 %v3240_v22  ;;  %v2471_v22 = vld [vmem:[%s8403_s19 + $0xa30] sm:$0xff]  ;;  %v3301_v23 = vunpack.c.l.s8.bf16 %v2469_v26  ;;  %v3309_v59 = vunpack.c.h.s8.bf16 %v2469_v26 }
 0x83b   : > { %6238 = vmatpush1.bf16.msra.mxu0 %v3237_v43  ;;  %v3303_v43 = vunpack.c.l.s8.bf16 %v2471_v22 }
 0x83c   : > { %6582 = vmatpush1.bf16.msra.mxu1 %v3239_v47  ;;  %6239 = vmatprep.subr.bf16.mxu0 %v3246_v44  ;;  %v3310_v47 = vunpack.c.h.s8.bf16 %v2470_v39  ;;  %v2478_v44 = vld [vmem:[%s8403_s19 + $0xa68] sm:$0xff] }
 0x83d   : > { %6583 = vmatprep.subr.bf16.mxu1 %v3248_v33  ;;  %v3312_v33 = vunpack.c.h.s8.bf16 %v2472_v19 }
 0x83f   : > { %6240 = vmatpush1.bf16.msra.mxu0 %v3245_v60  ;;  %v3311_v60 = vunpack.c.h.s8.bf16 %v2471_v22 }
 0x840   : > { %6584 = vmatpush1.bf16.msra.mxu1 %v3247_v49  ;;  %6241 = vmatprep.subr.bf16.mxu0 %v3254_v50  ;;  %v3318_v49 = vunpack.c.l.s8.bf16 %v2478_v44  ;;  %v2477_v50 = vld [vmem:[%s8403_s19 + $0xa60] sm:$0xff] }
 0x841   : > { %6585 = vmatprep.subr.bf16.mxu1 %v3256_v2  ;;  %v2479_v2 = vld [vmem:[%s8403_s19 + $0xa70] sm:$0xff]  ;;  %v3317_v53 = vunpack.c.l.s8.bf16 %v2477_v50  ;;  %v3325_v6 = vunpack.c.h.s8.bf16 %v2477_v50 }
 0x843   : > { %6242 = vmatpush1.bf16.msra.mxu0 %v3253_v3  ;;  %v3326_v3 = vunpack.c.h.s8.bf16 %v2478_v44 }
 0x844   : > { %6586 = vmatpush1.bf16.msra.mxu1 %v3255_v4  ;;  %6243 = vmatprep.subr.bf16.mxu0 %v3262_v56  ;;  %v3328_v4 = vunpack.c.h.s8.bf16 %v2480_v48  ;;  %v2486_v56 = vld [vmem:[%s8403_s19 + $0xaa8] sm:$0xff] }
 0x845   : > { %6587 = vmatprep.subr.bf16.mxu1 %v3264_v5  ;;  %v2488_v5 = vld [vmem:[%s8403_s19 + $0xab8] sm:$0xff]  ;;  %v3334_v7 = vunpack.c.l.s8.bf16 %v2486_v56  ;;  %v3342_v11 = vunpack.c.h.s8.bf16 %v2486_v56 }
 0x847   : > { %6244 = vmatpush1.bf16.msra.mxu0 %v3261_v8  ;;  %v2485_v8 = vld [vmem:[%s8403_s19 + $0xaa0] sm:$0xff] }
 0x848   : > { %6588 = vmatpush1.bf16.msra.mxu1 %v3263_v9  ;;  %6245 = vmatprep.subr.bf16.mxu0 %v3270_v63  ;;  %v3336_v9 = vunpack.c.l.s8.bf16 %v2488_v5  ;;  %v2487_v63 = vld [vmem:[%s8403_s19 + $0xab0] sm:$0xff]  ;;  %v3333_v51 = vunpack.c.l.s8.bf16 %v2485_v8 }
 0x849   : > { %6589 = vmatprep.subr.bf16.mxu1 %v3272_v10  ;;  %v3335_v10 = vunpack.c.l.s8.bf16 %v2487_v63  ;;  %v3343_v21 = vunpack.c.h.s8.bf16 %v2487_v63 }
 0x84b   : > { %6246 = vmatpush1.bf16.msra.mxu0 %v3269_v12  ;;  %v3344_v12 = vunpack.c.h.s8.bf16 %v2488_v5 }
 0x84c   : > { %6590 = vmatpush1.bf16.msra.mxu1 %v3271_v13  ;;  %6247 = vmatprep.subr.bf16.mxu0 %v3278_v14  ;;  %v2494_v13 = vld [vmem:[%s8403_s19 + $0xae8] sm:$0xff]  ;;  %v2496_v14 = vld [vmem:[%s8403_s19 + $0xaf8] sm:$0xff] }
 0x84d   : > { %6591 = vmatprep.subr.bf16.mxu1 %v3280_v54  ;;  %v3341_v54 = vunpack.c.h.s8.bf16 %v2485_v8  ;;  %v3350_v17 = vunpack.c.l.s8.bf16 %v2494_v13  ;;  %v3358_v27 = vunpack.c.h.s8.bf16 %v2494_v13 }
 0x84f   : > { %6248 = vmatpush1.bf16.msra.mxu0 %v3277_v18  ;;  %v2493_v18 = vld [vmem:[%s8403_s19 + $0xae0] sm:$0xff] }
 0x850   : > { %6592 = vmatpush1.bf16.msra.mxu1 %v3279_v52  ;;  %6249 = vmatprep.subr.bf16.mxu0 %v3286_v15  ;;  %v3352_v52 = vunpack.c.l.s8.bf16 %v2496_v14  ;;  %v2495_v15 = vld [vmem:[%s8403_s19 + $0xaf0] sm:$0xff]  ;;  %v3349_v16 = vunpack.c.l.s8.bf16 %v2493_v18 }
 0x851   : > { %6593 = vmatprep.subr.bf16.mxu1 %v3288_v24  ;;  %v3351_v24 = vunpack.c.l.s8.bf16 %v2495_v15  ;;  %v3359_v39 = vunpack.c.h.s8.bf16 %v2495_v15 }
 0x853   : > { %6250 = vmatpush1.bf16.msra.mxu0 %v3285_v28  ;;  %v3360_v28 = vunpack.c.h.s8.bf16 %v2496_v14 }
 0x854   : > { %6594 = vmatpush1.bf16.msra.mxu1 %v3287_v55  ;;  %6251 = vmatprep.subr.bf16.mxu0 %v3294_v57  ;;  %v2502_v55 = vld [vmem:[%s8403_s19 + $0xb28] sm:$0xff]  ;;  %v2504_v57 = vld [vmem:[%s8403_s19 + $0xb38] sm:$0xff] }
 0x855   : > { %6595 = vmatprep.subr.bf16.mxu1 %v3296_v31  ;;  %v3357_v31 = vunpack.c.h.s8.bf16 %v2493_v18  ;;  %v3366_v19 = vunpack.c.l.s8.bf16 %v2502_v55  ;;  %v3374_v22 = vunpack.c.h.s8.bf16 %v2502_v55 }
 0x857   : > { %6252 = vmatpush1.bf16.msra.mxu0 %v3293_v20  ;;  %v2501_v20 = vld [vmem:[%s8403_s19 + $0xb20] sm:$0xff] }
 0x858   : > { %6596 = vmatpush1.bf16.msra.mxu1 %v3295_v58  ;;  %6264 = vmatprep.subr.bf16.mxu0 %v3302_v25  ;;  %v3368_v58 = vunpack.c.l.s8.bf16 %v2504_v57  ;;  %v2503_v25 = vld [vmem:[%s8403_s19 + $0xb30] sm:$0xff]  ;;  %v3365_v26 = vunpack.c.l.s8.bf16 %v2501_v20  ;;  %v3373_v44 = vunpack.c.h.s8.bf16 %v2501_v20 }
 0x859   : > { %6608 = vmatprep.subr.bf16.mxu1 %v3304_v37  ;;  %v3367_v37 = vunpack.c.l.s8.bf16 %v2503_v25 }
 0x85a   : > { %6254 = vmatmul.mubr.bf16.vlgmr.msra.gmra.mrb[20].mxu0 %v9085_v61 }
 0x85b   : > { %6598 = vmatmul.mubr.bf16.vlgmr.msra.gmra.mrb[20].mxu1 %v9085_v61  ;;  %6265 = vmatpush1.bf16.msra.mxu0 %v3301_v23  ;;  %v3319_v61 = vunpack.c.l.s8.bf16 %v2479_v2  ;;  %v3376_v23 = vunpack.c.h.s8.bf16 %v2504_v57 }
 0x85c   : > { %6296 = vmatprep.mubr.bf16.mxu0 %v9091_v0  ;;  %6609 = vmatpush1.bf16.msra.mxu1 %v3303_v43  ;;  %v2510_v43 = vld [vmem:[%s8403_s19 + $0xb68] sm:$0xff] }
 0x85d   : > { %6640 = vmatprep.mubr.bf16.mxu1 %v9091_v0  ;;  %6266 = vmatprep.subr.bf16.mxu0 %v3310_v47  ;;  %v3327_v0 = vunpack.c.h.s8.bf16 %v2479_v2  ;;  %v2512_v47 = vld [vmem:[%s8403_s19 + $0xb78] sm:$0xff]  ;;  %v3382_v48 = vunpack.c.l.s8.bf16 %v2510_v43  ;;  %v3390_v2 = vunpack.c.h.s8.bf16 %v2510_v43 }
 0x85e   : > { %6610 = vmatprep.subr.bf16.mxu1 %v3312_v33  ;;  %v3375_v33 = vunpack.c.h.s8.bf16 %v2503_v25 }
 0x85f   : > { %6267 = vmatpush1.bf16.msra.mxu0 %v3309_v59  ;;  %v2509_v59 = vld [vmem:[%s8403_s19 + $0xb60] sm:$0xff] }
 0x860   : > { %6611 = vmatpush1.bf16.msra.mxu1 %v3311_v60  ;;  %6268 = vmatprep.subr.bf16.mxu0 %v3318_v49  ;;  %v3384_v60 = vunpack.c.l.s8.bf16 %v2512_v47  ;;  %v2511_v49 = vld [vmem:[%s8403_s19 + $0xb70] sm:$0xff]  ;;  %v3381_v50 = vunpack.c.l.s8.bf16 %v2509_v59 }
 0x861   : > { %6612 = vmatprep.subr.bf16.mxu1 %v3320_v1  ;;  %v3383_v1 = vunpack.c.l.s8.bf16 %v2511_v49  ;;  %v3391_v56 = vunpack.c.h.s8.bf16 %v2511_v49 }
 0x863   : > { %6269 = vmatpush1.bf16.msra.mxu0 %v3317_v53  ;;  %v3392_v53 = vunpack.c.h.s8.bf16 %v2512_v47 }
 0x864   : > { %6613 = vmatpush1.bf16.msra.mxu1 %v3319_v61  ;;  %6270 = vmatprep.subr.bf16.mxu0 %v3326_v3  ;;  %v2518_v61 = vld [vmem:[%s8403_s19 + $0xba8] sm:$0xff]  ;;  %v2520_v3 = vld [vmem:[%s8403_s19 + $0xbb8] sm:$0xff] }
 0x865   : > { %6614 = vmatprep.subr.bf16.mxu1 %v3328_v4  ;;  %v3389_v4 = vunpack.c.h.s8.bf16 %v2509_v59  ;;  %v3398_v5 = vunpack.c.l.s8.bf16 %v2518_v61  ;;  %v3406_v63 = vunpack.c.h.s8.bf16 %v2518_v61  ;;  %v2549_v61 = vld [vmem:[%s8403_s19 + $0xca0] sm:$0xff] }
 0x867   : > { %6271 = vmatpush1.bf16.msra.mxu0 %v3325_v6  ;;  %v2517_v6 = vld [vmem:[%s8403_s19 + $0xba0] sm:$0xff] }
 0x868   : > { %6615 = vmatpush1.bf16.msra.mxu1 %v3327_v0  ;;  %6272 = vmatprep.subr.bf16.mxu0 %v3334_v7  ;;  %v3400_v0 = vunpack.c.l.s8.bf16 %v2520_v3  ;;  %v2519_v7 = vld [vmem:[%s8403_s19 + $0xbb0] sm:$0xff]  ;;  %v3397_v8 = vunpack.c.l.s8.bf16 %v2517_v6 }
 0x869   : > { %6616 = vmatprep.subr.bf16.mxu1 %v3336_v9  ;;  %v3399_v9 = vunpack.c.l.s8.bf16 %v2519_v7  ;;  %v3407_v13 = vunpack.c.h.s8.bf16 %v2519_v7  ;;  %v2558_v7 = vld [vmem:[%s8403_s19 + $0xce8] sm:$0xff] }
 0x86b   : > { %6273 = vmatpush1.bf16.msra.mxu0 %v3333_v51  ;;  %v3408_v51 = vunpack.c.h.s8.bf16 %v2520_v3 }
 0x86c   : > { %6617 = vmatpush1.bf16.msra.mxu1 %v3335_v10  ;;  %6274 = vmatprep.subr.bf16.mxu0 %v3342_v11  ;;  %v2526_v10 = vld [vmem:[%s8403_s19 + $0xbe8] sm:$0xff]  ;;  %v2528_v11 = vld [vmem:[%s8403_s19 + $0xbf8] sm:$0xff] }
 0x86d   : > { %6618 = vmatprep.subr.bf16.mxu1 %v3344_v12  ;;  %v3405_v12 = vunpack.c.h.s8.bf16 %v2517_v6  ;;  %v3414_v14 = vunpack.c.l.s8.bf16 %v2526_v10  ;;  %v3422_v15 = vunpack.c.h.s8.bf16 %v2526_v10  ;;  %v2557_v10 = vld [vmem:[%s8403_s19 + $0xce0] sm:$0xff] }
 0x86f   : > { %6275 = vmatpush1.bf16.msra.mxu0 %v3341_v54  ;;  %v2525_v54 = vld [vmem:[%s8403_s19 + $0xbe0] sm:$0xff] }
 0x870   : > { %6619 = vmatpush1.bf16.msra.mxu1 %v3343_v21  ;;  %6276 = vmatprep.subr.bf16.mxu0 %v3350_v17  ;;  %v3416_v21 = vunpack.c.l.s8.bf16 %v2528_v11  ;;  %v2527_v17 = vld [vmem:[%s8403_s19 + $0xbf0] sm:$0xff]  ;;  %v3413_v18 = vunpack.c.l.s8.bf16 %v2525_v54 }
 0x871   : > { %6620 = vmatprep.subr.bf16.mxu1 %v3352_v52  ;;  %v3415_v52 = vunpack.c.l.s8.bf16 %v2527_v17  ;;  %v3423_v55 = vunpack.c.h.s8.bf16 %v2527_v17  ;;  %v2566_v17 = vld [vmem:[%s8403_s19 + $0xd28] sm:$0xff] }
 0x873   : > { %6277 = vmatpush1.bf16.msra.mxu0 %v3349_v16  ;;  %v3424_v16 = vunpack.c.h.s8.bf16 %v2528_v11 }
 0x874   : > { %6621 = vmatpush1.bf16.msra.mxu1 %v3351_v24  ;;  %6278 = vmatprep.subr.bf16.mxu0 %v3358_v27  ;;  %v2534_v24 = vld [vmem:[%s8403_s19 + $0xc28] sm:$0xff]  ;;  %v2536_v27 = vld [vmem:[%s8403_s19 + $0xc38] sm:$0xff] }
 0x875   : > { %6622 = vmatprep.subr.bf16.mxu1 %v3360_v28  ;;  %v3421_v28 = vunpack.c.h.s8.bf16 %v2525_v54  ;;  %v3430_v57 = vunpack.c.l.s8.bf16 %v2534_v24  ;;  %v3438_v25 = vunpack.c.h.s8.bf16 %v2534_v24  ;;  %v3486_v54 = vunpack.c.h.s8.bf16 %v2558_v7  ;;  %v2565_v24 = vld [vmem:[%s8403_s19 + $0xd20] sm:$0xff] }
 0x877   : > { %6279 = vmatpush1.bf16.msra.mxu0 %v3357_v31  ;;  %v2533_v31 = vld [vmem:[%s8403_s19 + $0xc20] sm:$0xff] }
 0x878   : > { %6623 = vmatpush1.bf16.msra.mxu1 %v3359_v39  ;;  %6280 = vmatprep.subr.bf16.mxu0 %v3366_v19  ;;  %v3432_v39 = vunpack.c.l.s8.bf16 %v2536_v27  ;;  %v2535_v19 = vld [vmem:[%s8403_s19 + $0xc30] sm:$0xff]  ;;  %v3429_v20 = vunpack.c.l.s8.bf16 %v2533_v31 }
 0x879   : > { %6624 = vmatprep.subr.bf16.mxu1 %v3368_v58  ;;  %v3431_v58 = vunpack.c.l.s8.bf16 %v2535_v19  ;;  %v3439_v43 = vunpack.c.h.s8.bf16 %v2535_v19  ;;  %v2574_v19 = vld [vmem:[%s8403_s19 + $0xd68] sm:$0xff] }
 0x87b   : > { %6281 = vmatpush1.bf16.msra.mxu0 %v3365_v26  ;;  %v2542_v26 = vld [vmem:[%s8403_s19 + $0xc68] sm:$0xff] }
 0x87c   : > { %6625 = vmatpush1.bf16.msra.mxu1 %v3367_v37  ;;  %6282 = vmatprep.subr.bf16.mxu0 %v3374_v22  ;;  %v3440_v37 = vunpack.c.h.s8.bf16 %v2536_v27  ;;  %v2544_v22 = vld [vmem:[%s8403_s19 + $0xc78] sm:$0xff]  ;;  %v3446_v47 = vunpack.c.l.s8.bf16 %v2542_v26 }
 0x87d   : > { %6626 = vmatprep.subr.bf16.mxu1 %v3376_v23  ;;  %v3437_v23 = vunpack.c.h.s8.bf16 %v2533_v31  ;;  %v3456_v49 = vunpack.c.h.s8.bf16 %v2544_v22  ;;  %v3502_v31 = vunpack.c.h.s8.bf16 %v2566_v17 }
 0x87f   : > { %6283 = vmatpush1.bf16.msra.mxu0 %v3373_v44  ;;  %v2541_v44 = vld [vmem:[%s8403_s19 + $0xc60] sm:$0xff] }
 0x880   : > { %6627 = vmatpush1.bf16.msra.mxu1 %v3375_v33  ;;  %6284 = vmatprep.subr.bf16.mxu0 %v3382_v48  ;;  %v3448_v33 = vunpack.c.l.s8.bf16 %v2544_v22  ;;  %v2543_v48 = vld [vmem:[%s8403_s19 + $0xc70] sm:$0xff]  ;;  %v3445_v59 = vunpack.c.l.s8.bf16 %v2541_v44 }
 0x881   : > { %6628 = vmatprep.subr.bf16.mxu1 %v3384_v60  ;;  %v3454_v60 = vunpack.c.h.s8.bf16 %v2542_v26  ;;  %v3510_v26 = vunpack.c.l.s8.bf16 %v2574_v19 }
 0x883   : > { %6285 = vmatpush1.bf16.msra.mxu0 %v3381_v50  ;;  %v2550_v50 = vld [vmem:[%s8403_s19 + $0xca8] sm:$0xff] }
 0x884   : > { %6629 = vmatpush1.bf16.msra.mxu1 %v3383_v1  ;;  %6286 = vmatprep.subr.bf16.mxu0 %v3390_v2  ;;  %v2552_v1 = vld [vmem:[%s8403_s19 + $0xcb8] sm:$0xff]  ;;  %v3453_v2 = vunpack.c.h.s8.bf16 %v2541_v44  ;;  %v3470_v6 = vunpack.c.h.s8.bf16 %v2550_v50  ;;  %v3518_v44 = vunpack.c.h.s8.bf16 %v2574_v19  ;;  %v2605_v19 = vld [vmem:[%s8403_s19 + $0xe60] sm:$0xff] }
 0x885   : > { %6630 = vmatprep.subr.bf16.mxu1 %v3392_v53  ;;  %v3462_v53 = vunpack.c.l.s8.bf16 %v2550_v50  ;;  %v3464_v3 = vunpack.c.l.s8.bf16 %v2552_v1  ;;  %v2581_v50 = vld [vmem:[%s8403_s19 + $0xda0] sm:$0xff] }
 0x887   : > { %6287 = vmatpush1.bf16.msra.mxu0 %v3389_v4  ;;  %v2551_v4 = vld [vmem:[%s8403_s19 + $0xcb0] sm:$0xff] }
 0x888   : > { %6631 = vmatpush1.bf16.msra.mxu1 %v3391_v56  ;;  %6288 = vmatprep.subr.bf16.mxu0 %v3398_v5  ;;  %v3461_v56 = vunpack.c.l.s8.bf16 %v2549_v61  ;;  %v3463_v5 = vunpack.c.l.s8.bf16 %v2551_v4 }
 0x889   : > { %6632 = vmatprep.subr.bf16.mxu1 %v3400_v0  ;;  %v3472_v0 = vunpack.c.h.s8.bf16 %v2552_v1 }
 0x88b   : > { %6289 = vmatpush1.bf16.msra.mxu0 %v3397_v8  ;;  %v2560_v8 = vld [vmem:[%s8403_s19 + $0xcf8] sm:$0xff] }
 0x88c   : > { %6633 = vmatpush1.bf16.msra.mxu1 %v3399_v9  ;;  %6290 = vmatprep.subr.bf16.mxu0 %v3406_v63  ;;  %v3469_v9 = vunpack.c.h.s8.bf16 %v2549_v61  ;;  %v3471_v63 = vunpack.c.h.s8.bf16 %v2551_v4  ;;  %v3480_v11 = vunpack.c.l.s8.bf16 %v2560_v8  ;;  %v2590_v4 = vld [vmem:[%s8403_s19 + $0xde8] sm:$0xff] }
 0x88d   : > { %6634 = vmatprep.subr.bf16.mxu1 %v3408_v51  ;;  %v3478_v51 = vunpack.c.l.s8.bf16 %v2558_v7  ;;  %v2589_v7 = vld [vmem:[%s8403_s19 + $0xde0] sm:$0xff] }
 0x88f   : > { %6291 = vmatpush1.bf16.msra.mxu0 %v3405_v12  ;;  %v2559_v12 = vld [vmem:[%s8403_s19 + $0xcf0] sm:$0xff] }
 0x890   : > { %6635 = vmatpush1.bf16.msra.mxu1 %v3407_v13  ;;  %6292 = vmatprep.subr.bf16.mxu0 %v3414_v14  ;;  %v3477_v13 = vunpack.c.l.s8.bf16 %v2557_v10  ;;  %v3479_v14 = vunpack.c.l.s8.bf16 %v2559_v12 }
 0x891   : > { %6636 = vmatprep.subr.bf16.mxu1 %v3416_v21  ;;  %v3488_v21 = vunpack.c.h.s8.bf16 %v2560_v8 }
 0x893   : > { %6293 = vmatpush1.bf16.msra.mxu0 %v3413_v18  ;;  %v2568_v18 = vld [vmem:[%s8403_s19 + $0xd38] sm:$0xff] }
 0x894   : > { %6637 = vmatpush1.bf16.msra.mxu1 %v3415_v52  ;;  %6294 = vmatprep.subr.bf16.mxu0 %v3422_v15  ;;  %v3485_v52 = vunpack.c.h.s8.bf16 %v2557_v10  ;;  %v3487_v15 = vunpack.c.h.s8.bf16 %v2559_v12  ;;  %v3496_v27 = vunpack.c.l.s8.bf16 %v2568_v18  ;;  %v3550_v10 = vunpack.c.h.s8.bf16 %v2590_v4  ;;  %v2598_v12 = vld [vmem:[%s8403_s19 + $0xe28] sm:$0xff] }
 0x895   : > { %6638 = vmatprep.subr.bf16.mxu1 %v3424_v16  ;;  %v3494_v16 = vunpack.c.l.s8.bf16 %v2566_v17  ;;  %v2597_v17 = vld [vmem:[%s8403_s19 + $0xe20] sm:$0xff] }
 0x897   : > { %6295 = vmatpush1.bf16.msra.mxu0 %v3421_v28  ;;  %v2567_v28 = vld [vmem:[%s8403_s19 + $0xd30] sm:$0xff] }
 0x898   : > { %6639 = vmatpush1.bf16.msra.mxu1 %v3423_v55  ;;  %6307 = vmatprep.subr.bf16.mxu0 %v3430_v57  ;;  %v3493_v55 = vunpack.c.l.s8.bf16 %v2565_v24  ;;  %v3495_v57 = vunpack.c.l.s8.bf16 %v2567_v28 }
 0x899   : > { %6651 = vmatprep.subr.bf16.mxu1 %v3432_v39  ;;  %v3504_v39 = vunpack.c.h.s8.bf16 %v2568_v18 }
 0x89a   : > { %6297 = vmatmul.mubr.bf16.vlgmr.msra.gmra.mrb[20].mxu0 %v9087_v62 }
 0x89b   : > { %6641 = vmatmul.mubr.bf16.vlgmr.msra.gmra.mrb[20].mxu1 %v9087_v62  ;;  %6308 = vmatpush1.bf16.msra.mxu0 %v3429_v20  ;;  %v3447_v62 = vunpack.c.l.s8.bf16 %v2543_v48  ;;  %v2576_v20 = vld [vmem:[%s8403_s19 + $0xd78] sm:$0xff] }
 0x89c   : > { %6339 = vmatprep.mubr.bf16.mxu0 %v9265_v38  ;;  %6652 = vmatpush1.bf16.msra.mxu1 %v3431_v58  ;;  %v3501_v58 = vunpack.c.h.s8.bf16 %v2565_v24  ;;  %v3512_v22 = vunpack.c.l.s8.bf16 %v2576_v20  ;;  %v3566_v24 = vunpack.c.h.s8.bf16 %v2598_v12 }
 0x89d   : > { %6683 = vmatprep.mubr.bf16.mxu1 %v9265_v38  ;;  %6309 = vmatprep.subr.bf16.mxu0 %v3438_v25  ;;  %v3455_v38 = vunpack.c.h.s8.bf16 %v2543_v48  ;;  %v3503_v25 = vunpack.c.h.s8.bf16 %v2567_v28  ;;  %v2582_v48 = vld [vmem:[%s8403_s19 + $0xda8] sm:$0xff] }
 0x89e   : > { %6653 = vmatprep.subr.bf16.mxu1 %v3440_v37  ;;  %v2573_v37 = vld [vmem:[%s8403_s19 + $0xd60] sm:$0xff]  ;;  %v3534_v61 = vunpack.c.h.s8.bf16 %v2582_v48 }
 0x89f   : > { %6310 = vmatpush1.bf16.msra.mxu0 %v3437_v23  ;;  %v2575_v23 = vld [vmem:[%s8403_s19 + $0xd70] sm:$0xff] }
 0x8a0   : > { %6654 = vmatpush1.bf16.msra.mxu1 %v3439_v43  ;;  %6311 = vmatprep.subr.bf16.mxu0 %v3446_v47  ;;  %v3509_v43 = vunpack.c.l.s8.bf16 %v2573_v37  ;;  %v3511_v47 = vunpack.c.l.s8.bf16 %v2575_v23 }
 0x8a1   : > { %6655 = vmatprep.subr.bf16.mxu1 %v3448_v33  ;;  %v3520_v33 = vunpack.c.h.s8.bf16 %v2576_v20 }
 0x8a3   : > { %6312 = vmatpush1.bf16.msra.mxu0 %v3445_v59  ;;  %v2584_v59 = vld [vmem:[%s8403_s19 + $0xdb8] sm:$0xff] }
 0x8a4   : > { %6656 = vmatpush1.bf16.msra.mxu1 %v3447_v62  ;;  %6313 = vmatprep.subr.bf16.mxu0 %v3454_v60  ;;  %v3517_v62 = vunpack.c.h.s8.bf16 %v2573_v37  ;;  %v3519_v60 = vunpack.c.h.s8.bf16 %v2575_v23  ;;  %v3528_v1 = vunpack.c.l.s8.bf16 %v2584_v59  ;;  %v2616_v23 = vld [vmem:[%s8403_s19 + $0xeb8] sm:$0xff] }
 0x8a5   : > { %6657 = vmatprep.subr.bf16.mxu1 %v3456_v49  ;;  %v3526_v49 = vunpack.c.l.s8.bf16 %v2582_v48  ;;  %v2615_v48 = vld [vmem:[%s8403_s19 + $0xeb0] sm:$0xff] }
 0x8a7   : > { %6314 = vmatpush1.bf16.msra.mxu0 %v3453_v2  ;;  %v2583_v2 = vld [vmem:[%s8403_s19 + $0xdb0] sm:$0xff] }
 0x8a8   : > { %6658 = vmatpush1.bf16.msra.mxu1 %v3455_v38  ;;  %6315 = vmatprep.subr.bf16.mxu0 %v3462_v53  ;;  %v3525_v38 = vunpack.c.l.s8.bf16 %v2581_v50  ;;  %v3527_v53 = vunpack.c.l.s8.bf16 %v2583_v2 }
 0x8a9   : > { %6659 = vmatprep.subr.bf16.mxu1 %v3464_v3  ;;  %v3536_v3 = vunpack.c.h.s8.bf16 %v2584_v59 }
 0x8ab   : > { %6316 = vmatpush1.bf16.msra.mxu0 %v3461_v56  ;;  %v2592_v56 = vld [vmem:[%s8403_s19 + $0xdf8] sm:$0xff] }
 0x8ac   : > { %6660 = vmatpush1.bf16.msra.mxu1 %v3463_v5  ;;  %6317 = vmatprep.subr.bf16.mxu0 %v3470_v6  ;;  %v3533_v5 = vunpack.c.h.s8.bf16 %v2581_v50  ;;  %v3535_v6 = vunpack.c.h.s8.bf16 %v2583_v2  ;;  %v3544_v8 = vunpack.c.l.s8.bf16 %v2592_v56  ;;  %v2622_v50 = vld [vmem:[%s8403_s19 + $0xee8] sm:$0xff] }
 0x8ad   : > { %6661 = vmatprep.subr.bf16.mxu1 %v3472_v0  ;;  %v3542_v0 = vunpack.c.l.s8.bf16 %v2590_v4  ;;  %v2623_v4 = vld [vmem:[%s8403_s19 + $0xef0] sm:$0xff] }
 0x8af   : > { %6318 = vmatpush1.bf16.msra.mxu0 %v3469_v9  ;;  %v2591_v9 = vld [vmem:[%s8403_s19 + $0xdf0] sm:$0xff] }
 0x8b0   : > { %6662 = vmatpush1.bf16.msra.mxu1 %v3471_v63  ;;  %6319 = vmatprep.subr.bf16.mxu0 %v3478_v51  ;;  %v3541_v63 = vunpack.c.l.s8.bf16 %v2589_v7  ;;  %v3543_v51 = vunpack.c.l.s8.bf16 %v2591_v9 }
 0x8b1   : > { %6663 = vmatprep.subr.bf16.mxu1 %v3480_v11  ;;  %v3552_v11 = vunpack.c.h.s8.bf16 %v2592_v56 }
 0x8b3   : > { %6320 = vmatpush1.bf16.msra.mxu0 %v3477_v13  ;;  %v2600_v13 = vld [vmem:[%s8403_s19 + $0xe38] sm:$0xff] }
 0x8b4   : > { %6664 = vmatpush1.bf16.msra.mxu1 %v3479_v14  ;;  %6321 = vmatprep.subr.bf16.mxu0 %v3486_v54  ;;  %v3549_v14 = vunpack.c.h.s8.bf16 %v2589_v7  ;;  %v3551_v54 = vunpack.c.h.s8.bf16 %v2591_v9  ;;  %v3560_v18 = vunpack.c.l.s8.bf16 %v2600_v13  ;;  %v3568_v28 = vunpack.c.h.s8.bf16 %v2600_v13  ;;  %v2630_v7 = vld [vmem:[%s8403_s19 + $0xf28] sm:$0xff] }
 0x8b5   : > { %6665 = vmatprep.subr.bf16.mxu1 %v3488_v21  ;;  %v3558_v21 = vunpack.c.l.s8.bf16 %v2598_v12  ;;  %v2631_v12 = vld [vmem:[%s8403_s19 + $0xf30] sm:$0xff] }
 0x8b7   : > { %6322 = vmatpush1.bf16.msra.mxu0 %v3485_v52  ;;  %v2599_v52 = vld [vmem:[%s8403_s19 + $0xe30] sm:$0xff] }
 0x8b8   : > { %6666 = vmatpush1.bf16.msra.mxu1 %v3487_v15  ;;  %6323 = vmatprep.subr.bf16.mxu0 %v3494_v16  ;;  %v3557_v15 = vunpack.c.l.s8.bf16 %v2597_v17  ;;  %v3559_v16 = vunpack.c.l.s8.bf16 %v2599_v52 }
 0x8b9   : > { %6667 = vmatprep.subr.bf16.mxu1 %v3496_v27  ;;  %v2606_v27 = vld [vmem:[%s8403_s19 + $0xe68] sm:$0xff] }
 0x8bb   : > { %6324 = vmatpush1.bf16.msra.mxu0 %v3493_v55  ;;  %v2608_v55 = vld [vmem:[%s8403_s19 + $0xe78] sm:$0xff] }
 0x8bc   : > { %6668 = vmatpush1.bf16.msra.mxu1 %v3495_v57  ;;  %6325 = vmatprep.subr.bf16.mxu0 %v3502_v31  ;;  %v3565_v57 = vunpack.c.h.s8.bf16 %v2597_v17  ;;  %v3567_v31 = vunpack.c.h.s8.bf16 %v2599_v52  ;;  %v3576_v20 = vunpack.c.l.s8.bf16 %v2608_v55  ;;  %v3584_v37 = vunpack.c.h.s8.bf16 %v2608_v55  ;;  %v2638_v17 = vld [vmem:[%s8403_s19 + $0xf68] sm:$0xff] }
 0x8bd   : > { %6669 = vmatprep.subr.bf16.mxu1 %v3504_v39  ;;  %v3574_v39 = vunpack.c.l.s8.bf16 %v2606_v27 }
 0x8bf   : > { %6326 = vmatpush1.bf16.msra.mxu0 %v3501_v58  ;;  %v2607_v58 = vld [vmem:[%s8403_s19 + $0xe70] sm:$0xff] }
 0x8c0   : > { %6670 = vmatpush1.bf16.msra.mxu1 %v3503_v25  ;;  %6327 = vmatprep.subr.bf16.mxu0 %v3510_v26  ;;  %v3573_v25 = vunpack.c.l.s8.bf16 %v2605_v19  ;;  %v3582_v26 = vunpack.c.h.s8.bf16 %v2606_v27 }
 0x8c1   : > { %6671 = vmatprep.subr.bf16.mxu1 %v3512_v22  ;;  %v2614_v22 = vld [vmem:[%s8403_s19 + $0xea8] sm:$0xff] }
 0x8c3   : > { %6328 = vmatpush1.bf16.msra.mxu0 %v3509_v43  ;;  %v3581_v43 = vunpack.c.h.s8.bf16 %v2605_v19  ;;  %v2646_v19 = vld [vmem:[%s8403_s19 + $0xfa8] sm:$0xff] }
 0x8c4   : > { %6672 = vmatpush1.bf16.msra.mxu1 %v3511_v47  ;;  %6329 = vmatprep.subr.bf16.mxu0 %v3518_v44  ;;  %v3590_v47 = vunpack.c.l.s8.bf16 %v2614_v22  ;;  %v2613_v44 = vld [vmem:[%s8403_s19 + $0xea0] sm:$0xff] }
 0x8c5   : > { %6673 = vmatprep.subr.bf16.mxu1 %v3520_v33  ;;  %v3592_v33 = vunpack.c.l.s8.bf16 %v2616_v23  ;;  %v3589_v59 = vunpack.c.l.s8.bf16 %v2613_v44  ;;  %v3597_v2 = vunpack.c.h.s8.bf16 %v2613_v44  ;;  %v2654_v44 = vld [vmem:[%s8403_s19 + $0xfe8] sm:$0xff] }
 0x8c7   : > { %6330 = vmatpush1.bf16.msra.mxu0 %v3517_v62  ;;  %v3591_v62 = vunpack.c.l.s8.bf16 %v2615_v48 }
 0x8c8   : > { %6674 = vmatpush1.bf16.msra.mxu1 %v3519_v60  ;;  %6331 = vmatprep.subr.bf16.mxu0 %v3526_v49  ;;  %v3598_v60 = vunpack.c.h.s8.bf16 %v2614_v22  ;;  %v3600_v49 = vunpack.c.h.s8.bf16 %v2616_v23  ;;  %v2647_v22 = vld [vmem:[%s8403_s19 + $0xfb0] sm:$0xff] }
 0x8c9   : > { %6675 = vmatprep.subr.bf16.mxu1 %v3528_v1  ;;  %v2624_v1 = vld [vmem:[%s8403_s19 + $0xef8] sm:$0xff] }
 0x8cb   : > { %6332 = vmatpush1.bf16.msra.mxu0 %v3525_v38  ;;  %v3599_v38 = vunpack.c.h.s8.bf16 %v2615_v48 }
 0x8cc   : > { %6676 = vmatpush1.bf16.msra.mxu1 %v3527_v53  ;;  %6333 = vmatprep.subr.bf16.mxu0 %v3534_v61  ;;  %v3606_v53 = vunpack.c.l.s8.bf16 %v2622_v50  ;;  %v2621_v61 = vld [vmem:[%s8403_s19 + $0xee0] sm:$0xff] }
 0x8cd   : > { %6677 = vmatprep.subr.bf16.mxu1 %v3536_v3  ;;  %v3608_v3 = vunpack.c.l.s8.bf16 %v2624_v1  ;;  %v3605_v56 = vunpack.c.l.s8.bf16 %v2621_v61  ;;  %v3613_v9 = vunpack.c.h.s8.bf16 %v2621_v61 }
 0x8cf   : > { %6334 = vmatpush1.bf16.msra.mxu0 %v3533_v5  ;;  %v3607_v5 = vunpack.c.l.s8.bf16 %v2623_v4 }
 0x8d0   : > { %6678 = vmatpush1.bf16.msra.mxu1 %v3535_v6  ;;  %6335 = vmatprep.subr.bf16.mxu0 %v3542_v0  ;;  %v3614_v6 = vunpack.c.h.s8.bf16 %v2622_v50  ;;  %v3616_v0 = vunpack.c.h.s8.bf16 %v2624_v1  ;;  %v2655_v50 = vld [vmem:[%s8403_s19 + $0xff0] sm:$0xff] }
 0x8d1   : > { %6679 = vmatprep.subr.bf16.mxu1 %v3544_v8  ;;  %v2632_v8 = vld [vmem:[%s8403_s19 + $0xf38] sm:$0xff] }
 0x8d3   : > { %6336 = vmatpush1.bf16.msra.mxu0 %v3541_v63  ;;  %v3615_v63 = vunpack.c.h.s8.bf16 %v2623_v4  ;;  %v5333_v4 = vld [vmem:[#allocation3 + $0x20] sm:$0xff] }
 0x8d4   : > { %6680 = vmatpush1.bf16.msra.mxu1 %v3543_v51  ;;  %6337 = vmatprep.subr.bf16.mxu0 %v3550_v10  ;;  %v3622_v51 = vunpack.c.l.s8.bf16 %v2630_v7  ;;  %v2629_v10 = vld [vmem:[%s8403_s19 + $0xf20] sm:$0xff] }
 0x8d5   : > { %6681 = vmatprep.subr.bf16.mxu1 %v3552_v11  ;;  %v3624_v11 = vunpack.c.l.s8.bf16 %v2632_v8  ;;  %v3621_v13 = vunpack.c.l.s8.bf16 %v2629_v10  ;;  %v3629_v52 = vunpack.c.h.s8.bf16 %v2629_v10  ;;  %v5342_v10 = vld [vmem:[#allocation3 + $0x68] sm:$0xff] }
 0x8d7   : > { %6338 = vmatpush1.bf16.msra.mxu0 %v3549_v14  ;;  %v3623_v14 = vunpack.c.l.s8.bf16 %v2631_v12 }
 0x8d8   : > { %6682 = vmatpush1.bf16.msra.mxu1 %v3551_v54  ;;  %6350 = vmatprep.subr.bf16.mxu0 %v3558_v21  ;;  %v3630_v54 = vunpack.c.h.s8.bf16 %v2630_v7  ;;  %v3632_v21 = vunpack.c.h.s8.bf16 %v2632_v8  ;;  %v5341_v7 = vld [vmem:[#allocation3 + $0x60] sm:$0xff] }
 0x8d9   : > { %6694 = vmatprep.subr.bf16.mxu1 %v3560_v18  ;;  %v2640_v18 = vld [vmem:[%s8403_s19 + $0xf78] sm:$0xff] }
 0x8da   : > { %6340 = vmatmul.mubr.bf16.vlgmr.msra.gmra.mrb[20].mxu0 %v9261_v32  ;;  %v3640_v27 = vunpack.c.l.s8.bf16 %v2640_v18 }
 0x8db   : > { %6684 = vmatmul.mubr.bf16.vlgmr.msra.gmra.mrb[20].mxu1 %v9261_v32  ;;  %6351 = vmatpush1.bf16.msra.mxu0 %v3557_v15  ;;  %v3575_v32 = vunpack.c.l.s8.bf16 %v2607_v58  ;;  %v3631_v15 = vunpack.c.h.s8.bf16 %v2631_v12 }
 0x8dc   : > { %6382 = vmatprep.mubr.bf16.mxu0 %v9267_v42  ;;  %6695 = vmatpush1.bf16.msra.mxu1 %v3559_v16  ;;  %v3638_v16 = vunpack.c.l.s8.bf16 %v2638_v17 }
 0x8dd   : > { %6726 = vmatprep.mubr.bf16.mxu1 %v9267_v42  ;;  %6352 = vmatprep.subr.bf16.mxu0 %v3566_v24  ;;  %v3583_v42 = vunpack.c.h.s8.bf16 %v2607_v58  ;;  %v2637_v24 = vld [vmem:[%s8403_s19 + $0xf60] sm:$0xff] }
 0x8de   : > { %6696 = vmatprep.subr.bf16.mxu1 %v3568_v28  ;;  %v2639_v28 = vld [vmem:[%s8403_s19 + $0xf70] sm:$0xff]  ;;  %v3637_v55 = vunpack.c.l.s8.bf16 %v2637_v24  ;;  %v3645_v58 = vunpack.c.h.s8.bf16 %v2637_v24 }
 0x8df   : > { %6353 = vmatpush1.bf16.msra.mxu0 %v3565_v57  ;;  %v3639_v57 = vunpack.c.l.s8.bf16 %v2639_v28 }
 0x8e0   : > { %6697 = vmatpush1.bf16.msra.mxu1 %v3567_v31  ;;  %6354 = vmatprep.subr.bf16.mxu0 %v3574_v39  ;;  %v3646_v31 = vunpack.c.h.s8.bf16 %v2638_v17  ;;  %v3648_v39 = vunpack.c.h.s8.bf16 %v2640_v18 }
 0x8e1   : > { %6698 = vmatprep.subr.bf16.mxu1 %v3576_v20  ;;  %v2648_v20 = vld [vmem:[%s8403_s19 + $0xfb8] sm:$0xff] }
 0x8e3   : > { %6355 = vmatpush1.bf16.msra.mxu0 %v3573_v25  ;;  %v3647_v25 = vunpack.c.h.s8.bf16 %v2639_v28  ;;  %v6783_v28 = vld [vmem:[#allocation3 + $0x40] sm:$0xff] (!%p9719_p11) }
 0x8e4   : > { %6699 = vmatpush1.bf16.msra.mxu1 %v3575_v32  ;;  %6356 = vmatprep.subr.bf16.mxu0 %v3582_v26  ;;  %v3654_v32 = vunpack.c.l.s8.bf16 %v2646_v19  ;;  %v2645_v26 = vld [vmem:[%s8403_s19 + $0xfa0] sm:$0xff] }
 0x8e5   : > { %6700 = vmatprep.subr.bf16.mxu1 %v3584_v37  ;;  %v3656_v37 = vunpack.c.l.s8.bf16 %v2648_v20  ;;  %v3653_v23 = vunpack.c.l.s8.bf16 %v2645_v26  ;;  %v3661_v48 = vunpack.c.h.s8.bf16 %v2645_v26 }
 0x8e7   : > { %6357 = vmatpush1.bf16.msra.mxu0 %v3581_v43  ;;  %v3655_v43 = vunpack.c.l.s8.bf16 %v2647_v22 }
 0x8e8   : > { %6701 = vmatpush1.bf16.msra.mxu1 %v3583_v42  ;;  %6358 = vmatprep.subr.bf16.mxu0 %v3590_v47  ;;  %v3662_v42 = vunpack.c.h.s8.bf16 %v2646_v19  ;;  %v3664_v47 = vunpack.c.h.s8.bf16 %v2648_v20  ;;  %v6784_v19 = vld [vmem:[#allocation3 + $0x48] sm:$0xff] (!%p9719_p11) }
 0x8e9   : > { %6702 = vmatprep.subr.bf16.mxu1 %v3592_v33  ;;  %v2656_v33 = vld [vmem:[%s8403_s19 + $0xff8] sm:$0xff] }
 0x8eb   : > { %6359 = vmatpush1.bf16.msra.mxu0 %v3589_v59  ;;  %v3663_v59 = vunpack.c.h.s8.bf16 %v2647_v22  ;;  %v6785_v22 = vld [vmem:[#allocation3 + $0x50] sm:$0xff] (!%p9719_p11) }
 0x8ec   : > { %6703 = vmatpush1.bf16.msra.mxu1 %v3591_v62  ;;  %6360 = vmatprep.subr.bf16.mxu0 %v3598_v60  ;;  %v3670_v62 = vunpack.c.l.s8.bf16 %v2654_v44  ;;  %v2653_v60 = vld [vmem:[%s8403_s19 + $0xfe0] sm:$0xff] }
 0x8ed   : > { %6704 = vmatprep.subr.bf16.mxu1 %v3600_v49  ;;  %v3672_v49 = vunpack.c.l.s8.bf16 %v2656_v33  ;;  %v3669_v1 = vunpack.c.l.s8.bf16 %v2653_v60  ;;  %v3677_v61 = vunpack.c.h.s8.bf16 %v2653_v60 }
 0x8ef   : > { %6361 = vmatpush1.bf16.msra.mxu0 %v3597_v2  ;;  %v3671_v2 = vunpack.c.l.s8.bf16 %v2655_v50 }
 0x8f0   : > { %6705 = vmatpush1.bf16.msra.mxu1 %v3599_v38  ;;  %6362 = vmatprep.subr.bf16.mxu0 %v3606_v53  ;;  %v3678_v38 = vunpack.c.h.s8.bf16 %v2654_v44  ;;  %v3680_v53 = vunpack.c.h.s8.bf16 %v2656_v33 }
 0x8f1   : > { %6706 = vmatprep.subr.bf16.mxu1 %v3608_v3  ;;  %v3679_v3 = vunpack.c.h.s8.bf16 %v2655_v50 }
 0x8f3   : > { %6363 = vmatpush1.bf16.msra.mxu0 %v3605_v56  ;;  %v5335_v56 = vld [vmem:[#allocation3 + $0x30] sm:$0xff] }
 0x8f4   : > { %6707 = vmatpush1.bf16.msra.mxu1 %v3607_v5  ;;  %6364 = vmatprep.subr.bf16.mxu0 %v3614_v6  ;;  %v5334_v5 = vld [vmem:[#allocation3 + $0x28] sm:$0xff] }
 0x8f5   : > { %6708 = vmatprep.subr.bf16.mxu1 %v3616_v0  ;;  %v5336_v0 = vld [vmem:[#allocation3 + $0x38] sm:$0xff] }
 0x8f7   : > { %6365 = vmatpush1.bf16.msra.mxu0 %v3613_v9 }
 0x8f8   : > { %6709 = vmatpush1.bf16.msra.mxu1 %v3615_v63  ;;  %6366 = vmatprep.subr.bf16.mxu0 %v3622_v51  ;;  %v5343_v51 = vld [vmem:[#allocation3 + $0x70] sm:$0xff] }
 0x8f9   : > { %6710 = vmatprep.subr.bf16.mxu1 %v3624_v11 }
 0x8fb   : > { %6367 = vmatpush1.bf16.msra.mxu0 %v3621_v13 }
 0x8fc   : > { %6711 = vmatpush1.bf16.msra.mxu1 %v3623_v14  ;;  %6368 = vmatprep.subr.bf16.mxu0 %v3630_v54  ;;  %v5344_v14 = vld [vmem:[#allocation3 + $0x78] sm:$0xff] }
 0x8fd   : > { %6712 = vmatprep.subr.bf16.mxu1 %v3632_v21 }
 0x8ff   : > { %6369 = vmatpush1.bf16.msra.mxu0 %v3629_v52 }
 0x900   : > { %6713 = vmatpush1.bf16.msra.mxu1 %v3631_v15  ;;  %6370 = vmatprep.subr.bf16.mxu0 %v3638_v16 }
 0x901   : > { %6714 = vmatprep.subr.bf16.mxu1 %v3640_v27  ;;  %v6775_v27 = vld [vmem:[#allocation3] sm:$0xff] (!%p9719_p11) }
 0x903   : > { %6371 = vmatpush1.bf16.msra.mxu0 %v3637_v55  ;;  %v6791_v55 = vld [vmem:[%s463_s27] sm:$0xff] (!%p9719_p11) }
 0x904   : > { %6715 = vmatpush1.bf16.msra.mxu1 %v3639_v57  ;;  %6372 = vmatprep.subr.bf16.mxu0 %v3646_v31  ;;  %v6796_v57 = vrot.slane (!%p9719_p11), %v6791_v55, %v8712_v40  ;;  %v6849_v31 = vld [vmem:[%s472_s2] sm:$0xff] (!%p9719_p11)  ;;  %v6800_v20 = vrot.slane (!%p9719_p11), %v6791_v55, %v8719_v45 }
 0x905   : > { %6716 = vmatprep.subr.bf16.mxu1 %v3648_v39  ;;  %v6776_v39 = vld [vmem:[#allocation3 + $0x8] sm:$0xff] (!%p9719_p11)  ;;  %v6858_v26 = vrot.slane (!%p9719_p11), %v6849_v31, %v8719_v45 }
 0x906   : > { %v6841_v44 = vmul.f32 (!%p9719_p11), %v6796_v57, %v6783_v28  ;;  %v6834_v33 = vmul.f32 (!%p9719_p11), %v6800_v20, %v6776_v39  ;;  %v6882_v28 = vrot.slane (!%p9719_p11), %v6849_v31, %v8891_v35 }
 0x907   : > { %6373 = vmatpush1.bf16.msra.mxu0 %v3645_v58  ;;  %v6804_v58 = vrot.slane (!%p9719_p11), %v6791_v55, %v8715_v41 }
 0x908   : > { %6717 = vmatpush1.bf16.msra.mxu1 %v3647_v25  ;;  %6374 = vmatprep.subr.bf16.mxu0 %v3654_v32  ;;  %v6808_v25 = vrot.slane (!%p9719_p11), %v6791_v55, %v8722_v46  ;;  %v6854_v32 = vrot.slane (!%p9719_p11), %v6849_v31, %v8712_v40 }
 0x909   : > { %6718 = vmatprep.subr.bf16.mxu1 %v3656_v37  ;;  %v6777_v37 = vld [vmem:[#allocation3 + $0x10] sm:$0xff] (!%p9719_p11)  ;;  %v6843_v60 = vmul.f32 (!%p9719_p11), %v6804_v58, %v6785_v22 }
 0x90b   : > { %6375 = vmatpush1.bf16.msra.mxu0 %v3653_v23  ;;  %v6862_v23 = vrot.slane (!%p9719_p11), %v6849_v31, %v8715_v41 }
 0x90c   : > { %6719 = vmatpush1.bf16.msra.mxu1 %v3655_v43  ;;  %6376 = vmatprep.subr.bf16.mxu0 %v3662_v42  ;;  %v6778_v43 = vld [vmem:[#allocation3 + $0x18] sm:$0xff] (!%p9719_p11)  ;;  %v6866_v42 = vrot.slane (!%p9719_p11), %v6849_v31, %v8722_v46 }
 0x90d   : > { %6720 = vmatprep.subr.bf16.mxu1 %v3664_v47  ;;  %v6833_v47 = vmul.f32 (!%p9719_p11), %v6796_v57, %v6775_v27  ;;  %v6824_v27 = vrot.slane (!%p9719_p11), %v6791_v55, %v8891_v35 }
 0x90f   : > { %6377 = vmatpush1.bf16.msra.mxu0 %v3661_v48  ;;  %v6842_v48 = vmul.f32 (!%p9719_p11), %v6800_v20, %v6784_v19 }
 0x910   : > { %6721 = vmatpush1.bf16.msra.mxu1 %v3663_v59  ;;  %6378 = vmatprep.subr.bf16.mxu0 %v3670_v62  ;;  %v6786_v59 = vld [vmem:[#allocation3 + $0x58] sm:$0xff] (!%p9719_p11)  ;;  %v6835_v62 = vmul.f32 (!%p9719_p11), %v6804_v58, %v6777_v37 }
 0x911   : > { %6722 = vmatprep.subr.bf16.mxu1 %v3672_v49  ;;  %v6836_v49 = vmul.f32 (!%p9719_p11), %v6808_v25, %v6778_v43  ;;  %v6844_v50 = vmul.f32 (!%p9719_p11), %v6808_v25, %v6786_v59 }
 0x913   : > { %6379 = vmatpush1.bf16.msra.mxu0 %v3669_v1  ;;  %v6891_v1 = vadd.f32 (!%p9719_p11), %v6854_v32, %v6833_v47 }
 0x914   : > { %6723 = vmatpush1.bf16.msra.mxu1 %v3671_v2  ;;  %6380 = vmatprep.subr.bf16.mxu0 %v3678_v38  ;;  %v6899_v2 = vadd.f32 (!%p9719_p11), %v6854_v32, %v6841_v44  ;;  %v6892_v38 = vadd.f32 (!%p9719_p11), %v6858_v26, %v6834_v33 }
 0x915   : > { %6724 = vmatprep.subr.bf16.mxu1 %v3680_v53  ;;  %v6900_v53 = vadd.f32 (!%p9719_p11), %v6858_v26, %v6842_v48 }
 0x917   : > { %6381 = vmatpush1.bf16.msra.mxu0 %v3677_v61  ;;  %v6893_v61 = vadd.f32 (!%p9719_p11), %v6862_v23, %v6835_v62 }
 0x918   : > { %6725 = vmatpush1.bf16.msra.mxu1 %v3679_v3  ;;  %v6901_v3 = vadd.f32 (!%p9719_p11), %v6862_v23, %v6843_v60 }
 0x91a   : > { %6383 = vmatmul.mubr.bf16.vlgmr.msra.gmra.mrb[20].mxu0 %v9263_v36 }
 0x91b   : > { %6727 = vmatmul.mubr.bf16.vlgmr.msra.gmra.mrb[20].mxu1 %v9263_v36 }
 0x9ed   : > { %v6384_v6 = vpop.f32.mrb[20].mxu0 }
 0x9ee   : > { %v6741_v8 = vadd.f32 %v6384_v6, %v5333_v4  ;;  %v6728_v9 = vpop.f32.mrb[20].mxu1  ;;  %v6386_v63 = vpop.f32.mrb[21].mxu0  ;;  %6774 = sbr.rel (%p9719_p11) target bundleno = 2563 (0xa03), region = 84  ;;  %v6894_v4 = vadd.f32 (!%p9719_p11), %v6866_v42, %v6836_v49 }
 0x9ef   : > { %v6743_v11 = vadd.f32 %v6728_v9, %v5335_v56  ;;  %v6742_v36 = vadd.f32 %v6386_v63, %v5334_v5  ;;  %v6730_v12 = vpop.f32.mrb[21].mxu1  ;;  %v6388_v13 = vpop.f32.mrb[22].mxu0  ;;  %v6902_v56 = vadd.f32 (!%p9719_p11), %v6866_v42, %v6844_v50  ;;  %v6870_v9 = vrot.slane (!%p9719_p11), %v6849_v31, %v8882_v29 }
 0x9f0   : > { %6757 = vst [vmem:[#allocation3 + $0x20] sm:$0xff] %v6741_v8  ;;  %v6744_v54 = vadd.f32 %v6730_v12, %v5336_v0  ;;  %v6749_v21 = vadd.f32 %v6388_v13, %v5341_v7  ;;  %v6732_v17 = vpop.f32.mrb[22].mxu1  ;;  %v6390_v18 = vpop.f32.mrb[23].mxu0  ;;  %v6907_v0 = vpack.c.bf16 (!%p9719_p11), %v6899_v2, %v6891_v1  ;;  %v6908_v7 = vpack.c.bf16 (!%p9719_p11), %v6900_v53, %v6892_v38 }
 0x9f1   : > { %6759 = vst [vmem:[#allocation3 + $0x30] sm:$0xff] %v6743_v11  ;;  %6758 = vst [vmem:[#allocation3 + $0x28] sm:$0xff] %v6742_v36  ;;  %v6751_v52 = vadd.f32 %v6732_v17, %v5343_v51  ;;  %v6750_v15 = vadd.f32 %v6390_v18, %v5342_v10  ;;  %v6734_v16 = vpop.f32.mrb[23].mxu1  ;;  %v6812_v8 = vrot.slane (!%p9719_p11), %v6791_v55, %v8882_v29 }
 0x9f2   : > { %6760 = vst [vmem:[#allocation3 + $0x38] sm:$0xff] %v6744_v54  ;;  %6765 = vst [vmem:[#allocation3 + $0x60] sm:$0xff] %v6749_v21  ;;  %v6752_v24 = vadd.f32 %v6734_v16, %v5344_v14  ;;  %v6909_v10 = vpack.c.bf16 (!%p9719_p11), %v6901_v3, %v6893_v61  ;;  %v6910_v11 = vpack.c.bf16 (!%p9719_p11), %v6902_v56, %v6894_v4 }
 0x9f3   : > { %6767 = vst [vmem:[#allocation3 + $0x70] sm:$0xff] %v6751_v52  ;;  %6766 = vst [vmem:[#allocation3 + $0x68] sm:$0xff] %v6750_v15  ;;  %v6816_v36 = vrot.slane (!%p9719_p11), %v6791_v55, %v8888_v34  ;;  %v6874_v12 = vrot.slane (!%p9719_p11), %v6849_v31, %v8888_v34  ;;  %v6820_v17 = vrot.slane (!%p9719_p11), %v6791_v55, %v8885_v30 }
 0x9f4   : > { %6768 = vst [vmem:[#allocation3 + $0x78] sm:$0xff] %v6752_v24  ;;  %6915 = vst [vmem:[#allocation2] sm:$0xff] (!%p9719_p11), %v6907_v0  ;;  %v6878_v18 = vrot.slane (!%p9719_p11), %v6849_v31, %v8885_v30 }
 0x9f5   : > { %6916 = vst [vmem:[#allocation2 + $0x8] sm:$0xff] %v6908_v7  ;;  %6917 = vst [vmem:[#allocation2 + $0x10] sm:$0xff] %v6909_v10 }
 0x9f6   : > { %6918 = vst [vmem:[#allocation2 + $0x18] sm:$0xff] %v6910_v11 }
 0x9f7   : > { %v6779_v5 = vld [vmem:[#allocation3 + $0x20] sm:$0xff] }
 0x9f8   : > { %v6780_v63 = vld [vmem:[#allocation3 + $0x28] sm:$0xff]  ;;  %v6781_v13 = vld [vmem:[#allocation3 + $0x30] sm:$0xff]  ;;  %v6837_v54 = vmul.f32 %v6812_v8, %v6779_v5 }
 0x9f9   : > { %v6787_v6 = vld [vmem:[#allocation3 + $0x60] sm:$0xff]  ;;  %v6782_v52 = vld [vmem:[#allocation3 + $0x38] sm:$0xff]  ;;  %v6838_v16 = vmul.f32 %v6816_v36, %v6780_v63  ;;  %v6839_v19 = vmul.f32 %v6820_v17, %v6781_v13 }
 0x9fa   : > { %v6788_v51 = vld [vmem:[#allocation3 + $0x68] sm:$0xff]  ;;  %v6789_v14 = vld [vmem:[#allocation3 + $0x70] sm:$0xff]  ;;  %v6845_v21 = vmul.f32 %v6812_v8, %v6787_v6  ;;  %v6895_v57 = vadd.f32 %v6870_v9, %v6837_v54  ;;  %v6840_v32 = vmul.f32 %v6824_v27, %v6782_v52 }
 0x9fb   : > { %v6790_v15 = vld [vmem:[#allocation3 + $0x78] sm:$0xff]  ;;  %v6846_v24 = vmul.f32 %v6816_v36, %v6788_v51  ;;  %v6847_v20 = vmul.f32 %v6820_v17, %v6789_v14  ;;  %v6896_v58 = vadd.f32 %v6874_v12, %v6838_v16  ;;  %v6897_v22 = vadd.f32 %v6878_v18, %v6839_v19 }
 0x9fc   : > { %v6903_v39 = vadd.f32 %v6870_v9, %v6845_v21  ;;  %v6848_v26 = vmul.f32 %v6824_v27, %v6790_v15  ;;  %v6898_v42 = vadd.f32 %v6882_v28, %v6840_v32 }
 0x9fd   : > { %v6904_v25 = vadd.f32 %v6874_v12, %v6846_v24  ;;  %v6905_v23 = vadd.f32 %v6878_v18, %v6847_v20 }
 0x9fe   : > { %v6911_v37 = vpack.c.bf16 %v6903_v39, %v6895_v57  ;;  %v6906_v47 = vadd.f32 %v6882_v28, %v6848_v26 }
 0x9ff   : > { %v6912_v43 = vpack.c.bf16 %v6904_v25, %v6896_v58  ;;  %v6913_v44 = vpack.c.bf16 %v6905_v23, %v6897_v22 }
 0xa00   : > { %6919 = vst [vmem:[#allocation2 + $0x20] sm:$0xff] %v6911_v37  ;;  %v6914_v55 = vpack.c.bf16 %v6906_v47, %v6898_v42 }
 0xa01   : > { %6920 = vst [vmem:[#allocation2 + $0x28] sm:$0xff] %v6912_v43  ;;  %6921 = vst [vmem:[#allocation2 + $0x30] sm:$0xff] %v6913_v44 }
 0xa02   : > { %6922 = vst [vmem:[#allocation2 + $0x38] sm:$0xff] %v6914_v55 }
 0xa03 PF: > { %s9925_s19 = sld [smem:[#allocation22_spill]] }
 0xa09   : > { %p6923_p6 = scmp.eq.s32.totalorder %s9925_s19, 1 }
 0xa0b   : > { %p6924_p7 = pnand %p6923_p6, %p6769_p4 }
 0xa0c   : > { %v6928_v31 = vld [vmem:[#allocation3] sm:$0xff] (!%p6924_p7)  ;;  %v7002_v48 = vld [vmem:[%s472_s2] sm:$0xff] (!%p6924_p7)  ;;  %v6929_v60 = vld [vmem:[#allocation3 + $0x8] sm:$0xff] (!%p6924_p7)  ;;  %s9927_s2 = sld [smem:[#allocation32_spill]] (!%p6924_p7) }
 0xa0d   : > { %6927 = sbr.rel (%p6924_p7) target bundleno = 2589 (0xa1d), region = 88  ;;  %v6944_v33 = vld [vmem:[%s463_s27] sm:$0xff] (!%p6924_p7)  ;;  %v7007_v62 = vrot.slane (!%p6924_p7), %v7002_v48, %v8712_v40  ;;  %v7011_v50 = vrot.slane (!%p6924_p7), %v7002_v48, %v8719_v45  ;;  %v6930_v1 = vld [vmem:[#allocation3 + $0x10] sm:$0xff] (!%p6924_p7)  ;;  %v6931_v2 = vld [vmem:[#allocation3 + $0x18] sm:$0xff] (!%p6924_p7)  ;;  %v7015_v53 = vrot.slane (!%p6924_p7), %v7002_v48, %v8715_v41  ;;  %v7019_v3 = vrot.slane (!%p6924_p7), %v7002_v48, %v8722_v46 }
 0xa0e   : > { %v6949_v59 = vrot.slane (!%p6924_p7), %v6944_v33, %v8712_v40  ;;  %v6953_v49 = vrot.slane (!%p6924_p7), %v6944_v33, %v8719_v45  ;;  %v6957_v38 = vrot.slane (!%p6924_p7), %v6944_v33, %v8715_v41  ;;  %v6961_v61 = vrot.slane (!%p6924_p7), %v6944_v33, %v8722_v46  ;;  %v6932_v4 = vld [vmem:[#allocation3 + $0x20] sm:$0xff] (!%p6924_p7)  ;;  %v6933_v0 = vld [vmem:[#allocation3 + $0x28] sm:$0xff] (!%p6924_p7)  ;;  %v6934_v63 = vld [vmem:[#allocation3 + $0x30] sm:$0xff] (!%p6924_p7) }
 0xa0f   : > { %v6965_v40 = vrot.slane (!%p6924_p7), %v6944_v33, %v8882_v29  ;;  %v7023_v6 = vrot.slane (!%p6924_p7), %v7002_v48, %v8882_v29  ;;  %v6969_v8 = vrot.slane (!%p6924_p7), %v6944_v33, %v8888_v34  ;;  %v7027_v9 = vrot.slane (!%p6924_p7), %v7002_v48, %v8888_v34  ;;  %v6936_v11 = vld [vmem:[#allocation3 + $0x40] sm:$0xff] (!%p6924_p7)  ;;  %v6937_v36 = vld [vmem:[#allocation3 + $0x48] sm:$0xff] (!%p6924_p7)  ;;  %v6938_v12 = vld [vmem:[#allocation3 + $0x50] sm:$0xff] (!%p6924_p7) }
 0xa10   : > { %v6986_v56 = vmul.f32 (!%p6924_p7), %v6949_v59, %v6928_v31  ;;  %v6987_v5 = vmul.f32 (!%p6924_p7), %v6953_v49, %v6929_v60  ;;  %v6988_v7 = vmul.f32 (!%p6924_p7), %v6957_v38, %v6930_v1  ;;  %v6989_v45 = vmul.f32 (!%p6924_p7), %v6961_v61, %v6931_v2  ;;  %v6935_v21 = vld [vmem:[#allocation3 + $0x38] sm:$0xff] (!%p6924_p7)  ;;  %v6940_v18 = vld [vmem:[#allocation3 + $0x60] sm:$0xff] (!%p6924_p7)  ;;  %v6941_v24 = vld [vmem:[#allocation3 + $0x68] sm:$0xff] (!%p6924_p7) }
 0xa11   : > { %v6990_v10 = vmul.f32 (!%p6924_p7), %v6965_v40, %v6932_v4  ;;  %v6973_v46 = vrot.slane (!%p6924_p7), %v6944_v33, %v8885_v30  ;;  %v6991_v54 = vmul.f32 (!%p6924_p7), %v6969_v8, %v6933_v0  ;;  %v7031_v29 = vrot.slane (!%p6924_p7), %v7002_v48, %v8885_v30  ;;  %v6939_v17 = vld [vmem:[#allocation3 + $0x58] sm:$0xff] (!%p6924_p7)  ;;  %v6942_v39 = vld [vmem:[#allocation3 + $0x70] sm:$0xff] (!%p6924_p7) }
 0xa12   : > { %v7044_v41 = vadd.f32 (!%p6924_p7), %v7007_v62, %v6986_v56  ;;  %v7045_v51 = vadd.f32 (!%p6924_p7), %v7011_v50, %v6987_v5  ;;  %v7046_v13 = vadd.f32 (!%p6924_p7), %v7015_v53, %v6988_v7  ;;  %v7047_v14 = vadd.f32 (!%p6924_p7), %v7019_v3, %v6989_v45  ;;  %v6943_v25 = vld [vmem:[#allocation3 + $0x78] sm:$0xff] (!%p6924_p7) }
 0xa13   : > { %v7048_v34 = vadd.f32 (!%p6924_p7), %v7023_v6, %v6990_v10  ;;  %v6992_v52 = vmul.f32 (!%p6924_p7), %v6973_v46, %v6934_v63  ;;  %v6977_v15 = vrot.slane (!%p6924_p7), %v6944_v33, %v8891_v35  ;;  %v7035_v16 = vrot.slane (!%p6924_p7), %v7002_v48, %v8891_v35 }
 0xa14   : > { %7060 = vst [vmem:[%s9927_s2] sm:$0xff] %v7044_v41  ;;  %7061 = vst [vmem:[%s9927_s2 + $0x8] sm:$0xff] %v7045_v51  ;;  %v7049_v30 = vadd.f32 %v7027_v9, %v6991_v54  ;;  %v6994_v27 = vmul.f32 %v6949_v59, %v6936_v11  ;;  %v6995_v28 = vmul.f32 %v6953_v49, %v6937_v36 }
 0xa15   : > { %7062 = vst [vmem:[%s9927_s2 + $0x10] sm:$0xff] %v7046_v13  ;;  %7063 = vst [vmem:[%s9927_s2 + $0x18] sm:$0xff] %v7047_v14  ;;  %v6996_v57 = vmul.f32 %v6957_v38, %v6938_v12  ;;  %v7050_v19 = vadd.f32 %v7031_v29, %v6992_v52  ;;  %v6993_v35 = vmul.f32 %v6977_v15, %v6935_v21 }
 0xa16   : > { %7064 = vst [vmem:[%s9927_s2 + $0x20] sm:$0xff] %v7048_v34  ;;  %v6997_v20 = vmul.f32 %v6961_v61, %v6939_v17  ;;  %v6998_v58 = vmul.f32 %v6965_v40, %v6940_v18  ;;  %7065 = vst [vmem:[%s9927_s2 + $0x28] sm:$0xff] %v7049_v30  ;;  %v7052_v32 = vadd.f32 %v7007_v62, %v6994_v27 }
 0xa17   : > { %v7053_v26 = vadd.f32 %v7011_v50, %v6995_v28  ;;  %v7054_v37 = vadd.f32 %v7015_v53, %v6996_v57  ;;  %v6999_v22 = vmul.f32 %v6969_v8, %v6941_v24  ;;  %7066 = vst [vmem:[%s9927_s2 + $0x30] sm:$0xff] %v7050_v19  ;;  %v7051_v23 = vadd.f32 %v7035_v16, %v6993_v35 }
 0xa18   : > { %v7055_v43 = vadd.f32 %v7019_v3, %v6997_v20  ;;  %v7056_v42 = vadd.f32 %v7023_v6, %v6998_v58  ;;  %v7000_v47 = vmul.f32 %v6973_v46, %v6942_v39  ;;  %7068 = vst [vmem:[%s9927_s2 + $0x40] sm:$0xff] %v7052_v32  ;;  %v7001_v55 = vmul.f32 %v6977_v15, %v6943_v25 }
 0xa19   : > { %7069 = vst [vmem:[%s9927_s2 + $0x48] sm:$0xff] %v7053_v26  ;;  %7070 = vst [vmem:[%s9927_s2 + $0x50] sm:$0xff] %v7054_v37  ;;  %v7057_v44 = vadd.f32 %v7027_v9, %v6999_v22 }
 0xa1a   : > { %7067 = vst [vmem:[%s9927_s2 + $0x38] sm:$0xff] %v7051_v23  ;;  %7071 = vst [vmem:[%s9927_s2 + $0x58] sm:$0xff] %v7055_v43  ;;  %v7058_v31 = vadd.f32 %v7031_v29, %v7000_v47  ;;  %v7059_v33 = vadd.f32 %v7035_v16, %v7001_v55 }
 0xa1b   : > { %7072 = vst [vmem:[%s9927_s2 + $0x60] sm:$0xff] %v7056_v42  ;;  %7073 = vst [vmem:[%s9927_s2 + $0x68] sm:$0xff] %v7057_v44 }
 0xa1c   : > { %7074 = vst [vmem:[%s9927_s2 + $0x70] sm:$0xff] %v7058_v31  ;;  %7075 = vst [vmem:[%s9927_s2 + $0x78] sm:$0xff] %v7059_v33 }
 0xa1d PF: > { %s29_s11 = sadd.s32 1, %s7982_s11   ;;  %s9928_s27 = sld [smem:[#allocation19_spill]] }
 0xa1e   : > { %p26_p2 = scmp.ge.s32.totalorder %s29_s11, 6   ;;  %s9929_s28 = sld [smem:[#allocation20_spill]] }
 0xa1f   : > { %s9930_s29 = sld [smem:[#allocation27_spill]]  ;;  %s9931_s30 = sld [smem:[#allocation23_spill]] }
 0xa20   : > { %s9932_s9 = sld [smem:[#allocation24_spill]]  ;;  %s9933_s0 = sld [smem:[#allocation25_spill]] }
 0xa21   : > { %s9934_s24 = smov %s7946_s25  ;;  %s9935_s25 = smov %s7950_s26 }
 0xa22   : > { %s9936_s26 = smov %s8299_s23  ;;  %s9937_s8 = smov %s7978_s10 }
 0xa23   :  { %28 = sbr.rel (!%p26_p2) target bundleno = 19 (0x13), region = 168 }
 0xa26   : > { %s9938_s10 = smov %s9933_s0 }
 0xa2a   :  { %7100 = vsyncpa [#allocation5], 1 }
 0xa2b   :  { %7102 = vsyncpa [#allocation5 + $0x1], 1 }
 0xa2c   :  { %7103 = vsyncpa [#allocation7], 1 }
 0xa2d   :  { %7105 = vsyncpa [#allocation7 + $0x1], 1 }
 0xa2e   :  { %7106 = vsyncpa [#allocation10], 1 }
 0xa2f   :  { %7108 = vsyncpa [#allocation10 + $0x1], 1 }
 0xa30   :  { %7109 = vsyncpa [#allocation13], 1 }
 0xa31   :  { %7111 = vsyncpa [#allocation13 + $0x1], 1 }

</bundles_post_ra>
